<compile_context>
chip_gen: v6e
topology: v6e:2x2x1
jax: 0.10.0
libtpu: 0.0.40
codegen_flags: <defaults>
</compile_context>

<pallas_src>
import functools
import math

import numpy as np
import jax
import jax.numpy as jnp
from jax.experimental import pallas as pl
from jax.experimental.pallas import tpu as pltpu

BF16 = jnp.bfloat16
F32 = jnp.float32
NEG_INF = -1e6  # d2l masked_softmax semantics


# ----------------------- in-kernel helper functions -------------------------
# These operate on jnp values and are traced inside the Pallas kernel bodies.

def _addnorm(x, y, g, b):
    """LayerNorm(x + y) over the last axis (eps matches nn.LayerNorm default)."""
    z = x + y
    mean = jnp.mean(z, axis=-1, keepdims=True)
    var = jnp.mean((z - mean) ** 2, axis=-1, keepdims=True)
    return (z - mean) * jax.lax.rsqrt(var + 1e-5) * g + b


def _ffn(x, w1, b1, w2, b2):
    """Position-wise FFN: ReLU(x @ w1 + b1) @ w2 + b2, fused in one kernel."""
    h = jnp.dot(x.astype(BF16), w1, preferred_element_type=F32) + b1
    h = jnp.maximum(h, 0.0)
    return jnp.dot(h.astype(BF16), w2, preferred_element_type=F32) + b2


def _mha_core(q2, k2, v2, wo_heads, bias, B, Tq, Tk, nh, H):
    """Multi-head scaled dot-product attention + output projection.

    q2: [B*Tq, H], k2/v2: [B*Tk, H] (f32, already projected),
    wo_heads: [nh, D, H] bf16 (output projection split per head),
    bias: [B, Tq, Tk] f32 additive mask (0 or NEG_INF).
    Returns [B*Tq, H] f32.
    """
    D = H // nh
    scale = 1.0 / math.sqrt(D)
    q = q2.reshape(B, Tq, H)
    k = k2.reshape(B, Tk, H)
    v = v2.reshape(B, Tk, H)
    out = jnp.zeros((B * Tq, H), F32)
    for h in range(nh):  # Python-unrolled; no grid-step overhead per head
        lo, hi = h * D, (h + 1) * D
        s = jnp.einsum("bqd,bkd->bqk",
                       q[:, :, lo:hi].astype(BF16),
                       k[:, :, lo:hi].astype(BF16),
                       preferred_element_type=F32) * scale + bias
        m = jnp.max(s, axis=-1, keepdims=True)
        e = jnp.exp(s - m)
        p = e * pl.reciprocal(jnp.sum(e, axis=-1, keepdims=True), approx=True)
        oh = jnp.einsum("bqk,bkd->bqd",
                        p.astype(BF16),
                        v[:, :, lo:hi].astype(BF16),
                        preferred_element_type=F32)
        # head-merge folded into the output projection: sum_h oh @ wo[h]
        out = out + jnp.dot(oh.reshape(B * Tq, D).astype(BF16),
                            wo_heads[h], preferred_element_type=F32)
    return out


# ------------------------------ Pallas kernels -------------------------------

def _make_encoder_kernel(B, T, H, F, nh, L):
    def kernel(x_ref, vl_ref, wqkv_ref, wo_ref, w1_ref, b1_ref, w2_ref, b2_ref,
               ln1g_ref, ln1b_ref, ln2g_ref, ln2b_ref, o_ref):
        x = x_ref[...]                                           # [B*T, H] f32
        key_idx = jax.lax.broadcasted_iota(jnp.int32, (B * T, T), 1)
        bias = jnp.where(key_idx < vl_ref[...], 0.0, NEG_INF).reshape(B, T, T)
        for l in range(L):
            qkv = jnp.dot(x.astype(BF16), wqkv_ref[l],
                          preferred_element_type=F32)            # [B*T, 3H]
            attn = _mha_core(qkv[:, :H], qkv[:, H:2 * H], qkv[:, 2 * H:],
                             wo_ref[l], bias, B, T, T, nh, H)
            x = _addnorm(x, attn, ln1g_ref[l], ln1b_ref[l])
            y = _ffn(x, w1_ref[l], b1_ref[l], w2_ref[l], b2_ref[l])
            x = _addnorm(x, y, ln2g_ref[l], ln2b_ref[l])
        o_ref[...] = x
    return kernel


def _make_decoder_kernel(B, Td, Te, H, F, nh, L, V):
    def kernel(x_ref, enc_ref, svl_ref, cvl_ref,
               wqkv_ref, wo_ref, wqc_ref, wkvc_ref, woc_ref,
               w1_ref, b1_ref, w2_ref, b2_ref,
               ln1g_ref, ln1b_ref, ln2g_ref, ln2b_ref, ln3g_ref, ln3b_ref,
               wout_ref, bout_ref, o_ref):
        x = x_ref[...]                                           # [B*Td, H] f32
        enc_b = enc_ref[...].astype(BF16)                        # [B*Te, H]
        ks = jax.lax.broadcasted_iota(jnp.int32, (B * Td, Td), 1)
        self_bias = jnp.where(ks < svl_ref[...], 0.0, NEG_INF).reshape(B, Td, Td)
        kc = jax.lax.broadcasted_iota(jnp.int32, (B * Td, Te), 1)
        cross_bias = jnp.where(kc < cvl_ref[...], 0.0, NEG_INF).reshape(B, Td, Te)
        for l in range(L):
            # masked self-attention
            qkv = jnp.dot(x.astype(BF16), wqkv_ref[l],
                          preferred_element_type=F32)            # [B*Td, 3H]
            attn = _mha_core(qkv[:, :H], qkv[:, H:2 * H], qkv[:, 2 * H:],
                             wo_ref[l], self_bias, B, Td, Td, nh, H)
            x1 = _addnorm(x, attn, ln1g_ref[l], ln1b_ref[l])
            # encoder-decoder cross attention
            q = jnp.dot(x1.astype(BF16), wqc_ref[l], preferred_element_type=F32)
            kv = jnp.dot(enc_b, wkvc_ref[l], preferred_element_type=F32)  # [B*Te, 2H]
            cross = _mha_core(q, kv[:, :H], kv[:, H:], woc_ref[l],
                              cross_bias, B, Td, Te, nh, H)
            x2 = _addnorm(x1, cross, ln2g_ref[l], ln2b_ref[l])
            # position-wise FFN
            y = _ffn(x2, w1_ref[l], b1_ref[l], w2_ref[l], b2_ref[l])
            x = _addnorm(x2, y, ln3g_ref[l], ln3b_ref[l])
        # final vocab projection fused into the same kernel
        o_ref[...] = (jnp.dot(x.astype(BF16), wout_ref[...],
                              preferred_element_type=F32) + bout_ref[...])
    return kernel


# ------------------------------ pallas_call glue ------------------------------

def _full_spec(shape):
    zeros = (0,) * len(shape)
    return pl.BlockSpec(shape, lambda i, _z=zeros: _z)


def pallas_encoder(x2, vl, w):
    BT, H = x2.shape
    T = vl.shape[1]
    B = BT // T
    F = w["w1"].shape[-1]
    L = w["wqkv"].shape[0]
    nh = w["wo"].shape[1]
    kernel = _make_encoder_kernel(B, T, H, F, nh, L)
    inputs = (x2, vl, w["wqkv"], w["wo"], w["w1"], w["b1"], w["w2"], w["b2"],
              w["ln1_g"], w["ln1_b"], w["ln2_g"], w["ln2_b"])
    return pl.pallas_call(
        kernel,
        out_shape=jax.ShapeDtypeStruct((BT, H), F32),
        grid=(1,),
        in_specs=[_full_spec(a.shape) for a in inputs],
        out_specs=_full_spec((BT, H)),
        compiler_params=pltpu.CompilerParams(
            dimension_semantics=("arbitrary",)),
    )(*inputs)


def pallas_decoder(x2, enc2, svl, cvl, w, V):
    BTd, H = x2.shape
    Td = svl.shape[1]
    Te = cvl.shape[1]
    B = BTd // Td
    F = w["w1"].shape[-1]
    L = w["wqkv"].shape[0]
    nh = w["wo"].shape[1]
    kernel = _make_decoder_kernel(B, Td, Te, H, F, nh, L, V)
    inputs = (x2, enc2, svl, cvl,
              w["wqkv"], w["wo"], w["wq_c"], w["wkv_c"], w["wo_c"],
              w["w1"], w["b1"], w["w2"], w["b2"],
              w["ln1_g"], w["ln1_b"], w["ln2_g"], w["ln2_b"],
              w["ln3_g"], w["ln3_b"], w["w_out"], w["b_out"])
    return pl.pallas_call(
        kernel,
        out_shape=jax.ShapeDtypeStruct((BTd, V), F32),
        grid=(1,),
        in_specs=[_full_spec(a.shape) for a in inputs],
        out_specs=_full_spec((BTd, V)),
        compiler_params=pltpu.CompilerParams(
            dimension_semantics=("arbitrary",)),
    )(*inputs)


# ------------------------------ params & packing ------------------------------

def positional_encoding(max_len, H):
    pe = np.zeros((max_len, H), dtype=np.float32)
    pos = np.arange(max_len, dtype=np.float32)[:, None]
    div = np.power(10000.0, np.arange(0, H, 2, dtype=np.float32) / H)
    pe[:, 0::2] = np.sin(pos / div)
    pe[:, 1::2] = np.cos(pos / div)
    return jnp.asarray(pe)


def init_params(key, vocab, H, F, nh, n_layers):
    keys = iter(jax.random.split(key, 256))

    def dense(shape):
        return 0.02 * jax.random.normal(next(keys), shape, F32)

    def attn():
        return {"wq": dense((H, H)), "wk": dense((H, H)),
                "wv": dense((H, H)), "wo": dense((H, H))}

    def enc_blk():
        return {"attn": attn(),
                "w1": dense((H, F)), "b1": jnp.zeros((F,), F32),
                "w2": dense((F, H)), "b2": jnp.zeros((H,), F32),
                "ln1_g": jnp.ones((H,), F32), "ln1_b": jnp.zeros((H,), F32),
                "ln2_g": jnp.ones((H,), F32), "ln2_b": jnp.zeros((H,), F32)}

    def dec_blk():
        d = enc_blk()
        d["cross"] = attn()
        d["ln3_g"] = jnp.ones((H,), F32)
        d["ln3_b"] = jnp.zeros((H,), F32)
        return d

    return {"enc_embed": dense((vocab, H)),
            "dec_embed": dense((vocab, H)),
            "enc_blocks": [enc_blk() for _ in range(n_layers)],
            "dec_blocks": [dec_blk() for _ in range(n_layers)],
            "w_out": dense((H, vocab)),
            "b_out": jnp.zeros((vocab,), F32)}


def pack_params(params, nh):
    """Stack per-layer weights, fuse Q|K|V, split wo per head, cast MXU operands to bf16."""
    H = params["enc_embed"].shape[1]
    D = H // nh

    def pack_attn(blocks, key):
        wqkv = jnp.stack([jnp.concatenate(
            [b[key]["wq"], b[key]["wk"], b[key]["wv"]], axis=1)
            for b in blocks]).astype(BF16)                       # [L, H, 3H]
        wo = jnp.stack([b[key]["wo"].reshape(nh, D, H)
                        for b in blocks]).astype(BF16)           # [L, nh, D, H]
        return wqkv, wo

    def common(blocks):
        return dict(
            w1=jnp.stack([b["w1"] for b in blocks]).astype(BF16),
            b1=jnp.stack([b["b1"][None, :] for b in blocks]),
            w2=jnp.stack([b["w2"] for b in blocks]).astype(BF16),
            b2=jnp.stack([b["b2"][None, :] for b in blocks]),
            ln1_g=jnp.stack([b["ln1_g"][None, :] for b in blocks]),
            ln1_b=jnp.stack([b["ln1_b"][None, :] for b in blocks]),
            ln2_g=jnp.stack([b["ln2_g"][None, :] for b in blocks]),
            ln2_b=jnp.stack([b["ln2_b"][None, :] for b in blocks]),
        )

    enc_w = common(params["enc_blocks"])
    enc_w["wqkv"], enc_w["wo"] = pack_attn(params["enc_blocks"], "attn")

    dec_blocks = params["dec_blocks"]
    dec_w = common(dec_blocks)
    dec_w["wqkv"], dec_w["wo"] = pack_attn(dec_blocks, "attn")
    dec_w["wq_c"] = jnp.stack([b["cross"]["wq"] for b in dec_blocks]).astype(BF16)
    dec_w["wkv_c"] = jnp.stack([jnp.concatenate(
        [b["cross"]["wk"], b["cross"]["wv"]], axis=1)
        for b in dec_blocks]).astype(BF16)                       # [L, H, 2H]
    dec_w["wo_c"] = jnp.stack([b["cross"]["wo"].reshape(nh, D, H)
                               for b in dec_blocks]).astype(BF16)
    dec_w["ln3_g"] = jnp.stack([b["ln3_g"][None, :] for b in dec_blocks])
    dec_w["ln3_b"] = jnp.stack([b["ln3_b"][None, :] for b in dec_blocks])
    dec_w["w_out"] = params["w_out"].astype(BF16)
    dec_w["b_out"] = params["b_out"][None, :]
    return enc_w, dec_w


# ------------------------------ model forward ---------------------------------

def encoder_forward(params, enc_w, pe, enc_X, X_valid_lens):
    B, T = enc_X.shape
    H = params["enc_embed"].shape[1]
    x = params["enc_embed"][enc_X] * math.sqrt(H) + pe[:T][None]     # JAX gather + PE
    x2 = x.reshape(B * T, H).astype(F32)
    vl = jnp.broadcast_to(X_valid_lens.astype(jnp.int32)[:, None, None],
                          (B, T, T)).reshape(B * T, T)
    return pallas_encoder(x2, vl, enc_w)                             # [B*T, H]


def decoder_init_state(enc_outputs_2d, X_valid_lens):
    return (enc_outputs_2d, X_valid_lens)


def decoder_forward(params, dec_w, pe, dec_X, state, Y_valid_lens):
    enc_out2, X_valid_lens = state
    B, Td = dec_X.shape
    H = params["dec_embed"].shape[1]
    V = params["w_out"].shape[1]
    Te = enc_out2.shape[0] // B
    x = params["dec_embed"][dec_X] * math.sqrt(H) + pe[:Td][None]
    x2 = x.reshape(B * Td, H).astype(F32)
    # decoder self-attention: causal mask combined with Y_valid_lens
    causal = jnp.arange(1, Td + 1, dtype=jnp.int32)
    self_vl = jnp.minimum(causal[None, :], Y_valid_lens.astype(jnp.int32)[:, None])
    svl = jnp.broadcast_to(self_vl[:, :, None], (B, Td, Td)).reshape(B * Td, Td)
    cvl = jnp.broadcast_to(X_valid_lens.astype(jnp.int32)[:, None, None],
                           (B, Td, Te)).reshape(B * Td, Te)
    logits2 = pallas_decoder(x2, enc_out2, svl, cvl, dec_w, V)
    return logits2.reshape(B, Td, V), state


@jax.jit
def encoder_decoder_forward(params, enc_w, dec_w, pe, enc_X, dec_X,
                            X_valid_lens, Y_valid_lens):
    """Mirrors EncoderDecoder.forward."""
    enc_outputs = encoder_forward(params, enc_w, pe, enc_X, X_valid_lens)
    dec_state = decoder_init_state(enc_outputs, X_valid_lens)
    return decoder_forward(params, dec_w, pe, dec_X, dec_state, Y_valid_lens)


# --------------------------------- main ---------------------------------------

if __name__ == "__main__":
    vocab, H, F, nh, n_layers = 32, 32, 64, 4, 2
    B, T_enc, T_dec = 2, 8, 8

    key = jax.random.PRNGKey(0)
    pkey, ekey, dkey = jax.random.split(key, 3)

    params = init_params(pkey, vocab, H, F, nh, n_layers)
    enc_w, dec_w = pack_params(params, nh)
    pe = positional_encoding(64, H)

    enc_X = jax.random.randint(ekey, (B, T_enc), 0, vocab, dtype=jnp.int32)
    dec_X = jax.random.randint(dkey, (B, T_dec), 0, vocab, dtype=jnp.int32)
    X_valid_lens = jnp.array([8, 5], dtype=jnp.int32)
    Y_valid_lens = jnp.array([8, 6], dtype=jnp.int32)

    logits, _ = encoder_decoder_forward(params, enc_w, dec_w, pe, enc_X, dec_X,
                                        X_valid_lens, Y_valid_lens)
    jax.block_until_ready(logits)
    assert logits.shape == (B, T_dec, vocab)
    assert bool(jnp.all(jnp.isfinite(logits)))
    print("KERNEL_OK")
</pallas_src>

<mosaic_0001>
module attributes {stable_mosaic.version = 11 : i64} {
  func.func @kernel(%arg0: i32, %arg1: memref<16x32xf32, #tpu.memory_space<vmem>>, %arg2: memref<16x8xi32, #tpu.memory_space<vmem>>, %arg3: memref<2x32x96xbf16, #tpu.memory_space<vmem>>, %arg4: memref<2x4x8x32xbf16, #tpu.memory_space<vmem>>, %arg5: memref<2x32x64xbf16, #tpu.memory_space<vmem>>, %arg6: memref<2x1x64xf32, #tpu.memory_space<vmem>>, %arg7: memref<2x64x32xbf16, #tpu.memory_space<vmem>>, %arg8: memref<2x1x32xf32, #tpu.memory_space<vmem>>, %arg9: memref<2x1x32xf32, #tpu.memory_space<vmem>>, %arg10: memref<2x1x32xf32, #tpu.memory_space<vmem>>, %arg11: memref<2x1x32xf32, #tpu.memory_space<vmem>>, %arg12: memref<2x1x32xf32, #tpu.memory_space<vmem>>, %arg13: memref<16x32xf32, #tpu.memory_space<vmem>>) attributes {dimension_semantics = [#tpu.dimension_semantics<arbitrary>], iteration_bounds = array<i64: 1>, scalar_prefetch = 0 : i64, scratch_operands = 0 : i64, tpu.core_type = #tpu.core_type<tc>, window_params = [{pipeline_mode = #tpu.pipeline_mode<synchronous>, transform_indices = @transform_0, window_bounds = array<i64: 16, 32>}, {pipeline_mode = #tpu.pipeline_mode<synchronous>, transform_indices = @transform_1, window_bounds = array<i64: 16, 8>}, {pipeline_mode = #tpu.pipeline_mode<synchronous>, transform_indices = @transform_2, window_bounds = array<i64: 2, 32, 96>}, {pipeline_mode = #tpu.pipeline_mode<synchronous>, transform_indices = @transform_3, window_bounds = array<i64: 2, 4, 8, 32>}, {pipeline_mode = #tpu.pipeline_mode<synchronous>, transform_indices = @transform_4, window_bounds = array<i64: 2, 32, 64>}, {pipeline_mode = #tpu.pipeline_mode<synchronous>, transform_indices = @transform_5, window_bounds = array<i64: 2, 1, 64>}, {pipeline_mode = #tpu.pipeline_mode<synchronous>, transform_indices = @transform_6, window_bounds = array<i64: 2, 64, 32>}, {pipeline_mode = #tpu.pipeline_mode<synchronous>, transform_indices = @transform_7, window_bounds = array<i64: 2, 1, 32>}, {pipeline_mode = #tpu.pipeline_mode<synchronous>, transform_indices = @transform_8, window_bounds = array<i64: 2, 1, 32>}, {pipeline_mode = #tpu.pipeline_mode<synchronous>, transform_indices = @transform_9, window_bounds = array<i64: 2, 1, 32>}, {pipeline_mode = #tpu.pipeline_mode<synchronous>, transform_indices = @transform_10, window_bounds = array<i64: 2, 1, 32>}, {pipeline_mode = #tpu.pipeline_mode<synchronous>, transform_indices = @transform_11, window_bounds = array<i64: 2, 1, 32>}, {pipeline_mode = #tpu.pipeline_mode<synchronous>, transform_indices = @transform_12, window_bounds = array<i64: 16, 32>}]} {
    %c0 = arith.constant 0 : index
    %c0_0 = arith.constant 0 : index
    %0 = vector.load %arg1[%c0, %c0_0] : memref<16x32xf32, #tpu.memory_space<vmem>>, vector<16x32xf32>
    %1 = tpu.iota {dimensions = array<i32: 1>} : vector<16x8xi32>
    %c0_1 = arith.constant 0 : index
    %c0_2 = arith.constant 0 : index
    %2 = vector.load %arg2[%c0_1, %c0_2] : memref<16x8xi32, #tpu.memory_space<vmem>>, vector<16x8xi32>
    %3 = arith.cmpi slt, %1, %2 : vector<16x8xi32>
    %cst = arith.constant 0.000000e+00 : f32
    %cst_3 = arith.constant -1.000000e+06 : f32
    %4 = vector.broadcast %cst : f32 to vector<16x8xf32>
    %5 = vector.broadcast %cst_3 : f32 to vector<16x8xf32>
    %6 = arith.select %3, %4, %5 : vector<16x8xi1>, vector<16x8xf32>
    %7 = vector.shape_cast %6 : vector<16x8xf32> to vector<2x8x8xf32>
    %8 = arith.truncf %0 : vector<16x32xf32> to vector<16x32xbf16>
    %c0_4 = arith.constant 0 : index
    %c0_5 = arith.constant 0 : index
    %c0_6 = arith.constant 0 : index
    %9 = vector.load %arg3[%c0_4, %c0_5, %c0_6] : memref<2x32x96xbf16, #tpu.memory_space<vmem>>, vector<1x32x96xbf16>
    %10 = vector.shape_cast %9 : vector<1x32x96xbf16> to vector<32x96xbf16>
    %cst_7 = arith.constant dense<0.000000e+00> : vector<16x96xf32>
    %11 = tpu.matmul %8, %10, %cst_7 {dimension_numbers = #tpu.dot_dimension_numbers<[1], [0], [0], [1], [0, 0, 1, 1], [], []>} : vector<16x32xbf16>, vector<32x96xbf16>, vector<16x96xf32> -> vector<16x96xf32>
    %12 = vector.extract_strided_slice %11 {offsets = [0, 0], sizes = [16, 32], strides = [1, 1]} : vector<16x96xf32> to vector<16x32xf32>
    %13 = vector.extract_strided_slice %11 {offsets = [0, 32], sizes = [16, 32], strides = [1, 1]} : vector<16x96xf32> to vector<16x32xf32>
    %14 = vector.extract_strided_slice %11 {offsets = [0, 64], sizes = [16, 32], strides = [1, 1]} : vector<16x96xf32> to vector<16x32xf32>
    %c0_8 = arith.constant 0 : index
    %c0_9 = arith.constant 0 : index
    %c0_10 = arith.constant 0 : index
    %c0_11 = arith.constant 0 : index
    %15 = vector.load %arg4[%c0_8, %c0_9, %c0_10, %c0_11] : memref<2x4x8x32xbf16, #tpu.memory_space<vmem>>, vector<1x4x8x32xbf16>
    %16 = vector.shape_cast %15 : vector<1x4x8x32xbf16> to vector<4x8x32xbf16>
    %17 = vector.shape_cast %12 : vector<16x32xf32> to vector<2x8x32xf32>
    %18 = vector.shape_cast %13 : vector<16x32xf32> to vector<2x8x32xf32>
    %19 = vector.shape_cast %14 : vector<16x32xf32> to vector<2x8x32xf32>
    %cst_12 = arith.constant 0.000000e+00 : f32
    %20 = vector.broadcast %cst_12 : f32 to vector<16x32xf32>
    %21 = vector.extract_strided_slice %17 {offsets = [0, 0, 0], sizes = [2, 8, 8], strides = [1, 1, 1]} : vector<2x8x32xf32> to vector<2x8x8xf32>
    %22 = arith.truncf %21 : vector<2x8x8xf32> to vector<2x8x8xbf16>
    %23 = vector.extract_strided_slice %18 {offsets = [0, 0, 0], sizes = [2, 8, 8], strides = [1, 1, 1]} : vector<2x8x32xf32> to vector<2x8x8xf32>
    %24 = arith.truncf %23 : vector<2x8x8xf32> to vector<2x8x8xbf16>
    "tpu.trace_start"() <{level = 10 : i32, message = "bqd,bkd->bqk"}> : () -> ()
    %cst_13 = arith.constant dense<0.000000e+00> : vector<2x8x8xf32>
    %25 = tpu.matmul %22, %24, %cst_13 {dimension_numbers = #tpu.dot_dimension_numbers<[2], [2], [1], [1], [0, 0, 0, 1, 1, 1], [0], [0]>} : vector<2x8x8xbf16>, vector<2x8x8xbf16>, vector<2x8x8xf32> -> vector<2x8x8xf32>
    "tpu.trace_stop"() : () -> ()
    %cst_14 = arith.constant 0.353553385 : f32
    %26 = vector.broadcast %cst_14 : f32 to vector<2x8x8xf32>
    %27 = arith.mulf %25, %26 : vector<2x8x8xf32>
    %28 = arith.addf %27, %7 : vector<2x8x8xf32>
    %cst_15 = arith.constant dense<0xFF800000> : vector<2x8xf32>
    %29 = vector.multi_reduction <maximumf>, %28, %cst_15 [2] : vector<2x8x8xf32> to vector<2x8xf32>
    %30 = vector.shape_cast %29 : vector<2x8xf32> to vector<2x8x1xf32>
    %31 = vector.broadcast %30 : vector<2x8x1xf32> to vector<2x8x8xf32>
    %32 = arith.subf %28, %31 : vector<2x8x8xf32>
    %33 = math.exp %32 : vector<2x8x8xf32>
    %cst_16 = arith.constant dense<0.000000e+00> : vector<2x8xf32>
    %34 = vector.multi_reduction <add>, %33, %cst_16 [2] : vector<2x8x8xf32> to vector<2x8xf32>
    %35 = vector.shape_cast %34 : vector<2x8xf32> to vector<2x8x1xf32>
    %36 = tpu.reciprocal %35 {approx = true} : vector<2x8x1xf32> -> vector<2x8x1xf32>
    %37 = vector.broadcast %36 : vector<2x8x1xf32> to vector<2x8x8xf32>
    %38 = arith.mulf %33, %37 : vector<2x8x8xf32>
    %39 = arith.truncf %38 : vector<2x8x8xf32> to vector<2x8x8xbf16>
    %40 = vector.extract_strided_slice %19 {offsets = [0, 0, 0], sizes = [2, 8, 8], strides = [1, 1, 1]} : vector<2x8x32xf32> to vector<2x8x8xf32>
    %41 = arith.truncf %40 : vector<2x8x8xf32> to vector<2x8x8xbf16>
    "tpu.trace_start"() <{level = 10 : i32, message = "bqk,bkd->bqd"}> : () -> ()
    %cst_17 = arith.constant dense<0.000000e+00> : vector<2x8x8xf32>
    %42 = tpu.matmul %39, %41, %cst_17 {dimension_numbers = #tpu.dot_dimension_numbers<[2], [1], [1], [2], [0, 0, 0, 1, 1, 2], [0], [0]>} : vector<2x8x8xbf16>, vector<2x8x8xbf16>, vector<2x8x8xf32> -> vector<2x8x8xf32>
    "tpu.trace_stop"() : () -> ()
    %43 = vector.shape_cast %42 : vector<2x8x8xf32> to vector<16x8xf32>
    %44 = arith.truncf %43 : vector<16x8xf32> to vector<16x8xbf16>
    %45 = vector.extract_strided_slice %16 {offsets = [0, 0, 0], sizes = [1, 8, 32], strides = [1, 1, 1]} : vector<4x8x32xbf16> to vector<1x8x32xbf16>
    %46 = vector.shape_cast %45 : vector<1x8x32xbf16> to vector<8x32xbf16>
    %cst_18 = arith.constant dense<0.000000e+00> : vector<16x32xf32>
    %47 = tpu.matmul %44, %46, %cst_18 {dimension_numbers = #tpu.dot_dimension_numbers<[1], [0], [0], [1], [0, 0, 1, 1], [], []>} : vector<16x8xbf16>, vector<8x32xbf16>, vector<16x32xf32> -> vector<16x32xf32>
    %48 = arith.addf %20, %47 : vector<16x32xf32>
    %49 = vector.extract_strided_slice %17 {offsets = [0, 0, 8], sizes = [2, 8, 8], strides = [1, 1, 1]} : vector<2x8x32xf32> to vector<2x8x8xf32>
    %50 = arith.truncf %49 : vector<2x8x8xf32> to vector<2x8x8xbf16>
    %51 = vector.extract_strided_slice %18 {offsets = [0, 0, 8], sizes = [2, 8, 8], strides = [1, 1, 1]} : vector<2x8x32xf32> to vector<2x8x8xf32>
    %52 = arith.truncf %51 : vector<2x8x8xf32> to vector<2x8x8xbf16>
    "tpu.trace_start"() <{level = 10 : i32, message = "bqd,bkd->bqk"}> : () -> ()
    %cst_19 = arith.constant dense<0.000000e+00> : vector<2x8x8xf32>
    %53 = tpu.matmul %50, %52, %cst_19 {dimension_numbers = #tpu.dot_dimension_numbers<[2], [2], [1], [1], [0, 0, 0, 1, 1, 1], [0], [0]>} : vector<2x8x8xbf16>, vector<2x8x8xbf16>, vector<2x8x8xf32> -> vector<2x8x8xf32>
    "tpu.trace_stop"() : () -> ()
    %cst_20 = arith.constant 0.353553385 : f32
    %54 = vector.broadcast %cst_20 : f32 to vector<2x8x8xf32>
    %55 = arith.mulf %53, %54 : vector<2x8x8xf32>
    %56 = arith.addf %55, %7 : vector<2x8x8xf32>
    %cst_21 = arith.constant dense<0xFF800000> : vector<2x8xf32>
    %57 = vector.multi_reduction <maximumf>, %56, %cst_21 [2] : vector<2x8x8xf32> to vector<2x8xf32>
    %58 = vector.shape_cast %57 : vector<2x8xf32> to vector<2x8x1xf32>
    %59 = vector.broadcast %58 : vector<2x8x1xf32> to vector<2x8x8xf32>
    %60 = arith.subf %56, %59 : vector<2x8x8xf32>
    %61 = math.exp %60 : vector<2x8x8xf32>
    %cst_22 = arith.constant dense<0.000000e+00> : vector<2x8xf32>
    %62 = vector.multi_reduction <add>, %61, %cst_22 [2] : vector<2x8x8xf32> to vector<2x8xf32>
    %63 = vector.shape_cast %62 : vector<2x8xf32> to vector<2x8x1xf32>
    %64 = tpu.reciprocal %63 {approx = true} : vector<2x8x1xf32> -> vector<2x8x1xf32>
    %65 = vector.broadcast %64 : vector<2x8x1xf32> to vector<2x8x8xf32>
    %66 = arith.mulf %61, %65 : vector<2x8x8xf32>
    %67 = arith.truncf %66 : vector<2x8x8xf32> to vector<2x8x8xbf16>
    %68 = vector.extract_strided_slice %19 {offsets = [0, 0, 8], sizes = [2, 8, 8], strides = [1, 1, 1]} : vector<2x8x32xf32> to vector<2x8x8xf32>
    %69 = arith.truncf %68 : vector<2x8x8xf32> to vector<2x8x8xbf16>
    "tpu.trace_start"() <{level = 10 : i32, message = "bqk,bkd->bqd"}> : () -> ()
    %cst_23 = arith.constant dense<0.000000e+00> : vector<2x8x8xf32>
    %70 = tpu.matmul %67, %69, %cst_23 {dimension_numbers = #tpu.dot_dimension_numbers<[2], [1], [1], [2], [0, 0, 0, 1, 1, 2], [0], [0]>} : vector<2x8x8xbf16>, vector<2x8x8xbf16>, vector<2x8x8xf32> -> vector<2x8x8xf32>
    "tpu.trace_stop"() : () -> ()
    %71 = vector.shape_cast %70 : vector<2x8x8xf32> to vector<16x8xf32>
    %72 = arith.truncf %71 : vector<16x8xf32> to vector<16x8xbf16>
    %73 = vector.extract_strided_slice %16 {offsets = [1, 0, 0], sizes = [1, 8, 32], strides = [1, 1, 1]} : vector<4x8x32xbf16> to vector<1x8x32xbf16>
    %74 = vector.shape_cast %73 : vector<1x8x32xbf16> to vector<8x32xbf16>
    %cst_24 = arith.constant dense<0.000000e+00> : vector<16x32xf32>
    %75 = tpu.matmul %72, %74, %cst_24 {dimension_numbers = #tpu.dot_dimension_numbers<[1], [0], [0], [1], [0, 0, 1, 1], [], []>} : vector<16x8xbf16>, vector<8x32xbf16>, vector<16x32xf32> -> vector<16x32xf32>
    %76 = arith.addf %48, %75 : vector<16x32xf32>
    %77 = vector.extract_strided_slice %17 {offsets = [0, 0, 16], sizes = [2, 8, 8], strides = [1, 1, 1]} : vector<2x8x32xf32> to vector<2x8x8xf32>
    %78 = arith.truncf %77 : vector<2x8x8xf32> to vector<2x8x8xbf16>
    %79 = vector.extract_strided_slice %18 {offsets = [0, 0, 16], sizes = [2, 8, 8], strides = [1, 1, 1]} : vector<2x8x32xf32> to vector<2x8x8xf32>
    %80 = arith.truncf %79 : vector<2x8x8xf32> to vector<2x8x8xbf16>
    "tpu.trace_start"() <{level = 10 : i32, message = "bqd,bkd->bqk"}> : () -> ()
    %cst_25 = arith.constant dense<0.000000e+00> : vector<2x8x8xf32>
    %81 = tpu.matmul %78, %80, %cst_25 {dimension_numbers = #tpu.dot_dimension_numbers<[2], [2], [1], [1], [0, 0, 0, 1, 1, 1], [0], [0]>} : vector<2x8x8xbf16>, vector<2x8x8xbf16>, vector<2x8x8xf32> -> vector<2x8x8xf32>
    "tpu.trace_stop"() : () -> ()
    %cst_26 = arith.constant 0.353553385 : f32
    %82 = vector.broadcast %cst_26 : f32 to vector<2x8x8xf32>
    %83 = arith.mulf %81, %82 : vector<2x8x8xf32>
    %84 = arith.addf %83, %7 : vector<2x8x8xf32>
    %cst_27 = arith.constant dense<0xFF800000> : vector<2x8xf32>
    %85 = vector.multi_reduction <maximumf>, %84, %cst_27 [2] : vector<2x8x8xf32> to vector<2x8xf32>
    %86 = vector.shape_cast %85 : vector<2x8xf32> to vector<2x8x1xf32>
    %87 = vector.broadcast %86 : vector<2x8x1xf32> to vector<2x8x8xf32>
    %88 = arith.subf %84, %87 : vector<2x8x8xf32>
    %89 = math.exp %88 : vector<2x8x8xf32>
    %cst_28 = arith.constant dense<0.000000e+00> : vector<2x8xf32>
    %90 = vector.multi_reduction <add>, %89, %cst_28 [2] : vector<2x8x8xf32> to vector<2x8xf32>
    %91 = vector.shape_cast %90 : vector<2x8xf32> to vector<2x8x1xf32>
    %92 = tpu.reciprocal %91 {approx = true} : vector<2x8x1xf32> -> vector<2x8x1xf32>
    %93 = vector.broadcast %92 : vector<2x8x1xf32> to vector<2x8x8xf32>
    %94 = arith.mulf %89, %93 : vector<2x8x8xf32>
    %95 = arith.truncf %94 : vector<2x8x8xf32> to vector<2x8x8xbf16>
    %96 = vector.extract_strided_slice %19 {offsets = [0, 0, 16], sizes = [2, 8, 8], strides = [1, 1, 1]} : vector<2x8x32xf32> to vector<2x8x8xf32>
    %97 = arith.truncf %96 : vector<2x8x8xf32> to vector<2x8x8xbf16>
    "tpu.trace_start"() <{level = 10 : i32, message = "bqk,bkd->bqd"}> : () -> ()
    %cst_29 = arith.constant dense<0.000000e+00> : vector<2x8x8xf32>
    %98 = tpu.matmul %95, %97, %cst_29 {dimension_numbers = #tpu.dot_dimension_numbers<[2], [1], [1], [2], [0, 0, 0, 1, 1, 2], [0], [0]>} : vector<2x8x8xbf16>, vector<2x8x8xbf16>, vector<2x8x8xf32> -> vector<2x8x8xf32>
    "tpu.trace_stop"() : () -> ()
    %99 = vector.shape_cast %98 : vector<2x8x8xf32> to vector<16x8xf32>
    %100 = arith.truncf %99 : vector<16x8xf32> to vector<16x8xbf16>
    %101 = vector.extract_strided_slice %16 {offsets = [2, 0, 0], sizes = [1, 8, 32], strides = [1, 1, 1]} : vector<4x8x32xbf16> to vector<1x8x32xbf16>
    %102 = vector.shape_cast %101 : vector<1x8x32xbf16> to vector<8x32xbf16>
    %cst_30 = arith.constant dense<0.000000e+00> : vector<16x32xf32>
    %103 = tpu.matmul %100, %102, %cst_30 {dimension_numbers = #tpu.dot_dimension_numbers<[1], [0], [0], [1], [0, 0, 1, 1], [], []>} : vector<16x8xbf16>, vector<8x32xbf16>, vector<16x32xf32> -> vector<16x32xf32>
    %104 = arith.addf %76, %103 : vector<16x32xf32>
    %105 = vector.extract_strided_slice %17 {offsets = [0, 0, 24], sizes = [2, 8, 8], strides = [1, 1, 1]} : vector<2x8x32xf32> to vector<2x8x8xf32>
    %106 = arith.truncf %105 : vector<2x8x8xf32> to vector<2x8x8xbf16>
    %107 = vector.extract_strided_slice %18 {offsets = [0, 0, 24], sizes = [2, 8, 8], strides = [1, 1, 1]} : vector<2x8x32xf32> to vector<2x8x8xf32>
    %108 = arith.truncf %107 : vector<2x8x8xf32> to vector<2x8x8xbf16>
    "tpu.trace_start"() <{level = 10 : i32, message = "bqd,bkd->bqk"}> : () -> ()
    %cst_31 = arith.constant dense<0.000000e+00> : vector<2x8x8xf32>
    %109 = tpu.matmul %106, %108, %cst_31 {dimension_numbers = #tpu.dot_dimension_numbers<[2], [2], [1], [1], [0, 0, 0, 1, 1, 1], [0], [0]>} : vector<2x8x8xbf16>, vector<2x8x8xbf16>, vector<2x8x8xf32> -> vector<2x8x8xf32>
    "tpu.trace_stop"() : () -> ()
    %cst_32 = arith.constant 0.353553385 : f32
    %110 = vector.broadcast %cst_32 : f32 to vector<2x8x8xf32>
    %111 = arith.mulf %109, %110 : vector<2x8x8xf32>
    %112 = arith.addf %111, %7 : vector<2x8x8xf32>
    %cst_33 = arith.constant dense<0xFF800000> : vector<2x8xf32>
    %113 = vector.multi_reduction <maximumf>, %112, %cst_33 [2] : vector<2x8x8xf32> to vector<2x8xf32>
    %114 = vector.shape_cast %113 : vector<2x8xf32> to vector<2x8x1xf32>
    %115 = vector.broadcast %114 : vector<2x8x1xf32> to vector<2x8x8xf32>
    %116 = arith.subf %112, %115 : vector<2x8x8xf32>
    %117 = math.exp %116 : vector<2x8x8xf32>
    %cst_34 = arith.constant dense<0.000000e+00> : vector<2x8xf32>
    %118 = vector.multi_reduction <add>, %117, %cst_34 [2] : vector<2x8x8xf32> to vector<2x8xf32>
    %119 = vector.shape_cast %118 : vector<2x8xf32> to vector<2x8x1xf32>
    %120 = tpu.reciprocal %119 {approx = true} : vector<2x8x1xf32> -> vector<2x8x1xf32>
    %121 = vector.broadcast %120 : vector<2x8x1xf32> to vector<2x8x8xf32>
    %122 = arith.mulf %117, %121 : vector<2x8x8xf32>
    %123 = arith.truncf %122 : vector<2x8x8xf32> to vector<2x8x8xbf16>
    %124 = vector.extract_strided_slice %19 {offsets = [0, 0, 24], sizes = [2, 8, 8], strides = [1, 1, 1]} : vector<2x8x32xf32> to vector<2x8x8xf32>
    %125 = arith.truncf %124 : vector<2x8x8xf32> to vector<2x8x8xbf16>
    "tpu.trace_start"() <{level = 10 : i32, message = "bqk,bkd->bqd"}> : () -> ()
    %cst_35 = arith.constant dense<0.000000e+00> : vector<2x8x8xf32>
    %126 = tpu.matmul %123, %125, %cst_35 {dimension_numbers = #tpu.dot_dimension_numbers<[2], [1], [1], [2], [0, 0, 0, 1, 1, 2], [0], [0]>} : vector<2x8x8xbf16>, vector<2x8x8xbf16>, vector<2x8x8xf32> -> vector<2x8x8xf32>
    "tpu.trace_stop"() : () -> ()
    %127 = vector.shape_cast %126 : vector<2x8x8xf32> to vector<16x8xf32>
    %128 = arith.truncf %127 : vector<16x8xf32> to vector<16x8xbf16>
    %129 = vector.extract_strided_slice %16 {offsets = [3, 0, 0], sizes = [1, 8, 32], strides = [1, 1, 1]} : vector<4x8x32xbf16> to vector<1x8x32xbf16>
    %130 = vector.shape_cast %129 : vector<1x8x32xbf16> to vector<8x32xbf16>
    %cst_36 = arith.constant dense<0.000000e+00> : vector<16x32xf32>
    %131 = tpu.matmul %128, %130, %cst_36 {dimension_numbers = #tpu.dot_dimension_numbers<[1], [0], [0], [1], [0, 0, 1, 1], [], []>} : vector<16x8xbf16>, vector<8x32xbf16>, vector<16x32xf32> -> vector<16x32xf32>
    %132 = arith.addf %104, %131 : vector<16x32xf32>
    %c0_37 = arith.constant 0 : index
    %c0_38 = arith.constant 0 : index
    %c0_39 = arith.constant 0 : index
    %133 = vector.load %arg9[%c0_37, %c0_38, %c0_39] : memref<2x1x32xf32, #tpu.memory_space<vmem>>, vector<1x1x32xf32>
    %134 = vector.shape_cast %133 : vector<1x1x32xf32> to vector<1x32xf32>
    %c0_40 = arith.constant 0 : index
    %c0_41 = arith.constant 0 : index
    %c0_42 = arith.constant 0 : index
    %135 = vector.load %arg10[%c0_40, %c0_41, %c0_42] : memref<2x1x32xf32, #tpu.memory_space<vmem>>, vector<1x1x32xf32>
    %136 = vector.shape_cast %135 : vector<1x1x32xf32> to vector<1x32xf32>
    %137 = arith.addf %0, %132 : vector<16x32xf32>
    %cst_43 = arith.constant dense<0.000000e+00> : vector<16xf32>
    %138 = vector.multi_reduction <add>, %137, %cst_43 [1] : vector<16x32xf32> to vector<16xf32>
    %139 = vector.shape_cast %138 : vector<16xf32> to vector<16x1xf32>
    %cst_44 = arith.constant 3.200000e+01 : f32
    %140 = vector.broadcast %cst_44 : f32 to vector<16x1xf32>
    %141 = arith.divf %139, %140 : vector<16x1xf32>
    %142 = vector.broadcast %141 : vector<16x1xf32> to vector<16x32xf32>
    %143 = arith.subf %137, %142 : vector<16x32xf32>
    %144 = arith.mulf %143, %143 : vector<16x32xf32>
    %cst_45 = arith.constant dense<0.000000e+00> : vector<16xf32>
    %145 = vector.multi_reduction <add>, %144, %cst_45 [1] : vector<16x32xf32> to vector<16xf32>
    %146 = vector.shape_cast %145 : vector<16xf32> to vector<16x1xf32>
    %cst_46 = arith.constant 3.200000e+01 : f32
    %147 = vector.broadcast %cst_46 : f32 to vector<16x1xf32>
    %148 = arith.divf %146, %147 : vector<16x1xf32>
    %149 = vector.broadcast %141 : vector<16x1xf32> to vector<16x32xf32>
    %150 = arith.subf %137, %149 : vector<16x32xf32>
    %cst_47 = arith.constant 9.99999974E-6 : f32
    %151 = vector.broadcast %cst_47 : f32 to vector<16x1xf32>
    %152 = arith.addf %148, %151 : vector<16x1xf32>
    %153 = math.rsqrt %152 : vector<16x1xf32>
    %154 = vector.broadcast %153 : vector<16x1xf32> to vector<16x32xf32>
    %155 = arith.mulf %150, %154 : vector<16x32xf32>
    %156 = vector.broadcast %134 : vector<1x32xf32> to vector<16x32xf32>
    %157 = arith.mulf %155, %156 : vector<16x32xf32>
    %158 = vector.broadcast %136 : vector<1x32xf32> to vector<16x32xf32>
    %159 = arith.addf %157, %158 : vector<16x32xf32>
    %c0_48 = arith.constant 0 : index
    %c0_49 = arith.constant 0 : index
    %c0_50 = arith.constant 0 : index
    %160 = vector.load %arg5[%c0_48, %c0_49, %c0_50] : memref<2x32x64xbf16, #tpu.memory_space<vmem>>, vector<1x32x64xbf16>
    %161 = vector.shape_cast %160 : vector<1x32x64xbf16> to vector<32x64xbf16>
    %c0_51 = arith.constant 0 : index
    %c0_52 = arith.constant 0 : index
    %c0_53 = arith.constant 0 : index
    %162 = vector.load %arg6[%c0_51, %c0_52, %c0_53] : memref<2x1x64xf32, #tpu.memory_space<vmem>>, vector<1x1x64xf32>
    %163 = vector.shape_cast %162 : vector<1x1x64xf32> to vector<1x64xf32>
    %c0_54 = arith.constant 0 : index
    %c0_55 = arith.constant 0 : index
    %c0_56 = arith.constant 0 : index
    %164 = vector.load %arg7[%c0_54, %c0_55, %c0_56] : memref<2x64x32xbf16, #tpu.memory_space<vmem>>, vector<1x64x32xbf16>
    %165 = vector.shape_cast %164 : vector<1x64x32xbf16> to vector<64x32xbf16>
    %c0_57 = arith.constant 0 : index
    %c0_58 = arith.constant 0 : index
    %c0_59 = arith.constant 0 : index
    %166 = vector.load %arg8[%c0_57, %c0_58, %c0_59] : memref<2x1x32xf32, #tpu.memory_space<vmem>>, vector<1x1x32xf32>
    %167 = vector.shape_cast %166 : vector<1x1x32xf32> to vector<1x32xf32>
    %168 = arith.truncf %159 : vector<16x32xf32> to vector<16x32xbf16>
    %cst_60 = arith.constant dense<0.000000e+00> : vector<16x64xf32>
    %169 = tpu.matmul %168, %161, %cst_60 {dimension_numbers = #tpu.dot_dimension_numbers<[1], [0], [0], [1], [0, 0, 1, 1], [], []>} : vector<16x32xbf16>, vector<32x64xbf16>, vector<16x64xf32> -> vector<16x64xf32>
    %170 = vector.broadcast %163 : vector<1x64xf32> to vector<16x64xf32>
    %171 = arith.addf %169, %170 : vector<16x64xf32>
    %cst_61 = arith.constant 0.000000e+00 : f32
    %172 = vector.broadcast %cst_61 : f32 to vector<16x64xf32>
    %173 = arith.maximumf %171, %172 : vector<16x64xf32>
    %174 = arith.truncf %173 : vector<16x64xf32> to vector<16x64xbf16>
    %cst_62 = arith.constant dense<0.000000e+00> : vector<16x32xf32>
    %175 = tpu.matmul %174, %165, %cst_62 {dimension_numbers = #tpu.dot_dimension_numbers<[1], [0], [0], [1], [0, 0, 1, 1], [], []>} : vector<16x64xbf16>, vector<64x32xbf16>, vector<16x32xf32> -> vector<16x32xf32>
    %176 = vector.broadcast %167 : vector<1x32xf32> to vector<16x32xf32>
    %177 = arith.addf %175, %176 : vector<16x32xf32>
    %c0_63 = arith.constant 0 : index
    %c0_64 = arith.constant 0 : index
    %c0_65 = arith.constant 0 : index
    %178 = vector.load %arg11[%c0_63, %c0_64, %c0_65] : memref<2x1x32xf32, #tpu.memory_space<vmem>>, vector<1x1x32xf32>
    %179 = vector.shape_cast %178 : vector<1x1x32xf32> to vector<1x32xf32>
    %c0_66 = arith.constant 0 : index
    %c0_67 = arith.constant 0 : index
    %c0_68 = arith.constant 0 : index
    %180 = vector.load %arg12[%c0_66, %c0_67, %c0_68] : memref<2x1x32xf32, #tpu.memory_space<vmem>>, vector<1x1x32xf32>
    %181 = vector.shape_cast %180 : vector<1x1x32xf32> to vector<1x32xf32>
    %182 = arith.addf %159, %177 : vector<16x32xf32>
    %cst_69 = arith.constant dense<0.000000e+00> : vector<16xf32>
    %183 = vector.multi_reduction <add>, %182, %cst_69 [1] : vector<16x32xf32> to vector<16xf32>
    %184 = vector.shape_cast %183 : vector<16xf32> to vector<16x1xf32>
    %cst_70 = arith.constant 3.200000e+01 : f32
    %185 = vector.broadcast %cst_70 : f32 to vector<16x1xf32>
    %186 = arith.divf %184, %185 : vector<16x1xf32>
    %187 = vector.broadcast %186 : vector<16x1xf32> to vector<16x32xf32>
    %188 = arith.subf %182, %187 : vector<16x32xf32>
    %189 = arith.mulf %188, %188 : vector<16x32xf32>
    %cst_71 = arith.constant dense<0.000000e+00> : vector<16xf32>
    %190 = vector.multi_reduction <add>, %189, %cst_71 [1] : vector<16x32xf32> to vector<16xf32>
    %191 = vector.shape_cast %190 : vector<16xf32> to vector<16x1xf32>
    %cst_72 = arith.constant 3.200000e+01 : f32
    %192 = vector.broadcast %cst_72 : f32 to vector<16x1xf32>
    %193 = arith.divf %191, %192 : vector<16x1xf32>
    %194 = vector.broadcast %186 : vector<16x1xf32> to vector<16x32xf32>
    %195 = arith.subf %182, %194 : vector<16x32xf32>
    %cst_73 = arith.constant 9.99999974E-6 : f32
    %196 = vector.broadcast %cst_73 : f32 to vector<16x1xf32>
    %197 = arith.addf %193, %196 : vector<16x1xf32>
    %198 = math.rsqrt %197 : vector<16x1xf32>
    %199 = vector.broadcast %198 : vector<16x1xf32> to vector<16x32xf32>
    %200 = arith.mulf %195, %199 : vector<16x32xf32>
    %201 = vector.broadcast %179 : vector<1x32xf32> to vector<16x32xf32>
    %202 = arith.mulf %200, %201 : vector<16x32xf32>
    %203 = vector.broadcast %181 : vector<1x32xf32> to vector<16x32xf32>
    %204 = arith.addf %202, %203 : vector<16x32xf32>
    %205 = arith.truncf %204 : vector<16x32xf32> to vector<16x32xbf16>
    %c1 = arith.constant 1 : index
    %c0_74 = arith.constant 0 : index
    %c0_75 = arith.constant 0 : index
    %206 = vector.load %arg3[%c1, %c0_74, %c0_75] : memref<2x32x96xbf16, #tpu.memory_space<vmem>>, vector<1x32x96xbf16>
    %207 = vector.shape_cast %206 : vector<1x32x96xbf16> to vector<32x96xbf16>
    %cst_76 = arith.constant dense<0.000000e+00> : vector<16x96xf32>
    %208 = tpu.matmul %205, %207, %cst_76 {dimension_numbers = #tpu.dot_dimension_numbers<[1], [0], [0], [1], [0, 0, 1, 1], [], []>} : vector<16x32xbf16>, vector<32x96xbf16>, vector<16x96xf32> -> vector<16x96xf32>
    %209 = vector.extract_strided_slice %208 {offsets = [0, 0], sizes = [16, 32], strides = [1, 1]} : vector<16x96xf32> to vector<16x32xf32>
    %210 = vector.extract_strided_slice %208 {offsets = [0, 32], sizes = [16, 32], strides = [1, 1]} : vector<16x96xf32> to vector<16x32xf32>
    %211 = vector.extract_strided_slice %208 {offsets = [0, 64], sizes = [16, 32], strides = [1, 1]} : vector<16x96xf32> to vector<16x32xf32>
    %c1_77 = arith.constant 1 : index
    %c0_78 = arith.constant 0 : index
    %c0_79 = arith.constant 0 : index
    %c0_80 = arith.constant 0 : index
    %212 = vector.load %arg4[%c1_77, %c0_78, %c0_79, %c0_80] : memref<2x4x8x32xbf16, #tpu.memory_space<vmem>>, vector<1x4x8x32xbf16>
    %213 = vector.shape_cast %212 : vector<1x4x8x32xbf16> to vector<4x8x32xbf16>
    %214 = vector.shape_cast %209 : vector<16x32xf32> to vector<2x8x32xf32>
    %215 = vector.shape_cast %210 : vector<16x32xf32> to vector<2x8x32xf32>
    %216 = vector.shape_cast %211 : vector<16x32xf32> to vector<2x8x32xf32>
    %cst_81 = arith.constant 0.000000e+00 : f32
    %217 = vector.broadcast %cst_81 : f32 to vector<16x32xf32>
    %218 = vector.extract_strided_slice %214 {offsets = [0, 0, 0], sizes = [2, 8, 8], strides = [1, 1, 1]} : vector<2x8x32xf32> to vector<2x8x8xf32>
    %219 = arith.truncf %218 : vector<2x8x8xf32> to vector<2x8x8xbf16>
    %220 = vector.extract_strided_slice %215 {offsets = [0, 0, 0], sizes = [2, 8, 8], strides = [1, 1, 1]} : vector<2x8x32xf32> to vector<2x8x8xf32>
    %221 = arith.truncf %220 : vector<2x8x8xf32> to vector<2x8x8xbf16>
    "tpu.trace_start"() <{level = 10 : i32, message = "bqd,bkd->bqk"}> : () -> ()
    %cst_82 = arith.constant dense<0.000000e+00> : vector<2x8x8xf32>
    %222 = tpu.matmul %219, %221, %cst_82 {dimension_numbers = #tpu.dot_dimension_numbers<[2], [2], [1], [1], [0, 0, 0, 1, 1, 1], [0], [0]>} : vector<2x8x8xbf16>, vector<2x8x8xbf16>, vector<2x8x8xf32> -> vector<2x8x8xf32>
    "tpu.trace_stop"() : () -> ()
    %cst_83 = arith.constant 0.353553385 : f32
    %223 = vector.broadcast %cst_83 : f32 to vector<2x8x8xf32>
    %224 = arith.mulf %222, %223 : vector<2x8x8xf32>
    %225 = arith.addf %224, %7 : vector<2x8x8xf32>
    %cst_84 = arith.constant dense<0xFF800000> : vector<2x8xf32>
    %226 = vector.multi_reduction <maximumf>, %225, %cst_84 [2] : vector<2x8x8xf32> to vector<2x8xf32>
    %227 = vector.shape_cast %226 : vector<2x8xf32> to vector<2x8x1xf32>
    %228 = vector.broadcast %227 : vector<2x8x1xf32> to vector<2x8x8xf32>
    %229 = arith.subf %225, %228 : vector<2x8x8xf32>
    %230 = math.exp %229 : vector<2x8x8xf32>
    %cst_85 = arith.constant dense<0.000000e+00> : vector<2x8xf32>
    %231 = vector.multi_reduction <add>, %230, %cst_85 [2] : vector<2x8x8xf32> to vector<2x8xf32>
    %232 = vector.shape_cast %231 : vector<2x8xf32> to vector<2x8x1xf32>
    %233 = tpu.reciprocal %232 {approx = true} : vector<2x8x1xf32> -> vector<2x8x1xf32>
    %234 = vector.broadcast %233 : vector<2x8x1xf32> to vector<2x8x8xf32>
    %235 = arith.mulf %230, %234 : vector<2x8x8xf32>
    %236 = arith.truncf %235 : vector<2x8x8xf32> to vector<2x8x8xbf16>
    %237 = vector.extract_strided_slice %216 {offsets = [0, 0, 0], sizes = [2, 8, 8], strides = [1, 1, 1]} : vector<2x8x32xf32> to vector<2x8x8xf32>
    %238 = arith.truncf %237 : vector<2x8x8xf32> to vector<2x8x8xbf16>
    "tpu.trace_start"() <{level = 10 : i32, message = "bqk,bkd->bqd"}> : () -> ()
    %cst_86 = arith.constant dense<0.000000e+00> : vector<2x8x8xf32>
    %239 = tpu.matmul %236, %238, %cst_86 {dimension_numbers = #tpu.dot_dimension_numbers<[2], [1], [1], [2], [0, 0, 0, 1, 1, 2], [0], [0]>} : vector<2x8x8xbf16>, vector<2x8x8xbf16>, vector<2x8x8xf32> -> vector<2x8x8xf32>
    "tpu.trace_stop"() : () -> ()
    %240 = vector.shape_cast %239 : vector<2x8x8xf32> to vector<16x8xf32>
    %241 = arith.truncf %240 : vector<16x8xf32> to vector<16x8xbf16>
    %242 = vector.extract_strided_slice %213 {offsets = [0, 0, 0], sizes = [1, 8, 32], strides = [1, 1, 1]} : vector<4x8x32xbf16> to vector<1x8x32xbf16>
    %243 = vector.shape_cast %242 : vector<1x8x32xbf16> to vector<8x32xbf16>
    %cst_87 = arith.constant dense<0.000000e+00> : vector<16x32xf32>
    %244 = tpu.matmul %241, %243, %cst_87 {dimension_numbers = #tpu.dot_dimension_numbers<[1], [0], [0], [1], [0, 0, 1, 1], [], []>} : vector<16x8xbf16>, vector<8x32xbf16>, vector<16x32xf32> -> vector<16x32xf32>
    %245 = arith.addf %217, %244 : vector<16x32xf32>
    %246 = vector.extract_strided_slice %214 {offsets = [0, 0, 8], sizes = [2, 8, 8], strides = [1, 1, 1]} : vector<2x8x32xf32> to vector<2x8x8xf32>
    %247 = arith.truncf %246 : vector<2x8x8xf32> to vector<2x8x8xbf16>
    %248 = vector.extract_strided_slice %215 {offsets = [0, 0, 8], sizes = [2, 8, 8], strides = [1, 1, 1]} : vector<2x8x32xf32> to vector<2x8x8xf32>
    %249 = arith.truncf %248 : vector<2x8x8xf32> to vector<2x8x8xbf16>
    "tpu.trace_start"() <{level = 10 : i32, message = "bqd,bkd->bqk"}> : () -> ()
    %cst_88 = arith.constant dense<0.000000e+00> : vector<2x8x8xf32>
    %250 = tpu.matmul %247, %249, %cst_88 {dimension_numbers = #tpu.dot_dimension_numbers<[2], [2], [1], [1], [0, 0, 0, 1, 1, 1], [0], [0]>} : vector<2x8x8xbf16>, vector<2x8x8xbf16>, vector<2x8x8xf32> -> vector<2x8x8xf32>
    "tpu.trace_stop"() : () -> ()
    %cst_89 = arith.constant 0.353553385 : f32
    %251 = vector.broadcast %cst_89 : f32 to vector<2x8x8xf32>
    %252 = arith.mulf %250, %251 : vector<2x8x8xf32>
    %253 = arith.addf %252, %7 : vector<2x8x8xf32>
    %cst_90 = arith.constant dense<0xFF800000> : vector<2x8xf32>
    %254 = vector.multi_reduction <maximumf>, %253, %cst_90 [2] : vector<2x8x8xf32> to vector<2x8xf32>
    %255 = vector.shape_cast %254 : vector<2x8xf32> to vector<2x8x1xf32>
    %256 = vector.broadcast %255 : vector<2x8x1xf32> to vector<2x8x8xf32>
    %257 = arith.subf %253, %256 : vector<2x8x8xf32>
    %258 = math.exp %257 : vector<2x8x8xf32>
    %cst_91 = arith.constant dense<0.000000e+00> : vector<2x8xf32>
    %259 = vector.multi_reduction <add>, %258, %cst_91 [2] : vector<2x8x8xf32> to vector<2x8xf32>
    %260 = vector.shape_cast %259 : vector<2x8xf32> to vector<2x8x1xf32>
    %261 = tpu.reciprocal %260 {approx = true} : vector<2x8x1xf32> -> vector<2x8x1xf32>
    %262 = vector.broadcast %261 : vector<2x8x1xf32> to vector<2x8x8xf32>
    %263 = arith.mulf %258, %262 : vector<2x8x8xf32>
    %264 = arith.truncf %263 : vector<2x8x8xf32> to vector<2x8x8xbf16>
    %265 = vector.extract_strided_slice %216 {offsets = [0, 0, 8], sizes = [2, 8, 8], strides = [1, 1, 1]} : vector<2x8x32xf32> to vector<2x8x8xf32>
    %266 = arith.truncf %265 : vector<2x8x8xf32> to vector<2x8x8xbf16>
    "tpu.trace_start"() <{level = 10 : i32, message = "bqk,bkd->bqd"}> : () -> ()
    %cst_92 = arith.constant dense<0.000000e+00> : vector<2x8x8xf32>
    %267 = tpu.matmul %264, %266, %cst_92 {dimension_numbers = #tpu.dot_dimension_numbers<[2], [1], [1], [2], [0, 0, 0, 1, 1, 2], [0], [0]>} : vector<2x8x8xbf16>, vector<2x8x8xbf16>, vector<2x8x8xf32> -> vector<2x8x8xf32>
    "tpu.trace_stop"() : () -> ()
    %268 = vector.shape_cast %267 : vector<2x8x8xf32> to vector<16x8xf32>
    %269 = arith.truncf %268 : vector<16x8xf32> to vector<16x8xbf16>
    %270 = vector.extract_strided_slice %213 {offsets = [1, 0, 0], sizes = [1, 8, 32], strides = [1, 1, 1]} : vector<4x8x32xbf16> to vector<1x8x32xbf16>
    %271 = vector.shape_cast %270 : vector<1x8x32xbf16> to vector<8x32xbf16>
    %cst_93 = arith.constant dense<0.000000e+00> : vector<16x32xf32>
    %272 = tpu.matmul %269, %271, %cst_93 {dimension_numbers = #tpu.dot_dimension_numbers<[1], [0], [0], [1], [0, 0, 1, 1], [], []>} : vector<16x8xbf16>, vector<8x32xbf16>, vector<16x32xf32> -> vector<16x32xf32>
    %273 = arith.addf %245, %272 : vector<16x32xf32>
    %274 = vector.extract_strided_slice %214 {offsets = [0, 0, 16], sizes = [2, 8, 8], strides = [1, 1, 1]} : vector<2x8x32xf32> to vector<2x8x8xf32>
    %275 = arith.truncf %274 : vector<2x8x8xf32> to vector<2x8x8xbf16>
    %276 = vector.extract_strided_slice %215 {offsets = [0, 0, 16], sizes = [2, 8, 8], strides = [1, 1, 1]} : vector<2x8x32xf32> to vector<2x8x8xf32>
    %277 = arith.truncf %276 : vector<2x8x8xf32> to vector<2x8x8xbf16>
    "tpu.trace_start"() <{level = 10 : i32, message = "bqd,bkd->bqk"}> : () -> ()
    %cst_94 = arith.constant dense<0.000000e+00> : vector<2x8x8xf32>
    %278 = tpu.matmul %275, %277, %cst_94 {dimension_numbers = #tpu.dot_dimension_numbers<[2], [2], [1], [1], [0, 0, 0, 1, 1, 1], [0], [0]>} : vector<2x8x8xbf16>, vector<2x8x8xbf16>, vector<2x8x8xf32> -> vector<2x8x8xf32>
    "tpu.trace_stop"() : () -> ()
    %cst_95 = arith.constant 0.353553385 : f32
    %279 = vector.broadcast %cst_95 : f32 to vector<2x8x8xf32>
    %280 = arith.mulf %278, %279 : vector<2x8x8xf32>
    %281 = arith.addf %280, %7 : vector<2x8x8xf32>
    %cst_96 = arith.constant dense<0xFF800000> : vector<2x8xf32>
    %282 = vector.multi_reduction <maximumf>, %281, %cst_96 [2] : vector<2x8x8xf32> to vector<2x8xf32>
    %283 = vector.shape_cast %282 : vector<2x8xf32> to vector<2x8x1xf32>
    %284 = vector.broadcast %283 : vector<2x8x1xf32> to vector<2x8x8xf32>
    %285 = arith.subf %281, %284 : vector<2x8x8xf32>
    %286 = math.exp %285 : vector<2x8x8xf32>
    %cst_97 = arith.constant dense<0.000000e+00> : vector<2x8xf32>
    %287 = vector.multi_reduction <add>, %286, %cst_97 [2] : vector<2x8x8xf32> to vector<2x8xf32>
    %288 = vector.shape_cast %287 : vector<2x8xf32> to vector<2x8x1xf32>
    %289 = tpu.reciprocal %288 {approx = true} : vector<2x8x1xf32> -> vector<2x8x1xf32>
    %290 = vector.broadcast %289 : vector<2x8x1xf32> to vector<2x8x8xf32>
    %291 = arith.mulf %286, %290 : vector<2x8x8xf32>
    %292 = arith.truncf %291 : vector<2x8x8xf32> to vector<2x8x8xbf16>
    %293 = vector.extract_strided_slice %216 {offsets = [0, 0, 16], sizes = [2, 8, 8], strides = [1, 1, 1]} : vector<2x8x32xf32> to vector<2x8x8xf32>
    %294 = arith.truncf %293 : vector<2x8x8xf32> to vector<2x8x8xbf16>
    "tpu.trace_start"() <{level = 10 : i32, message = "bqk,bkd->bqd"}> : () -> ()
    %cst_98 = arith.constant dense<0.000000e+00> : vector<2x8x8xf32>
    %295 = tpu.matmul %292, %294, %cst_98 {dimension_numbers = #tpu.dot_dimension_numbers<[2], [1], [1], [2], [0, 0, 0, 1, 1, 2], [0], [0]>} : vector<2x8x8xbf16>, vector<2x8x8xbf16>, vector<2x8x8xf32> -> vector<2x8x8xf32>
    "tpu.trace_stop"() : () -> ()
    %296 = vector.shape_cast %295 : vector<2x8x8xf32> to vector<16x8xf32>
    %297 = arith.truncf %296 : vector<16x8xf32> to vector<16x8xbf16>
    %298 = vector.extract_strided_slice %213 {offsets = [2, 0, 0], sizes = [1, 8, 32], strides = [1, 1, 1]} : vector<4x8x32xbf16> to vector<1x8x32xbf16>
    %299 = vector.shape_cast %298 : vector<1x8x32xbf16> to vector<8x32xbf16>
    %cst_99 = arith.constant dense<0.000000e+00> : vector<16x32xf32>
    %300 = tpu.matmul %297, %299, %cst_99 {dimension_numbers = #tpu.dot_dimension_numbers<[1], [0], [0], [1], [0, 0, 1, 1], [], []>} : vector<16x8xbf16>, vector<8x32xbf16>, vector<16x32xf32> -> vector<16x32xf32>
    %301 = arith.addf %273, %300 : vector<16x32xf32>
    %302 = vector.extract_strided_slice %214 {offsets = [0, 0, 24], sizes = [2, 8, 8], strides = [1, 1, 1]} : vector<2x8x32xf32> to vector<2x8x8xf32>
    %303 = arith.truncf %302 : vector<2x8x8xf32> to vector<2x8x8xbf16>
    %304 = vector.extract_strided_slice %215 {offsets = [0, 0, 24], sizes = [2, 8, 8], strides = [1, 1, 1]} : vector<2x8x32xf32> to vector<2x8x8xf32>
    %305 = arith.truncf %304 : vector<2x8x8xf32> to vector<2x8x8xbf16>
    "tpu.trace_start"() <{level = 10 : i32, message = "bqd,bkd->bqk"}> : () -> ()
    %cst_100 = arith.constant dense<0.000000e+00> : vector<2x8x8xf32>
    %306 = tpu.matmul %303, %305, %cst_100 {dimension_numbers = #tpu.dot_dimension_numbers<[2], [2], [1], [1], [0, 0, 0, 1, 1, 1], [0], [0]>} : vector<2x8x8xbf16>, vector<2x8x8xbf16>, vector<2x8x8xf32> -> vector<2x8x8xf32>
    "tpu.trace_stop"() : () -> ()
    %cst_101 = arith.constant 0.353553385 : f32
    %307 = vector.broadcast %cst_101 : f32 to vector<2x8x8xf32>
    %308 = arith.mulf %306, %307 : vector<2x8x8xf32>
    %309 = arith.addf %308, %7 : vector<2x8x8xf32>
    %cst_102 = arith.constant dense<0xFF800000> : vector<2x8xf32>
    %310 = vector.multi_reduction <maximumf>, %309, %cst_102 [2] : vector<2x8x8xf32> to vector<2x8xf32>
    %311 = vector.shape_cast %310 : vector<2x8xf32> to vector<2x8x1xf32>
    %312 = vector.broadcast %311 : vector<2x8x1xf32> to vector<2x8x8xf32>
    %313 = arith.subf %309, %312 : vector<2x8x8xf32>
    %314 = math.exp %313 : vector<2x8x8xf32>
    %cst_103 = arith.constant dense<0.000000e+00> : vector<2x8xf32>
    %315 = vector.multi_reduction <add>, %314, %cst_103 [2] : vector<2x8x8xf32> to vector<2x8xf32>
    %316 = vector.shape_cast %315 : vector<2x8xf32> to vector<2x8x1xf32>
    %317 = tpu.reciprocal %316 {approx = true} : vector<2x8x1xf32> -> vector<2x8x1xf32>
    %318 = vector.broadcast %317 : vector<2x8x1xf32> to vector<2x8x8xf32>
    %319 = arith.mulf %314, %318 : vector<2x8x8xf32>
    %320 = arith.truncf %319 : vector<2x8x8xf32> to vector<2x8x8xbf16>
    %321 = vector.extract_strided_slice %216 {offsets = [0, 0, 24], sizes = [2, 8, 8], strides = [1, 1, 1]} : vector<2x8x32xf32> to vector<2x8x8xf32>
    %322 = arith.truncf %321 : vector<2x8x8xf32> to vector<2x8x8xbf16>
    "tpu.trace_start"() <{level = 10 : i32, message = "bqk,bkd->bqd"}> : () -> ()
    %cst_104 = arith.constant dense<0.000000e+00> : vector<2x8x8xf32>
    %323 = tpu.matmul %320, %322, %cst_104 {dimension_numbers = #tpu.dot_dimension_numbers<[2], [1], [1], [2], [0, 0, 0, 1, 1, 2], [0], [0]>} : vector<2x8x8xbf16>, vector<2x8x8xbf16>, vector<2x8x8xf32> -> vector<2x8x8xf32>
    "tpu.trace_stop"() : () -> ()
    %324 = vector.shape_cast %323 : vector<2x8x8xf32> to vector<16x8xf32>
    %325 = arith.truncf %324 : vector<16x8xf32> to vector<16x8xbf16>
    %326 = vector.extract_strided_slice %213 {offsets = [3, 0, 0], sizes = [1, 8, 32], strides = [1, 1, 1]} : vector<4x8x32xbf16> to vector<1x8x32xbf16>
    %327 = vector.shape_cast %326 : vector<1x8x32xbf16> to vector<8x32xbf16>
    %cst_105 = arith.constant dense<0.000000e+00> : vector<16x32xf32>
    %328 = tpu.matmul %325, %327, %cst_105 {dimension_numbers = #tpu.dot_dimension_numbers<[1], [0], [0], [1], [0, 0, 1, 1], [], []>} : vector<16x8xbf16>, vector<8x32xbf16>, vector<16x32xf32> -> vector<16x32xf32>
    %329 = arith.addf %301, %328 : vector<16x32xf32>
    %c1_106 = arith.constant 1 : index
    %c0_107 = arith.constant 0 : index
    %c0_108 = arith.constant 0 : index
    %330 = vector.load %arg9[%c1_106, %c0_107, %c0_108] : memref<2x1x32xf32, #tpu.memory_space<vmem>>, vector<1x1x32xf32>
    %331 = vector.shape_cast %330 : vector<1x1x32xf32> to vector<1x32xf32>
    %c1_109 = arith.constant 1 : index
    %c0_110 = arith.constant 0 : index
    %c0_111 = arith.constant 0 : index
    %332 = vector.load %arg10[%c1_109, %c0_110, %c0_111] : memref<2x1x32xf32, #tpu.memory_space<vmem>>, vector<1x1x32xf32>
    %333 = vector.shape_cast %332 : vector<1x1x32xf32> to vector<1x32xf32>
    %334 = arith.addf %204, %329 : vector<16x32xf32>
    %cst_112 = arith.constant dense<0.000000e+00> : vector<16xf32>
    %335 = vector.multi_reduction <add>, %334, %cst_112 [1] : vector<16x32xf32> to vector<16xf32>
    %336 = vector.shape_cast %335 : vector<16xf32> to vector<16x1xf32>
    %cst_113 = arith.constant 3.200000e+01 : f32
    %337 = vector.broadcast %cst_113 : f32 to vector<16x1xf32>
    %338 = arith.divf %336, %337 : vector<16x1xf32>
    %339 = vector.broadcast %338 : vector<16x1xf32> to vector<16x32xf32>
    %340 = arith.subf %334, %339 : vector<16x32xf32>
    %341 = arith.mulf %340, %340 : vector<16x32xf32>
    %cst_114 = arith.constant dense<0.000000e+00> : vector<16xf32>
    %342 = vector.multi_reduction <add>, %341, %cst_114 [1] : vector<16x32xf32> to vector<16xf32>
    %343 = vector.shape_cast %342 : vector<16xf32> to vector<16x1xf32>
    %cst_115 = arith.constant 3.200000e+01 : f32
    %344 = vector.broadcast %cst_115 : f32 to vector<16x1xf32>
    %345 = arith.divf %343, %344 : vector<16x1xf32>
    %346 = vector.broadcast %338 : vector<16x1xf32> to vector<16x32xf32>
    %347 = arith.subf %334, %346 : vector<16x32xf32>
    %cst_116 = arith.constant 9.99999974E-6 : f32
    %348 = vector.broadcast %cst_116 : f32 to vector<16x1xf32>
    %349 = arith.addf %345, %348 : vector<16x1xf32>
    %350 = math.rsqrt %349 : vector<16x1xf32>
    %351 = vector.broadcast %350 : vector<16x1xf32> to vector<16x32xf32>
    %352 = arith.mulf %347, %351 : vector<16x32xf32>
    %353 = vector.broadcast %331 : vector<1x32xf32> to vector<16x32xf32>
    %354 = arith.mulf %352, %353 : vector<16x32xf32>
    %355 = vector.broadcast %333 : vector<1x32xf32> to vector<16x32xf32>
    %356 = arith.addf %354, %355 : vector<16x32xf32>
    %c1_117 = arith.constant 1 : index
    %c0_118 = arith.constant 0 : index
    %c0_119 = arith.constant 0 : index
    %357 = vector.load %arg5[%c1_117, %c0_118, %c0_119] : memref<2x32x64xbf16, #tpu.memory_space<vmem>>, vector<1x32x64xbf16>
    %358 = vector.shape_cast %357 : vector<1x32x64xbf16> to vector<32x64xbf16>
    %c1_120 = arith.constant 1 : index
    %c0_121 = arith.constant 0 : index
    %c0_122 = arith.constant 0 : index
    %359 = vector.load %arg6[%c1_120, %c0_121, %c0_122] : memref<2x1x64xf32, #tpu.memory_space<vmem>>, vector<1x1x64xf32>
    %360 = vector.shape_cast %359 : vector<1x1x64xf32> to vector<1x64xf32>
    %c1_123 = arith.constant 1 : index
    %c0_124 = arith.constant 0 : index
    %c0_125 = arith.constant 0 : index
    %361 = vector.load %arg7[%c1_123, %c0_124, %c0_125] : memref<2x64x32xbf16, #tpu.memory_space<vmem>>, vector<1x64x32xbf16>
    %362 = vector.shape_cast %361 : vector<1x64x32xbf16> to vector<64x32xbf16>
    %c1_126 = arith.constant 1 : index
    %c0_127 = arith.constant 0 : index
    %c0_128 = arith.constant 0 : index
    %363 = vector.load %arg8[%c1_126, %c0_127, %c0_128] : memref<2x1x32xf32, #tpu.memory_space<vmem>>, vector<1x1x32xf32>
    %364 = vector.shape_cast %363 : vector<1x1x32xf32> to vector<1x32xf32>
    %365 = arith.truncf %356 : vector<16x32xf32> to vector<16x32xbf16>
    %cst_129 = arith.constant dense<0.000000e+00> : vector<16x64xf32>
    %366 = tpu.matmul %365, %358, %cst_129 {dimension_numbers = #tpu.dot_dimension_numbers<[1], [0], [0], [1], [0, 0, 1, 1], [], []>} : vector<16x32xbf16>, vector<32x64xbf16>, vector<16x64xf32> -> vector<16x64xf32>
    %367 = vector.broadcast %360 : vector<1x64xf32> to vector<16x64xf32>
    %368 = arith.addf %366, %367 : vector<16x64xf32>
    %cst_130 = arith.constant 0.000000e+00 : f32
    %369 = vector.broadcast %cst_130 : f32 to vector<16x64xf32>
    %370 = arith.maximumf %368, %369 : vector<16x64xf32>
    %371 = arith.truncf %370 : vector<16x64xf32> to vector<16x64xbf16>
    %cst_131 = arith.constant dense<0.000000e+00> : vector<16x32xf32>
    %372 = tpu.matmul %371, %362, %cst_131 {dimension_numbers = #tpu.dot_dimension_numbers<[1], [0], [0], [1], [0, 0, 1, 1], [], []>} : vector<16x64xbf16>, vector<64x32xbf16>, vector<16x32xf32> -> vector<16x32xf32>
    %373 = vector.broadcast %364 : vector<1x32xf32> to vector<16x32xf32>
    %374 = arith.addf %372, %373 : vector<16x32xf32>
    %c1_132 = arith.constant 1 : index
    %c0_133 = arith.constant 0 : index
    %c0_134 = arith.constant 0 : index
    %375 = vector.load %arg11[%c1_132, %c0_133, %c0_134] : memref<2x1x32xf32, #tpu.memory_space<vmem>>, vector<1x1x32xf32>
    %376 = vector.shape_cast %375 : vector<1x1x32xf32> to vector<1x32xf32>
    %c1_135 = arith.constant 1 : index
    %c0_136 = arith.constant 0 : index
    %c0_137 = arith.constant 0 : index
    %377 = vector.load %arg12[%c1_135, %c0_136, %c0_137] : memref<2x1x32xf32, #tpu.memory_space<vmem>>, vector<1x1x32xf32>
    %378 = vector.shape_cast %377 : vector<1x1x32xf32> to vector<1x32xf32>
    %379 = arith.addf %356, %374 : vector<16x32xf32>
    %cst_138 = arith.constant dense<0.000000e+00> : vector<16xf32>
    %380 = vector.multi_reduction <add>, %379, %cst_138 [1] : vector<16x32xf32> to vector<16xf32>
    %381 = vector.shape_cast %380 : vector<16xf32> to vector<16x1xf32>
    %cst_139 = arith.constant 3.200000e+01 : f32
    %382 = vector.broadcast %cst_139 : f32 to vector<16x1xf32>
    %383 = arith.divf %381, %382 : vector<16x1xf32>
    %384 = vector.broadcast %383 : vector<16x1xf32> to vector<16x32xf32>
    %385 = arith.subf %379, %384 : vector<16x32xf32>
    %386 = arith.mulf %385, %385 : vector<16x32xf32>
    %cst_140 = arith.constant dense<0.000000e+00> : vector<16xf32>
    %387 = vector.multi_reduction <add>, %386, %cst_140 [1] : vector<16x32xf32> to vector<16xf32>
    %388 = vector.shape_cast %387 : vector<16xf32> to vector<16x1xf32>
    %cst_141 = arith.constant 3.200000e+01 : f32
    %389 = vector.broadcast %cst_141 : f32 to vector<16x1xf32>
    %390 = arith.divf %388, %389 : vector<16x1xf32>
    %391 = vector.broadcast %383 : vector<16x1xf32> to vector<16x32xf32>
    %392 = arith.subf %379, %391 : vector<16x32xf32>
    %cst_142 = arith.constant 9.99999974E-6 : f32
    %393 = vector.broadcast %cst_142 : f32 to vector<16x1xf32>
    %394 = arith.addf %390, %393 : vector<16x1xf32>
    %395 = math.rsqrt %394 : vector<16x1xf32>
    %396 = vector.broadcast %395 : vector<16x1xf32> to vector<16x32xf32>
    %397 = arith.mulf %392, %396 : vector<16x32xf32>
    %398 = vector.broadcast %376 : vector<1x32xf32> to vector<16x32xf32>
    %399 = arith.mulf %397, %398 : vector<16x32xf32>
    %400 = vector.broadcast %378 : vector<1x32xf32> to vector<16x32xf32>
    %401 = arith.addf %399, %400 : vector<16x32xf32>
    %c0_143 = arith.constant 0 : index
    %c0_144 = arith.constant 0 : index
    %402 = vector.load %arg13[%c0_143, %c0_144] : memref<16x32xf32, #tpu.memory_space<vmem>>, vector<16x32xf32>
    tpu.vector_store %arg13[%c0_143, %c0_144], %401 {strides = array<i32>} : memref<16x32xf32, #tpu.memory_space<vmem>>, vector<16x32xf32>,
    return
  }
  func.func @transform_0(%arg0: i32) -> (i32, i32) {
    %c0_i32 = arith.constant 0 : i32
    %c0_i32_0 = arith.constant 0 : i32
    %c0_i32_1 = arith.constant 0 : i32
    return %c0_i32, %c0_i32_0 : i32, i32
  }
  func.func @transform_1(%arg0: i32) -> (i32, i32) {
    %c0_i32 = arith.constant 0 : i32
    %c0_i32_0 = arith.constant 0 : i32
    %c0_i32_1 = arith.constant 0 : i32
    return %c0_i32, %c0_i32_0 : i32, i32
  }
  func.func @transform_2(%arg0: i32) -> (i32, i32, i32) {
    %c0_i32 = arith.constant 0 : i32
    %c0_i32_0 = arith.constant 0 : i32
    %c0_i32_1 = arith.constant 0 : i32
    %c0_i32_2 = arith.constant 0 : i32
    return %c0_i32, %c0_i32_0, %c0_i32_1 : i32, i32, i32
  }
  func.func @transform_3(%arg0: i32) -> (i32, i32, i32, i32) {
    %c0_i32 = arith.constant 0 : i32
    %c0_i32_0 = arith.constant 0 : i32
    %c0_i32_1 = arith.constant 0 : i32
    %c0_i32_2 = arith.constant 0 : i32
    %c0_i32_3 = arith.constant 0 : i32
    return %c0_i32, %c0_i32_0, %c0_i32_1, %c0_i32_2 : i32, i32, i32, i32
  }
  func.func @transform_4(%arg0: i32) -> (i32, i32, i32) {
    %c0_i32 = arith.constant 0 : i32
    %c0_i32_0 = arith.constant 0 : i32
    %c0_i32_1 = arith.constant 0 : i32
    %c0_i32_2 = arith.constant 0 : i32
    return %c0_i32, %c0_i32_0, %c0_i32_1 : i32, i32, i32
  }
  func.func @transform_5(%arg0: i32) -> (i32, i32, i32) {
    %c0_i32 = arith.constant 0 : i32
    %c0_i32_0 = arith.constant 0 : i32
    %c0_i32_1 = arith.constant 0 : i32
    %c0_i32_2 = arith.constant 0 : i32
    return %c0_i32, %c0_i32_0, %c0_i32_1 : i32, i32, i32
  }
  func.func @transform_6(%arg0: i32) -> (i32, i32, i32) {
    %c0_i32 = arith.constant 0 : i32
    %c0_i32_0 = arith.constant 0 : i32
    %c0_i32_1 = arith.constant 0 : i32
    %c0_i32_2 = arith.constant 0 : i32
    return %c0_i32, %c0_i32_0, %c0_i32_1 : i32, i32, i32
  }
  func.func @transform_7(%arg0: i32) -> (i32, i32, i32) {
    %c0_i32 = arith.constant 0 : i32
    %c0_i32_0 = arith.constant 0 : i32
    %c0_i32_1 = arith.constant 0 : i32
    %c0_i32_2 = arith.constant 0 : i32
    return %c0_i32, %c0_i32_0, %c0_i32_1 : i32, i32, i32
  }
  func.func @transform_8(%arg0: i32) -> (i32, i32, i32) {
    %c0_i32 = arith.constant 0 : i32
    %c0_i32_0 = arith.constant 0 : i32
    %c0_i32_1 = arith.constant 0 : i32
    %c0_i32_2 = arith.constant 0 : i32
    return %c0_i32, %c0_i32_0, %c0_i32_1 : i32, i32, i32
  }
  func.func @transform_9(%arg0: i32) -> (i32, i32, i32) {
    %c0_i32 = arith.constant 0 : i32
    %c0_i32_0 = arith.constant 0 : i32
    %c0_i32_1 = arith.constant 0 : i32
    %c0_i32_2 = arith.constant 0 : i32
    return %c0_i32, %c0_i32_0, %c0_i32_1 : i32, i32, i32
  }
  func.func @transform_10(%arg0: i32) -> (i32, i32, i32) {
    %c0_i32 = arith.constant 0 : i32
    %c0_i32_0 = arith.constant 0 : i32
    %c0_i32_1 = arith.constant 0 : i32
    %c0_i32_2 = arith.constant 0 : i32
    return %c0_i32, %c0_i32_0, %c0_i32_1 : i32, i32, i32
  }
  func.func @transform_11(%arg0: i32) -> (i32, i32, i32) {
    %c0_i32 = arith.constant 0 : i32
    %c0_i32_0 = arith.constant 0 : i32
    %c0_i32_1 = arith.constant 0 : i32
    %c0_i32_2 = arith.constant 0 : i32
    return %c0_i32, %c0_i32_0, %c0_i32_1 : i32, i32, i32
  }
  func.func @transform_12(%arg0: i32) -> (i32, i32) {
    %c0_i32 = arith.constant 0 : i32
    %c0_i32_0 = arith.constant 0 : i32
    %c0_i32_1 = arith.constant 0 : i32
    return %c0_i32, %c0_i32_0 : i32, i32
  }
}

module attributes {stable_mosaic.version = 11 : i64} {
  func.func @kernel(%arg0: i32, %arg1: memref<16x32xf32, #tpu.memory_space<vmem>>, %arg2: memref<16x32xf32, #tpu.memory_space<vmem>>, %arg3: memref<16x8xi32, #tpu.memory_space<vmem>>, %arg4: memref<16x8xi32, #tpu.memory_space<vmem>>, %arg5: memref<2x32x96xbf16, #tpu.memory_space<vmem>>, %arg6: memref<2x4x8x32xbf16, #tpu.memory_space<vmem>>, %arg7: memref<2x32x32xbf16, #tpu.memory_space<vmem>>, %arg8: memref<2x32x64xbf16, #tpu.memory_space<vmem>>, %arg9: memref<2x4x8x32xbf16, #tpu.memory_space<vmem>>, %arg10: memref<2x32x64xbf16, #tpu.memory_space<vmem>>, %arg11: memref<2x1x64xf32, #tpu.memory_space<vmem>>, %arg12: memref<2x64x32xbf16, #tpu.memory_space<vmem>>, %arg13: memref<2x1x32xf32, #tpu.memory_space<vmem>>, %arg14: memref<2x1x32xf32, #tpu.memory_space<vmem>>, %arg15: memref<2x1x32xf32, #tpu.memory_space<vmem>>, %arg16: memref<2x1x32xf32, #tpu.memory_space<vmem>>, %arg17: memref<2x1x32xf32, #tpu.memory_space<vmem>>, %arg18: memref<2x1x32xf32, #tpu.memory_space<vmem>>, %arg19: memref<2x1x32xf32, #tpu.memory_space<vmem>>, %arg20: memref<32x32xbf16, #tpu.memory_space<vmem>>, %arg21: memref<1x32xf32, #tpu.memory_space<vmem>>, %arg22: memref<16x32xf32, #tpu.memory_space<vmem>>) attributes {dimension_semantics = [#tpu.dimension_semantics<arbitrary>], iteration_bounds = array<i64: 1>, scalar_prefetch = 0 : i64, scratch_operands = 0 : i64, tpu.core_type = #tpu.core_type<tc>, window_params = [{pipeline_mode = #tpu.pipeline_mode<synchronous>, transform_indices = @transform_0, window_bounds = array<i64: 16, 32>}, {pipeline_mode = #tpu.pipeline_mode<synchronous>, transform_indices = @transform_1, window_bounds = array<i64: 16, 32>}, {pipeline_mode = #tpu.pipeline_mode<synchronous>, transform_indices = @transform_2, window_bounds = array<i64: 16, 8>}, {pipeline_mode = #tpu.pipeline_mode<synchronous>, transform_indices = @transform_3, window_bounds = array<i64: 16, 8>}, {pipeline_mode = #tpu.pipeline_mode<synchronous>, transform_indices = @transform_4, window_bounds = array<i64: 2, 32, 96>}, {pipeline_mode = #tpu.pipeline_mode<synchronous>, transform_indices = @transform_5, window_bounds = array<i64: 2, 4, 8, 32>}, {pipeline_mode = #tpu.pipeline_mode<synchronous>, transform_indices = @transform_6, window_bounds = array<i64: 2, 32, 32>}, {pipeline_mode = #tpu.pipeline_mode<synchronous>, transform_indices = @transform_7, window_bounds = array<i64: 2, 32, 64>}, {pipeline_mode = #tpu.pipeline_mode<synchronous>, transform_indices = @transform_8, window_bounds = array<i64: 2, 4, 8, 32>}, {pipeline_mode = #tpu.pipeline_mode<synchronous>, transform_indices = @transform_9, window_bounds = array<i64: 2, 32, 64>}, {pipeline_mode = #tpu.pipeline_mode<synchronous>, transform_indices = @transform_10, window_bounds = array<i64: 2, 1, 64>}, {pipeline_mode = #tpu.pipeline_mode<synchronous>, transform_indices = @transform_11, window_bounds = array<i64: 2, 64, 32>}, {pipeline_mode = #tpu.pipeline_mode<synchronous>, transform_indices = @transform_12, window_bounds = array<i64: 2, 1, 32>}, {pipeline_mode = #tpu.pipeline_mode<synchronous>, transform_indices = @transform_13, window_bounds = array<i64: 2, 1, 32>}, {pipeline_mode = #tpu.pipeline_mode<synchronous>, transform_indices = @transform_14, window_bounds = array<i64: 2, 1, 32>}, {pipeline_mode = #tpu.pipeline_mode<synchronous>, transform_indices = @transform_15, window_bounds = array<i64: 2, 1, 32>}, {pipeline_mode = #tpu.pipeline_mode<synchronous>, transform_indices = @transform_16, window_bounds = array<i64: 2, 1, 32>}, {pipeline_mode = #tpu.pipeline_mode<synchronous>, transform_indices = @transform_17, window_bounds = array<i64: 2, 1, 32>}, {pipeline_mode = #tpu.pipeline_mode<synchronous>, transform_indices = @transform_18, window_bounds = array<i64: 2, 1, 32>}, {pipeline_mode = #tpu.pipeline_mode<synchronous>, transform_indices = @transform_19, window_bounds = array<i64: 32, 32>}, {pipeline_mode = #tpu.pipeline_mode<synchronous>, transform_indices = @transform_20, window_bounds = array<i64: 1, 32>}, {pipeline_mode = #tpu.pipeline_mode<synchronous>, transform_indices = @transform_21, window_bounds = array<i64: 16, 32>}]} {
    %c0 = arith.constant 0 : index
    %c0_0 = arith.constant 0 : index
    %0 = vector.load %arg1[%c0, %c0_0] : memref<16x32xf32, #tpu.memory_space<vmem>>, vector<16x32xf32>
    %c0_1 = arith.constant 0 : index
    %c0_2 = arith.constant 0 : index
    %1 = vector.load %arg2[%c0_1, %c0_2] : memref<16x32xf32, #tpu.memory_space<vmem>>, vector<16x32xf32>
    %2 = arith.truncf %1 : vector<16x32xf32> to vector<16x32xbf16>
    %3 = tpu.iota {dimensions = array<i32: 1>} : vector<16x8xi32>
    %c0_3 = arith.constant 0 : index
    %c0_4 = arith.constant 0 : index
    %4 = vector.load %arg3[%c0_3, %c0_4] : memref<16x8xi32, #tpu.memory_space<vmem>>, vector<16x8xi32>
    %5 = arith.cmpi slt, %3, %4 : vector<16x8xi32>
    %cst = arith.constant 0.000000e+00 : f32
    %cst_5 = arith.constant -1.000000e+06 : f32
    %6 = vector.broadcast %cst : f32 to vector<16x8xf32>
    %7 = vector.broadcast %cst_5 : f32 to vector<16x8xf32>
    %8 = arith.select %5, %6, %7 : vector<16x8xi1>, vector<16x8xf32>
    %9 = vector.shape_cast %8 : vector<16x8xf32> to vector<2x8x8xf32>
    %10 = tpu.iota {dimensions = array<i32: 1>} : vector<16x8xi32>
    %c0_6 = arith.constant 0 : index
    %c0_7 = arith.constant 0 : index
    %11 = vector.load %arg4[%c0_6, %c0_7] : memref<16x8xi32, #tpu.memory_space<vmem>>, vector<16x8xi32>
    %12 = arith.cmpi slt, %10, %11 : vector<16x8xi32>
    %cst_8 = arith.constant 0.000000e+00 : f32
    %cst_9 = arith.constant -1.000000e+06 : f32
    %13 = vector.broadcast %cst_8 : f32 to vector<16x8xf32>
    %14 = vector.broadcast %cst_9 : f32 to vector<16x8xf32>
    %15 = arith.select %12, %13, %14 : vector<16x8xi1>, vector<16x8xf32>
    %16 = vector.shape_cast %15 : vector<16x8xf32> to vector<2x8x8xf32>
    %17 = arith.truncf %0 : vector<16x32xf32> to vector<16x32xbf16>
    %c0_10 = arith.constant 0 : index
    %c0_11 = arith.constant 0 : index
    %c0_12 = arith.constant 0 : index
    %18 = vector.load %arg5[%c0_10, %c0_11, %c0_12] : memref<2x32x96xbf16, #tpu.memory_space<vmem>>, vector<1x32x96xbf16>
    %19 = vector.shape_cast %18 : vector<1x32x96xbf16> to vector<32x96xbf16>
    %cst_13 = arith.constant dense<0.000000e+00> : vector<16x96xf32>
    %20 = tpu.matmul %17, %19, %cst_13 {dimension_numbers = #tpu.dot_dimension_numbers<[1], [0], [0], [1], [0, 0, 1, 1], [], []>} : vector<16x32xbf16>, vector<32x96xbf16>, vector<16x96xf32> -> vector<16x96xf32>
    %21 = vector.extract_strided_slice %20 {offsets = [0, 0], sizes = [16, 32], strides = [1, 1]} : vector<16x96xf32> to vector<16x32xf32>
    %22 = vector.extract_strided_slice %20 {offsets = [0, 32], sizes = [16, 32], strides = [1, 1]} : vector<16x96xf32> to vector<16x32xf32>
    %23 = vector.extract_strided_slice %20 {offsets = [0, 64], sizes = [16, 32], strides = [1, 1]} : vector<16x96xf32> to vector<16x32xf32>
    %c0_14 = arith.constant 0 : index
    %c0_15 = arith.constant 0 : index
    %c0_16 = arith.constant 0 : index
    %c0_17 = arith.constant 0 : index
    %24 = vector.load %arg6[%c0_14, %c0_15, %c0_16, %c0_17] : memref<2x4x8x32xbf16, #tpu.memory_space<vmem>>, vector<1x4x8x32xbf16>
    %25 = vector.shape_cast %24 : vector<1x4x8x32xbf16> to vector<4x8x32xbf16>
    %26 = vector.shape_cast %21 : vector<16x32xf32> to vector<2x8x32xf32>
    %27 = vector.shape_cast %22 : vector<16x32xf32> to vector<2x8x32xf32>
    %28 = vector.shape_cast %23 : vector<16x32xf32> to vector<2x8x32xf32>
    %cst_18 = arith.constant 0.000000e+00 : f32
    %29 = vector.broadcast %cst_18 : f32 to vector<16x32xf32>
    %30 = vector.extract_strided_slice %26 {offsets = [0, 0, 0], sizes = [2, 8, 8], strides = [1, 1, 1]} : vector<2x8x32xf32> to vector<2x8x8xf32>
    %31 = arith.truncf %30 : vector<2x8x8xf32> to vector<2x8x8xbf16>
    %32 = vector.extract_strided_slice %27 {offsets = [0, 0, 0], sizes = [2, 8, 8], strides = [1, 1, 1]} : vector<2x8x32xf32> to vector<2x8x8xf32>
    %33 = arith.truncf %32 : vector<2x8x8xf32> to vector<2x8x8xbf16>
    "tpu.trace_start"() <{level = 10 : i32, message = "bqd,bkd->bqk"}> : () -> ()
    %cst_19 = arith.constant dense<0.000000e+00> : vector<2x8x8xf32>
    %34 = tpu.matmul %31, %33, %cst_19 {dimension_numbers = #tpu.dot_dimension_numbers<[2], [2], [1], [1], [0, 0, 0, 1, 1, 1], [0], [0]>} : vector<2x8x8xbf16>, vector<2x8x8xbf16>, vector<2x8x8xf32> -> vector<2x8x8xf32>
    "tpu.trace_stop"() : () -> ()
    %cst_20 = arith.constant 0.353553385 : f32
    %35 = vector.broadcast %cst_20 : f32 to vector<2x8x8xf32>
    %36 = arith.mulf %34, %35 : vector<2x8x8xf32>
    %37 = arith.addf %36, %9 : vector<2x8x8xf32>
    %cst_21 = arith.constant dense<0xFF800000> : vector<2x8xf32>
    %38 = vector.multi_reduction <maximumf>, %37, %cst_21 [2] : vector<2x8x8xf32> to vector<2x8xf32>
    %39 = vector.shape_cast %38 : vector<2x8xf32> to vector<2x8x1xf32>
    %40 = vector.broadcast %39 : vector<2x8x1xf32> to vector<2x8x8xf32>
    %41 = arith.subf %37, %40 : vector<2x8x8xf32>
    %42 = math.exp %41 : vector<2x8x8xf32>
    %cst_22 = arith.constant dense<0.000000e+00> : vector<2x8xf32>
    %43 = vector.multi_reduction <add>, %42, %cst_22 [2] : vector<2x8x8xf32> to vector<2x8xf32>
    %44 = vector.shape_cast %43 : vector<2x8xf32> to vector<2x8x1xf32>
    %45 = tpu.reciprocal %44 {approx = true} : vector<2x8x1xf32> -> vector<2x8x1xf32>
    %46 = vector.broadcast %45 : vector<2x8x1xf32> to vector<2x8x8xf32>
    %47 = arith.mulf %42, %46 : vector<2x8x8xf32>
    %48 = arith.truncf %47 : vector<2x8x8xf32> to vector<2x8x8xbf16>
    %49 = vector.extract_strided_slice %28 {offsets = [0, 0, 0], sizes = [2, 8, 8], strides = [1, 1, 1]} : vector<2x8x32xf32> to vector<2x8x8xf32>
    %50 = arith.truncf %49 : vector<2x8x8xf32> to vector<2x8x8xbf16>
    "tpu.trace_start"() <{level = 10 : i32, message = "bqk,bkd->bqd"}> : () -> ()
    %cst_23 = arith.constant dense<0.000000e+00> : vector<2x8x8xf32>
    %51 = tpu.matmul %48, %50, %cst_23 {dimension_numbers = #tpu.dot_dimension_numbers<[2], [1], [1], [2], [0, 0, 0, 1, 1, 2], [0], [0]>} : vector<2x8x8xbf16>, vector<2x8x8xbf16>, vector<2x8x8xf32> -> vector<2x8x8xf32>
    "tpu.trace_stop"() : () -> ()
    %52 = vector.shape_cast %51 : vector<2x8x8xf32> to vector<16x8xf32>
    %53 = arith.truncf %52 : vector<16x8xf32> to vector<16x8xbf16>
    %54 = vector.extract_strided_slice %25 {offsets = [0, 0, 0], sizes = [1, 8, 32], strides = [1, 1, 1]} : vector<4x8x32xbf16> to vector<1x8x32xbf16>
    %55 = vector.shape_cast %54 : vector<1x8x32xbf16> to vector<8x32xbf16>
    %cst_24 = arith.constant dense<0.000000e+00> : vector<16x32xf32>
    %56 = tpu.matmul %53, %55, %cst_24 {dimension_numbers = #tpu.dot_dimension_numbers<[1], [0], [0], [1], [0, 0, 1, 1], [], []>} : vector<16x8xbf16>, vector<8x32xbf16>, vector<16x32xf32> -> vector<16x32xf32>
    %57 = arith.addf %29, %56 : vector<16x32xf32>
    %58 = vector.extract_strided_slice %26 {offsets = [0, 0, 8], sizes = [2, 8, 8], strides = [1, 1, 1]} : vector<2x8x32xf32> to vector<2x8x8xf32>
    %59 = arith.truncf %58 : vector<2x8x8xf32> to vector<2x8x8xbf16>
    %60 = vector.extract_strided_slice %27 {offsets = [0, 0, 8], sizes = [2, 8, 8], strides = [1, 1, 1]} : vector<2x8x32xf32> to vector<2x8x8xf32>
    %61 = arith.truncf %60 : vector<2x8x8xf32> to vector<2x8x8xbf16>
    "tpu.trace_start"() <{level = 10 : i32, message = "bqd,bkd->bqk"}> : () -> ()
    %cst_25 = arith.constant dense<0.000000e+00> : vector<2x8x8xf32>
    %62 = tpu.matmul %59, %61, %cst_25 {dimension_numbers = #tpu.dot_dimension_numbers<[2], [2], [1], [1], [0, 0, 0, 1, 1, 1], [0], [0]>} : vector<2x8x8xbf16>, vector<2x8x8xbf16>, vector<2x8x8xf32> -> vector<2x8x8xf32>
    "tpu.trace_stop"() : () -> ()
    %cst_26 = arith.constant 0.353553385 : f32
    %63 = vector.broadcast %cst_26 : f32 to vector<2x8x8xf32>
    %64 = arith.mulf %62, %63 : vector<2x8x8xf32>
    %65 = arith.addf %64, %9 : vector<2x8x8xf32>
    %cst_27 = arith.constant dense<0xFF800000> : vector<2x8xf32>
    %66 = vector.multi_reduction <maximumf>, %65, %cst_27 [2] : vector<2x8x8xf32> to vector<2x8xf32>
    %67 = vector.shape_cast %66 : vector<2x8xf32> to vector<2x8x1xf32>
    %68 = vector.broadcast %67 : vector<2x8x1xf32> to vector<2x8x8xf32>
    %69 = arith.subf %65, %68 : vector<2x8x8xf32>
    %70 = math.exp %69 : vector<2x8x8xf32>
    %cst_28 = arith.constant dense<0.000000e+00> : vector<2x8xf32>
    %71 = vector.multi_reduction <add>, %70, %cst_28 [2] : vector<2x8x8xf32> to vector<2x8xf32>
    %72 = vector.shape_cast %71 : vector<2x8xf32> to vector<2x8x1xf32>
    %73 = tpu.reciprocal %72 {approx = true} : vector<2x8x1xf32> -> vector<2x8x1xf32>
    %74 = vector.broadcast %73 : vector<2x8x1xf32> to vector<2x8x8xf32>
    %75 = arith.mulf %70, %74 : vector<2x8x8xf32>
    %76 = arith.truncf %75 : vector<2x8x8xf32> to vector<2x8x8xbf16>
    %77 = vector.extract_strided_slice %28 {offsets = [0, 0, 8], sizes = [2, 8, 8], strides = [1, 1, 1]} : vector<2x8x32xf32> to vector<2x8x8xf32>
    %78 = arith.truncf %77 : vector<2x8x8xf32> to vector<2x8x8xbf16>
    "tpu.trace_start"() <{level = 10 : i32, message = "bqk,bkd->bqd"}> : () -> ()
    %cst_29 = arith.constant dense<0.000000e+00> : vector<2x8x8xf32>
    %79 = tpu.matmul %76, %78, %cst_29 {dimension_numbers = #tpu.dot_dimension_numbers<[2], [1], [1], [2], [0, 0, 0, 1, 1, 2], [0], [0]>} : vector<2x8x8xbf16>, vector<2x8x8xbf16>, vector<2x8x8xf32> -> vector<2x8x8xf32>
    "tpu.trace_stop"() : () -> ()
    %80 = vector.shape_cast %79 : vector<2x8x8xf32> to vector<16x8xf32>
    %81 = arith.truncf %80 : vector<16x8xf32> to vector<16x8xbf16>
    %82 = vector.extract_strided_slice %25 {offsets = [1, 0, 0], sizes = [1, 8, 32], strides = [1, 1, 1]} : vector<4x8x32xbf16> to vector<1x8x32xbf16>
    %83 = vector.shape_cast %82 : vector<1x8x32xbf16> to vector<8x32xbf16>
    %cst_30 = arith.constant dense<0.000000e+00> : vector<16x32xf32>
    %84 = tpu.matmul %81, %83, %cst_30 {dimension_numbers = #tpu.dot_dimension_numbers<[1], [0], [0], [1], [0, 0, 1, 1], [], []>} : vector<16x8xbf16>, vector<8x32xbf16>, vector<16x32xf32> -> vector<16x32xf32>
    %85 = arith.addf %57, %84 : vector<16x32xf32>
    %86 = vector.extract_strided_slice %26 {offsets = [0, 0, 16], sizes = [2, 8, 8], strides = [1, 1, 1]} : vector<2x8x32xf32> to vector<2x8x8xf32>
    %87 = arith.truncf %86 : vector<2x8x8xf32> to vector<2x8x8xbf16>
    %88 = vector.extract_strided_slice %27 {offsets = [0, 0, 16], sizes = [2, 8, 8], strides = [1, 1, 1]} : vector<2x8x32xf32> to vector<2x8x8xf32>
    %89 = arith.truncf %88 : vector<2x8x8xf32> to vector<2x8x8xbf16>
    "tpu.trace_start"() <{level = 10 : i32, message = "bqd,bkd->bqk"}> : () -> ()
    %cst_31 = arith.constant dense<0.000000e+00> : vector<2x8x8xf32>
    %90 = tpu.matmul %87, %89, %cst_31 {dimension_numbers = #tpu.dot_dimension_numbers<[2], [2], [1], [1], [0, 0, 0, 1, 1, 1], [0], [0]>} : vector<2x8x8xbf16>, vector<2x8x8xbf16>, vector<2x8x8xf32> -> vector<2x8x8xf32>
    "tpu.trace_stop"() : () -> ()
    %cst_32 = arith.constant 0.353553385 : f32
    %91 = vector.broadcast %cst_32 : f32 to vector<2x8x8xf32>
    %92 = arith.mulf %90, %91 : vector<2x8x8xf32>
    %93 = arith.addf %92, %9 : vector<2x8x8xf32>
    %cst_33 = arith.constant dense<0xFF800000> : vector<2x8xf32>
    %94 = vector.multi_reduction <maximumf>, %93, %cst_33 [2] : vector<2x8x8xf32> to vector<2x8xf32>
    %95 = vector.shape_cast %94 : vector<2x8xf32> to vector<2x8x1xf32>
    %96 = vector.broadcast %95 : vector<2x8x1xf32> to vector<2x8x8xf32>
    %97 = arith.subf %93, %96 : vector<2x8x8xf32>
    %98 = math.exp %97 : vector<2x8x8xf32>
    %cst_34 = arith.constant dense<0.000000e+00> : vector<2x8xf32>
    %99 = vector.multi_reduction <add>, %98, %cst_34 [2] : vector<2x8x8xf32> to vector<2x8xf32>
    %100 = vector.shape_cast %99 : vector<2x8xf32> to vector<2x8x1xf32>
    %101 = tpu.reciprocal %100 {approx = true} : vector<2x8x1xf32> -> vector<2x8x1xf32>
    %102 = vector.broadcast %101 : vector<2x8x1xf32> to vector<2x8x8xf32>
    %103 = arith.mulf %98, %102 : vector<2x8x8xf32>
    %104 = arith.truncf %103 : vector<2x8x8xf32> to vector<2x8x8xbf16>
    %105 = vector.extract_strided_slice %28 {offsets = [0, 0, 16], sizes = [2, 8, 8], strides = [1, 1, 1]} : vector<2x8x32xf32> to vector<2x8x8xf32>
    %106 = arith.truncf %105 : vector<2x8x8xf32> to vector<2x8x8xbf16>
    "tpu.trace_start"() <{level = 10 : i32, message = "bqk,bkd->bqd"}> : () -> ()
    %cst_35 = arith.constant dense<0.000000e+00> : vector<2x8x8xf32>
    %107 = tpu.matmul %104, %106, %cst_35 {dimension_numbers = #tpu.dot_dimension_numbers<[2], [1], [1], [2], [0, 0, 0, 1, 1, 2], [0], [0]>} : vector<2x8x8xbf16>, vector<2x8x8xbf16>, vector<2x8x8xf32> -> vector<2x8x8xf32>
    "tpu.trace_stop"() : () -> ()
    %108 = vector.shape_cast %107 : vector<2x8x8xf32> to vector<16x8xf32>
    %109 = arith.truncf %108 : vector<16x8xf32> to vector<16x8xbf16>
    %110 = vector.extract_strided_slice %25 {offsets = [2, 0, 0], sizes = [1, 8, 32], strides = [1, 1, 1]} : vector<4x8x32xbf16> to vector<1x8x32xbf16>
    %111 = vector.shape_cast %110 : vector<1x8x32xbf16> to vector<8x32xbf16>
    %cst_36 = arith.constant dense<0.000000e+00> : vector<16x32xf32>
    %112 = tpu.matmul %109, %111, %cst_36 {dimension_numbers = #tpu.dot_dimension_numbers<[1], [0], [0], [1], [0, 0, 1, 1], [], []>} : vector<16x8xbf16>, vector<8x32xbf16>, vector<16x32xf32> -> vector<16x32xf32>
    %113 = arith.addf %85, %112 : vector<16x32xf32>
    %114 = vector.extract_strided_slice %26 {offsets = [0, 0, 24], sizes = [2, 8, 8], strides = [1, 1, 1]} : vector<2x8x32xf32> to vector<2x8x8xf32>
    %115 = arith.truncf %114 : vector<2x8x8xf32> to vector<2x8x8xbf16>
    %116 = vector.extract_strided_slice %27 {offsets = [0, 0, 24], sizes = [2, 8, 8], strides = [1, 1, 1]} : vector<2x8x32xf32> to vector<2x8x8xf32>
    %117 = arith.truncf %116 : vector<2x8x8xf32> to vector<2x8x8xbf16>
    "tpu.trace_start"() <{level = 10 : i32, message = "bqd,bkd->bqk"}> : () -> ()
    %cst_37 = arith.constant dense<0.000000e+00> : vector<2x8x8xf32>
    %118 = tpu.matmul %115, %117, %cst_37 {dimension_numbers = #tpu.dot_dimension_numbers<[2], [2], [1], [1], [0, 0, 0, 1, 1, 1], [0], [0]>} : vector<2x8x8xbf16>, vector<2x8x8xbf16>, vector<2x8x8xf32> -> vector<2x8x8xf32>
    "tpu.trace_stop"() : () -> ()
    %cst_38 = arith.constant 0.353553385 : f32
    %119 = vector.broadcast %cst_38 : f32 to vector<2x8x8xf32>
    %120 = arith.mulf %118, %119 : vector<2x8x8xf32>
    %121 = arith.addf %120, %9 : vector<2x8x8xf32>
    %cst_39 = arith.constant dense<0xFF800000> : vector<2x8xf32>
    %122 = vector.multi_reduction <maximumf>, %121, %cst_39 [2] : vector<2x8x8xf32> to vector<2x8xf32>
    %123 = vector.shape_cast %122 : vector<2x8xf32> to vector<2x8x1xf32>
    %124 = vector.broadcast %123 : vector<2x8x1xf32> to vector<2x8x8xf32>
    %125 = arith.subf %121, %124 : vector<2x8x8xf32>
    %126 = math.exp %125 : vector<2x8x8xf32>
    %cst_40 = arith.constant dense<0.000000e+00> : vector<2x8xf32>
    %127 = vector.multi_reduction <add>, %126, %cst_40 [2] : vector<2x8x8xf32> to vector<2x8xf32>
    %128 = vector.shape_cast %127 : vector<2x8xf32> to vector<2x8x1xf32>
    %129 = tpu.reciprocal %128 {approx = true} : vector<2x8x1xf32> -> vector<2x8x1xf32>
    %130 = vector.broadcast %129 : vector<2x8x1xf32> to vector<2x8x8xf32>
    %131 = arith.mulf %126, %130 : vector<2x8x8xf32>
    %132 = arith.truncf %131 : vector<2x8x8xf32> to vector<2x8x8xbf16>
    %133 = vector.extract_strided_slice %28 {offsets = [0, 0, 24], sizes = [2, 8, 8], strides = [1, 1, 1]} : vector<2x8x32xf32> to vector<2x8x8xf32>
    %134 = arith.truncf %133 : vector<2x8x8xf32> to vector<2x8x8xbf16>
    "tpu.trace_start"() <{level = 10 : i32, message = "bqk,bkd->bqd"}> : () -> ()
    %cst_41 = arith.constant dense<0.000000e+00> : vector<2x8x8xf32>
    %135 = tpu.matmul %132, %134, %cst_41 {dimension_numbers = #tpu.dot_dimension_numbers<[2], [1], [1], [2], [0, 0, 0, 1, 1, 2], [0], [0]>} : vector<2x8x8xbf16>, vector<2x8x8xbf16>, vector<2x8x8xf32> -> vector<2x8x8xf32>
    "tpu.trace_stop"() : () -> ()
    %136 = vector.shape_cast %135 : vector<2x8x8xf32> to vector<16x8xf32>
    %137 = arith.truncf %136 : vector<16x8xf32> to vector<16x8xbf16>
    %138 = vector.extract_strided_slice %25 {offsets = [3, 0, 0], sizes = [1, 8, 32], strides = [1, 1, 1]} : vector<4x8x32xbf16> to vector<1x8x32xbf16>
    %139 = vector.shape_cast %138 : vector<1x8x32xbf16> to vector<8x32xbf16>
    %cst_42 = arith.constant dense<0.000000e+00> : vector<16x32xf32>
    %140 = tpu.matmul %137, %139, %cst_42 {dimension_numbers = #tpu.dot_dimension_numbers<[1], [0], [0], [1], [0, 0, 1, 1], [], []>} : vector<16x8xbf16>, vector<8x32xbf16>, vector<16x32xf32> -> vector<16x32xf32>
    %141 = arith.addf %113, %140 : vector<16x32xf32>
    %c0_43 = arith.constant 0 : index
    %c0_44 = arith.constant 0 : index
    %c0_45 = arith.constant 0 : index
    %142 = vector.load %arg14[%c0_43, %c0_44, %c0_45] : memref<2x1x32xf32, #tpu.memory_space<vmem>>, vector<1x1x32xf32>
    %143 = vector.shape_cast %142 : vector<1x1x32xf32> to vector<1x32xf32>
    %c0_46 = arith.constant 0 : index
    %c0_47 = arith.constant 0 : index
    %c0_48 = arith.constant 0 : index
    %144 = vector.load %arg15[%c0_46, %c0_47, %c0_48] : memref<2x1x32xf32, #tpu.memory_space<vmem>>, vector<1x1x32xf32>
    %145 = vector.shape_cast %144 : vector<1x1x32xf32> to vector<1x32xf32>
    %146 = arith.addf %0, %141 : vector<16x32xf32>
    %cst_49 = arith.constant dense<0.000000e+00> : vector<16xf32>
    %147 = vector.multi_reduction <add>, %146, %cst_49 [1] : vector<16x32xf32> to vector<16xf32>
    %148 = vector.shape_cast %147 : vector<16xf32> to vector<16x1xf32>
    %cst_50 = arith.constant 3.200000e+01 : f32
    %149 = vector.broadcast %cst_50 : f32 to vector<16x1xf32>
    %150 = arith.divf %148, %149 : vector<16x1xf32>
    %151 = vector.broadcast %150 : vector<16x1xf32> to vector<16x32xf32>
    %152 = arith.subf %146, %151 : vector<16x32xf32>
    %153 = arith.mulf %152, %152 : vector<16x32xf32>
    %cst_51 = arith.constant dense<0.000000e+00> : vector<16xf32>
    %154 = vector.multi_reduction <add>, %153, %cst_51 [1] : vector<16x32xf32> to vector<16xf32>
    %155 = vector.shape_cast %154 : vector<16xf32> to vector<16x1xf32>
    %cst_52 = arith.constant 3.200000e+01 : f32
    %156 = vector.broadcast %cst_52 : f32 to vector<16x1xf32>
    %157 = arith.divf %155, %156 : vector<16x1xf32>
    %158 = vector.broadcast %150 : vector<16x1xf32> to vector<16x32xf32>
    %159 = arith.subf %146, %158 : vector<16x32xf32>
    %cst_53 = arith.constant 9.99999974E-6 : f32
    %160 = vector.broadcast %cst_53 : f32 to vector<16x1xf32>
    %161 = arith.addf %157, %160 : vector<16x1xf32>
    %162 = math.rsqrt %161 : vector<16x1xf32>
    %163 = vector.broadcast %162 : vector<16x1xf32> to vector<16x32xf32>
    %164 = arith.mulf %159, %163 : vector<16x32xf32>
    %165 = vector.broadcast %143 : vector<1x32xf32> to vector<16x32xf32>
    %166 = arith.mulf %164, %165 : vector<16x32xf32>
    %167 = vector.broadcast %145 : vector<1x32xf32> to vector<16x32xf32>
    %168 = arith.addf %166, %167 : vector<16x32xf32>
    %169 = arith.truncf %168 : vector<16x32xf32> to vector<16x32xbf16>
    %c0_54 = arith.constant 0 : index
    %c0_55 = arith.constant 0 : index
    %c0_56 = arith.constant 0 : index
    %170 = vector.load %arg7[%c0_54, %c0_55, %c0_56] : memref<2x32x32xbf16, #tpu.memory_space<vmem>>, vector<1x32x32xbf16>
    %171 = vector.shape_cast %170 : vector<1x32x32xbf16> to vector<32x32xbf16>
    %cst_57 = arith.constant dense<0.000000e+00> : vector<16x32xf32>
    %172 = tpu.matmul %169, %171, %cst_57 {dimension_numbers = #tpu.dot_dimension_numbers<[1], [0], [0], [1], [0, 0, 1, 1], [], []>} : vector<16x32xbf16>, vector<32x32xbf16>, vector<16x32xf32> -> vector<16x32xf32>
    %c0_58 = arith.constant 0 : index
    %c0_59 = arith.constant 0 : index
    %c0_60 = arith.constant 0 : index
    %173 = vector.load %arg8[%c0_58, %c0_59, %c0_60] : memref<2x32x64xbf16, #tpu.memory_space<vmem>>, vector<1x32x64xbf16>
    %174 = vector.shape_cast %173 : vector<1x32x64xbf16> to vector<32x64xbf16>
    %cst_61 = arith.constant dense<0.000000e+00> : vector<16x64xf32>
    %175 = tpu.matmul %2, %174, %cst_61 {dimension_numbers = #tpu.dot_dimension_numbers<[1], [0], [0], [1], [0, 0, 1, 1], [], []>} : vector<16x32xbf16>, vector<32x64xbf16>, vector<16x64xf32> -> vector<16x64xf32>
    %176 = vector.extract_strided_slice %175 {offsets = [0, 0], sizes = [16, 32], strides = [1, 1]} : vector<16x64xf32> to vector<16x32xf32>
    %177 = vector.extract_strided_slice %175 {offsets = [0, 32], sizes = [16, 32], strides = [1, 1]} : vector<16x64xf32> to vector<16x32xf32>
    %c0_62 = arith.constant 0 : index
    %c0_63 = arith.constant 0 : index
    %c0_64 = arith.constant 0 : index
    %c0_65 = arith.constant 0 : index
    %178 = vector.load %arg9[%c0_62, %c0_63, %c0_64, %c0_65] : memref<2x4x8x32xbf16, #tpu.memory_space<vmem>>, vector<1x4x8x32xbf16>
    %179 = vector.shape_cast %178 : vector<1x4x8x32xbf16> to vector<4x8x32xbf16>
    %180 = vector.shape_cast %172 : vector<16x32xf32> to vector<2x8x32xf32>
    %181 = vector.shape_cast %176 : vector<16x32xf32> to vector<2x8x32xf32>
    %182 = vector.shape_cast %177 : vector<16x32xf32> to vector<2x8x32xf32>
    %cst_66 = arith.constant 0.000000e+00 : f32
    %183 = vector.broadcast %cst_66 : f32 to vector<16x32xf32>
    %184 = vector.extract_strided_slice %180 {offsets = [0, 0, 0], sizes = [2, 8, 8], strides = [1, 1, 1]} : vector<2x8x32xf32> to vector<2x8x8xf32>
    %185 = arith.truncf %184 : vector<2x8x8xf32> to vector<2x8x8xbf16>
    %186 = vector.extract_strided_slice %181 {offsets = [0, 0, 0], sizes = [2, 8, 8], strides = [1, 1, 1]} : vector<2x8x32xf32> to vector<2x8x8xf32>
    %187 = arith.truncf %186 : vector<2x8x8xf32> to vector<2x8x8xbf16>
    "tpu.trace_start"() <{level = 10 : i32, message = "bqd,bkd->bqk"}> : () -> ()
    %cst_67 = arith.constant dense<0.000000e+00> : vector<2x8x8xf32>
    %188 = tpu.matmul %185, %187, %cst_67 {dimension_numbers = #tpu.dot_dimension_numbers<[2], [2], [1], [1], [0, 0, 0, 1, 1, 1], [0], [0]>} : vector<2x8x8xbf16>, vector<2x8x8xbf16>, vector<2x8x8xf32> -> vector<2x8x8xf32>
    "tpu.trace_stop"() : () -> ()
    %cst_68 = arith.constant 0.353553385 : f32
    %189 = vector.broadcast %cst_68 : f32 to vector<2x8x8xf32>
    %190 = arith.mulf %188, %189 : vector<2x8x8xf32>
    %191 = arith.addf %190, %16 : vector<2x8x8xf32>
    %cst_69 = arith.constant dense<0xFF800000> : vector<2x8xf32>
    %192 = vector.multi_reduction <maximumf>, %191, %cst_69 [2] : vector<2x8x8xf32> to vector<2x8xf32>
    %193 = vector.shape_cast %192 : vector<2x8xf32> to vector<2x8x1xf32>
    %194 = vector.broadcast %193 : vector<2x8x1xf32> to vector<2x8x8xf32>
    %195 = arith.subf %191, %194 : vector<2x8x8xf32>
    %196 = math.exp %195 : vector<2x8x8xf32>
    %cst_70 = arith.constant dense<0.000000e+00> : vector<2x8xf32>
    %197 = vector.multi_reduction <add>, %196, %cst_70 [2] : vector<2x8x8xf32> to vector<2x8xf32>
    %198 = vector.shape_cast %197 : vector<2x8xf32> to vector<2x8x1xf32>
    %199 = tpu.reciprocal %198 {approx = true} : vector<2x8x1xf32> -> vector<2x8x1xf32>
    %200 = vector.broadcast %199 : vector<2x8x1xf32> to vector<2x8x8xf32>
    %201 = arith.mulf %196, %200 : vector<2x8x8xf32>
    %202 = arith.truncf %201 : vector<2x8x8xf32> to vector<2x8x8xbf16>
    %203 = vector.extract_strided_slice %182 {offsets = [0, 0, 0], sizes = [2, 8, 8], strides = [1, 1, 1]} : vector<2x8x32xf32> to vector<2x8x8xf32>
    %204 = arith.truncf %203 : vector<2x8x8xf32> to vector<2x8x8xbf16>
    "tpu.trace_start"() <{level = 10 : i32, message = "bqk,bkd->bqd"}> : () -> ()
    %cst_71 = arith.constant dense<0.000000e+00> : vector<2x8x8xf32>
    %205 = tpu.matmul %202, %204, %cst_71 {dimension_numbers = #tpu.dot_dimension_numbers<[2], [1], [1], [2], [0, 0, 0, 1, 1, 2], [0], [0]>} : vector<2x8x8xbf16>, vector<2x8x8xbf16>, vector<2x8x8xf32> -> vector<2x8x8xf32>
    "tpu.trace_stop"() : () -> ()
    %206 = vector.shape_cast %205 : vector<2x8x8xf32> to vector<16x8xf32>
    %207 = arith.truncf %206 : vector<16x8xf32> to vector<16x8xbf16>
    %208 = vector.extract_strided_slice %179 {offsets = [0, 0, 0], sizes = [1, 8, 32], strides = [1, 1, 1]} : vector<4x8x32xbf16> to vector<1x8x32xbf16>
    %209 = vector.shape_cast %208 : vector<1x8x32xbf16> to vector<8x32xbf16>
    %cst_72 = arith.constant dense<0.000000e+00> : vector<16x32xf32>
    %210 = tpu.matmul %207, %209, %cst_72 {dimension_numbers = #tpu.dot_dimension_numbers<[1], [0], [0], [1], [0, 0, 1, 1], [], []>} : vector<16x8xbf16>, vector<8x32xbf16>, vector<16x32xf32> -> vector<16x32xf32>
    %211 = arith.addf %183, %210 : vector<16x32xf32>
    %212 = vector.extract_strided_slice %180 {offsets = [0, 0, 8], sizes = [2, 8, 8], strides = [1, 1, 1]} : vector<2x8x32xf32> to vector<2x8x8xf32>
    %213 = arith.truncf %212 : vector<2x8x8xf32> to vector<2x8x8xbf16>
    %214 = vector.extract_strided_slice %181 {offsets = [0, 0, 8], sizes = [2, 8, 8], strides = [1, 1, 1]} : vector<2x8x32xf32> to vector<2x8x8xf32>
    %215 = arith.truncf %214 : vector<2x8x8xf32> to vector<2x8x8xbf16>
    "tpu.trace_start"() <{level = 10 : i32, message = "bqd,bkd->bqk"}> : () -> ()
    %cst_73 = arith.constant dense<0.000000e+00> : vector<2x8x8xf32>
    %216 = tpu.matmul %213, %215, %cst_73 {dimension_numbers = #tpu.dot_dimension_numbers<[2], [2], [1], [1], [0, 0, 0, 1, 1, 1], [0], [0]>} : vector<2x8x8xbf16>, vector<2x8x8xbf16>, vector<2x8x8xf32> -> vector<2x8x8xf32>
    "tpu.trace_stop"() : () -> ()
    %cst_74 = arith.constant 0.353553385 : f32
    %217 = vector.broadcast %cst_74 : f32 to vector<2x8x8xf32>
    %218 = arith.mulf %216, %217 : vector<2x8x8xf32>
    %219 = arith.addf %218, %16 : vector<2x8x8xf32>
    %cst_75 = arith.constant dense<0xFF800000> : vector<2x8xf32>
    %220 = vector.multi_reduction <maximumf>, %219, %cst_75 [2] : vector<2x8x8xf32> to vector<2x8xf32>
    %221 = vector.shape_cast %220 : vector<2x8xf32> to vector<2x8x1xf32>
    %222 = vector.broadcast %221 : vector<2x8x1xf32> to vector<2x8x8xf32>
    %223 = arith.subf %219, %222 : vector<2x8x8xf32>
    %224 = math.exp %223 : vector<2x8x8xf32>
    %cst_76 = arith.constant dense<0.000000e+00> : vector<2x8xf32>
    %225 = vector.multi_reduction <add>, %224, %cst_76 [2] : vector<2x8x8xf32> to vector<2x8xf32>
    %226 = vector.shape_cast %225 : vector<2x8xf32> to vector<2x8x1xf32>
    %227 = tpu.reciprocal %226 {approx = true} : vector<2x8x1xf32> -> vector<2x8x1xf32>
    %228 = vector.broadcast %227 : vector<2x8x1xf32> to vector<2x8x8xf32>
    %229 = arith.mulf %224, %228 : vector<2x8x8xf32>
    %230 = arith.truncf %229 : vector<2x8x8xf32> to vector<2x8x8xbf16>
    %231 = vector.extract_strided_slice %182 {offsets = [0, 0, 8], sizes = [2, 8, 8], strides = [1, 1, 1]} : vector<2x8x32xf32> to vector<2x8x8xf32>
    %232 = arith.truncf %231 : vector<2x8x8xf32> to vector<2x8x8xbf16>
    "tpu.trace_start"() <{level = 10 : i32, message = "bqk,bkd->bqd"}> : () -> ()
    %cst_77 = arith.constant dense<0.000000e+00> : vector<2x8x8xf32>
    %233 = tpu.matmul %230, %232, %cst_77 {dimension_numbers = #tpu.dot_dimension_numbers<[2], [1], [1], [2], [0, 0, 0, 1, 1, 2], [0], [0]>} : vector<2x8x8xbf16>, vector<2x8x8xbf16>, vector<2x8x8xf32> -> vector<2x8x8xf32>
    "tpu.trace_stop"() : () -> ()
    %234 = vector.shape_cast %233 : vector<2x8x8xf32> to vector<16x8xf32>
    %235 = arith.truncf %234 : vector<16x8xf32> to vector<16x8xbf16>
    %236 = vector.extract_strided_slice %179 {offsets = [1, 0, 0], sizes = [1, 8, 32], strides = [1, 1, 1]} : vector<4x8x32xbf16> to vector<1x8x32xbf16>
    %237 = vector.shape_cast %236 : vector<1x8x32xbf16> to vector<8x32xbf16>
    %cst_78 = arith.constant dense<0.000000e+00> : vector<16x32xf32>
    %238 = tpu.matmul %235, %237, %cst_78 {dimension_numbers = #tpu.dot_dimension_numbers<[1], [0], [0], [1], [0, 0, 1, 1], [], []>} : vector<16x8xbf16>, vector<8x32xbf16>, vector<16x32xf32> -> vector<16x32xf32>
    %239 = arith.addf %211, %238 : vector<16x32xf32>
    %240 = vector.extract_strided_slice %180 {offsets = [0, 0, 16], sizes = [2, 8, 8], strides = [1, 1, 1]} : vector<2x8x32xf32> to vector<2x8x8xf32>
    %241 = arith.truncf %240 : vector<2x8x8xf32> to vector<2x8x8xbf16>
    %242 = vector.extract_strided_slice %181 {offsets = [0, 0, 16], sizes = [2, 8, 8], strides = [1, 1, 1]} : vector<2x8x32xf32> to vector<2x8x8xf32>
    %243 = arith.truncf %242 : vector<2x8x8xf32> to vector<2x8x8xbf16>
    "tpu.trace_start"() <{level = 10 : i32, message = "bqd,bkd->bqk"}> : () -> ()
    %cst_79 = arith.constant dense<0.000000e+00> : vector<2x8x8xf32>
    %244 = tpu.matmul %241, %243, %cst_79 {dimension_numbers = #tpu.dot_dimension_numbers<[2], [2], [1], [1], [0, 0, 0, 1, 1, 1], [0], [0]>} : vector<2x8x8xbf16>, vector<2x8x8xbf16>, vector<2x8x8xf32> -> vector<2x8x8xf32>
    "tpu.trace_stop"() : () -> ()
    %cst_80 = arith.constant 0.353553385 : f32
    %245 = vector.broadcast %cst_80 : f32 to vector<2x8x8xf32>
    %246 = arith.mulf %244, %245 : vector<2x8x8xf32>
    %247 = arith.addf %246, %16 : vector<2x8x8xf32>
    %cst_81 = arith.constant dense<0xFF800000> : vector<2x8xf32>
    %248 = vector.multi_reduction <maximumf>, %247, %cst_81 [2] : vector<2x8x8xf32> to vector<2x8xf32>
    %249 = vector.shape_cast %248 : vector<2x8xf32> to vector<2x8x1xf32>
    %250 = vector.broadcast %249 : vector<2x8x1xf32> to vector<2x8x8xf32>
    %251 = arith.subf %247, %250 : vector<2x8x8xf32>
    %252 = math.exp %251 : vector<2x8x8xf32>
    %cst_82 = arith.constant dense<0.000000e+00> : vector<2x8xf32>
    %253 = vector.multi_reduction <add>, %252, %cst_82 [2] : vector<2x8x8xf32> to vector<2x8xf32>
    %254 = vector.shape_cast %253 : vector<2x8xf32> to vector<2x8x1xf32>
    %255 = tpu.reciprocal %254 {approx = true} : vector<2x8x1xf32> -> vector<2x8x1xf32>
    %256 = vector.broadcast %255 : vector<2x8x1xf32> to vector<2x8x8xf32>
    %257 = arith.mulf %252, %256 : vector<2x8x8xf32>
    %258 = arith.truncf %257 : vector<2x8x8xf32> to vector<2x8x8xbf16>
    %259 = vector.extract_strided_slice %182 {offsets = [0, 0, 16], sizes = [2, 8, 8], strides = [1, 1, 1]} : vector<2x8x32xf32> to vector<2x8x8xf32>
    %260 = arith.truncf %259 : vector<2x8x8xf32> to vector<2x8x8xbf16>
    "tpu.trace_start"() <{level = 10 : i32, message = "bqk,bkd->bqd"}> : () -> ()
    %cst_83 = arith.constant dense<0.000000e+00> : vector<2x8x8xf32>
    %261 = tpu.matmul %258, %260, %cst_83 {dimension_numbers = #tpu.dot_dimension_numbers<[2], [1], [1], [2], [0, 0, 0, 1, 1, 2], [0], [0]>} : vector<2x8x8xbf16>, vector<2x8x8xbf16>, vector<2x8x8xf32> -> vector<2x8x8xf32>
    "tpu.trace_stop"() : () -> ()
    %262 = vector.shape_cast %261 : vector<2x8x8xf32> to vector<16x8xf32>
    %263 = arith.truncf %262 : vector<16x8xf32> to vector<16x8xbf16>
    %264 = vector.extract_strided_slice %179 {offsets = [2, 0, 0], sizes = [1, 8, 32], strides = [1, 1, 1]} : vector<4x8x32xbf16> to vector<1x8x32xbf16>
    %265 = vector.shape_cast %264 : vector<1x8x32xbf16> to vector<8x32xbf16>
    %cst_84 = arith.constant dense<0.000000e+00> : vector<16x32xf32>
    %266 = tpu.matmul %263, %265, %cst_84 {dimension_numbers = #tpu.dot_dimension_numbers<[1], [0], [0], [1], [0, 0, 1, 1], [], []>} : vector<16x8xbf16>, vector<8x32xbf16>, vector<16x32xf32> -> vector<16x32xf32>
    %267 = arith.addf %239, %266 : vector<16x32xf32>
    %268 = vector.extract_strided_slice %180 {offsets = [0, 0, 24], sizes = [2, 8, 8], strides = [1, 1, 1]} : vector<2x8x32xf32> to vector<2x8x8xf32>
    %269 = arith.truncf %268 : vector<2x8x8xf32> to vector<2x8x8xbf16>
    %270 = vector.extract_strided_slice %181 {offsets = [0, 0, 24], sizes = [2, 8, 8], strides = [1, 1, 1]} : vector<2x8x32xf32> to vector<2x8x8xf32>
    %271 = arith.truncf %270 : vector<2x8x8xf32> to vector<2x8x8xbf16>
    "tpu.trace_start"() <{level = 10 : i32, message = "bqd,bkd->bqk"}> : () -> ()
    %cst_85 = arith.constant dense<0.000000e+00> : vector<2x8x8xf32>
    %272 = tpu.matmul %269, %271, %cst_85 {dimension_numbers = #tpu.dot_dimension_numbers<[2], [2], [1], [1], [0, 0, 0, 1, 1, 1], [0], [0]>} : vector<2x8x8xbf16>, vector<2x8x8xbf16>, vector<2x8x8xf32> -> vector<2x8x8xf32>
    "tpu.trace_stop"() : () -> ()
    %cst_86 = arith.constant 0.353553385 : f32
    %273 = vector.broadcast %cst_86 : f32 to vector<2x8x8xf32>
    %274 = arith.mulf %272, %273 : vector<2x8x8xf32>
    %275 = arith.addf %274, %16 : vector<2x8x8xf32>
    %cst_87 = arith.constant dense<0xFF800000> : vector<2x8xf32>
    %276 = vector.multi_reduction <maximumf>, %275, %cst_87 [2] : vector<2x8x8xf32> to vector<2x8xf32>
    %277 = vector.shape_cast %276 : vector<2x8xf32> to vector<2x8x1xf32>
    %278 = vector.broadcast %277 : vector<2x8x1xf32> to vector<2x8x8xf32>
    %279 = arith.subf %275, %278 : vector<2x8x8xf32>
    %280 = math.exp %279 : vector<2x8x8xf32>
    %cst_88 = arith.constant dense<0.000000e+00> : vector<2x8xf32>
    %281 = vector.multi_reduction <add>, %280, %cst_88 [2] : vector<2x8x8xf32> to vector<2x8xf32>
    %282 = vector.shape_cast %281 : vector<2x8xf32> to vector<2x8x1xf32>
    %283 = tpu.reciprocal %282 {approx = true} : vector<2x8x1xf32> -> vector<2x8x1xf32>
    %284 = vector.broadcast %283 : vector<2x8x1xf32> to vector<2x8x8xf32>
    %285 = arith.mulf %280, %284 : vector<2x8x8xf32>
    %286 = arith.truncf %285 : vector<2x8x8xf32> to vector<2x8x8xbf16>
    %287 = vector.extract_strided_slice %182 {offsets = [0, 0, 24], sizes = [2, 8, 8], strides = [1, 1, 1]} : vector<2x8x32xf32> to vector<2x8x8xf32>
    %288 = arith.truncf %287 : vector<2x8x8xf32> to vector<2x8x8xbf16>
    "tpu.trace_start"() <{level = 10 : i32, message = "bqk,bkd->bqd"}> : () -> ()
    %cst_89 = arith.constant dense<0.000000e+00> : vector<2x8x8xf32>
    %289 = tpu.matmul %286, %288, %cst_89 {dimension_numbers = #tpu.dot_dimension_numbers<[2], [1], [1], [2], [0, 0, 0, 1, 1, 2], [0], [0]>} : vector<2x8x8xbf16>, vector<2x8x8xbf16>, vector<2x8x8xf32> -> vector<2x8x8xf32>
    "tpu.trace_stop"() : () -> ()
    %290 = vector.shape_cast %289 : vector<2x8x8xf32> to vector<16x8xf32>
    %291 = arith.truncf %290 : vector<16x8xf32> to vector<16x8xbf16>
    %292 = vector.extract_strided_slice %179 {offsets = [3, 0, 0], sizes = [1, 8, 32], strides = [1, 1, 1]} : vector<4x8x32xbf16> to vector<1x8x32xbf16>
    %293 = vector.shape_cast %292 : vector<1x8x32xbf16> to vector<8x32xbf16>
    %cst_90 = arith.constant dense<0.000000e+00> : vector<16x32xf32>
    %294 = tpu.matmul %291, %293, %cst_90 {dimension_numbers = #tpu.dot_dimension_numbers<[1], [0], [0], [1], [0, 0, 1, 1], [], []>} : vector<16x8xbf16>, vector<8x32xbf16>, vector<16x32xf32> -> vector<16x32xf32>
    %295 = arith.addf %267, %294 : vector<16x32xf32>
    %c0_91 = arith.constant 0 : index
    %c0_92 = arith.constant 0 : index
    %c0_93 = arith.constant 0 : index
    %296 = vector.load %arg16[%c0_91, %c0_92, %c0_93] : memref<2x1x32xf32, #tpu.memory_space<vmem>>, vector<1x1x32xf32>
    %297 = vector.shape_cast %296 : vector<1x1x32xf32> to vector<1x32xf32>
    %c0_94 = arith.constant 0 : index
    %c0_95 = arith.constant 0 : index
    %c0_96 = arith.constant 0 : index
    %298 = vector.load %arg17[%c0_94, %c0_95, %c0_96] : memref<2x1x32xf32, #tpu.memory_space<vmem>>, vector<1x1x32xf32>
    %299 = vector.shape_cast %298 : vector<1x1x32xf32> to vector<1x32xf32>
    %300 = arith.addf %168, %295 : vector<16x32xf32>
    %cst_97 = arith.constant dense<0.000000e+00> : vector<16xf32>
    %301 = vector.multi_reduction <add>, %300, %cst_97 [1] : vector<16x32xf32> to vector<16xf32>
    %302 = vector.shape_cast %301 : vector<16xf32> to vector<16x1xf32>
    %cst_98 = arith.constant 3.200000e+01 : f32
    %303 = vector.broadcast %cst_98 : f32 to vector<16x1xf32>
    %304 = arith.divf %302, %303 : vector<16x1xf32>
    %305 = vector.broadcast %304 : vector<16x1xf32> to vector<16x32xf32>
    %306 = arith.subf %300, %305 : vector<16x32xf32>
    %307 = arith.mulf %306, %306 : vector<16x32xf32>
    %cst_99 = arith.constant dense<0.000000e+00> : vector<16xf32>
    %308 = vector.multi_reduction <add>, %307, %cst_99 [1] : vector<16x32xf32> to vector<16xf32>
    %309 = vector.shape_cast %308 : vector<16xf32> to vector<16x1xf32>
    %cst_100 = arith.constant 3.200000e+01 : f32
    %310 = vector.broadcast %cst_100 : f32 to vector<16x1xf32>
    %311 = arith.divf %309, %310 : vector<16x1xf32>
    %312 = vector.broadcast %304 : vector<16x1xf32> to vector<16x32xf32>
    %313 = arith.subf %300, %312 : vector<16x32xf32>
    %cst_101 = arith.constant 9.99999974E-6 : f32
    %314 = vector.broadcast %cst_101 : f32 to vector<16x1xf32>
    %315 = arith.addf %311, %314 : vector<16x1xf32>
    %316 = math.rsqrt %315 : vector<16x1xf32>
    %317 = vector.broadcast %316 : vector<16x1xf32> to vector<16x32xf32>
    %318 = arith.mulf %313, %317 : vector<16x32xf32>
    %319 = vector.broadcast %297 : vector<1x32xf32> to vector<16x32xf32>
    %320 = arith.mulf %318, %319 : vector<16x32xf32>
    %321 = vector.broadcast %299 : vector<1x32xf32> to vector<16x32xf32>
    %322 = arith.addf %320, %321 : vector<16x32xf32>
    %c0_102 = arith.constant 0 : index
    %c0_103 = arith.constant 0 : index
    %c0_104 = arith.constant 0 : index
    %323 = vector.load %arg10[%c0_102, %c0_103, %c0_104] : memref<2x32x64xbf16, #tpu.memory_space<vmem>>, vector<1x32x64xbf16>
    %324 = vector.shape_cast %323 : vector<1x32x64xbf16> to vector<32x64xbf16>
    %c0_105 = arith.constant 0 : index
    %c0_106 = arith.constant 0 : index
    %c0_107 = arith.constant 0 : index
    %325 = vector.load %arg11[%c0_105, %c0_106, %c0_107] : memref<2x1x64xf32, #tpu.memory_space<vmem>>, vector<1x1x64xf32>
    %326 = vector.shape_cast %325 : vector<1x1x64xf32> to vector<1x64xf32>
    %c0_108 = arith.constant 0 : index
    %c0_109 = arith.constant 0 : index
    %c0_110 = arith.constant 0 : index
    %327 = vector.load %arg12[%c0_108, %c0_109, %c0_110] : memref<2x64x32xbf16, #tpu.memory_space<vmem>>, vector<1x64x32xbf16>
    %328 = vector.shape_cast %327 : vector<1x64x32xbf16> to vector<64x32xbf16>
    %c0_111 = arith.constant 0 : index
    %c0_112 = arith.constant 0 : index
    %c0_113 = arith.constant 0 : index
    %329 = vector.load %arg13[%c0_111, %c0_112, %c0_113] : memref<2x1x32xf32, #tpu.memory_space<vmem>>, vector<1x1x32xf32>
    %330 = vector.shape_cast %329 : vector<1x1x32xf32> to vector<1x32xf32>
    %331 = arith.truncf %322 : vector<16x32xf32> to vector<16x32xbf16>
    %cst_114 = arith.constant dense<0.000000e+00> : vector<16x64xf32>
    %332 = tpu.matmul %331, %324, %cst_114 {dimension_numbers = #tpu.dot_dimension_numbers<[1], [0], [0], [1], [0, 0, 1, 1], [], []>} : vector<16x32xbf16>, vector<32x64xbf16>, vector<16x64xf32> -> vector<16x64xf32>
    %333 = vector.broadcast %326 : vector<1x64xf32> to vector<16x64xf32>
    %334 = arith.addf %332, %333 : vector<16x64xf32>
    %cst_115 = arith.constant 0.000000e+00 : f32
    %335 = vector.broadcast %cst_115 : f32 to vector<16x64xf32>
    %336 = arith.maximumf %334, %335 : vector<16x64xf32>
    %337 = arith.truncf %336 : vector<16x64xf32> to vector<16x64xbf16>
    %cst_116 = arith.constant dense<0.000000e+00> : vector<16x32xf32>
    %338 = tpu.matmul %337, %328, %cst_116 {dimension_numbers = #tpu.dot_dimension_numbers<[1], [0], [0], [1], [0, 0, 1, 1], [], []>} : vector<16x64xbf16>, vector<64x32xbf16>, vector<16x32xf32> -> vector<16x32xf32>
    %339 = vector.broadcast %330 : vector<1x32xf32> to vector<16x32xf32>
    %340 = arith.addf %338, %339 : vector<16x32xf32>
    %c0_117 = arith.constant 0 : index
    %c0_118 = arith.constant 0 : index
    %c0_119 = arith.constant 0 : index
    %341 = vector.load %arg18[%c0_117, %c0_118, %c0_119] : memref<2x1x32xf32, #tpu.memory_space<vmem>>, vector<1x1x32xf32>
    %342 = vector.shape_cast %341 : vector<1x1x32xf32> to vector<1x32xf32>
    %c0_120 = arith.constant 0 : index
    %c0_121 = arith.constant 0 : index
    %c0_122 = arith.constant 0 : index
    %343 = vector.load %arg19[%c0_120, %c0_121, %c0_122] : memref<2x1x32xf32, #tpu.memory_space<vmem>>, vector<1x1x32xf32>
    %344 = vector.shape_cast %343 : vector<1x1x32xf32> to vector<1x32xf32>
    %345 = arith.addf %322, %340 : vector<16x32xf32>
    %cst_123 = arith.constant dense<0.000000e+00> : vector<16xf32>
    %346 = vector.multi_reduction <add>, %345, %cst_123 [1] : vector<16x32xf32> to vector<16xf32>
    %347 = vector.shape_cast %346 : vector<16xf32> to vector<16x1xf32>
    %cst_124 = arith.constant 3.200000e+01 : f32
    %348 = vector.broadcast %cst_124 : f32 to vector<16x1xf32>
    %349 = arith.divf %347, %348 : vector<16x1xf32>
    %350 = vector.broadcast %349 : vector<16x1xf32> to vector<16x32xf32>
    %351 = arith.subf %345, %350 : vector<16x32xf32>
    %352 = arith.mulf %351, %351 : vector<16x32xf32>
    %cst_125 = arith.constant dense<0.000000e+00> : vector<16xf32>
    %353 = vector.multi_reduction <add>, %352, %cst_125 [1] : vector<16x32xf32> to vector<16xf32>
    %354 = vector.shape_cast %353 : vector<16xf32> to vector<16x1xf32>
    %cst_126 = arith.constant 3.200000e+01 : f32
    %355 = vector.broadcast %cst_126 : f32 to vector<16x1xf32>
    %356 = arith.divf %354, %355 : vector<16x1xf32>
    %357 = vector.broadcast %349 : vector<16x1xf32> to vector<16x32xf32>
    %358 = arith.subf %345, %357 : vector<16x32xf32>
    %cst_127 = arith.constant 9.99999974E-6 : f32
    %359 = vector.broadcast %cst_127 : f32 to vector<16x1xf32>
    %360 = arith.addf %356, %359 : vector<16x1xf32>
    %361 = math.rsqrt %360 : vector<16x1xf32>
    %362 = vector.broadcast %361 : vector<16x1xf32> to vector<16x32xf32>
    %363 = arith.mulf %358, %362 : vector<16x32xf32>
    %364 = vector.broadcast %342 : vector<1x32xf32> to vector<16x32xf32>
    %365 = arith.mulf %363, %364 : vector<16x32xf32>
    %366 = vector.broadcast %344 : vector<1x32xf32> to vector<16x32xf32>
    %367 = arith.addf %365, %366 : vector<16x32xf32>
    %368 = arith.truncf %367 : vector<16x32xf32> to vector<16x32xbf16>
    %c1 = arith.constant 1 : index
    %c0_128 = arith.constant 0 : index
    %c0_129 = arith.constant 0 : index
    %369 = vector.load %arg5[%c1, %c0_128, %c0_129] : memref<2x32x96xbf16, #tpu.memory_space<vmem>>, vector<1x32x96xbf16>
    %370 = vector.shape_cast %369 : vector<1x32x96xbf16> to vector<32x96xbf16>
    %cst_130 = arith.constant dense<0.000000e+00> : vector<16x96xf32>
    %371 = tpu.matmul %368, %370, %cst_130 {dimension_numbers = #tpu.dot_dimension_numbers<[1], [0], [0], [1], [0, 0, 1, 1], [], []>} : vector<16x32xbf16>, vector<32x96xbf16>, vector<16x96xf32> -> vector<16x96xf32>
    %372 = vector.extract_strided_slice %371 {offsets = [0, 0], sizes = [16, 32], strides = [1, 1]} : vector<16x96xf32> to vector<16x32xf32>
    %373 = vector.extract_strided_slice %371 {offsets = [0, 32], sizes = [16, 32], strides = [1, 1]} : vector<16x96xf32> to vector<16x32xf32>
    %374 = vector.extract_strided_slice %371 {offsets = [0, 64], sizes = [16, 32], strides = [1, 1]} : vector<16x96xf32> to vector<16x32xf32>
    %c1_131 = arith.constant 1 : index
    %c0_132 = arith.constant 0 : index
    %c0_133 = arith.constant 0 : index
    %c0_134 = arith.constant 0 : index
    %375 = vector.load %arg6[%c1_131, %c0_132, %c0_133, %c0_134] : memref<2x4x8x32xbf16, #tpu.memory_space<vmem>>, vector<1x4x8x32xbf16>
    %376 = vector.shape_cast %375 : vector<1x4x8x32xbf16> to vector<4x8x32xbf16>
    %377 = vector.shape_cast %372 : vector<16x32xf32> to vector<2x8x32xf32>
    %378 = vector.shape_cast %373 : vector<16x32xf32> to vector<2x8x32xf32>
    %379 = vector.shape_cast %374 : vector<16x32xf32> to vector<2x8x32xf32>
    %cst_135 = arith.constant 0.000000e+00 : f32
    %380 = vector.broadcast %cst_135 : f32 to vector<16x32xf32>
    %381 = vector.extract_strided_slice %377 {offsets = [0, 0, 0], sizes = [2, 8, 8], strides = [1, 1, 1]} : vector<2x8x32xf32> to vector<2x8x8xf32>
    %382 = arith.truncf %381 : vector<2x8x8xf32> to vector<2x8x8xbf16>
    %383 = vector.extract_strided_slice %378 {offsets = [0, 0, 0], sizes = [2, 8, 8], strides = [1, 1, 1]} : vector<2x8x32xf32> to vector<2x8x8xf32>
    %384 = arith.truncf %383 : vector<2x8x8xf32> to vector<2x8x8xbf16>
    "tpu.trace_start"() <{level = 10 : i32, message = "bqd,bkd->bqk"}> : () -> ()
    %cst_136 = arith.constant dense<0.000000e+00> : vector<2x8x8xf32>
    %385 = tpu.matmul %382, %384, %cst_136 {dimension_numbers = #tpu.dot_dimension_numbers<[2], [2], [1], [1], [0, 0, 0, 1, 1, 1], [0], [0]>} : vector<2x8x8xbf16>, vector<2x8x8xbf16>, vector<2x8x8xf32> -> vector<2x8x8xf32>
    "tpu.trace_stop"() : () -> ()
    %cst_137 = arith.constant 0.353553385 : f32
    %386 = vector.broadcast %cst_137 : f32 to vector<2x8x8xf32>
    %387 = arith.mulf %385, %386 : vector<2x8x8xf32>
    %388 = arith.addf %387, %9 : vector<2x8x8xf32>
    %cst_138 = arith.constant dense<0xFF800000> : vector<2x8xf32>
    %389 = vector.multi_reduction <maximumf>, %388, %cst_138 [2] : vector<2x8x8xf32> to vector<2x8xf32>
    %390 = vector.shape_cast %389 : vector<2x8xf32> to vector<2x8x1xf32>
    %391 = vector.broadcast %390 : vector<2x8x1xf32> to vector<2x8x8xf32>
    %392 = arith.subf %388, %391 : vector<2x8x8xf32>
    %393 = math.exp %392 : vector<2x8x8xf32>
    %cst_139 = arith.constant dense<0.000000e+00> : vector<2x8xf32>
    %394 = vector.multi_reduction <add>, %393, %cst_139 [2] : vector<2x8x8xf32> to vector<2x8xf32>
    %395 = vector.shape_cast %394 : vector<2x8xf32> to vector<2x8x1xf32>
    %396 = tpu.reciprocal %395 {approx = true} : vector<2x8x1xf32> -> vector<2x8x1xf32>
    %397 = vector.broadcast %396 : vector<2x8x1xf32> to vector<2x8x8xf32>
    %398 = arith.mulf %393, %397 : vector<2x8x8xf32>
    %399 = arith.truncf %398 : vector<2x8x8xf32> to vector<2x8x8xbf16>
    %400 = vector.extract_strided_slice %379 {offsets = [0, 0, 0], sizes = [2, 8, 8], strides = [1, 1, 1]} : vector<2x8x32xf32> to vector<2x8x8xf32>
    %401 = arith.truncf %400 : vector<2x8x8xf32> to vector<2x8x8xbf16>
    "tpu.trace_start"() <{level = 10 : i32, message = "bqk,bkd->bqd"}> : () -> ()
    %cst_140 = arith.constant dense<0.000000e+00> : vector<2x8x8xf32>
    %402 = tpu.matmul %399, %401, %cst_140 {dimension_numbers = #tpu.dot_dimension_numbers<[2], [1], [1], [2], [0, 0, 0, 1, 1, 2], [0], [0]>} : vector<2x8x8xbf16>, vector<2x8x8xbf16>, vector<2x8x8xf32> -> vector<2x8x8xf32>
    "tpu.trace_stop"() : () -> ()
    %403 = vector.shape_cast %402 : vector<2x8x8xf32> to vector<16x8xf32>
    %404 = arith.truncf %403 : vector<16x8xf32> to vector<16x8xbf16>
    %405 = vector.extract_strided_slice %376 {offsets = [0, 0, 0], sizes = [1, 8, 32], strides = [1, 1, 1]} : vector<4x8x32xbf16> to vector<1x8x32xbf16>
    %406 = vector.shape_cast %405 : vector<1x8x32xbf16> to vector<8x32xbf16>
    %cst_141 = arith.constant dense<0.000000e+00> : vector<16x32xf32>
    %407 = tpu.matmul %404, %406, %cst_141 {dimension_numbers = #tpu.dot_dimension_numbers<[1], [0], [0], [1], [0, 0, 1, 1], [], []>} : vector<16x8xbf16>, vector<8x32xbf16>, vector<16x32xf32> -> vector<16x32xf32>
    %408 = arith.addf %380, %407 : vector<16x32xf32>
    %409 = vector.extract_strided_slice %377 {offsets = [0, 0, 8], sizes = [2, 8, 8], strides = [1, 1, 1]} : vector<2x8x32xf32> to vector<2x8x8xf32>
    %410 = arith.truncf %409 : vector<2x8x8xf32> to vector<2x8x8xbf16>
    %411 = vector.extract_strided_slice %378 {offsets = [0, 0, 8], sizes = [2, 8, 8], strides = [1, 1, 1]} : vector<2x8x32xf32> to vector<2x8x8xf32>
    %412 = arith.truncf %411 : vector<2x8x8xf32> to vector<2x8x8xbf16>
    "tpu.trace_start"() <{level = 10 : i32, message = "bqd,bkd->bqk"}> : () -> ()
    %cst_142 = arith.constant dense<0.000000e+00> : vector<2x8x8xf32>
    %413 = tpu.matmul %410, %412, %cst_142 {dimension_numbers = #tpu.dot_dimension_numbers<[2], [2], [1], [1], [0, 0, 0, 1, 1, 1], [0], [0]>} : vector<2x8x8xbf16>, vector<2x8x8xbf16>, vector<2x8x8xf32> -> vector<2x8x8xf32>
    "tpu.trace_stop"() : () -> ()
    %cst_143 = arith.constant 0.353553385 : f32
    %414 = vector.broadcast %cst_143 : f32 to vector<2x8x8xf32>
    %415 = arith.mulf %413, %414 : vector<2x8x8xf32>
    %416 = arith.addf %415, %9 : vector<2x8x8xf32>
    %cst_144 = arith.constant dense<0xFF800000> : vector<2x8xf32>
    %417 = vector.multi_reduction <maximumf>, %416, %cst_144 [2] : vector<2x8x8xf32> to vector<2x8xf32>
    %418 = vector.shape_cast %417 : vector<2x8xf32> to vector<2x8x1xf32>
    %419 = vector.broadcast %418 : vector<2x8x1xf32> to vector<2x8x8xf32>
    %420 = arith.subf %416, %419 : vector<2x8x8xf32>
    %421 = math.exp %420 : vector<2x8x8xf32>
    %cst_145 = arith.constant dense<0.000000e+00> : vector<2x8xf32>
    %422 = vector.multi_reduction <add>, %421, %cst_145 [2] : vector<2x8x8xf32> to vector<2x8xf32>
    %423 = vector.shape_cast %422 : vector<2x8xf32> to vector<2x8x1xf32>
    %424 = tpu.reciprocal %423 {approx = true} : vector<2x8x1xf32> -> vector<2x8x1xf32>
    %425 = vector.broadcast %424 : vector<2x8x1xf32> to vector<2x8x8xf32>
    %426 = arith.mulf %421, %425 : vector<2x8x8xf32>
    %427 = arith.truncf %426 : vector<2x8x8xf32> to vector<2x8x8xbf16>
    %428 = vector.extract_strided_slice %379 {offsets = [0, 0, 8], sizes = [2, 8, 8], strides = [1, 1, 1]} : vector<2x8x32xf32> to vector<2x8x8xf32>
    %429 = arith.truncf %428 : vector<2x8x8xf32> to vector<2x8x8xbf16>
    "tpu.trace_start"() <{level = 10 : i32, message = "bqk,bkd->bqd"}> : () -> ()
    %cst_146 = arith.constant dense<0.000000e+00> : vector<2x8x8xf32>
    %430 = tpu.matmul %427, %429, %cst_146 {dimension_numbers = #tpu.dot_dimension_numbers<[2], [1], [1], [2], [0, 0, 0, 1, 1, 2], [0], [0]>} : vector<2x8x8xbf16>, vector<2x8x8xbf16>, vector<2x8x8xf32> -> vector<2x8x8xf32>
    "tpu.trace_stop"() : () -> ()
    %431 = vector.shape_cast %430 : vector<2x8x8xf32> to vector<16x8xf32>
    %432 = arith.truncf %431 : vector<16x8xf32> to vector<16x8xbf16>
    %433 = vector.extract_strided_slice %376 {offsets = [1, 0, 0], sizes = [1, 8, 32], strides = [1, 1, 1]} : vector<4x8x32xbf16> to vector<1x8x32xbf16>
    %434 = vector.shape_cast %433 : vector<1x8x32xbf16> to vector<8x32xbf16>
    %cst_147 = arith.constant dense<0.000000e+00> : vector<16x32xf32>
    %435 = tpu.matmul %432, %434, %cst_147 {dimension_numbers = #tpu.dot_dimension_numbers<[1], [0], [0], [1], [0, 0, 1, 1], [], []>} : vector<16x8xbf16>, vector<8x32xbf16>, vector<16x32xf32> -> vector<16x32xf32>
    %436 = arith.addf %408, %435 : vector<16x32xf32>
    %437 = vector.extract_strided_slice %377 {offsets = [0, 0, 16], sizes = [2, 8, 8], strides = [1, 1, 1]} : vector<2x8x32xf32> to vector<2x8x8xf32>
    %438 = arith.truncf %437 : vector<2x8x8xf32> to vector<2x8x8xbf16>
    %439 = vector.extract_strided_slice %378 {offsets = [0, 0, 16], sizes = [2, 8, 8], strides = [1, 1, 1]} : vector<2x8x32xf32> to vector<2x8x8xf32>
    %440 = arith.truncf %439 : vector<2x8x8xf32> to vector<2x8x8xbf16>
    "tpu.trace_start"() <{level = 10 : i32, message = "bqd,bkd->bqk"}> : () -> ()
    %cst_148 = arith.constant dense<0.000000e+00> : vector<2x8x8xf32>
    %441 = tpu.matmul %438, %440, %cst_148 {dimension_numbers = #tpu.dot_dimension_numbers<[2], [2], [1], [1], [0, 0, 0, 1, 1, 1], [0], [0]>} : vector<2x8x8xbf16>, vector<2x8x8xbf16>, vector<2x8x8xf32> -> vector<2x8x8xf32>
    "tpu.trace_stop"() : () -> ()
    %cst_149 = arith.constant 0.353553385 : f32
    %442 = vector.broadcast %cst_149 : f32 to vector<2x8x8xf32>
    %443 = arith.mulf %441, %442 : vector<2x8x8xf32>
    %444 = arith.addf %443, %9 : vector<2x8x8xf32>
    %cst_150 = arith.constant dense<0xFF800000> : vector<2x8xf32>
    %445 = vector.multi_reduction <maximumf>, %444, %cst_150 [2] : vector<2x8x8xf32> to vector<2x8xf32>
    %446 = vector.shape_cast %445 : vector<2x8xf32> to vector<2x8x1xf32>
    %447 = vector.broadcast %446 : vector<2x8x1xf32> to vector<2x8x8xf32>
    %448 = arith.subf %444, %447 : vector<2x8x8xf32>
    %449 = math.exp %448 : vector<2x8x8xf32>
    %cst_151 = arith.constant dense<0.000000e+00> : vector<2x8xf32>
    %450 = vector.multi_reduction <add>, %449, %cst_151 [2] : vector<2x8x8xf32> to vector<2x8xf32>
    %451 = vector.shape_cast %450 : vector<2x8xf32> to vector<2x8x1xf32>
    %452 = tpu.reciprocal %451 {approx = true} : vector<2x8x1xf32> -> vector<2x8x1xf32>
    %453 = vector.broadcast %452 : vector<2x8x1xf32> to vector<2x8x8xf32>
    %454 = arith.mulf %449, %453 : vector<2x8x8xf32>
    %455 = arith.truncf %454 : vector<2x8x8xf32> to vector<2x8x8xbf16>
    %456 = vector.extract_strided_slice %379 {offsets = [0, 0, 16], sizes = [2, 8, 8], strides = [1, 1, 1]} : vector<2x8x32xf32> to vector<2x8x8xf32>
    %457 = arith.truncf %456 : vector<2x8x8xf32> to vector<2x8x8xbf16>
    "tpu.trace_start"() <{level = 10 : i32, message = "bqk,bkd->bqd"}> : () -> ()
    %cst_152 = arith.constant dense<0.000000e+00> : vector<2x8x8xf32>
    %458 = tpu.matmul %455, %457, %cst_152 {dimension_numbers = #tpu.dot_dimension_numbers<[2], [1], [1], [2], [0, 0, 0, 1, 1, 2], [0], [0]>} : vector<2x8x8xbf16>, vector<2x8x8xbf16>, vector<2x8x8xf32> -> vector<2x8x8xf32>
    "tpu.trace_stop"() : () -> ()
    %459 = vector.shape_cast %458 : vector<2x8x8xf32> to vector<16x8xf32>
    %460 = arith.truncf %459 : vector<16x8xf32> to vector<16x8xbf16>
    %461 = vector.extract_strided_slice %376 {offsets = [2, 0, 0], sizes = [1, 8, 32], strides = [1, 1, 1]} : vector<4x8x32xbf16> to vector<1x8x32xbf16>
    %462 = vector.shape_cast %461 : vector<1x8x32xbf16> to vector<8x32xbf16>
    %cst_153 = arith.constant dense<0.000000e+00> : vector<16x32xf32>
    %463 = tpu.matmul %460, %462, %cst_153 {dimension_numbers = #tpu.dot_dimension_numbers<[1], [0], [0], [1], [0, 0, 1, 1], [], []>} : vector<16x8xbf16>, vector<8x32xbf16>, vector<16x32xf32> -> vector<16x32xf32>
    %464 = arith.addf %436, %463 : vector<16x32xf32>
    %465 = vector.extract_strided_slice %377 {offsets = [0, 0, 24], sizes = [2, 8, 8], strides = [1, 1, 1]} : vector<2x8x32xf32> to vector<2x8x8xf32>
    %466 = arith.truncf %465 : vector<2x8x8xf32> to vector<2x8x8xbf16>
    %467 = vector.extract_strided_slice %378 {offsets = [0, 0, 24], sizes = [2, 8, 8], strides = [1, 1, 1]} : vector<2x8x32xf32> to vector<2x8x8xf32>
    %468 = arith.truncf %467 : vector<2x8x8xf32> to vector<2x8x8xbf16>
    "tpu.trace_start"() <{level = 10 : i32, message = "bqd,bkd->bqk"}> : () -> ()
    %cst_154 = arith.constant dense<0.000000e+00> : vector<2x8x8xf32>
    %469 = tpu.matmul %466, %468, %cst_154 {dimension_numbers = #tpu.dot_dimension_numbers<[2], [2], [1], [1], [0, 0, 0, 1, 1, 1], [0], [0]>} : vector<2x8x8xbf16>, vector<2x8x8xbf16>, vector<2x8x8xf32> -> vector<2x8x8xf32>
    "tpu.trace_stop"() : () -> ()
    %cst_155 = arith.constant 0.353553385 : f32
    %470 = vector.broadcast %cst_155 : f32 to vector<2x8x8xf32>
    %471 = arith.mulf %469, %470 : vector<2x8x8xf32>
    %472 = arith.addf %471, %9 : vector<2x8x8xf32>
    %cst_156 = arith.constant dense<0xFF800000> : vector<2x8xf32>
    %473 = vector.multi_reduction <maximumf>, %472, %cst_156 [2] : vector<2x8x8xf32> to vector<2x8xf32>
    %474 = vector.shape_cast %473 : vector<2x8xf32> to vector<2x8x1xf32>
    %475 = vector.broadcast %474 : vector<2x8x1xf32> to vector<2x8x8xf32>
    %476 = arith.subf %472, %475 : vector<2x8x8xf32>
    %477 = math.exp %476 : vector<2x8x8xf32>
    %cst_157 = arith.constant dense<0.000000e+00> : vector<2x8xf32>
    %478 = vector.multi_reduction <add>, %477, %cst_157 [2] : vector<2x8x8xf32> to vector<2x8xf32>
    %479 = vector.shape_cast %478 : vector<2x8xf32> to vector<2x8x1xf32>
    %480 = tpu.reciprocal %479 {approx = true} : vector<2x8x1xf32> -> vector<2x8x1xf32>
    %481 = vector.broadcast %480 : vector<2x8x1xf32> to vector<2x8x8xf32>
    %482 = arith.mulf %477, %481 : vector<2x8x8xf32>
    %483 = arith.truncf %482 : vector<2x8x8xf32> to vector<2x8x8xbf16>
    %484 = vector.extract_strided_slice %379 {offsets = [0, 0, 24], sizes = [2, 8, 8], strides = [1, 1, 1]} : vector<2x8x32xf32> to vector<2x8x8xf32>
    %485 = arith.truncf %484 : vector<2x8x8xf32> to vector<2x8x8xbf16>
    "tpu.trace_start"() <{level = 10 : i32, message = "bqk,bkd->bqd"}> : () -> ()
    %cst_158 = arith.constant dense<0.000000e+00> : vector<2x8x8xf32>
    %486 = tpu.matmul %483, %485, %cst_158 {dimension_numbers = #tpu.dot_dimension_numbers<[2], [1], [1], [2], [0, 0, 0, 1, 1, 2], [0], [0]>} : vector<2x8x8xbf16>, vector<2x8x8xbf16>, vector<2x8x8xf32> -> vector<2x8x8xf32>
    "tpu.trace_stop"() : () -> ()
    %487 = vector.shape_cast %486 : vector<2x8x8xf32> to vector<16x8xf32>
    %488 = arith.truncf %487 : vector<16x8xf32> to vector<16x8xbf16>
    %489 = vector.extract_strided_slice %376 {offsets = [3, 0, 0], sizes = [1, 8, 32], strides = [1, 1, 1]} : vector<4x8x32xbf16> to vector<1x8x32xbf16>
    %490 = vector.shape_cast %489 : vector<1x8x32xbf16> to vector<8x32xbf16>
    %cst_159 = arith.constant dense<0.000000e+00> : vector<16x32xf32>
    %491 = tpu.matmul %488, %490, %cst_159 {dimension_numbers = #tpu.dot_dimension_numbers<[1], [0], [0], [1], [0, 0, 1, 1], [], []>} : vector<16x8xbf16>, vector<8x32xbf16>, vector<16x32xf32> -> vector<16x32xf32>
    %492 = arith.addf %464, %491 : vector<16x32xf32>
    %c1_160 = arith.constant 1 : index
    %c0_161 = arith.constant 0 : index
    %c0_162 = arith.constant 0 : index
    %493 = vector.load %arg14[%c1_160, %c0_161, %c0_162] : memref<2x1x32xf32, #tpu.memory_space<vmem>>, vector<1x1x32xf32>
    %494 = vector.shape_cast %493 : vector<1x1x32xf32> to vector<1x32xf32>
    %c1_163 = arith.constant 1 : index
    %c0_164 = arith.constant 0 : index
    %c0_165 = arith.constant 0 : index
    %495 = vector.load %arg15[%c1_163, %c0_164, %c0_165] : memref<2x1x32xf32, #tpu.memory_space<vmem>>, vector<1x1x32xf32>
    %496 = vector.shape_cast %495 : vector<1x1x32xf32> to vector<1x32xf32>
    %497 = arith.addf %367, %492 : vector<16x32xf32>
    %cst_166 = arith.constant dense<0.000000e+00> : vector<16xf32>
    %498 = vector.multi_reduction <add>, %497, %cst_166 [1] : vector<16x32xf32> to vector<16xf32>
    %499 = vector.shape_cast %498 : vector<16xf32> to vector<16x1xf32>
    %cst_167 = arith.constant 3.200000e+01 : f32
    %500 = vector.broadcast %cst_167 : f32 to vector<16x1xf32>
    %501 = arith.divf %499, %500 : vector<16x1xf32>
    %502 = vector.broadcast %501 : vector<16x1xf32> to vector<16x32xf32>
    %503 = arith.subf %497, %502 : vector<16x32xf32>
    %504 = arith.mulf %503, %503 : vector<16x32xf32>
    %cst_168 = arith.constant dense<0.000000e+00> : vector<16xf32>
    %505 = vector.multi_reduction <add>, %504, %cst_168 [1] : vector<16x32xf32> to vector<16xf32>
    %506 = vector.shape_cast %505 : vector<16xf32> to vector<16x1xf32>
    %cst_169 = arith.constant 3.200000e+01 : f32
    %507 = vector.broadcast %cst_169 : f32 to vector<16x1xf32>
    %508 = arith.divf %506, %507 : vector<16x1xf32>
    %509 = vector.broadcast %501 : vector<16x1xf32> to vector<16x32xf32>
    %510 = arith.subf %497, %509 : vector<16x32xf32>
    %cst_170 = arith.constant 9.99999974E-6 : f32
    %511 = vector.broadcast %cst_170 : f32 to vector<16x1xf32>
    %512 = arith.addf %508, %511 : vector<16x1xf32>
    %513 = math.rsqrt %512 : vector<16x1xf32>
    %514 = vector.broadcast %513 : vector<16x1xf32> to vector<16x32xf32>
    %515 = arith.mulf %510, %514 : vector<16x32xf32>
    %516 = vector.broadcast %494 : vector<1x32xf32> to vector<16x32xf32>
    %517 = arith.mulf %515, %516 : vector<16x32xf32>
    %518 = vector.broadcast %496 : vector<1x32xf32> to vector<16x32xf32>
    %519 = arith.addf %517, %518 : vector<16x32xf32>
    %520 = arith.truncf %519 : vector<16x32xf32> to vector<16x32xbf16>
    %c1_171 = arith.constant 1 : index
    %c0_172 = arith.constant 0 : index
    %c0_173 = arith.constant 0 : index
    %521 = vector.load %arg7[%c1_171, %c0_172, %c0_173] : memref<2x32x32xbf16, #tpu.memory_space<vmem>>, vector<1x32x32xbf16>
    %522 = vector.shape_cast %521 : vector<1x32x32xbf16> to vector<32x32xbf16>
    %cst_174 = arith.constant dense<0.000000e+00> : vector<16x32xf32>
    %523 = tpu.matmul %520, %522, %cst_174 {dimension_numbers = #tpu.dot_dimension_numbers<[1], [0], [0], [1], [0, 0, 1, 1], [], []>} : vector<16x32xbf16>, vector<32x32xbf16>, vector<16x32xf32> -> vector<16x32xf32>
    %c1_175 = arith.constant 1 : index
    %c0_176 = arith.constant 0 : index
    %c0_177 = arith.constant 0 : index
    %524 = vector.load %arg8[%c1_175, %c0_176, %c0_177] : memref<2x32x64xbf16, #tpu.memory_space<vmem>>, vector<1x32x64xbf16>
    %525 = vector.shape_cast %524 : vector<1x32x64xbf16> to vector<32x64xbf16>
    %cst_178 = arith.constant dense<0.000000e+00> : vector<16x64xf32>
    %526 = tpu.matmul %2, %525, %cst_178 {dimension_numbers = #tpu.dot_dimension_numbers<[1], [0], [0], [1], [0, 0, 1, 1], [], []>} : vector<16x32xbf16>, vector<32x64xbf16>, vector<16x64xf32> -> vector<16x64xf32>
    %527 = vector.extract_strided_slice %526 {offsets = [0, 0], sizes = [16, 32], strides = [1, 1]} : vector<16x64xf32> to vector<16x32xf32>
    %528 = vector.extract_strided_slice %526 {offsets = [0, 32], sizes = [16, 32], strides = [1, 1]} : vector<16x64xf32> to vector<16x32xf32>
    %c1_179 = arith.constant 1 : index
    %c0_180 = arith.constant 0 : index
    %c0_181 = arith.constant 0 : index
    %c0_182 = arith.constant 0 : index
    %529 = vector.load %arg9[%c1_179, %c0_180, %c0_181, %c0_182] : memref<2x4x8x32xbf16, #tpu.memory_space<vmem>>, vector<1x4x8x32xbf16>
    %530 = vector.shape_cast %529 : vector<1x4x8x32xbf16> to vector<4x8x32xbf16>
    %531 = vector.shape_cast %523 : vector<16x32xf32> to vector<2x8x32xf32>
    %532 = vector.shape_cast %527 : vector<16x32xf32> to vector<2x8x32xf32>
    %533 = vector.shape_cast %528 : vector<16x32xf32> to vector<2x8x32xf32>
    %cst_183 = arith.constant 0.000000e+00 : f32
    %534 = vector.broadcast %cst_183 : f32 to vector<16x32xf32>
    %535 = vector.extract_strided_slice %531 {offsets = [0, 0, 0], sizes = [2, 8, 8], strides = [1, 1, 1]} : vector<2x8x32xf32> to vector<2x8x8xf32>
    %536 = arith.truncf %535 : vector<2x8x8xf32> to vector<2x8x8xbf16>
    %537 = vector.extract_strided_slice %532 {offsets = [0, 0, 0], sizes = [2, 8, 8], strides = [1, 1, 1]} : vector<2x8x32xf32> to vector<2x8x8xf32>
    %538 = arith.truncf %537 : vector<2x8x8xf32> to vector<2x8x8xbf16>
    "tpu.trace_start"() <{level = 10 : i32, message = "bqd,bkd->bqk"}> : () -> ()
    %cst_184 = arith.constant dense<0.000000e+00> : vector<2x8x8xf32>
    %539 = tpu.matmul %536, %538, %cst_184 {dimension_numbers = #tpu.dot_dimension_numbers<[2], [2], [1], [1], [0, 0, 0, 1, 1, 1], [0], [0]>} : vector<2x8x8xbf16>, vector<2x8x8xbf16>, vector<2x8x8xf32> -> vector<2x8x8xf32>
    "tpu.trace_stop"() : () -> ()
    %cst_185 = arith.constant 0.353553385 : f32
    %540 = vector.broadcast %cst_185 : f32 to vector<2x8x8xf32>
    %541 = arith.mulf %539, %540 : vector<2x8x8xf32>
    %542 = arith.addf %541, %16 : vector<2x8x8xf32>
    %cst_186 = arith.constant dense<0xFF800000> : vector<2x8xf32>
    %543 = vector.multi_reduction <maximumf>, %542, %cst_186 [2] : vector<2x8x8xf32> to vector<2x8xf32>
    %544 = vector.shape_cast %543 : vector<2x8xf32> to vector<2x8x1xf32>
    %545 = vector.broadcast %544 : vector<2x8x1xf32> to vector<2x8x8xf32>
    %546 = arith.subf %542, %545 : vector<2x8x8xf32>
    %547 = math.exp %546 : vector<2x8x8xf32>
    %cst_187 = arith.constant dense<0.000000e+00> : vector<2x8xf32>
    %548 = vector.multi_reduction <add>, %547, %cst_187 [2] : vector<2x8x8xf32> to vector<2x8xf32>
    %549 = vector.shape_cast %548 : vector<2x8xf32> to vector<2x8x1xf32>
    %550 = tpu.reciprocal %549 {approx = true} : vector<2x8x1xf32> -> vector<2x8x1xf32>
    %551 = vector.broadcast %550 : vector<2x8x1xf32> to vector<2x8x8xf32>
    %552 = arith.mulf %547, %551 : vector<2x8x8xf32>
    %553 = arith.truncf %552 : vector<2x8x8xf32> to vector<2x8x8xbf16>
    %554 = vector.extract_strided_slice %533 {offsets = [0, 0, 0], sizes = [2, 8, 8], strides = [1, 1, 1]} : vector<2x8x32xf32> to vector<2x8x8xf32>
    %555 = arith.truncf %554 : vector<2x8x8xf32> to vector<2x8x8xbf16>
    "tpu.trace_start"() <{level = 10 : i32, message = "bqk,bkd->bqd"}> : () -> ()
    %cst_188 = arith.constant dense<0.000000e+00> : vector<2x8x8xf32>
    %556 = tpu.matmul %553, %555, %cst_188 {dimension_numbers = #tpu.dot_dimension_numbers<[2], [1], [1], [2], [0, 0, 0, 1, 1, 2], [0], [0]>} : vector<2x8x8xbf16>, vector<2x8x8xbf16>, vector<2x8x8xf32> -> vector<2x8x8xf32>
    "tpu.trace_stop"() : () -> ()
    %557 = vector.shape_cast %556 : vector<2x8x8xf32> to vector<16x8xf32>
    %558 = arith.truncf %557 : vector<16x8xf32> to vector<16x8xbf16>
    %559 = vector.extract_strided_slice %530 {offsets = [0, 0, 0], sizes = [1, 8, 32], strides = [1, 1, 1]} : vector<4x8x32xbf16> to vector<1x8x32xbf16>
    %560 = vector.shape_cast %559 : vector<1x8x32xbf16> to vector<8x32xbf16>
    %cst_189 = arith.constant dense<0.000000e+00> : vector<16x32xf32>
    %561 = tpu.matmul %558, %560, %cst_189 {dimension_numbers = #tpu.dot_dimension_numbers<[1], [0], [0], [1], [0, 0, 1, 1], [], []>} : vector<16x8xbf16>, vector<8x32xbf16>, vector<16x32xf32> -> vector<16x32xf32>
    %562 = arith.addf %534, %561 : vector<16x32xf32>
    %563 = vector.extract_strided_slice %531 {offsets = [0, 0, 8], sizes = [2, 8, 8], strides = [1, 1, 1]} : vector<2x8x32xf32> to vector<2x8x8xf32>
    %564 = arith.truncf %563 : vector<2x8x8xf32> to vector<2x8x8xbf16>
    %565 = vector.extract_strided_slice %532 {offsets = [0, 0, 8], sizes = [2, 8, 8], strides = [1, 1, 1]} : vector<2x8x32xf32> to vector<2x8x8xf32>
    %566 = arith.truncf %565 : vector<2x8x8xf32> to vector<2x8x8xbf16>
    "tpu.trace_start"() <{level = 10 : i32, message = "bqd,bkd->bqk"}> : () -> ()
    %cst_190 = arith.constant dense<0.000000e+00> : vector<2x8x8xf32>
    %567 = tpu.matmul %564, %566, %cst_190 {dimension_numbers = #tpu.dot_dimension_numbers<[2], [2], [1], [1], [0, 0, 0, 1, 1, 1], [0], [0]>} : vector<2x8x8xbf16>, vector<2x8x8xbf16>, vector<2x8x8xf32> -> vector<2x8x8xf32>
    "tpu.trace_stop"() : () -> ()
    %cst_191 = arith.constant 0.353553385 : f32
    %568 = vector.broadcast %cst_191 : f32 to vector<2x8x8xf32>
    %569 = arith.mulf %567, %568 : vector<2x8x8xf32>
    %570 = arith.addf %569, %16 : vector<2x8x8xf32>
    %cst_192 = arith.constant dense<0xFF800000> : vector<2x8xf32>
    %571 = vector.multi_reduction <maximumf>, %570, %cst_192 [2] : vector<2x8x8xf32> to vector<2x8xf32>
    %572 = vector.shape_cast %571 : vector<2x8xf32> to vector<2x8x1xf32>
    %573 = vector.broadcast %572 : vector<2x8x1xf32> to vector<2x8x8xf32>
    %574 = arith.subf %570, %573 : vector<2x8x8xf32>
    %575 = math.exp %574 : vector<2x8x8xf32>
    %cst_193 = arith.constant dense<0.000000e+00> : vector<2x8xf32>
    %576 = vector.multi_reduction <add>, %575, %cst_193 [2] : vector<2x8x8xf32> to vector<2x8xf32>
    %577 = vector.shape_cast %576 : vector<2x8xf32> to vector<2x8x1xf32>
    %578 = tpu.reciprocal %577 {approx = true} : vector<2x8x1xf32> -> vector<2x8x1xf32>
    %579 = vector.broadcast %578 : vector<2x8x1xf32> to vector<2x8x8xf32>
    %580 = arith.mulf %575, %579 : vector<2x8x8xf32>
    %581 = arith.truncf %580 : vector<2x8x8xf32> to vector<2x8x8xbf16>
    %582 = vector.extract_strided_slice %533 {offsets = [0, 0, 8], sizes = [2, 8, 8], strides = [1, 1, 1]} : vector<2x8x32xf32> to vector<2x8x8xf32>
    %583 = arith.truncf %582 : vector<2x8x8xf32> to vector<2x8x8xbf16>
    "tpu.trace_start"() <{level = 10 : i32, message = "bqk,bkd->bqd"}> : () -> ()
    %cst_194 = arith.constant dense<0.000000e+00> : vector<2x8x8xf32>
    %584 = tpu.matmul %581, %583, %cst_194 {dimension_numbers = #tpu.dot_dimension_numbers<[2], [1], [1], [2], [0, 0, 0, 1, 1, 2], [0], [0]>} : vector<2x8x8xbf16>, vector<2x8x8xbf16>, vector<2x8x8xf32> -> vector<2x8x8xf32>
    "tpu.trace_stop"() : () -> ()
    %585 = vector.shape_cast %584 : vector<2x8x8xf32> to vector<16x8xf32>
    %586 = arith.truncf %585 : vector<16x8xf32> to vector<16x8xbf16>
    %587 = vector.extract_strided_slice %530 {offsets = [1, 0, 0], sizes = [1, 8, 32], strides = [1, 1, 1]} : vector<4x8x32xbf16> to vector<1x8x32xbf16>
    %588 = vector.shape_cast %587 : vector<1x8x32xbf16> to vector<8x32xbf16>
    %cst_195 = arith.constant dense<0.000000e+00> : vector<16x32xf32>
    %589 = tpu.matmul %586, %588, %cst_195 {dimension_numbers = #tpu.dot_dimension_numbers<[1], [0], [0], [1], [0, 0, 1, 1], [], []>} : vector<16x8xbf16>, vector<8x32xbf16>, vector<16x32xf32> -> vector<16x32xf32>
    %590 = arith.addf %562, %589 : vector<16x32xf32>
    %591 = vector.extract_strided_slice %531 {offsets = [0, 0, 16], sizes = [2, 8, 8], strides = [1, 1, 1]} : vector<2x8x32xf32> to vector<2x8x8xf32>
    %592 = arith.truncf %591 : vector<2x8x8xf32> to vector<2x8x8xbf16>
    %593 = vector.extract_strided_slice %532 {offsets = [0, 0, 16], sizes = [2, 8, 8], strides = [1, 1, 1]} : vector<2x8x32xf32> to vector<2x8x8xf32>
    %594 = arith.truncf %593 : vector<2x8x8xf32> to vector<2x8x8xbf16>
    "tpu.trace_start"() <{level = 10 : i32, message = "bqd,bkd->bqk"}> : () -> ()
    %cst_196 = arith.constant dense<0.000000e+00> : vector<2x8x8xf32>
    %595 = tpu.matmul %592, %594, %cst_196 {dimension_numbers = #tpu.dot_dimension_numbers<[2], [2], [1], [1], [0, 0, 0, 1, 1, 1], [0], [0]>} : vector<2x8x8xbf16>, vector<2x8x8xbf16>, vector<2x8x8xf32> -> vector<2x8x8xf32>
    "tpu.trace_stop"() : () -> ()
    %cst_197 = arith.constant 0.353553385 : f32
    %596 = vector.broadcast %cst_197 : f32 to vector<2x8x8xf32>
    %597 = arith.mulf %595, %596 : vector<2x8x8xf32>
    %598 = arith.addf %597, %16 : vector<2x8x8xf32>
    %cst_198 = arith.constant dense<0xFF800000> : vector<2x8xf32>
    %599 = vector.multi_reduction <maximumf>, %598, %cst_198 [2] : vector<2x8x8xf32> to vector<2x8xf32>
    %600 = vector.shape_cast %599 : vector<2x8xf32> to vector<2x8x1xf32>
    %601 = vector.broadcast %600 : vector<2x8x1xf32> to vector<2x8x8xf32>
    %602 = arith.subf %598, %601 : vector<2x8x8xf32>
    %603 = math.exp %602 : vector<2x8x8xf32>
    %cst_199 = arith.constant dense<0.000000e+00> : vector<2x8xf32>
    %604 = vector.multi_reduction <add>, %603, %cst_199 [2] : vector<2x8x8xf32> to vector<2x8xf32>
    %605 = vector.shape_cast %604 : vector<2x8xf32> to vector<2x8x1xf32>
    %606 = tpu.reciprocal %605 {approx = true} : vector<2x8x1xf32> -> vector<2x8x1xf32>
    %607 = vector.broadcast %606 : vector<2x8x1xf32> to vector<2x8x8xf32>
    %608 = arith.mulf %603, %607 : vector<2x8x8xf32>
    %609 = arith.truncf %608 : vector<2x8x8xf32> to vector<2x8x8xbf16>
    %610 = vector.extract_strided_slice %533 {offsets = [0, 0, 16], sizes = [2, 8, 8], strides = [1, 1, 1]} : vector<2x8x32xf32> to vector<2x8x8xf32>
    %611 = arith.truncf %610 : vector<2x8x8xf32> to vector<2x8x8xbf16>
    "tpu.trace_start"() <{level = 10 : i32, message = "bqk,bkd->bqd"}> : () -> ()
    %cst_200 = arith.constant dense<0.000000e+00> : vector<2x8x8xf32>
    %612 = tpu.matmul %609, %611, %cst_200 {dimension_numbers = #tpu.dot_dimension_numbers<[2], [1], [1], [2], [0, 0, 0, 1, 1, 2], [0], [0]>} : vector<2x8x8xbf16>, vector<2x8x8xbf16>, vector<2x8x8xf32> -> vector<2x8x8xf32>
    "tpu.trace_stop"() : () -> ()
    %613 = vector.shape_cast %612 : vector<2x8x8xf32> to vector<16x8xf32>
    %614 = arith.truncf %613 : vector<16x8xf32> to vector<16x8xbf16>
    %615 = vector.extract_strided_slice %530 {offsets = [2, 0, 0], sizes = [1, 8, 32], strides = [1, 1, 1]} : vector<4x8x32xbf16> to vector<1x8x32xbf16>
    %616 = vector.shape_cast %615 : vector<1x8x32xbf16> to vector<8x32xbf16>
    %cst_201 = arith.constant dense<0.000000e+00> : vector<16x32xf32>
    %617 = tpu.matmul %614, %616, %cst_201 {dimension_numbers = #tpu.dot_dimension_numbers<[1], [0], [0], [1], [0, 0, 1, 1], [], []>} : vector<16x8xbf16>, vector<8x32xbf16>, vector<16x32xf32> -> vector<16x32xf32>
    %618 = arith.addf %590, %617 : vector<16x32xf32>
    %619 = vector.extract_strided_slice %531 {offsets = [0, 0, 24], sizes = [2, 8, 8], strides = [1, 1, 1]} : vector<2x8x32xf32> to vector<2x8x8xf32>
    %620 = arith.truncf %619 : vector<2x8x8xf32> to vector<2x8x8xbf16>
    %621 = vector.extract_strided_slice %532 {offsets = [0, 0, 24], sizes = [2, 8, 8], strides = [1, 1, 1]} : vector<2x8x32xf32> to vector<2x8x8xf32>
    %622 = arith.truncf %621 : vector<2x8x8xf32> to vector<2x8x8xbf16>
    "tpu.trace_start"() <{level = 10 : i32, message = "bqd,bkd->bqk"}> : () -> ()
    %cst_202 = arith.constant dense<0.000000e+00> : vector<2x8x8xf32>
    %623 = tpu.matmul %620, %622, %cst_202 {dimension_numbers = #tpu.dot_dimension_numbers<[2], [2], [1], [1], [0, 0, 0, 1, 1, 1], [0], [0]>} : vector<2x8x8xbf16>, vector<2x8x8xbf16>, vector<2x8x8xf32> -> vector<2x8x8xf32>
    "tpu.trace_stop"() : () -> ()
    %cst_203 = arith.constant 0.353553385 : f32
    %624 = vector.broadcast %cst_203 : f32 to vector<2x8x8xf32>
    %625 = arith.mulf %623, %624 : vector<2x8x8xf32>
    %626 = arith.addf %625, %16 : vector<2x8x8xf32>
    %cst_204 = arith.constant dense<0xFF800000> : vector<2x8xf32>
    %627 = vector.multi_reduction <maximumf>, %626, %cst_204 [2] : vector<2x8x8xf32> to vector<2x8xf32>
    %628 = vector.shape_cast %627 : vector<2x8xf32> to vector<2x8x1xf32>
    %629 = vector.broadcast %628 : vector<2x8x1xf32> to vector<2x8x8xf32>
    %630 = arith.subf %626, %629 : vector<2x8x8xf32>
    %631 = math.exp %630 : vector<2x8x8xf32>
    %cst_205 = arith.constant dense<0.000000e+00> : vector<2x8xf32>
    %632 = vector.multi_reduction <add>, %631, %cst_205 [2] : vector<2x8x8xf32> to vector<2x8xf32>
    %633 = vector.shape_cast %632 : vector<2x8xf32> to vector<2x8x1xf32>
    %634 = tpu.reciprocal %633 {approx = true} : vector<2x8x1xf32> -> vector<2x8x1xf32>
    %635 = vector.broadcast %634 : vector<2x8x1xf32> to vector<2x8x8xf32>
    %636 = arith.mulf %631, %635 : vector<2x8x8xf32>
    %637 = arith.truncf %636 : vector<2x8x8xf32> to vector<2x8x8xbf16>
    %638 = vector.extract_strided_slice %533 {offsets = [0, 0, 24], sizes = [2, 8, 8], strides = [1, 1, 1]} : vector<2x8x32xf32> to vector<2x8x8xf32>
    %639 = arith.truncf %638 : vector<2x8x8xf32> to vector<2x8x8xbf16>
    "tpu.trace_start"() <{level = 10 : i32, message = "bqk,bkd->bqd"}> : () -> ()
    %cst_206 = arith.constant dense<0.000000e+00> : vector<2x8x8xf32>
    %640 = tpu.matmul %637, %639, %cst_206 {dimension_numbers = #tpu.dot_dimension_numbers<[2], [1], [1], [2], [0, 0, 0, 1, 1, 2], [0], [0]>} : vector<2x8x8xbf16>, vector<2x8x8xbf16>, vector<2x8x8xf32> -> vector<2x8x8xf32>
    "tpu.trace_stop"() : () -> ()
    %641 = vector.shape_cast %640 : vector<2x8x8xf32> to vector<16x8xf32>
    %642 = arith.truncf %641 : vector<16x8xf32> to vector<16x8xbf16>
    %643 = vector.extract_strided_slice %530 {offsets = [3, 0, 0], sizes = [1, 8, 32], strides = [1, 1, 1]} : vector<4x8x32xbf16> to vector<1x8x32xbf16>
    %644 = vector.shape_cast %643 : vector<1x8x32xbf16> to vector<8x32xbf16>
    %cst_207 = arith.constant dense<0.000000e+00> : vector<16x32xf32>
    %645 = tpu.matmul %642, %644, %cst_207 {dimension_numbers = #tpu.dot_dimension_numbers<[1], [0], [0], [1], [0, 0, 1, 1], [], []>} : vector<16x8xbf16>, vector<8x32xbf16>, vector<16x32xf32> -> vector<16x32xf32>
    %646 = arith.addf %618, %645 : vector<16x32xf32>
    %c1_208 = arith.constant 1 : index
    %c0_209 = arith.constant 0 : index
    %c0_210 = arith.constant 0 : index
    %647 = vector.load %arg16[%c1_208, %c0_209, %c0_210] : memref<2x1x32xf32, #tpu.memory_space<vmem>>, vector<1x1x32xf32>
    %648 = vector.shape_cast %647 : vector<1x1x32xf32> to vector<1x32xf32>
    %c1_211 = arith.constant 1 : index
    %c0_212 = arith.constant 0 : index
    %c0_213 = arith.constant 0 : index
    %649 = vector.load %arg17[%c1_211, %c0_212, %c0_213] : memref<2x1x32xf32, #tpu.memory_space<vmem>>, vector<1x1x32xf32>
    %650 = vector.shape_cast %649 : vector<1x1x32xf32> to vector<1x32xf32>
    %651 = arith.addf %519, %646 : vector<16x32xf32>
    %cst_214 = arith.constant dense<0.000000e+00> : vector<16xf32>
    %652 = vector.multi_reduction <add>, %651, %cst_214 [1] : vector<16x32xf32> to vector<16xf32>
    %653 = vector.shape_cast %652 : vector<16xf32> to vector<16x1xf32>
    %cst_215 = arith.constant 3.200000e+01 : f32
    %654 = vector.broadcast %cst_215 : f32 to vector<16x1xf32>
    %655 = arith.divf %653, %654 : vector<16x1xf32>
    %656 = vector.broadcast %655 : vector<16x1xf32> to vector<16x32xf32>
    %657 = arith.subf %651, %656 : vector<16x32xf32>
    %658 = arith.mulf %657, %657 : vector<16x32xf32>
    %cst_216 = arith.constant dense<0.000000e+00> : vector<16xf32>
    %659 = vector.multi_reduction <add>, %658, %cst_216 [1] : vector<16x32xf32> to vector<16xf32>
    %660 = vector.shape_cast %659 : vector<16xf32> to vector<16x1xf32>
    %cst_217 = arith.constant 3.200000e+01 : f32
    %661 = vector.broadcast %cst_217 : f32 to vector<16x1xf32>
    %662 = arith.divf %660, %661 : vector<16x1xf32>
    %663 = vector.broadcast %655 : vector<16x1xf32> to vector<16x32xf32>
    %664 = arith.subf %651, %663 : vector<16x32xf32>
    %cst_218 = arith.constant 9.99999974E-6 : f32
    %665 = vector.broadcast %cst_218 : f32 to vector<16x1xf32>
    %666 = arith.addf %662, %665 : vector<16x1xf32>
    %667 = math.rsqrt %666 : vector<16x1xf32>
    %668 = vector.broadcast %667 : vector<16x1xf32> to vector<16x32xf32>
    %669 = arith.mulf %664, %668 : vector<16x32xf32>
    %670 = vector.broadcast %648 : vector<1x32xf32> to vector<16x32xf32>
    %671 = arith.mulf %669, %670 : vector<16x32xf32>
    %672 = vector.broadcast %650 : vector<1x32xf32> to vector<16x32xf32>
    %673 = arith.addf %671, %672 : vector<16x32xf32>
    %c1_219 = arith.constant 1 : index
    %c0_220 = arith.constant 0 : index
    %c0_221 = arith.constant 0 : index
    %674 = vector.load %arg10[%c1_219, %c0_220, %c0_221] : memref<2x32x64xbf16, #tpu.memory_space<vmem>>, vector<1x32x64xbf16>
    %675 = vector.shape_cast %674 : vector<1x32x64xbf16> to vector<32x64xbf16>
    %c1_222 = arith.constant 1 : index
    %c0_223 = arith.constant 0 : index
    %c0_224 = arith.constant 0 : index
    %676 = vector.load %arg11[%c1_222, %c0_223, %c0_224] : memref<2x1x64xf32, #tpu.memory_space<vmem>>, vector<1x1x64xf32>
    %677 = vector.shape_cast %676 : vector<1x1x64xf32> to vector<1x64xf32>
    %c1_225 = arith.constant 1 : index
    %c0_226 = arith.constant 0 : index
    %c0_227 = arith.constant 0 : index
    %678 = vector.load %arg12[%c1_225, %c0_226, %c0_227] : memref<2x64x32xbf16, #tpu.memory_space<vmem>>, vector<1x64x32xbf16>
    %679 = vector.shape_cast %678 : vector<1x64x32xbf16> to vector<64x32xbf16>
    %c1_228 = arith.constant 1 : index
    %c0_229 = arith.constant 0 : index
    %c0_230 = arith.constant 0 : index
    %680 = vector.load %arg13[%c1_228, %c0_229, %c0_230] : memref<2x1x32xf32, #tpu.memory_space<vmem>>, vector<1x1x32xf32>
    %681 = vector.shape_cast %680 : vector<1x1x32xf32> to vector<1x32xf32>
    %682 = arith.truncf %673 : vector<16x32xf32> to vector<16x32xbf16>
    %cst_231 = arith.constant dense<0.000000e+00> : vector<16x64xf32>
    %683 = tpu.matmul %682, %675, %cst_231 {dimension_numbers = #tpu.dot_dimension_numbers<[1], [0], [0], [1], [0, 0, 1, 1], [], []>} : vector<16x32xbf16>, vector<32x64xbf16>, vector<16x64xf32> -> vector<16x64xf32>
    %684 = vector.broadcast %677 : vector<1x64xf32> to vector<16x64xf32>
    %685 = arith.addf %683, %684 : vector<16x64xf32>
    %cst_232 = arith.constant 0.000000e+00 : f32
    %686 = vector.broadcast %cst_232 : f32 to vector<16x64xf32>
    %687 = arith.maximumf %685, %686 : vector<16x64xf32>
    %688 = arith.truncf %687 : vector<16x64xf32> to vector<16x64xbf16>
    %cst_233 = arith.constant dense<0.000000e+00> : vector<16x32xf32>
    %689 = tpu.matmul %688, %679, %cst_233 {dimension_numbers = #tpu.dot_dimension_numbers<[1], [0], [0], [1], [0, 0, 1, 1], [], []>} : vector<16x64xbf16>, vector<64x32xbf16>, vector<16x32xf32> -> vector<16x32xf32>
    %690 = vector.broadcast %681 : vector<1x32xf32> to vector<16x32xf32>
    %691 = arith.addf %689, %690 : vector<16x32xf32>
    %c1_234 = arith.constant 1 : index
    %c0_235 = arith.constant 0 : index
    %c0_236 = arith.constant 0 : index
    %692 = vector.load %arg18[%c1_234, %c0_235, %c0_236] : memref<2x1x32xf32, #tpu.memory_space<vmem>>, vector<1x1x32xf32>
    %693 = vector.shape_cast %692 : vector<1x1x32xf32> to vector<1x32xf32>
    %c1_237 = arith.constant 1 : index
    %c0_238 = arith.constant 0 : index
    %c0_239 = arith.constant 0 : index
    %694 = vector.load %arg19[%c1_237, %c0_238, %c0_239] : memref<2x1x32xf32, #tpu.memory_space<vmem>>, vector<1x1x32xf32>
    %695 = vector.shape_cast %694 : vector<1x1x32xf32> to vector<1x32xf32>
    %696 = arith.addf %673, %691 : vector<16x32xf32>
    %cst_240 = arith.constant dense<0.000000e+00> : vector<16xf32>
    %697 = vector.multi_reduction <add>, %696, %cst_240 [1] : vector<16x32xf32> to vector<16xf32>
    %698 = vector.shape_cast %697 : vector<16xf32> to vector<16x1xf32>
    %cst_241 = arith.constant 3.200000e+01 : f32
    %699 = vector.broadcast %cst_241 : f32 to vector<16x1xf32>
    %700 = arith.divf %698, %699 : vector<16x1xf32>
    %701 = vector.broadcast %700 : vector<16x1xf32> to vector<16x32xf32>
    %702 = arith.subf %696, %701 : vector<16x32xf32>
    %703 = arith.mulf %702, %702 : vector<16x32xf32>
    %cst_242 = arith.constant dense<0.000000e+00> : vector<16xf32>
    %704 = vector.multi_reduction <add>, %703, %cst_242 [1] : vector<16x32xf32> to vector<16xf32>
    %705 = vector.shape_cast %704 : vector<16xf32> to vector<16x1xf32>
    %cst_243 = arith.constant 3.200000e+01 : f32
    %706 = vector.broadcast %cst_243 : f32 to vector<16x1xf32>
    %707 = arith.divf %705, %706 : vector<16x1xf32>
    %708 = vector.broadcast %700 : vector<16x1xf32> to vector<16x32xf32>
    %709 = arith.subf %696, %708 : vector<16x32xf32>
    %cst_244 = arith.constant 9.99999974E-6 : f32
    %710 = vector.broadcast %cst_244 : f32 to vector<16x1xf32>
    %711 = arith.addf %707, %710 : vector<16x1xf32>
    %712 = math.rsqrt %711 : vector<16x1xf32>
    %713 = vector.broadcast %712 : vector<16x1xf32> to vector<16x32xf32>
    %714 = arith.mulf %709, %713 : vector<16x32xf32>
    %715 = vector.broadcast %693 : vector<1x32xf32> to vector<16x32xf32>
    %716 = arith.mulf %714, %715 : vector<16x32xf32>
    %717 = vector.broadcast %695 : vector<1x32xf32> to vector<16x32xf32>
    %718 = arith.addf %716, %717 : vector<16x32xf32>
    %719 = arith.truncf %718 : vector<16x32xf32> to vector<16x32xbf16>
    %c0_245 = arith.constant 0 : index
    %c0_246 = arith.constant 0 : index
    %720 = vector.load %arg20[%c0_245, %c0_246] : memref<32x32xbf16, #tpu.memory_space<vmem>>, vector<32x32xbf16>
    %cst_247 = arith.constant dense<0.000000e+00> : vector<16x32xf32>
    %721 = tpu.matmul %719, %720, %cst_247 {dimension_numbers = #tpu.dot_dimension_numbers<[1], [0], [0], [1], [0, 0, 1, 1], [], []>} : vector<16x32xbf16>, vector<32x32xbf16>, vector<16x32xf32> -> vector<16x32xf32>
    %c0_248 = arith.constant 0 : index
    %c0_249 = arith.constant 0 : index
    %722 = vector.load %arg21[%c0_248, %c0_249] : memref<1x32xf32, #tpu.memory_space<vmem>>, vector<1x32xf32>
    %723 = vector.broadcast %722 : vector<1x32xf32> to vector<16x32xf32>
    %724 = arith.addf %721, %723 : vector<16x32xf32>
    %c0_250 = arith.constant 0 : index
    %c0_251 = arith.constant 0 : index
    %725 = vector.load %arg22[%c0_250, %c0_251] : memref<16x32xf32, #tpu.memory_space<vmem>>, vector<16x32xf32>
    tpu.vector_store %arg22[%c0_250, %c0_251], %724 {strides = array<i32>} : memref<16x32xf32, #tpu.memory_space<vmem>>, vector<16x32xf32>,
    return
  }
  func.func @transform_0(%arg0: i32) -> (i32, i32) {
    %c0_i32 = arith.constant 0 : i32
    %c0_i32_0 = arith.constant 0 : i32
    %c0_i32_1 = arith.constant 0 : i32
    return %c0_i32, %c0_i32_0 : i32, i32
  }
  func.func @transform_1(%arg0: i32) -> (i32, i32) {
    %c0_i32 = arith.constant 0 : i32
    %c0_i32_0 = arith.constant 0 : i32
    %c0_i32_1 = arith.constant 0 : i32
    return %c0_i32, %c0_i32_0 : i32, i32
  }
  func.func @transform_2(%arg0: i32) -> (i32, i32) {
    %c0_i32 = arith.constant 0 : i32
    %c0_i32_0 = arith.constant 0 : i32
    %c0_i32_1 = arith.constant 0 : i32
    return %c0_i32, %c0_i32_0 : i32, i32
  }
  func.func @transform_3(%arg0: i32) -> (i32, i32) {
    %c0_i32 = arith.constant 0 : i32
    %c0_i32_0 = arith.constant 0 : i32
    %c0_i32_1 = arith.constant 0 : i32
    return %c0_i32, %c0_i32_0 : i32, i32
  }
  func.func @transform_4(%arg0: i32) -> (i32, i32, i32) {
    %c0_i32 = arith.constant 0 : i32
    %c0_i32_0 = arith.constant 0 : i32
    %c0_i32_1 = arith.constant 0 : i32
    %c0_i32_2 = arith.constant 0 : i32
    return %c0_i32, %c0_i32_0, %c0_i32_1 : i32, i32, i32
  }
  func.func @transform_5(%arg0: i32) -> (i32, i32, i32, i32) {
    %c0_i32 = arith.constant 0 : i32
    %c0_i32_0 = arith.constant 0 : i32
    %c0_i32_1 = arith.constant 0 : i32
    %c0_i32_2 = arith.constant 0 : i32
    %c0_i32_3 = arith.constant 0 : i32
    return %c0_i32, %c0_i32_0, %c0_i32_1, %c0_i32_2 : i32, i32, i32, i32
  }
  func.func @transform_6(%arg0: i32) -> (i32, i32, i32) {
    %c0_i32 = arith.constant 0 : i32
    %c0_i32_0 = arith.constant 0 : i32
    %c0_i32_1 = arith.constant 0 : i32
    %c0_i32_2 = arith.constant 0 : i32
    return %c0_i32, %c0_i32_0, %c0_i32_1 : i32, i32, i32
  }
  func.func @transform_7(%arg0: i32) -> (i32, i32, i32) {
    %c0_i32 = arith.constant 0 : i32
    %c0_i32_0 = arith.constant 0 : i32
    %c0_i32_1 = arith.constant 0 : i32
    %c0_i32_2 = arith.constant 0 : i32
    return %c0_i32, %c0_i32_0, %c0_i32_1 : i32, i32, i32
  }
  func.func @transform_8(%arg0: i32) -> (i32, i32, i32, i32) {
    %c0_i32 = arith.constant 0 : i32
    %c0_i32_0 = arith.constant 0 : i32
    %c0_i32_1 = arith.constant 0 : i32
    %c0_i32_2 = arith.constant 0 : i32
    %c0_i32_3 = arith.constant 0 : i32
    return %c0_i32, %c0_i32_0, %c0_i32_1, %c0_i32_2 : i32, i32, i32, i32
  }
  func.func @transform_9(%arg0: i32) -> (i32, i32, i32) {
    %c0_i32 = arith.constant 0 : i32
    %c0_i32_0 = arith.constant 0 : i32
    %c0_i32_1 = arith.constant 0 : i32
    %c0_i32_2 = arith.constant 0 : i32
    return %c0_i32, %c0_i32_0, %c0_i32_1 : i32, i32, i32
  }
  func.func @transform_10(%arg0: i32) -> (i32, i32, i32) {
    %c0_i32 = arith.constant 0 : i32
    %c0_i32_0 = arith.constant 0 : i32
    %c0_i32_1 = arith.constant 0 : i32
    %c0_i32_2 = arith.constant 0 : i32
    return %c0_i32, %c0_i32_0, %c0_i32_1 : i32, i32, i32
  }
  func.func @transform_11(%arg0: i32) -> (i32, i32, i32) {
    %c0_i32 = arith.constant 0 : i32
    %c0_i32_0 = arith.constant 0 : i32
    %c0_i32_1 = arith.constant 0 : i32
    %c0_i32_2 = arith.constant 0 : i32
    return %c0_i32, %c0_i32_0, %c0_i32_1 : i32, i32, i32
  }
  func.func @transform_12(%arg0: i32) -> (i32, i32, i32) {
    %c0_i32 = arith.constant 0 : i32
    %c0_i32_0 = arith.constant 0 : i32
    %c0_i32_1 = arith.constant 0 : i32
    %c0_i32_2 = arith.constant 0 : i32
    return %c0_i32, %c0_i32_0, %c0_i32_1 : i32, i32, i32
  }
  func.func @transform_13(%arg0: i32) -> (i32, i32, i32) {
    %c0_i32 = arith.constant 0 : i32
    %c0_i32_0 = arith.constant 0 : i32
    %c0_i32_1 = arith.constant 0 : i32
    %c0_i32_2 = arith.constant 0 : i32
    return %c0_i32, %c0_i32_0, %c0_i32_1 : i32, i32, i32
  }
  func.func @transform_14(%arg0: i32) -> (i32, i32, i32) {
    %c0_i32 = arith.constant 0 : i32
    %c0_i32_0 = arith.constant 0 : i32
    %c0_i32_1 = arith.constant 0 : i32
    %c0_i32_2 = arith.constant 0 : i32
    return %c0_i32, %c0_i32_0, %c0_i32_1 : i32, i32, i32
  }
  func.func @transform_15(%arg0: i32) -> (i32, i32, i32) {
    %c0_i32 = arith.constant 0 : i32
    %c0_i32_0 = arith.constant 0 : i32
    %c0_i32_1 = arith.constant 0 : i32
    %c0_i32_2 = arith.constant 0 : i32
    return %c0_i32, %c0_i32_0, %c0_i32_1 : i32, i32, i32
  }
  func.func @transform_16(%arg0: i32) -> (i32, i32, i32) {
    %c0_i32 = arith.constant 0 : i32
    %c0_i32_0 = arith.constant 0 : i32
    %c0_i32_1 = arith.constant 0 : i32
    %c0_i32_2 = arith.constant 0 : i32
    return %c0_i32, %c0_i32_0, %c0_i32_1 : i32, i32, i32
  }
  func.func @transform_17(%arg0: i32) -> (i32, i32, i32) {
    %c0_i32 = arith.constant 0 : i32
    %c0_i32_0 = arith.constant 0 : i32
    %c0_i32_1 = arith.constant 0 : i32
    %c0_i32_2 = arith.constant 0 : i32
    return %c0_i32, %c0_i32_0, %c0_i32_1 : i32, i32, i32
  }
  func.func @transform_18(%arg0: i32) -> (i32, i32, i32) {
    %c0_i32 = arith.constant 0 : i32
    %c0_i32_0 = arith.constant 0 : i32
    %c0_i32_1 = arith.constant 0 : i32
    %c0_i32_2 = arith.constant 0 : i32
    return %c0_i32, %c0_i32_0, %c0_i32_1 : i32, i32, i32
  }
  func.func @transform_19(%arg0: i32) -> (i32, i32) {
    %c0_i32 = arith.constant 0 : i32
    %c0_i32_0 = arith.constant 0 : i32
    %c0_i32_1 = arith.constant 0 : i32
    return %c0_i32, %c0_i32_0 : i32, i32
  }
  func.func @transform_20(%arg0: i32) -> (i32, i32) {
    %c0_i32 = arith.constant 0 : i32
    %c0_i32_0 = arith.constant 0 : i32
    %c0_i32_1 = arith.constant 0 : i32
    return %c0_i32, %c0_i32_0 : i32, i32
  }
  func.func @transform_21(%arg0: i32) -> (i32, i32) {
    %c0_i32 = arith.constant 0 : i32
    %c0_i32_0 = arith.constant 0 : i32
    %c0_i32_1 = arith.constant 0 : i32
    return %c0_i32, %c0_i32_0 : i32, i32
  }
}

</mosaic_0001>

<bundles_post_ra>
// kernel: encoder_decoder_forward.2
= control target key start
LH: loop header
LB: loop body
LE: loop exit
PB: predicated region body
PF: predicated region fallthrough
CT: control target
= control target key end

     0   :  { %v3487_v0 = vmov 0.0   ;;  %vm3488_vm0 = vmmov 0   ;;  %vm69_vm1 = vcmask 261120   ;;  %vm123_vm2 = vcmask 64512   ;;  %s3492_s15 = smov 88   ;;  %s3493_s16 = smov 120   ;;  %s4154_s2 = inlined_call_operand.vmem [shape: bf16[2,32,96], index: 2, kind: input, shape index: {}]   ;;  %s4155_s0 = inlined_call_operand.vmem [shape: f32[16,32], index: 0, kind: input, shape index: {}]   ;;  %s4156_s1 = inlined_call_operand.vmem [shape: s32[16,8], index: 1, kind: input, shape index: {}]   ;;  %s4157_s3 = inlined_call_operand.vmem [shape: bf16[2,4,8,32], index: 3, kind: input, shape index: {}]   ;;  %s4158_s4 = inlined_call_operand.vmem [shape: bf16[2,32,64], index: 4, kind: input, shape index: {}]   ;;  %s4159_s6 = inlined_call_operand.vmem [shape: bf16[2,64,32], index: 6, kind: input, shape index: {}]   ;;  %s4160_s8 = inlined_call_operand.vmem [shape: f32[2,1,32], index: 8, kind: input, shape index: {}]   ;;  %s4161_s9 = inlined_call_operand.vmem [shape: f32[2,1,32], index: 9, kind: input, shape index: {}]   ;;  %s4162_s5 = inlined_call_operand.vmem [shape: f32[2,1,64], index: 5, kind: input, shape index: {}]   ;;  %s4163_s7 = inlined_call_operand.vmem [shape: f32[2,1,32], index: 7, kind: input, shape index: {}]   ;;  %s4164_s10 = inlined_call_operand.vmem [shape: f32[2,1,32], index: 10, kind: input, shape index: {}]   ;;  %s4165_s11 = inlined_call_operand.vmem [shape: f32[2,1,32], index: 11, kind: input, shape index: {}]   ;;  %s4166_s12 = inlined_call_operand.vmem [shape: f32[16,32], index: 12, kind: output, shape index: {}]  }
   0x1   :  { %3081 = vmatprep.subr.bf16.mxu1 %v3487_v0  ;;  %v3391_v1 = vld [vmem:[%s4154_s2 + $0x8] sm:$0xff]   ;;  %3085 = vmatprep.mubr.msk.bf16.mxu1 %vm3488_vm0, %v3487_v0  ;;  %v3392_v2 = vld [vmem:[%s4154_s2] sm:$0xff]   ;;  %v44_v16 = vlaneseq  ;;  %v3490_v21 = vmov -1000000.0   ;;  %vm252_vm5 = vcmask 1043456   ;;  %s3494_s17 = smov 56  }
   0x2   :  { %3095 = vmatprep.subr.bf16.mxu0 %v3487_v0  ;;  %3097 = vmatprep.mubr.msk.bf16.mxu0 %vm3488_vm0, %v3487_v0  ;;  %v3581_v3 = vld [vmem:[%s4155_s0] sm:$0xff]  ;;  %v3586_v4 = vld [vmem:[%s4155_s0 + $0x8] sm:$0xff]  ;;  %s3489_s0 = smov 96   ;;  %s3495_s18 = smov 112   ;;  %vm1369_vm6 = vcmask 523264  }
   0x3   :  { %3082 = vmatpush3.bf16.msra.mxu1 %v3391_v1  ;;  %v52_v5 = vpack.c.bf16 %v3586_v4, %v3581_v3  ;;  %v45_v17 = vand.u32 127, %v44_v16  ;;  %v46_v18 = vld [vmem:[%s4156_s1] sm:$0xff]  ;;  %v47_v19 = vld [vmem:[%s4156_s1 + $0x8] sm:$0xff]  ;;  %s3491_s1 = smov 64   ;;  %s3496_s19 = smov 80  }
   0x4   :  { %3083 = vmatprep.subr.bf16.mxu1 %v3487_v0  ;;  %s3497_s24 = smov 48   ;;  %s3498_s25 = smov 72  }
   0x5   :  { %vm48_vm3 = vcmp.lt.s32.totalorder %v45_v17, %v46_v18  ;;  %vm49_vm4 = vcmp.lt.s32.totalorder %v45_v17, %v47_v19  ;;  %s3499_s26 = smov 104   ;;  %s3500_s29 = smov 40  }
   0x6   :  { %v3621_v22 = vsel %vm48_vm3, 0.0, %v3490_v21  ;;  %v3624_v28 = vsel %vm49_vm4, 0.0, %v3490_v21 }
   0x7   :  { %3084 = vmatpush3.bf16.msra.mxu1 %v3392_v2 }
   0x8   :  { %3089 = vmatprep.subr.bf16.mxu1 %v3487_v0 }
   0xa   :  { %3086 = vmatmul.mubr.msk.bf16.vlgmr.msra.gmra.mxu1 %vm69_vm1, %v52_v5 }
   0xb   :  { %3091 = vmatprep.mubr.msk.bf16.mxu1 %vm3488_vm0, %v3487_v0 }
  0xca   :  { %v107_v6 = vpop.f32.mrf.mxu1 }
  0xcb   :  { %v3595_v7 = vpack.c.bf16 %v107_v6, %v107_v6 }
  0xcc   :  { %v3087_v8 = vpop.f32.mrf.mxu1 }
  0xcd   :  { %121 = vrot.lane.b32.xlu0 %v3595_v7, %s3489_s0 }
  0xce   :  { %v110_v9 = vpop.f32.mrf.mxu1 }
  0xcf   :  { %v3599_v10 = vpack.c.bf16 %v110_v9, %v110_v9 }
  0xd0   :  { %v3088_v11 = vpop.f32.mrf.mxu1 }
  0xd1   :  { %171 = vrot.lane.b32.xlu0 %v3599_v10, %s3489_s0 }
 0x13f   :  { %v122_v12 = vpop.permute.xlu0 %121 }
 0x140   :  { %v128_v13 = vsel %vm123_vm2, %v122_v12, 0 }
 0x141   :  { %3090 = vmatpush3.bf16.xpose.msra.mxu1 %v128_v13 }
 0x142   :  { %3101 = vmatprep.subr.bf16.mxu1 %v3487_v0 }
 0x143   :  { %v172_v14 = vpop.permute.xlu0 %171 }
 0x144   :  { %v177_v15 = vsel %vm123_vm2, %v172_v14, 0 }
 0x145   :  { %3096 = vmatpush3.bf16.xpose.msra.mxu0 %v177_v15 }
 0x146   :  { %3107 = vmatprep.subr.bf16.mxu0 %v3487_v0 }
 0x148   :  { %3092 = vmatmul.mubr.msk.bf16.vlgmr.msra.gmra.mxu1 %vm123_vm2, %v3595_v7 }
 0x149   :  { %3103 = vmatprep.mubr.msk.bf16.mxu1 %vm3488_vm0, %v3487_v0 }
 0x14c   :  { %3098 = vmatmul.mubr.msk.bf16.vlgmr.msra.gmra.mxu0 %vm123_vm2, %v3599_v10 }
 0x14d   :  { %3109 = vmatprep.mubr.msk.bf16.mxu0 %vm3488_vm0, %v3487_v0 }
 0x208   :  { %v164_v20 = vpop.f32.mrf.mxu1 }
 0x209   :  { %v219_v23 = vmul.f32 0.35355338, %v164_v20 }
 0x20a   :  { %v3093_v24 = vpop.f32.mrf.mxu1 }
 0x20b   :  { %v221_v25 = vadd.f32 %v219_v23, %v3621_v22 }
 0x20c   :  { %v167_v26 = vpop.f32.mrf.mxu1  ;;  %v213_v27 = vpop.f32.mrf.mxu0 }
 0x20d   :  { %v220_v29 = vmul.f32 0.35355338, %v213_v27  ;;  %v223_v30 = vsel %vm123_vm2, %v221_v25, -inf }
 0x20e   :  { %v3099_v31 = vpop.f32.mrf.mxu0  ;;  %224 = vmax.xlane.f32.xlu1 %v223_v30  ;;  %v3094_v32 = vpop.f32.mrf.mxu1 }
 0x20f   :  { %v222_v33 = vadd.f32 %v220_v29, %v3624_v28 }
 0x210   :  { %v216_v34 = vpop.f32.mrf.mxu0 }
 0x211   :  { %v226_v35 = vsel %vm123_vm2, %v222_v33, -inf }
 0x212   :  { %v3100_v36 = vpop.f32.mrf.mxu0  ;;  %227 = vmax.xlane.f32.xlu1 %v226_v35 }
 0x223   :  { %247 = vrot.lane.b32.xlu1 %v3595_v7, %s3491_s1 }
 0x227   :  { %296 = vrot.lane.b32.xlu1 %v3599_v10, %s3491_s1 }
 0x22b   :  { %347 = vrot.lane.b32.xlu1 %v3595_v7, %s3492_s15 }
 0x297   :  { %v225_v37 = vpop.xlane.xlu1 %224 }
 0x298   :  { %v229_v38 = vsub.f32 %v221_v25, %v225_v37 }
 0x29a   :  { %v231_v39 = vmul.f32 1.442695, %v229_v38 }
 0x29b   :  { %v228_v40 = vpop.xlane.xlu1 %227 }
 0x29c   :  { %3407 = vpow2.f32 %v231_v39  ;;  %v230_v41 = vsub.f32 %v222_v33, %v228_v40 }
 0x29e   :  { %v233_v42 = vmul.f32 1.442695, %v230_v41 }
 0x29f   :  { %v248_v43 = vpop.permute.xlu1 %247 }
 0x2a0   :  { %3409 = vpow2.f32 %v233_v42  ;;  %v254_v44 = vsel %vm252_vm5, %v248_v43, 0 }
 0x2a1   :  { %3102 = vmatpush3.bf16.msra.mxu1 %v254_v44 }
 0x2a2   :  { %3113 = vmatprep.subr.bf16.mxu1 %v3487_v0 }
 0x2a3   :  { %v297_v45 = vpop.permute.xlu1 %296 }
 0x2a4   :  { %v302_v46 = vsel %vm252_vm5, %v297_v45, 0 }
 0x2a5   :  { %3108 = vmatpush3.bf16.msra.mxu0 %v302_v46 }
 0x2a6   :  { %3119 = vmatprep.subr.bf16.mxu0 %v3487_v0 }
 0x2a7   :  { %v348_v51 = vpop.permute.xlu1 %347 }
 0x2a8   :  { %v353_v58 = vsel %vm123_vm2, %v348_v51, 0  ;;  %v114_v51 = vld [vmem:[%s4157_s3] sm:$0xf] }
 0x2a9   :  { %v3408_v47 = vpop.eup %3407 }
 0x2aa   :  { %v235_v48 = vsel %vm123_vm2, %v3408_v47, 0.0 }
 0x2ab   :  { %236 = vadd.xlane.f32.xlu0 %v235_v48 }
 0x2ad   :  { %v3410_v49 = vpop.eup %3409 }
 0x2ae   :  { %v238_v50 = vsel %vm123_vm2, %v3410_v49, 0.0 }
 0x2af   :  { %239 = vadd.xlane.f32.xlu1 %v238_v50 }
 0x2c0   :  { %397 = vrot.lane.b32.xlu1 %v3599_v10, %s3492_s15 }
 0x2c1   :  { %345 = vrot.lane.b32.xlu0 %v3595_v7, %s3493_s16 }
 0x2c4   :  { %395 = vrot.lane.b32.xlu1 %v3599_v10, %s3493_s16 }
 0x334   :  { %v237_v52 = vpop.xlane.xlu0 %236 }
 0x335   :  { %3411 = vrcp.f32 %v237_v52 }
 0x338   :  { %v240_v53 = vpop.xlane.xlu1 %239  ;;  %v346_v63 = vpop.permute.xlu0 %345 }
 0x339   :  { %3413 = vrcp.f32 %v240_v53 }
 0x33c   :  { %v398_v60 = vpop.permute.xlu1 %397 }
 0x33d   :  { %v403_v62 = vsel %vm123_vm2, %v398_v60, 0 }
 0x340   :  { %v396_v1 = vpop.permute.xlu1 %395 }
 0x342   :  { %v3412_v54 = vpop.eup %3411 }
 0x343   :  { %v243_v55 = vmul.f32 %v3412_v54, %v3408_v47  ;;  %v621_v54 = vsel %vm252_vm5, %v114_v51, 0 }
 0x345   :  { %v245_v56 = vpack.c.bf16 %v243_v55, %v243_v55 }
 0x346   :  { %v3414_v57 = vpop.eup %3413 }
 0x347   :  { %3104 = vmatmul.mubr.msk.bf16.vlgmr.msra.gmra.mxu1 %vm123_vm2, %v245_v56  ;;  %v244_v59 = vmul.f32 %v3414_v57, %v3410_v49 }
 0x348   :  { %3114 = vmatpush3.bf16.xpose.msra.mxu1 %v353_v58  ;;  %3115 = vmatprep.mubr.msk.bf16.mxu1 %vm3488_vm0, %v3487_v0 }
 0x349   :  { %v246_v61 = vpack.c.bf16 %v244_v59, %v244_v59  ;;  %3125 = vmatprep.subr.bf16.mxu1 %v3487_v0  ;;  %v115_v59 = vld [vmem:[%s4157_s3 + $0x4] sm:$0xf] }
 0x34a   :  { %v574_v60 = vsel %vm252_vm5, %v115_v59, 0 }
 0x34b   :  { %3110 = vmatmul.mubr.msk.bf16.vlgmr.msra.gmra.mxu0 %vm123_vm2, %v246_v61 }
 0x34c   :  { %3120 = vmatpush3.bf16.xpose.msra.mxu0 %v403_v62  ;;  %3121 = vmatprep.mubr.msk.bf16.mxu0 %vm3488_vm0, %v3487_v0 }
 0x34d   :  { %3131 = vmatprep.subr.bf16.mxu0 %v3487_v0 }
 0x34f   :  { %3116 = vmatmul.mubr.msk.bf16.vlgmr.msra.gmra.mxu1 %vm123_vm2, %v346_v63 }
 0x350   :  { %3127 = vmatprep.mubr.msk.bf16.mxu1 %vm3488_vm0, %v3487_v0 }
 0x353   :  { %3122 = vmatmul.mubr.msk.bf16.vlgmr.msra.gmra.mxu0 %vm123_vm2, %v396_v1 }
 0x354   :  { %3133 = vmatprep.mubr.msk.bf16.mxu0 %vm3488_vm0, %v3487_v0 }
 0x407   :  { %v3663_v2 = vpop.f32.mrf.mxu1 }
 0x409   :  { %v3105_v5 = vpop.f32.mrf.mxu1 }
 0x40b   :  { %v293_v6 = vpop.f32.mrf.mxu1  ;;  %v3665_v8 = vpop.f32.mrf.mxu0 }
 0x40c   :  { %v344_v9 = vpack.c.bf16 %v3665_v8, %v3663_v2 }
 0x40d   :  { %v3106_v11 = vpop.f32.mrf.mxu1  ;;  %v3111_v12 = vpop.f32.mrf.mxu0 }
 0x40f   :  { %v341_v13 = vpop.f32.mrf.mxu0  ;;  %v389_v14 = vpop.f32.mrf.mxu1 }
 0x410   :  { %v445_v15 = vmul.f32 0.35355338, %v389_v14 }
 0x411   :  { %v3112_v16 = vpop.f32.mrf.mxu0  ;;  %v3117_v17 = vpop.f32.mrf.mxu1 }
 0x412   :  { %v447_v18 = vadd.f32 %v445_v15, %v3621_v22 }
 0x413   :  { %v392_v19 = vpop.f32.mrf.mxu1  ;;  %v439_v20 = vpop.f32.mrf.mxu0 }
 0x414   :  { %v446_v21 = vmul.f32 0.35355338, %v439_v20  ;;  %v449_v23 = vsel %vm123_vm2, %v447_v18, -inf }
 0x415   :  { %v3123_v24 = vpop.f32.mrf.mxu0  ;;  %450 = vmax.xlane.f32.xlu1 %v449_v23  ;;  %v3118_v25 = vpop.f32.mrf.mxu1 }
 0x416   :  { %v448_v26 = vadd.f32 %v446_v21, %v3624_v28 }
 0x417   :  { %v442_v27 = vpop.f32.mrf.mxu0 }
 0x418   :  { %v452_v29 = vsel %vm123_vm2, %v448_v26, -inf }
 0x419   :  { %453 = vmax.xlane.f32.xlu0 %v452_v29  ;;  %v3124_v30 = vpop.f32.mrf.mxu0 }
 0x42f   :  { %521 = vrot.lane.b32.xlu0 %v3599_v10, %s3494_s17 }
 0x433   :  { %664 = vrot.lane.b32.xlu0 %v3595_v7, %s3495_s18 }
 0x49e   :  { %v451_v31 = vpop.xlane.xlu1 %450 }
 0x49f   :  { %v455_v32 = vsub.f32 %v447_v18, %v451_v31 }
 0x4a1   :  { %v457_v33 = vmul.f32 1.442695, %v455_v32 }
 0x4a2   :  { %v454_v34 = vpop.xlane.xlu0 %453 }
 0x4a3   :  { %3415 = vpow2.f32 %v457_v33  ;;  %v456_v35 = vsub.f32 %v448_v26, %v454_v34 }
 0x4a5   :  { %v459_v36 = vmul.f32 1.442695, %v456_v35 }
 0x4a6   :  { %v522_v37 = vpop.permute.xlu0 %521 }
 0x4a7   :  { %3417 = vpow2.f32 %v459_v36  ;;  %v527_v38 = vsel %vm252_vm5, %v522_v37, 0 }
 0x4a8   :  { %3132 = vmatpush3.bf16.msra.mxu0 %v527_v38 }
 0x4a9   :  { %3143 = vmatprep.subr.bf16.mxu0 %v3487_v0 }
 0x4aa   :  { %v665_v13 = vpop.permute.xlu0 %664 }
 0x4b0   :  { %v3416_v39 = vpop.eup %3415 }
 0x4b1   :  { %v461_v40 = vsel %vm123_vm2, %v3416_v39, 0.0 }
 0x4b2   :  { %462 = vadd.xlane.f32.xlu1 %v461_v40 }
 0x4b4   :  { %v3418_v41 = vpop.eup %3417 }
 0x4b5   :  { %v464_v42 = vsel %vm123_vm2, %v3418_v41, 0.0 }
 0x4b6   :  { %465 = vadd.xlane.f32.xlu1 %v464_v42 }
 0x4c7   :  { %473 = vrot.lane.b32.xlu1 %v3595_v7, %s3494_s17 }
 0x4cb   :  { %666 = vrot.lane.b32.xlu1 %v3595_v7, %s3496_s19 }
 0x4cf   :  { %716 = vrot.lane.b32.xlu1 %v3599_v10, %s3496_s19 }
 0x4d3   :  { %714 = vrot.lane.b32.xlu1 %v3599_v10, %s3495_s18 }
 0x53b   :  { %v463_v43 = vpop.xlane.xlu1 %462 }
 0x53c   :  { %3419 = vrcp.f32 %v463_v43 }
 0x53f   :  { %v466_v44 = vpop.xlane.xlu1 %465 }
 0x540   :  { %3421 = vrcp.f32 %v466_v44 }
 0x543   :  { %v474_v45 = vpop.permute.xlu1 %473 }
 0x544   :  { %v479_v46 = vsel %vm252_vm5, %v474_v45, 0 }
 0x545   :  { %3126 = vmatpush3.bf16.msra.mxu1 %v479_v46 }
 0x546   :  { %3137 = vmatprep.subr.bf16.mxu1 %v3487_v0 }
 0x547   :  { %v667_v55 = vpop.permute.xlu1 %666 }
 0x548   :  { %v672_v8 = vsel %vm123_vm2, %v667_v55, 0 }
 0x549   :  { %v3420_v47 = vpop.eup %3419 }
 0x54a   :  { %v469_v48 = vmul.f32 %v3420_v47, %v3416_v39 }
 0x54b   :  { %v717_v56 = vpop.permute.xlu1 %716 }
 0x54c   :  { %v471_v49 = vpack.c.bf16 %v469_v48, %v469_v48  ;;  %v722_v57 = vsel %vm123_vm2, %v717_v56, 0 }
 0x54d   :  { %v3422_v50 = vpop.eup %3421 }
 0x54e   :  { %3128 = vmatmul.mubr.msk.bf16.vlgmr.msra.gmra.mxu1 %vm123_vm2, %v471_v49  ;;  %v470_v52 = vmul.f32 %v3422_v50, %v3418_v41 }
 0x54f   :  { %3139 = vmatprep.mubr.msk.bf16.mxu1 %vm3488_vm0, %v3487_v0  ;;  %v715_v58 = vpop.permute.xlu1 %714  ;;  %3138 = vmatpush3.bf16.msra.mxu1 %v574_v60 }
 0x550   :  { %v472_v53 = vpack.c.bf16 %v470_v52, %v470_v52  ;;  %3149 = vmatprep.subr.bf16.mxu1 %v3487_v0 }
 0x552   :  { %3134 = vmatmul.mubr.msk.bf16.vlgmr.msra.gmra.mxu0 %vm123_vm2, %v472_v53 }
 0x553   :  { %3144 = vmatpush3.bf16.msra.mxu0 %v621_v54  ;;  %3145 = vmatprep.mubr.msk.bf16.mxu0 %vm3488_vm0, %v3487_v0 }
 0x554   :  { %3155 = vmatprep.subr.bf16.mxu0 %v3487_v0 }
 0x55a   :  { %3146 = vmatmul.mubr.msk.bf16.vlgmr.msra.gmra.mxu0 %vm123_vm2, %v344_v9 }
 0x55b   :  { %3156 = vmatpush3.bf16.xpose.msra.mxu0 %v722_v57  ;;  %3157 = vmatprep.mubr.msk.bf16.mxu0 %vm3488_vm0, %v3487_v0 }
 0x55c   :  { %3167 = vmatprep.subr.bf16.mxu0 %v3487_v0 }
 0x562   :  { %3158 = vmatmul.mubr.msk.bf16.vlgmr.msra.gmra.mxu0 %vm123_vm2, %v715_v58 }
 0x563   :  { %3169 = vmatprep.mubr.msk.bf16.mxu0 %vm3488_vm0, %v3487_v0 }
 0x60e   :  { %v515_v61 = vpop.f32.mrf.mxu1 }
 0x610   :  { %v3129_v62 = vpop.f32.mrf.mxu1 }
 0x611   :  { %v116_v62 = vld [vmem:[%s4157_s3 + $0x8] sm:$0xf] }
 0x612   :  { %v518_v63 = vpop.f32.mrf.mxu1  ;;  %v563_v1 = vpop.f32.mrf.mxu0 }
 0x613   :  { %v569_v2 = vpack.c.bf16 %v563_v1, %v515_v61  ;;  %v893_v63 = vsel %vm252_vm5, %v116_v62, 0 }
 0x614   :  { %v3130_v5 = vpop.f32.mrf.mxu1  ;;  %v3135_v6 = vpop.f32.mrf.mxu0 }
 0x615   :  { %3140 = vmatmul.mubr.msk.bf16.vlgmr.msra.gmra.mxu1 %vm123_vm2, %v569_v2 }
 0x616   :  { %3150 = vmatpush3.bf16.xpose.msra.mxu1 %v672_v8  ;;  %v566_v9 = vpop.f32.mrf.mxu0  ;;  %3151 = vmatprep.mubr.msk.bf16.mxu1 %vm3488_vm0, %v3487_v0 }
 0x617   :  { %3161 = vmatprep.subr.bf16.mxu1 %v3487_v0 }
 0x618   :  { %v3136_v11 = vpop.f32.mrf.mxu0 }
 0x61a   :  { %v3723_v12 = vpop.f32.mrf.mxu0 }
 0x61c   :  { %v3147_v14 = vpop.f32.mrf.mxu0 }
 0x61d   :  { %3152 = vmatmul.mubr.msk.bf16.vlgmr.msra.gmra.mxu1 %vm123_vm2, %v665_v13 }
 0x61e   :  { %v3726_v15 = vpop.f32.mrf.mxu0  ;;  %3163 = vmatprep.mubr.msk.bf16.mxu1 %vm3488_vm0, %v3487_v0 }
 0x620   :  { %v3148_v16 = vpop.f32.mrf.mxu0 }
 0x622   :  { %v758_v17 = vpop.f32.mrf.mxu0 }
 0x623   :  { %v765_v18 = vmul.f32 0.35355338, %v758_v17 }
 0x624   :  { %v3159_v19 = vpop.f32.mrf.mxu0 }
 0x625   :  { %v767_v20 = vadd.f32 %v765_v18, %v3624_v28 }
 0x626   :  { %v761_v21 = vpop.f32.mrf.mxu0 }
 0x627   :  { %v771_v23 = vsel %vm123_vm2, %v767_v20, -inf }
 0x628   :  { %772 = vmax.xlane.f32.xlu1 %v771_v23  ;;  %v3160_v24 = vpop.f32.mrf.mxu0 }
 0x639   :  { %792 = vrot.lane.b32.xlu1 %v3595_v7, %s3497_s24 }
 0x63d   :  { %940 = vrot.lane.b32.xlu1 %v3595_v7, %s3498_s25 }
 0x641   :  { %990 = vrot.lane.b32.xlu1 %v3599_v10, %s3498_s25 }
 0x645   :  { %988 = vrot.lane.b32.xlu1 %v3599_v10, %s3499_s26 }
 0x6b1   :  { %v773_v25 = vpop.xlane.xlu1 %772 }
 0x6b2   :  { %v775_v29 = vsub.f32 %v767_v20, %v773_v25 }
 0x6b4   :  { %v778_v30 = vmul.f32 1.442695, %v775_v29 }
 0x6b5   :  { %v793_v26 = vpop.permute.xlu1 %792 }
 0x6b6   :  { %v798_v27 = vsel %vm252_vm5, %v793_v26, 0  ;;  %3423 = vpow2.f32 %v778_v30 }
 0x6b7   :  { %3162 = vmatpush3.bf16.msra.mxu1 %v798_v27 }
 0x6b8   :  { %3173 = vmatprep.subr.bf16.mxu1 %v3487_v0 }
 0x6b9   :  { %v941_v55 = vpop.permute.xlu1 %940 }
 0x6ba   :  { %v946_v57 = vsel %vm123_vm2, %v941_v55, 0 }
 0x6bd   :  { %v991_v9 = vpop.permute.xlu1 %990 }
 0x6be   :  { %v996_v20 = vsel %vm123_vm2, %v991_v9, 0 }
 0x6c1   :  { %v989_v26 = vpop.permute.xlu1 %988 }
 0x6c3   :  { %v3424_v41 = vpop.eup %3423 }
 0x6c4   :  { %v783_v43 = vsel %vm123_vm2, %v3424_v41, 0.0 }
 0x6d5   :  { %v3742_v31 = vpop.f32.mrf.mxu1 }
 0x6d7   :  { %v3141_v32 = vpop.f32.mrf.mxu1 }
 0x6d9   :  { %v3744_v33 = vpop.f32.mrf.mxu1 }
 0x6db   :  { %v3142_v34 = vpop.f32.mrf.mxu1 }
 0x6dd   :  { %v708_v35 = vpop.f32.mrf.mxu1 }
 0x6de   :  { %v764_v36 = vmul.f32 0.35355338, %v708_v35  ;;  %v658_v35 = vadd.f32 %v3723_v12, %v3742_v31 }
 0x6df   :  { %v3153_v37 = vpop.f32.mrf.mxu1 }
 0x6e0   :  { %v766_v38 = vadd.f32 %v764_v36, %v3621_v22 }
 0x6e1   :  { %v711_v39 = vpop.f32.mrf.mxu1 }
 0x6e2   :  { %v768_v40 = vsel %vm123_vm2, %v766_v38, -inf  ;;  %v661_v39 = vadd.f32 %v3726_v15, %v3744_v33 }
 0x6e3   :  { %769 = vmax.xlane.f32.xlu0 %v768_v40  ;;  %v3154_v42 = vpop.f32.mrf.mxu1 }
 0x6e7   :  { %784 = vadd.xlane.f32.xlu0 %v783_v43 }
 0x76c   :  { %v770_v44 = vpop.xlane.xlu0 %769 }
 0x76d   :  { %v774_v45 = vsub.f32 %v766_v38, %v770_v44 }
 0x76f   :  { %v776_v46 = vmul.f32 1.442695, %v774_v45 }
 0x770   :  { %v785_v49 = vpop.xlane.xlu0 %784 }
 0x771   :  { %3425 = vpow2.f32 %v776_v46 }
 0x772   :  { %3427 = vrcp.f32 %v785_v49 }
 0x77e   :  { %v3426_v47 = vpop.eup %3425 }
 0x77f   :  { %v780_v48 = vsel %vm123_vm2, %v3426_v47, 0.0  ;;  %v3428_v50 = vpop.eup %3427 }
 0x780   :  { %781 = vadd.xlane.f32.xlu0 %v780_v48  ;;  %v789_v52 = vmul.f32 %v3428_v50, %v3424_v41 }
 0x782   :  { %v791_v56 = vpack.c.bf16 %v789_v52, %v789_v52 }
 0x796   :  { %840 = vrot.lane.b32.xlu0 %v3599_v10, %s3497_s24 }
 0x79a   :  { %938 = vrot.lane.b32.xlu0 %v3595_v7, %s3499_s26 }
 0x809   :  { %v782_v51 = vpop.xlane.xlu0 %781 }
 0x80a   :  { %3429 = vrcp.f32 %v782_v51 }
 0x80d   :  { %v841_v53 = vpop.permute.xlu0 %840 }
 0x80e   :  { %v846_v54 = vsel %vm252_vm5, %v841_v53, 0 }
 0x80f   :  { %3168 = vmatpush3.bf16.msra.mxu0 %v846_v54 }
 0x810   :  { %3179 = vmatprep.subr.bf16.mxu0 %v3487_v0 }
 0x811   :  { %v939_v60 = vpop.permute.xlu0 %938 }
 0x812   :  { %3170 = vmatmul.mubr.msk.bf16.vlgmr.msra.gmra.mxu0 %vm123_vm2, %v791_v56  ;;  %v117_v56 = vld [vmem:[%s4157_s3 + $0xc] sm:$0xf] }
 0x813   :  { %3180 = vmatpush3.bf16.xpose.msra.mxu0 %v946_v57  ;;  %3181 = vmatprep.mubr.msk.bf16.mxu0 %vm3488_vm0, %v3487_v0  ;;  %v1167_v57 = vsel %vm252_vm5, %v117_v56, 0 }
 0x814   :  { %3191 = vmatprep.subr.bf16.mxu0 %v3487_v0 }
 0x817   :  { %v3430_v58 = vpop.eup %3429 }
 0x818   :  { %v788_v59 = vmul.f32 %v3430_v58, %v3426_v47 }
 0x81a   :  { %3182 = vmatmul.mubr.msk.bf16.vlgmr.msra.gmra.mxu0 %vm123_vm2, %v939_v60  ;;  %v790_v61 = vpack.c.bf16 %v788_v59, %v788_v59 }
 0x81b   :  { %3193 = vmatprep.mubr.msk.bf16.mxu0 %vm3488_vm0, %v3487_v0 }
 0x81c   :  { %3164 = vmatmul.mubr.msk.bf16.vlgmr.msra.gmra.mxu1 %vm123_vm2, %v790_v61 }
 0x81d   :  { %3175 = vmatprep.mubr.msk.bf16.mxu1 %vm3488_vm0, %v3487_v0  ;;  %3174 = vmatpush3.bf16.msra.mxu1 %v893_v63 }
 0x81e   :  { %3185 = vmatprep.subr.bf16.mxu1 %v3487_v0 }
 0x8d2   :  { %v882_v1 = vpop.f32.mrf.mxu0 }
 0x8d4   :  { %v3171_v2 = vpop.f32.mrf.mxu0 }
 0x8d6   :  { %v885_v5 = vpop.f32.mrf.mxu0 }
 0x8d8   :  { %v3172_v6 = vpop.f32.mrf.mxu0 }
 0x8da   :  { %v982_v8 = vpop.f32.mrf.mxu0 }
 0x8db   :  { %v1038_v11 = vmul.f32 0.35355338, %v982_v8 }
 0x8dc   :  { %v834_v13 = vpop.f32.mrf.mxu1  ;;  %v3183_v14 = vpop.f32.mrf.mxu0 }
 0x8dd   :  { %v888_v16 = vpack.c.bf16 %v882_v1, %v834_v13  ;;  %v1040_v17 = vadd.f32 %v1038_v11, %v3621_v22 }
 0x8de   :  { %v3165_v18 = vpop.f32.mrf.mxu1  ;;  %v985_v19 = vpop.f32.mrf.mxu0 }
 0x8df   :  { %3176 = vmatmul.mubr.msk.bf16.vlgmr.msra.gmra.mxu1 %vm123_vm2, %v888_v16  ;;  %v1042_v21 = vsel %vm123_vm2, %v1040_v17, -inf }
 0x8e0   :  { %3186 = vmatpush3.bf16.xpose.msra.mxu1 %v996_v20  ;;  %1043 = vmax.xlane.f32.xlu0 %v1042_v21  ;;  %v837_v23 = vpop.f32.mrf.mxu1  ;;  %v3184_v24 = vpop.f32.mrf.mxu0 }
 0x8e1   :  { %3187 = vmatprep.mubr.msk.bf16.mxu1 %vm3488_vm0, %v3487_v0  ;;  %3197 = vmatprep.subr.bf16.mxu1 %v3487_v0 }
 0x8e2   :  { %v3166_v25 = vpop.f32.mrf.mxu1 }
 0x8e7   :  { %3188 = vmatmul.mubr.msk.bf16.vlgmr.msra.gmra.mxu1 %vm123_vm2, %v989_v26 }
 0x8e8   :  { %3199 = vmatprep.mubr.msk.bf16.mxu1 %vm3488_vm0, %v3487_v0 }
 0x969   :  { %v1044_v27 = vpop.xlane.xlu0 %1043 }
 0x96a   :  { %v1048_v29 = vsub.f32 %v1040_v17, %v1044_v27 }
 0x96c   :  { %v1050_v30 = vmul.f32 1.442695, %v1048_v29 }
 0x96e   :  { %3431 = vpow2.f32 %v1050_v30 }
 0x97b   :  { %v3432_v32 = vpop.eup %3431 }
 0x97c   :  { %v1054_v34 = vsel %vm123_vm2, %v3432_v32, 0.0 }
 0x97d   :  { %1055 = vadd.xlane.f32.xlu0 %v1054_v34 }
 0x99f   :  { %v929_v36 = vpop.f32.mrf.mxu1 }
 0x9a0   :  { %v936_v37 = vadd.f32 %v929_v36, %v658_v35 }
 0x9a1   :  { %v3177_v38 = vpop.f32.mrf.mxu1 }
 0x9a2   :  { %v3394_v38 = vld [vmem:[%s4158_s4] sm:$0xff]  }
 0x9a3   :  { %v932_v40 = vpop.f32.mrf.mxu1 }
 0x9a4   :  { %v937_v41 = vadd.f32 %v932_v40, %v661_v39  ;;  %v3395_v39 = vld [vmem:[%s4159_s6 + $0x18] sm:$0xff]  }
 0x9a5   :  { %v3178_v42 = vpop.f32.mrf.mxu1 }
 0x9a7   :  { %v1032_v43 = vpop.f32.mrf.mxu1 }
 0x9a8   :  { %v1039_v44 = vmul.f32 0.35355338, %v1032_v43 }
 0x9a9   :  { %v3189_v45 = vpop.f32.mrf.mxu1 }
 0x9aa   :  { %v1041_v46 = vadd.f32 %v1039_v44, %v3624_v28 }
 0x9ab   :  { %v1035_v47 = vpop.f32.mrf.mxu1 }
 0x9ac   :  { %v1045_v48 = vsel %vm123_vm2, %v1041_v46, -inf }
 0x9ad   :  { %1046 = vmax.xlane.f32.xlu1 %v1045_v48  ;;  %v3190_v49 = vpop.f32.mrf.mxu1  ;;  %v2902_v48 = vld [vmem:[%s4160_s8] ss:$0 sm:$0xff] }
 0x9be   :  { %1066 = vrot.lane.b32.xlu1 %v3595_v7, %s3500_s29 }
 0xa06   :  { %v1056_v12 = vpop.xlane.xlu0 %1055 }
 0xa07   :  { %3433 = vrcp.f32 %v1056_v12 }
 0xa14   :  { %v3434_v15 = vpop.eup %3433 }
 0xa15   :  { %v1062_v51 = vmul.f32 %v3434_v15, %v3432_v32 }
 0xa17   :  { %v1064_v54 = vpack.c.bf16 %v1062_v51, %v1062_v51 }
 0xa36   :  { %v1047_v31 = vpop.xlane.xlu1 %1046 }
 0xa37   :  { %v1049_v33 = vsub.f32 %v1041_v46, %v1047_v31  ;;  %v2903_v31 = vld [vmem:[%s4161_s9] ss:$0 sm:$0xff] }
 0xa39   :  { %v1052_v50 = vmul.f32 1.442695, %v1049_v33 }
 0xa3a   :  { %v1067_v52 = vpop.permute.xlu1 %1066 }
 0xa3b   :  { %3435 = vpow2.f32 %v1052_v50  ;;  %v1072_v53 = vsel %vm252_vm5, %v1067_v52, 0 }
 0xa3c   :  { %3192 = vmatpush3.bf16.msra.mxu0 %v1072_v53  ;;  %v3396_v53 = vld [vmem:[%s4159_s6 + $0x10] sm:$0xff]  }
 0xa3d   :  { %3203 = vmatprep.subr.bf16.mxu0 %v3487_v0 }
 0xa3f   :  { %3194 = vmatmul.mubr.msk.bf16.vlgmr.msra.gmra.mxu0 %vm123_vm2, %v1064_v54  ;;  %v3397_v54 = vld [vmem:[%s4159_s6 + $0x8] sm:$0xff]  }
 0xa40   :  { %3205 = vmatprep.mubr.msk.bf16.mxu0 %vm3488_vm0, %v3487_v0  ;;  %3204 = vmatpush3.bf16.msra.mxu0 %v1167_v57 }
 0xa41   :  { %3217 = vmatprep.subr.bf16.mxu0 %v3487_v0 }
 0xa48   :  { %v3436_v7 = vpop.eup %3435 }
 0xa49   :  { %v1057_v55 = vsel %vm123_vm2, %v3436_v7, 0.0 }
 0xa4a   :  { %1058 = vadd.xlane.f32.xlu0 %v1057_v55  ;;  %v2904_v55 = vld [vmem:[%s4162_s5] ss:$0 sm:$0xff] }
 0xa60   :  { %1114 = vrot.lane.b32.xlu0 %v3599_v10, %s3500_s29 }
 0xad3   :  { %v1059_v58 = vpop.xlane.xlu0 %1058 }
 0xad4   :  { %3437 = vrcp.f32 %v1059_v58 }
 0xad7   :  { %v1115_v59 = vpop.permute.xlu0 %1114 }
 0xad8   :  { %v1120_v60 = vsel %vm252_vm5, %v1115_v59, 0 }
 0xad9   :  { %3198 = vmatpush3.bf16.msra.mxu1 %v1120_v60 }
 0xada   :  { %3209 = vmatprep.subr.bf16.mxu1 %v3487_v0 }
 0xae1   :  { %v3438_v61 = vpop.eup %3437 }
 0xae2   :  { %v1063_v62 = vmul.f32 %v3438_v61, %v3436_v7  ;;  %v3398_v7 = vld [vmem:[%s4159_s6] sm:$0xff]  }
 0xae4   :  { %v1065_v10 = vpack.c.bf16 %v1063_v62, %v1063_v62 }
 0xae6   :  { %3200 = vmatmul.mubr.msk.bf16.vlgmr.msra.gmra.mxu1 %vm123_vm2, %v1065_v10 }
 0xae7   :  { %3213 = vmatprep.mubr.msk.bf16.mxu1 %vm3488_vm0, %v3487_v0 }
 0xaff   :  { %v1108_v63 = vpop.f32.mrf.mxu0 }
 0xb01   :  { %v3195_v1 = vpop.f32.mrf.mxu0 }
 0xb02   :  { %v2908_v1 = vld [vmem:[%s4163_s7] ss:$0 sm:$0xff] }
 0xb03   :  { %v1111_v2 = vpop.f32.mrf.mxu0 }
 0xb05   :  { %v3196_v5 = vpop.f32.mrf.mxu0 }
 0xba6   :  { %v1156_v6 = vpop.f32.mrf.mxu1 }
 0xba7   :  { %v1162_v8 = vpack.c.bf16 %v1156_v6, %v1108_v63 }
 0xba8   :  { %v3201_v9 = vpop.f32.mrf.mxu1 }
 0xba9   :  { %3206 = vmatmul.mubr.msk.bf16.vlgmr.msra.gmra.mxu0 %vm123_vm2, %v1162_v8 }
 0xbaa   :  { %v1159_v11 = vpop.f32.mrf.mxu1  ;;  %3225 = vmatprep.mubr.msk.bf16.mxu0 %vm3488_vm0, %v3487_v0  ;;  %3218 = vmatpush3.bf16.msra.mxu0 %v3395_v39 }
 0xbab   :  { %3219 = vmatprep.subr.bf16.mxu0 %v3487_v0 }
 0xbac   :  { %v3202_v13 = vpop.f32.mrf.mxu1 }
 0xbae   :  { %3220 = vmatpush3.bf16.msra.mxu0 %v3396_v53 }
 0xbaf   :  { %3221 = vmatprep.subr.bf16.mxu0 %v3487_v0 }
 0xbb2   :  { %3222 = vmatpush3.bf16.msra.mxu0 %v3397_v54 }
 0xbb3   :  { %3223 = vmatprep.subr.bf16.mxu0 %v3487_v0 }
 0xbb6   :  { %3224 = vmatpush3.bf16.msra.mxu0 %v3398_v7 }
 0xbb7   :  { %3243 = vmatprep.subr.bf16.mxu0 %v3487_v0 }
 0xc69   :  { %v1203_v14 = vpop.f32.mrf.mxu0 }
 0xc6a   :  { %v1210_v16 = vadd.f32 %v1203_v14, %v936_v37 }
 0xc6b   :  { %v3207_v17 = vpop.f32.mrf.mxu0 }
 0xc6c   :  { %v1214_v18 = vadd.f32 %v1210_v16, %v3581_v3 }
 0xc6d   :  { %v1206_v19 = vpop.f32.mrf.mxu0 }
 0xc6e   :  { %v1211_v20 = vadd.f32 %v1206_v19, %v937_v41  ;;  %v1216_v21 = vsel %vm69_vm1, %v1214_v18, 0.0 }
 0xc6f   :  { %1217 = vadd.xlane.f32.xlu1 %v1216_v21  ;;  %v3208_v23 = vpop.f32.mrf.mxu0 }
 0xc70   :  { %v1215_v24 = vadd.f32 %v1211_v20, %v3586_v4  ;;  %v3393_v4 = vld [vmem:[%s4158_s4 + $0x8] sm:$0xff]  }
 0xc71   :  { %3210 = vmatpush3.bf16.msra.mxu1 %v3393_v4 }
 0xc72   :  { %v1219_v25 = vsel %vm69_vm1, %v1215_v24, 0.0  ;;  %3211 = vmatprep.subr.bf16.mxu1 %v3487_v0 }
 0xc73   :  { %1220 = vadd.xlane.f32.xlu0 %v1219_v25 }
 0xc75   :  { %3212 = vmatpush3.bf16.msra.mxu1 %v3394_v38 }
 0xc76   :  { %3229 = vmatprep.subr.bf16.mxu1 %v3487_v0 }
 0xcf8   :  { %v1218_v26 = vpop.xlane.xlu1 %1217 }
 0xcf9   :  { %v1223_v27 = vmul.f32 0.03125, %v1218_v26 }
 0xcfb   :  { %v1225_v29 = vsub.f32 %v1214_v18, %v1223_v27 }
 0xcfc   :  { %v1221_v30 = vpop.xlane.xlu0 %1220 }
 0xcfd   :  { %v1224_v32 = vmul.f32 0.03125, %v1221_v30  ;;  %v1227_v34 = vmul.f32 %v1225_v29, %v1225_v29  ;;  %v3399_v30 = vld [vmem:[%s4154_s2 + $0x18] sm:$0xff]  }
 0xcff   :  { %v1226_v35 = vsub.f32 %v1215_v24, %v1224_v32  ;;  %v1229_v3 = vsel %vm69_vm1, %v1227_v34, 0.0  ;;  %v3400_v32 = vld [vmem:[%s4154_s2 + $0x10] sm:$0xff]  }
 0xd00   :  { %1230 = vadd.xlane.f32.xlu1 %v1229_v3 }
 0xd01   :  { %v1228_v36 = vmul.f32 %v1226_v35, %v1226_v35 }
 0xd03   :  { %v1232_v37 = vsel %vm69_vm1, %v1228_v36, 0.0 }
 0xd04   :  { %1233 = vadd.xlane.f32.xlu0 %v1232_v37 }
 0xd89   :  { %v1231_v40 = vpop.xlane.xlu1 %1230 }
 0xd8a   :  { %v1235_v41 = vmul.f32 0.03125, %v1231_v40  ;;  %v2914_v40 = vld [vmem:[%s4164_s10] ss:$0 sm:$0xff] }
 0xd8c   :  { %v1237_v42 = vadd.f32 1e-05, %v1235_v41 }
 0xd8d   :  { %v1234_v43 = vpop.xlane.xlu0 %1233 }
 0xd8e   :  { %3439 = vrsqrt.f32 %v1237_v42  ;;  %v1236_v44 = vmul.f32 0.03125, %v1234_v43 }
 0xd90   :  { %v1238_v45 = vadd.f32 1e-05, %v1236_v44  ;;  %v2915_v44 = vld [vmem:[%s4165_s11] ss:$0 sm:$0xff] }
 0xd92   :  { %3441 = vrsqrt.f32 %v1238_v45 }
 0xd9b   :  { %v3440_v46 = vpop.eup %3439 }
 0xd9c   :  { %v1241_v47 = vmul.f32 %v3440_v46, %v1225_v29 }
 0xd9e   :  { %v1249_v15 = vmul.f32 %v2902_v48, %v1241_v47 }
 0xd9f   :  { %v3442_v49 = vpop.eup %3441 }
 0xda0   :  { %v1242_v12 = vmul.f32 %v3442_v49, %v1226_v35  ;;  %v1257_v50 = vadd.f32 %v2903_v31, %v1249_v15 }
 0xda2   :  { %v1250_v33 = vmul.f32 %v2902_v48, %v1242_v12 }
 0xda4   :  { %v1258_v51 = vadd.f32 %v2903_v31, %v1250_v33 }
 0xda6   :  { %v1273_v52 = vpack.c.bf16 %v1258_v51, %v1257_v50 }
 0xda8   :  { %3214 = vmatmul.mubr.msk.bf16.vlgmr.msra.gmra.mxu1 %vm69_vm1, %v1273_v52 }
 0xda9   :  { %3233 = vmatprep.mubr.msk.bf16.mxu1 %vm3488_vm0, %v3487_v0  ;;  %3230 = vmatpush3.bf16.msra.mxu1 %v3399_v30 }
 0xdaa   :  { %3231 = vmatprep.subr.bf16.mxu1 %v3487_v0 }
 0xdad   :  { %3232 = vmatpush3.bf16.msra.mxu1 %v3400_v32 }
 0xdae   :  { %3237 = vmatprep.subr.bf16.mxu1 %v3487_v0 }
 0xe68   :  { %v1329_v56 = vpop.f32.mrf.mxu1 }
 0xe69   :  { %v1330_v58 = vadd.f32 %v2904_v55, %v1329_v56 }
 0xe6a   :  { %v3215_v57 = vpop.f32.mrf.mxu1 }
 0xe6b   :  { %v1336_v62 = vmax.f32 %v1330_v58, 0.0 }
 0xe6c   :  { %v1332_v59 = vpop.f32.mrf.mxu1 }
 0xe6d   :  { %v1333_v60 = vadd.f32 %v2904_v55, %v1332_v59 }
 0xe6e   :  { %v3216_v61 = vpop.f32.mrf.mxu1 }
 0xe6f   :  { %v1337_v10 = vmax.f32 %v1333_v60, 0.0 }
 0xe71   :  { %v1338_v63 = vpack.c.bf16 %v1337_v10, %v1336_v62 }
 0xe73   :  { %3226 = vmatmul.mubr.msk.bf16.vlgmr.msra.gmra.mxu0 %vm1369_vm6, %v1338_v63 }
 0xe74   :  { %3245 = vmatprep.mubr.msk.bf16.mxu0 %vm3488_vm0, %v3487_v0 }
 0xf33   :  { %v1407_v2 = vpop.f32.mrf.mxu0 }
 0xf34   :  { %v1408_v5 = vadd.f32 %v2908_v1, %v1407_v2 }
 0xf35   :  { %v3227_v6 = vpop.f32.mrf.mxu0 }
 0xf36   :  { %v1416_v8 = vadd.f32 %v1408_v5, %v1257_v50 }
 0xf37   :  { %v1410_v9 = vpop.f32.mrf.mxu0 }
 0xf38   :  { %v1411_v11 = vadd.f32 %v2908_v1, %v1410_v9  ;;  %v1418_v13 = vsel %vm69_vm1, %v1416_v8, 0.0 }
 0xf39   :  { %1419 = vadd.xlane.f32.xlu1 %v1418_v13  ;;  %v3228_v14 = vpop.f32.mrf.mxu0 }
 0xf3a   :  { %v1417_v16 = vadd.f32 %v1411_v11, %v1258_v51 }
 0xf3c   :  { %v1421_v17 = vsel %vm69_vm1, %v1417_v16, 0.0 }
 0xf3d   :  { %1422 = vadd.xlane.f32.xlu0 %v1421_v17 }
 0xfc2   :  { %v1420_v18 = vpop.xlane.xlu1 %1419 }
 0xfc3   :  { %v1424_v19 = vmul.f32 0.03125, %v1420_v18 }
 0xfc5   :  { %v1426_v20 = vsub.f32 %v1416_v8, %v1424_v19 }
 0xfc6   :  { %v1423_v21 = vpop.xlane.xlu0 %1422 }
 0xfc7   :  { %v1425_v23 = vmul.f32 0.03125, %v1423_v21  ;;  %v1428_v24 = vmul.f32 %v1426_v20, %v1426_v20 }
 0xfc9   :  { %v1427_v25 = vsub.f32 %v1417_v16, %v1425_v23  ;;  %v1430_v26 = vsel %vm69_vm1, %v1428_v24, 0.0 }
 0xfca   :  { %1431 = vadd.xlane.f32.xlu1 %v1430_v26 }
 0xfcb   :  { %v1429_v27 = vmul.f32 %v1427_v25, %v1427_v25 }
 0xfcd   :  { %v1433_v29 = vsel %vm69_vm1, %v1429_v27, 0.0 }
 0xfce   :  { %1434 = vadd.xlane.f32.xlu0 %v1433_v29 }
0x1053   :  { %v1432_v34 = vpop.xlane.xlu1 %1431 }
0x1054   :  { %v1436_v35 = vmul.f32 0.03125, %v1432_v34 }
0x1056   :  { %v1438_v3 = vadd.f32 1e-05, %v1436_v35 }
0x1057   :  { %v1435_v36 = vpop.xlane.xlu0 %1434 }
0x1058   :  { %3443 = vrsqrt.f32 %v1438_v3  ;;  %v1437_v37 = vmul.f32 0.03125, %v1435_v36 }
0x105a   :  { %v1439_v4 = vadd.f32 1e-05, %v1437_v37 }
0x105c   :  { %3445 = vrsqrt.f32 %v1439_v4 }
0x1065   :  { %v3444_v38 = vpop.eup %3443 }
0x1066   :  { %v1442_v39 = vmul.f32 %v3444_v38, %v1426_v20 }
0x1068   :  { %v1450_v43 = vmul.f32 %v2914_v40, %v1442_v39 }
0x1069   :  { %v3446_v41 = vpop.eup %3445 }
0x106a   :  { %v1443_v42 = vmul.f32 %v3446_v41, %v1427_v25  ;;  %v3878_v46 = vadd.f32 %v2915_v44, %v1450_v43 }
0x106c   :  { %v1451_v45 = vmul.f32 %v2914_v40, %v1443_v42 }
0x106e   :  { %v3880_v47 = vadd.f32 %v2915_v44, %v1451_v45 }
0x1070   :  { %v1460_v48 = vpack.c.bf16 %v3880_v47, %v3878_v46 }
0x1072   :  { %3234 = vmatmul.mubr.msk.bf16.vlgmr.msra.gmra.mxu1 %vm69_vm1, %v1460_v48 }
0x1073   :  { %3239 = vmatprep.mubr.msk.bf16.mxu1 %vm3488_vm0, %v3487_v0 }
0x1132   :  { %v1515_v49 = vpop.f32.mrf.mxu1 }
0x1133   :  { %v3887_v12 = vpack.c.bf16 %v1515_v49, %v1515_v49 }
0x1134   :  { %v3235_v15 = vpop.f32.mrf.mxu1 }
0x1135   :  { %1530 = vrot.lane.b32.xlu1 %v3887_v12, %s3489_s0 }
0x1136   :  { %v1518_v31 = vpop.f32.mrf.mxu1 }
0x1137   :  { %v3891_v33 = vpack.c.bf16 %v1518_v31, %v1518_v31 }
0x1138   :  { %v3236_v50 = vpop.f32.mrf.mxu1 }
0x1139   :  { %1579 = vrot.lane.b32.xlu0 %v3891_v33, %s3489_s0 }
0x11a7   :  { %v1531_v51 = vpop.permute.xlu1 %1530 }
0x11a8   :  { %v1536_v52 = vsel %vm123_vm2, %v1531_v51, 0 }
0x11a9   :  { %3238 = vmatpush3.bf16.xpose.msra.mxu1 %v1536_v52 }
0x11aa   :  { %3249 = vmatprep.subr.bf16.mxu1 %v3487_v0 }
0x11ab   :  { %v1580_v53 = vpop.permute.xlu0 %1579 }
0x11ac   :  { %v1585_v54 = vsel %vm123_vm2, %v1580_v53, 0 }
0x11ad   :  { %3244 = vmatpush3.bf16.xpose.msra.mxu0 %v1585_v54 }
0x11ae   :  { %3255 = vmatprep.subr.bf16.mxu0 %v3487_v0 }
0x11b0   :  { %3240 = vmatmul.mubr.msk.bf16.vlgmr.msra.gmra.mxu1 %vm123_vm2, %v3887_v12 }
0x11b1   :  { %3251 = vmatprep.mubr.msk.bf16.mxu1 %vm3488_vm0, %v3487_v0 }
0x11b4   :  { %3246 = vmatmul.mubr.msk.bf16.vlgmr.msra.gmra.mxu0 %vm123_vm2, %v3891_v33 }
0x11b5   :  { %3257 = vmatprep.mubr.msk.bf16.mxu0 %vm3488_vm0, %v3487_v0 }
0x1270   :  { %v1572_v7 = vpop.f32.mrf.mxu1 }
0x1271   :  { %v1627_v55 = vmul.f32 0.35355338, %v1572_v7 }
0x1272   :  { %v3241_v56 = vpop.f32.mrf.mxu1 }
0x1273   :  { %v1629_v57 = vadd.f32 %v1627_v55, %v3621_v22 }
0x1274   :  { %v1575_v58 = vpop.f32.mrf.mxu1  ;;  %v1621_v59 = vpop.f32.mrf.mxu0 }
0x1275   :  { %v1628_v60 = vmul.f32 0.35355338, %v1621_v59  ;;  %v1631_v61 = vsel %vm123_vm2, %v1629_v57, -inf }
0x1276   :  { %v3247_v62 = vpop.f32.mrf.mxu0  ;;  %1632 = vmax.xlane.f32.xlu1 %v1631_v61  ;;  %v3242_v10 = vpop.f32.mrf.mxu1 }
0x1277   :  { %v1630_v63 = vadd.f32 %v1628_v60, %v3624_v28 }
0x1278   :  { %v1624_v1 = vpop.f32.mrf.mxu0 }
0x1279   :  { %v1634_v2 = vsel %vm123_vm2, %v1630_v63, -inf }
0x127a   :  { %1635 = vmax.xlane.f32.xlu0 %v1634_v2  ;;  %v3248_v5 = vpop.f32.mrf.mxu0 }
0x1287   :  { %1655 = vrot.lane.b32.xlu1 %v3887_v12, %s3491_s1 }
0x12ff   :  { %v1633_v6 = vpop.xlane.xlu1 %1632 }
0x1300   :  { %v1637_v8 = vsub.f32 %v1629_v57, %v1633_v6 }
0x1302   :  { %v1639_v9 = vmul.f32 1.442695, %v1637_v8 }
0x1303   :  { %v1636_v11 = vpop.xlane.xlu0 %1635  ;;  %v1656_v13 = vpop.permute.xlu1 %1655 }
0x1304   :  { %3447 = vpow2.f32 %v1639_v9  ;;  %v1638_v14 = vsub.f32 %v1630_v63, %v1636_v11  ;;  %v1661_v16 = vsel %vm252_vm5, %v1656_v13, 0 }
0x1305   :  { %3250 = vmatpush3.bf16.msra.mxu1 %v1661_v16 }
0x1306   :  { %v1641_v17 = vmul.f32 1.442695, %v1638_v14  ;;  %3261 = vmatprep.subr.bf16.mxu1 %v3487_v0 }
0x1308   :  { %3449 = vpow2.f32 %v1641_v17 }
0x1311   :  { %v3448_v18 = vpop.eup %3447 }
0x1312   :  { %v1643_v19 = vsel %vm123_vm2, %v3448_v18, 0.0 }
0x1313   :  { %1644 = vadd.xlane.f32.xlu1 %v1643_v19 }
0x1315   :  { %v3450_v20 = vpop.eup %3449 }
0x1316   :  { %v1646_v21 = vsel %vm123_vm2, %v3450_v20, 0.0 }
0x1317   :  { %1647 = vadd.xlane.f32.xlu0 %v1646_v21 }
0x1324   :  { %1754 = vrot.lane.b32.xlu1 %v3887_v12, %s3492_s15 }
0x1328   :  { %1804 = vrot.lane.b32.xlu1 %v3891_v33, %s3492_s15 }
0x132c   :  { %1802 = vrot.lane.b32.xlu1 %v3891_v33, %s3493_s16 }
0x132d   :  { %1703 = vrot.lane.b32.xlu0 %v3891_v33, %s3491_s1 }
0x1331   :  { %1752 = vrot.lane.b32.xlu0 %v3887_v12, %s3493_s16 }
0x139c   :  { %v1645_v23 = vpop.xlane.xlu1 %1644 }
0x139d   :  { %3451 = vrcp.f32 %v1645_v23 }
0x13a0   :  { %v1648_v24 = vpop.xlane.xlu0 %1647  ;;  %v1755_v29 = vpop.permute.xlu1 %1754 }
0x13a1   :  { %3453 = vrcp.f32 %v1648_v24  ;;  %v1760_v35 = vsel %vm123_vm2, %v1755_v29, 0 }
0x13a4   :  { %v1704_v25 = vpop.permute.xlu0 %1703  ;;  %v1805_v36 = vpop.permute.xlu1 %1804 }
0x13a5   :  { %v1709_v26 = vsel %vm252_vm5, %v1704_v25, 0  ;;  %v1810_v4 = vsel %vm123_vm2, %v1805_v36, 0  ;;  %v2923_v25 = vld [vmem:[%s4157_s3 + $0x10] sm:$0xf] }
0x13a6   :  { %3256 = vmatpush3.bf16.msra.mxu0 %v1709_v26  ;;  %v2028_v29 = vsel %vm252_vm5, %v2923_v25, 0 }
0x13a7   :  { %3267 = vmatprep.subr.bf16.mxu0 %v3487_v0 }
0x13a8   :  { %v1753_v38 = vpop.permute.xlu0 %1752  ;;  %v1803_v39 = vpop.permute.xlu1 %1802 }
0x13aa   :  { %v3452_v27 = vpop.eup %3451 }
0x13ab   :  { %v1651_v30 = vmul.f32 %v3452_v27, %v3448_v18 }
0x13ad   :  { %v1653_v32 = vpack.c.bf16 %v1651_v30, %v1651_v30 }
0x13ae   :  { %v3454_v34 = vpop.eup %3453 }
0x13af   :  { %3252 = vmatmul.mubr.msk.bf16.vlgmr.msra.gmra.mxu1 %vm123_vm2, %v1653_v32  ;;  %v1652_v3 = vmul.f32 %v3454_v34, %v3450_v20 }
0x13b0   :  { %3262 = vmatpush3.bf16.xpose.msra.mxu1 %v1760_v35  ;;  %3263 = vmatprep.mubr.msk.bf16.mxu1 %vm3488_vm0, %v3487_v0 }
0x13b1   :  { %v1654_v37 = vpack.c.bf16 %v1652_v3, %v1652_v3  ;;  %3273 = vmatprep.subr.bf16.mxu1 %v3487_v0  ;;  %v2924_v3 = vld [vmem:[%s4157_s3 + $0x14] sm:$0xf] }
0x13b2   :  { %v1981_v36 = vsel %vm252_vm5, %v2924_v3, 0 }
0x13b3   :  { %3258 = vmatmul.mubr.msk.bf16.vlgmr.msra.gmra.mxu0 %vm123_vm2, %v1654_v37 }
0x13b4   :  { %3268 = vmatpush3.bf16.xpose.msra.mxu0 %v1810_v4  ;;  %3269 = vmatprep.mubr.msk.bf16.mxu0 %vm3488_vm0, %v3487_v0 }
0x13b5   :  { %3279 = vmatprep.subr.bf16.mxu0 %v3487_v0 }
0x13b7   :  { %3264 = vmatmul.mubr.msk.bf16.vlgmr.msra.gmra.mxu1 %vm123_vm2, %v1753_v38 }
0x13b8   :  { %3275 = vmatprep.mubr.msk.bf16.mxu1 %vm3488_vm0, %v3487_v0 }
0x13bb   :  { %3270 = vmatmul.mubr.msk.bf16.vlgmr.msra.gmra.mxu0 %vm123_vm2, %v1803_v39 }
0x13bc   :  { %3281 = vmatprep.mubr.msk.bf16.mxu0 %vm3488_vm0, %v3487_v0 }
0x146f   :  { %v3945_v40 = vpop.f32.mrf.mxu1 }
0x1471   :  { %v3253_v41 = vpop.f32.mrf.mxu1 }
0x1473   :  { %v1700_v42 = vpop.f32.mrf.mxu1  ;;  %v3947_v43 = vpop.f32.mrf.mxu0 }
0x1474   :  { %v1751_v44 = vpack.c.bf16 %v3947_v43, %v3945_v40 }
0x1475   :  { %v3254_v45 = vpop.f32.mrf.mxu1  ;;  %v3259_v48 = vpop.f32.mrf.mxu0 }
0x1477   :  { %v1748_v49 = vpop.f32.mrf.mxu0  ;;  %v1796_v15 = vpop.f32.mrf.mxu1 }
0x1478   :  { %v1852_v31 = vmul.f32 0.35355338, %v1796_v15 }
0x1479   :  { %v3260_v50 = vpop.f32.mrf.mxu0  ;;  %v3265_v51 = vpop.f32.mrf.mxu1 }
0x147a   :  { %v1854_v52 = vadd.f32 %v1852_v31, %v3621_v22 }
0x147b   :  { %v1799_v53 = vpop.f32.mrf.mxu1  ;;  %v1846_v54 = vpop.f32.mrf.mxu0 }
0x147c   :  { %v1853_v7 = vmul.f32 0.35355338, %v1846_v54  ;;  %v1856_v55 = vsel %vm123_vm2, %v1854_v52, -inf }
0x147d   :  { %v3271_v56 = vpop.f32.mrf.mxu0  ;;  %1857 = vmax.xlane.f32.xlu0 %v1856_v55  ;;  %v3266_v57 = vpop.f32.mrf.mxu1 }
0x147e   :  { %v1855_v58 = vadd.f32 %v1853_v7, %v3624_v28 }
0x147f   :  { %v1849_v59 = vpop.f32.mrf.mxu0 }
0x1480   :  { %v1859_v60 = vsel %vm123_vm2, %v1855_v58, -inf }
0x1481   :  { %1860 = vmax.xlane.f32.xlu1 %v1859_v60  ;;  %v3272_v61 = vpop.f32.mrf.mxu0 }
0x1492   :  { %1880 = vrot.lane.b32.xlu1 %v3887_v12, %s3494_s17 }
0x1496   :  { %2073 = vrot.lane.b32.xlu1 %v3887_v12, %s3496_s19 }
0x149a   :  { %2123 = vrot.lane.b32.xlu1 %v3891_v33, %s3496_s19 }
0x149e   :  { %2121 = vrot.lane.b32.xlu1 %v3891_v33, %s3495_s18 }
0x1506   :  { %v1858_v62 = vpop.xlane.xlu0 %1857 }
0x1507   :  { %v1862_v10 = vsub.f32 %v1854_v52, %v1858_v62 }
0x1509   :  { %v1864_v63 = vmul.f32 1.442695, %v1862_v10 }
0x150a   :  { %v1861_v1 = vpop.xlane.xlu1 %1860 }
0x150b   :  { %3455 = vpow2.f32 %v1864_v63  ;;  %v1863_v2 = vsub.f32 %v1855_v58, %v1861_v1 }
0x150d   :  { %v1866_v5 = vmul.f32 1.442695, %v1863_v2 }
0x150e   :  { %v1881_v6 = vpop.permute.xlu1 %1880 }
0x150f   :  { %3457 = vpow2.f32 %v1866_v5  ;;  %v1886_v8 = vsel %vm252_vm5, %v1881_v6, 0 }
0x1510   :  { %3274 = vmatpush3.bf16.msra.mxu1 %v1886_v8 }
0x1511   :  { %3285 = vmatprep.subr.bf16.mxu1 %v3487_v0 }
0x1512   :  { %v2074_v30 = vpop.permute.xlu1 %2073 }
0x1513   :  { %v2079_v43 = vsel %vm123_vm2, %v2074_v30, 0 }
0x1516   :  { %v2124_v32 = vpop.permute.xlu1 %2123 }
0x1517   :  { %v2129_v34 = vsel %vm123_vm2, %v2124_v32, 0 }
0x1518   :  { %v3456_v9 = vpop.eup %3455 }
0x1519   :  { %v1868_v11 = vsel %vm123_vm2, %v3456_v9, 0.0 }
0x151a   :  { %1869 = vadd.xlane.f32.xlu0 %v1868_v11  ;;  %v2122_v35 = vpop.permute.xlu1 %2121 }
0x151c   :  { %v3458_v13 = vpop.eup %3457 }
0x151d   :  { %v1871_v14 = vsel %vm123_vm2, %v3458_v13, 0.0 }
0x151e   :  { %1872 = vadd.xlane.f32.xlu0 %v1871_v14 }
0x1534   :  { %1928 = vrot.lane.b32.xlu0 %v3891_v33, %s3494_s17 }
0x1538   :  { %2071 = vrot.lane.b32.xlu0 %v3887_v12, %s3495_s18 }
0x15a3   :  { %v1870_v16 = vpop.xlane.xlu0 %1869 }
0x15a4   :  { %3459 = vrcp.f32 %v1870_v16 }
0x15a7   :  { %v1873_v17 = vpop.xlane.xlu0 %1872 }
0x15a8   :  { %3461 = vrcp.f32 %v1873_v17 }
0x15ab   :  { %v1929_v18 = vpop.permute.xlu0 %1928 }
0x15ac   :  { %v1934_v19 = vsel %vm252_vm5, %v1929_v18, 0 }
0x15ad   :  { %3280 = vmatpush3.bf16.msra.mxu0 %v1934_v19 }
0x15ae   :  { %3291 = vmatprep.subr.bf16.mxu0 %v3487_v0 }
0x15af   :  { %v2072_v49 = vpop.permute.xlu0 %2071 }
0x15b1   :  { %v3460_v20 = vpop.eup %3459 }
0x15b2   :  { %v1876_v21 = vmul.f32 %v3460_v20, %v3456_v9 }
0x15b4   :  { %v1878_v23 = vpack.c.bf16 %v1876_v21, %v1876_v21 }
0x15b5   :  { %v3462_v24 = vpop.eup %3461 }
0x15b6   :  { %3276 = vmatmul.mubr.msk.bf16.vlgmr.msra.gmra.mxu1 %vm123_vm2, %v1878_v23  ;;  %v1877_v26 = vmul.f32 %v3462_v24, %v3458_v13 }
0x15b7   :  { %3287 = vmatprep.mubr.msk.bf16.mxu1 %vm3488_vm0, %v3487_v0  ;;  %3286 = vmatpush3.bf16.msra.mxu1 %v1981_v36 }
0x15b8   :  { %v1879_v27 = vpack.c.bf16 %v1877_v26, %v1877_v26  ;;  %3297 = vmatprep.subr.bf16.mxu1 %v3487_v0 }
0x15ba   :  { %3282 = vmatmul.mubr.msk.bf16.vlgmr.msra.gmra.mxu0 %vm123_vm2, %v1879_v27 }
0x15bb   :  { %3292 = vmatpush3.bf16.msra.mxu0 %v2028_v29  ;;  %3293 = vmatprep.mubr.msk.bf16.mxu0 %vm3488_vm0, %v3487_v0 }
0x15bc   :  { %3303 = vmatprep.subr.bf16.mxu0 %v3487_v0 }
0x15c2   :  { %3294 = vmatmul.mubr.msk.bf16.vlgmr.msra.gmra.mxu0 %vm123_vm2, %v1751_v44 }
0x15c3   :  { %3304 = vmatpush3.bf16.xpose.msra.mxu0 %v2129_v34  ;;  %3305 = vmatprep.mubr.msk.bf16.mxu0 %vm3488_vm0, %v3487_v0 }
0x15c4   :  { %3315 = vmatprep.subr.bf16.mxu0 %v3487_v0 }
0x15ca   :  { %3306 = vmatmul.mubr.msk.bf16.vlgmr.msra.gmra.mxu0 %vm123_vm2, %v2122_v35 }
0x15cb   :  { %3317 = vmatprep.mubr.msk.bf16.mxu0 %vm3488_vm0, %v3487_v0 }
0x1676   :  { %v1922_v37 = vpop.f32.mrf.mxu1 }
0x1678   :  { %v3277_v4 = vpop.f32.mrf.mxu1 }
0x1679   :  { %v2925_v4 = vld [vmem:[%s4157_s3 + $0x18] sm:$0xf] }
0x167a   :  { %v1925_v38 = vpop.f32.mrf.mxu1  ;;  %v1970_v39 = vpop.f32.mrf.mxu0 }
0x167b   :  { %v1976_v40 = vpack.c.bf16 %v1970_v39, %v1922_v37  ;;  %v2300_v38 = vsel %vm252_vm5, %v2925_v4, 0 }
0x167c   :  { %v3278_v41 = vpop.f32.mrf.mxu1  ;;  %v3283_v42 = vpop.f32.mrf.mxu0 }
0x167d   :  { %3288 = vmatmul.mubr.msk.bf16.vlgmr.msra.gmra.mxu1 %vm123_vm2, %v1976_v40 }
0x167e   :  { %3298 = vmatpush3.bf16.xpose.msra.mxu1 %v2079_v43  ;;  %v1973_v44 = vpop.f32.mrf.mxu0  ;;  %3299 = vmatprep.mubr.msk.bf16.mxu1 %vm3488_vm0, %v3487_v0 }
0x167f   :  { %3309 = vmatprep.subr.bf16.mxu1 %v3487_v0 }
0x1680   :  { %v3284_v45 = vpop.f32.mrf.mxu0 }
0x1682   :  { %v4005_v48 = vpop.f32.mrf.mxu0 }
0x1684   :  { %v3295_v15 = vpop.f32.mrf.mxu0 }
0x1685   :  { %3300 = vmatmul.mubr.msk.bf16.vlgmr.msra.gmra.mxu1 %vm123_vm2, %v2072_v49 }
0x1686   :  { %v4008_v31 = vpop.f32.mrf.mxu0  ;;  %3311 = vmatprep.mubr.msk.bf16.mxu1 %vm3488_vm0, %v3487_v0 }
0x1688   :  { %v3296_v50 = vpop.f32.mrf.mxu0 }
0x168a   :  { %v2165_v51 = vpop.f32.mrf.mxu0 }
0x168b   :  { %v2172_v52 = vmul.f32 0.35355338, %v2165_v51 }
0x168c   :  { %v3307_v53 = vpop.f32.mrf.mxu0 }
0x168d   :  { %v2174_v54 = vadd.f32 %v2172_v52, %v3624_v28 }
0x168e   :  { %v2168_v7 = vpop.f32.mrf.mxu0 }
0x168f   :  { %v2178_v55 = vsel %vm123_vm2, %v2174_v54, -inf }
0x1690   :  { %2179 = vmax.xlane.f32.xlu1 %v2178_v55  ;;  %v3308_v56 = vpop.f32.mrf.mxu0 }
0x16a1   :  { %2199 = vrot.lane.b32.xlu1 %v3887_v12, %s3497_s24 }
0x16a5   :  { %2347 = vrot.lane.b32.xlu1 %v3887_v12, %s3498_s25 }
0x16a9   :  { %2397 = vrot.lane.b32.xlu1 %v3891_v33, %s3498_s25 }
0x16ad   :  { %2395 = vrot.lane.b32.xlu1 %v3891_v33, %s3499_s26 }
0x1719   :  { %v2180_v57 = vpop.xlane.xlu1 %2179 }
0x171a   :  { %v2182_v60 = vsub.f32 %v2174_v54, %v2180_v57 }
0x171c   :  { %v2185_v61 = vmul.f32 1.442695, %v2182_v60 }
0x171d   :  { %v2200_v58 = vpop.permute.xlu1 %2199 }
0x171e   :  { %v2205_v59 = vsel %vm252_vm5, %v2200_v58, 0  ;;  %3463 = vpow2.f32 %v2185_v61 }
0x171f   :  { %3310 = vmatpush3.bf16.msra.mxu1 %v2205_v59 }
0x1720   :  { %3321 = vmatprep.subr.bf16.mxu1 %v3487_v0 }
0x1721   :  { %v2348_v30 = vpop.permute.xlu1 %2347 }
0x1722   :  { %v2353_v34 = vsel %vm123_vm2, %v2348_v30, 0 }
0x1725   :  { %v2398_v44 = vpop.permute.xlu1 %2397 }
0x1726   :  { %v2403_v54 = vsel %vm123_vm2, %v2398_v44, 0 }
0x1729   :  { %v2396_v58 = vpop.permute.xlu1 %2395 }
0x172b   :  { %v3464_v13 = vpop.eup %3463 }
0x172c   :  { %v2190_v16 = vsel %vm123_vm2, %v3464_v13, 0.0 }
0x173d   :  { %v4024_v62 = vpop.f32.mrf.mxu1 }
0x173f   :  { %v3289_v10 = vpop.f32.mrf.mxu1 }
0x1741   :  { %v4026_v63 = vpop.f32.mrf.mxu1 }
0x1743   :  { %v3290_v1 = vpop.f32.mrf.mxu1 }
0x1744   :  { %v2065_v1 = vadd.f32 %v4005_v48, %v4024_v62 }
0x1745   :  { %v2115_v2 = vpop.f32.mrf.mxu1 }
0x1746   :  { %v2171_v5 = vmul.f32 0.35355338, %v2115_v2 }
0x1747   :  { %v3301_v6 = vpop.f32.mrf.mxu1 }
0x1748   :  { %v2173_v8 = vadd.f32 %v2171_v5, %v3621_v22 }
0x1749   :  { %v2118_v9 = vpop.f32.mrf.mxu1 }
0x174a   :  { %v2175_v11 = vsel %vm123_vm2, %v2173_v8, -inf }
0x174b   :  { %2176 = vmax.xlane.f32.xlu0 %v2175_v11  ;;  %v3302_v14 = vpop.f32.mrf.mxu1 }
0x174f   :  { %2191 = vadd.xlane.f32.xlu0 %v2190_v16 }
0x17d4   :  { %v2177_v17 = vpop.xlane.xlu0 %2176 }
0x17d5   :  { %v2181_v18 = vsub.f32 %v2173_v8, %v2177_v17  ;;  %v2068_v8 = vadd.f32 %v4008_v31, %v4026_v63 }
0x17d7   :  { %v2183_v19 = vmul.f32 1.442695, %v2181_v18 }
0x17d8   :  { %v2192_v23 = vpop.xlane.xlu0 %2191 }
0x17d9   :  { %3465 = vpow2.f32 %v2183_v19 }
0x17da   :  { %3467 = vrcp.f32 %v2192_v23 }
0x17e6   :  { %v3466_v20 = vpop.eup %3465 }
0x17e7   :  { %v2187_v21 = vsel %vm123_vm2, %v3466_v20, 0.0  ;;  %v3468_v24 = vpop.eup %3467 }
0x17e8   :  { %2188 = vadd.xlane.f32.xlu0 %v2187_v21  ;;  %v2196_v26 = vmul.f32 %v3468_v24, %v3464_v13 }
0x17ea   :  { %v2198_v32 = vpack.c.bf16 %v2196_v26, %v2196_v26 }
0x17fe   :  { %2247 = vrot.lane.b32.xlu0 %v3891_v33, %s3497_s24 }
0x1802   :  { %2345 = vrot.lane.b32.xlu0 %v3887_v12, %s3499_s26 }
0x1871   :  { %v2189_v25 = vpop.xlane.xlu0 %2188 }
0x1872   :  { %3469 = vrcp.f32 %v2189_v25 }
0x1875   :  { %v2248_v27 = vpop.permute.xlu0 %2247 }
0x1876   :  { %v2253_v29 = vsel %vm252_vm5, %v2248_v27, 0 }
0x1877   :  { %3316 = vmatpush3.bf16.msra.mxu0 %v2253_v29  ;;  %v2926_v29 = vld [vmem:[%s4157_s3 + $0x1c] sm:$0xf] }
0x1878   :  { %3327 = vmatprep.subr.bf16.mxu0 %v3487_v0  ;;  %v2574_v30 = vsel %vm252_vm5, %v2926_v29, 0 }
0x1879   :  { %v2346_v36 = vpop.permute.xlu0 %2345 }
0x187a   :  { %3318 = vmatmul.mubr.msk.bf16.vlgmr.msra.gmra.mxu0 %vm123_vm2, %v2198_v32 }
0x187b   :  { %3328 = vmatpush3.bf16.xpose.msra.mxu0 %v2353_v34  ;;  %3329 = vmatprep.mubr.msk.bf16.mxu0 %vm3488_vm0, %v3487_v0 }
0x187c   :  { %3339 = vmatprep.subr.bf16.mxu0 %v3487_v0 }
0x187f   :  { %v3470_v35 = vpop.eup %3469 }
0x1880   :  { %v2195_v3 = vmul.f32 %v3470_v35, %v3466_v20 }
0x1882   :  { %3330 = vmatmul.mubr.msk.bf16.vlgmr.msra.gmra.mxu0 %vm123_vm2, %v2346_v36  ;;  %v2197_v37 = vpack.c.bf16 %v2195_v3, %v2195_v3 }
0x1883   :  { %3341 = vmatprep.mubr.msk.bf16.mxu0 %vm3488_vm0, %v3487_v0 }
0x1884   :  { %3312 = vmatmul.mubr.msk.bf16.vlgmr.msra.gmra.mxu1 %vm123_vm2, %v2197_v37 }
0x1885   :  { %3323 = vmatprep.mubr.msk.bf16.mxu1 %vm3488_vm0, %v3487_v0  ;;  %3322 = vmatpush3.bf16.msra.mxu1 %v2300_v38 }
0x1886   :  { %3333 = vmatprep.subr.bf16.mxu1 %v3487_v0 }
0x193a   :  { %v2289_v39 = vpop.f32.mrf.mxu0 }
0x193c   :  { %v3319_v40 = vpop.f32.mrf.mxu0 }
0x193e   :  { %v2292_v41 = vpop.f32.mrf.mxu0 }
0x1940   :  { %v3320_v42 = vpop.f32.mrf.mxu0 }
0x1942   :  { %v2389_v43 = vpop.f32.mrf.mxu0 }
0x1943   :  { %v2445_v45 = vmul.f32 0.35355338, %v2389_v43 }
0x1944   :  { %v2241_v49 = vpop.f32.mrf.mxu1  ;;  %v3331_v15 = vpop.f32.mrf.mxu0 }
0x1945   :  { %v2295_v50 = vpack.c.bf16 %v2289_v39, %v2241_v49  ;;  %v2447_v51 = vadd.f32 %v2445_v45, %v3621_v22 }
0x1946   :  { %v3313_v52 = vpop.f32.mrf.mxu1  ;;  %v2392_v53 = vpop.f32.mrf.mxu0 }
0x1947   :  { %3324 = vmatmul.mubr.msk.bf16.vlgmr.msra.gmra.mxu1 %vm123_vm2, %v2295_v50  ;;  %v2449_v7 = vsel %vm123_vm2, %v2447_v51, -inf }
0x1948   :  { %3334 = vmatpush3.bf16.xpose.msra.mxu1 %v2403_v54  ;;  %2450 = vmax.xlane.f32.xlu0 %v2449_v7  ;;  %v2244_v55 = vpop.f32.mrf.mxu1  ;;  %v3332_v56 = vpop.f32.mrf.mxu0 }
0x1949   :  { %3335 = vmatprep.mubr.msk.bf16.mxu1 %vm3488_vm0, %v3487_v0  ;;  %3345 = vmatprep.subr.bf16.mxu1 %v3487_v0 }
0x194a   :  { %v3314_v57 = vpop.f32.mrf.mxu1 }
0x194f   :  { %3336 = vmatmul.mubr.msk.bf16.vlgmr.msra.gmra.mxu1 %vm123_vm2, %v2396_v58 }
0x1950   :  { %3347 = vmatprep.mubr.msk.bf16.mxu1 %vm3488_vm0, %v3487_v0 }
0x19d1   :  { %v2451_v22 = vpop.xlane.xlu0 %2450 }
0x19d2   :  { %v2455_v59 = vsub.f32 %v2447_v51, %v2451_v22 }
0x19d4   :  { %v2457_v60 = vmul.f32 1.442695, %v2455_v59 }
0x19d6   :  { %3471 = vpow2.f32 %v2457_v60 }
0x19e3   :  { %v3472_v61 = vpop.eup %3471 }
0x19e4   :  { %v2461_v10 = vsel %vm123_vm2, %v3472_v61, 0.0 }
0x19e5   :  { %2462 = vadd.xlane.f32.xlu0 %v2461_v10 }
0x1a07   :  { %v2336_v2 = vpop.f32.mrf.mxu1 }
0x1a08   :  { %v2343_v5 = vadd.f32 %v2336_v2, %v2065_v1  ;;  %v3402_v2 = vld [vmem:[%s4158_s4 + $0x10] sm:$0xff]  }
0x1a09   :  { %v3325_v6 = vpop.f32.mrf.mxu1 }
0x1a0b   :  { %v2339_v9 = vpop.f32.mrf.mxu1 }
0x1a0c   :  { %v2344_v11 = vadd.f32 %v2339_v9, %v2068_v8 }
0x1a0d   :  { %v3326_v13 = vpop.f32.mrf.mxu1 }
0x1a0f   :  { %v2439_v14 = vpop.f32.mrf.mxu1 }
0x1a10   :  { %v2446_v16 = vmul.f32 0.35355338, %v2439_v14 }
0x1a11   :  { %v3337_v17 = vpop.f32.mrf.mxu1 }
0x1a12   :  { %v2448_v18 = vadd.f32 %v2446_v16, %v3624_v28 }
0x1a13   :  { %v2442_v19 = vpop.f32.mrf.mxu1 }
0x1a14   :  { %v2452_v20 = vsel %vm123_vm2, %v2448_v18, -inf }
0x1a15   :  { %2453 = vmax.xlane.f32.xlu1 %v2452_v20  ;;  %v3338_v21 = vpop.f32.mrf.mxu1 }
0x1a26   :  { %2473 = vrot.lane.b32.xlu1 %v3887_v12, %s3500_s29 }
0x1a6e   :  { %v2463_v48 = vpop.xlane.xlu0 %2462 }
0x1a6f   :  { %3473 = vrcp.f32 %v2463_v48  ;;  %v2950_v48 = vld [vmem:[%s4161_s9 + $0x1] ss:$0 sm:$0xff] }
0x1a7c   :  { %v3474_v62 = vpop.eup %3473 }
0x1a7d   :  { %v2469_v24 = vmul.f32 %v3474_v62, %v3472_v61 }
0x1a7f   :  { %v2471_v28 = vpack.c.bf16 %v2469_v24, %v2469_v24  ;;  %v3404_v24 = vld [vmem:[%s4159_s6 + $0x30] sm:$0xff]  }
0x1a9e   :  { %v2454_v31 = vpop.xlane.xlu1 %2453 }
0x1a9f   :  { %v2456_v63 = vsub.f32 %v2448_v18, %v2454_v31  ;;  %v2949_v18 = vld [vmem:[%s4160_s8 + $0x1] ss:$0 sm:$0xff] }
0x1aa1   :  { %v2459_v23 = vmul.f32 1.442695, %v2456_v63 }
0x1aa2   :  { %v2474_v25 = vpop.permute.xlu1 %2473 }
0x1aa3   :  { %3475 = vpow2.f32 %v2459_v23  ;;  %v2479_v26 = vsel %vm252_vm5, %v2474_v25, 0  ;;  %v3405_v25 = vld [vmem:[%s4159_s6 + $0x28] sm:$0xff]  }
0x1aa4   :  { %3340 = vmatpush3.bf16.msra.mxu0 %v2479_v26  ;;  %v3406_v26 = vld [vmem:[%s4159_s6 + $0x20] sm:$0xff]  }
0x1aa5   :  { %3351 = vmatprep.subr.bf16.mxu0 %v3487_v0 }
0x1aa7   :  { %3342 = vmatmul.mubr.msk.bf16.vlgmr.msra.gmra.mxu0 %vm123_vm2, %v2471_v28  ;;  %v2965_v28 = vld [vmem:[%s4162_s5 + $0x1] ss:$0 sm:$0xff] }
0x1aa8   :  { %3353 = vmatprep.mubr.msk.bf16.mxu0 %vm3488_vm0, %v3487_v0  ;;  %3352 = vmatpush3.bf16.msra.mxu0 %v2574_v30 }
0x1aa9   :  { %3365 = vmatprep.subr.bf16.mxu0 %v3487_v0 }
0x1ab0   :  { %v3476_v12 = vpop.eup %3475 }
0x1ab1   :  { %v2464_v27 = vsel %vm123_vm2, %v3476_v12, 0.0 }
0x1ab2   :  { %2465 = vadd.xlane.f32.xlu0 %v2464_v27 }
0x1ac8   :  { %2521 = vrot.lane.b32.xlu0 %v3891_v33, %s3500_s29 }
0x1b3b   :  { %v2466_v32 = vpop.xlane.xlu0 %2465 }
0x1b3c   :  { %3477 = vrcp.f32 %v2466_v32 }
0x1b3f   :  { %v2522_v34 = vpop.permute.xlu0 %2521 }
0x1b40   :  { %v2527_v35 = vsel %vm252_vm5, %v2522_v34, 0 }
0x1b41   :  { %3346 = vmatpush3.bf16.msra.mxu1 %v2527_v35 }
0x1b42   :  { %3357 = vmatprep.subr.bf16.mxu1 %v3487_v0 }
0x1b49   :  { %v3478_v3 = vpop.eup %3477 }
0x1b4a   :  { %v2470_v36 = vmul.f32 %v3478_v3, %v3476_v12 }
0x1b4c   :  { %v2472_v33 = vpack.c.bf16 %v2470_v36, %v2470_v36 }
0x1b4e   :  { %3348 = vmatmul.mubr.msk.bf16.vlgmr.msra.gmra.mxu1 %vm123_vm2, %v2472_v33 }
0x1b4f   :  { %3361 = vmatprep.mubr.msk.bf16.mxu1 %vm3488_vm0, %v3487_v0 }
0x1b67   :  { %v2515_v37 = vpop.f32.mrf.mxu0 }
0x1b69   :  { %v3343_v4 = vpop.f32.mrf.mxu0 }
0x1b6b   :  { %v2518_v38 = vpop.f32.mrf.mxu0 }
0x1b6d   :  { %v3344_v39 = vpop.f32.mrf.mxu0 }
0x1c0e   :  { %v2563_v40 = vpop.f32.mrf.mxu1 }
0x1c0f   :  { %v2569_v41 = vpack.c.bf16 %v2563_v40, %v2515_v37 }
0x1c10   :  { %v3349_v42 = vpop.f32.mrf.mxu1 }
0x1c11   :  { %3354 = vmatmul.mubr.msk.bf16.vlgmr.msra.gmra.mxu0 %vm123_vm2, %v2569_v41 }
0x1c12   :  { %v2566_v43 = vpop.f32.mrf.mxu1  ;;  %3373 = vmatprep.mubr.msk.bf16.mxu0 %vm3488_vm0, %v3487_v0 }
0x1c14   :  { %v3350_v44 = vpop.f32.mrf.mxu1 }
0x1cd1   :  { %v2610_v45 = vpop.f32.mrf.mxu0 }
0x1cd2   :  { %v2617_v49 = vadd.f32 %v2610_v45, %v2343_v5  ;;  %v3403_v5 = vld [vmem:[%s4159_s6 + $0x38] sm:$0xff]  }
0x1cd3   :  { %v3355_v15 = vpop.f32.mrf.mxu0  ;;  %3366 = vmatpush3.bf16.msra.mxu0 %v3403_v5 }
0x1cd4   :  { %v2623_v50 = vadd.f32 %v2617_v49, %v3878_v46  ;;  %3367 = vmatprep.subr.bf16.mxu0 %v3487_v0 }
0x1cd5   :  { %v2613_v51 = vpop.f32.mrf.mxu0 }
0x1cd6   :  { %v2618_v52 = vadd.f32 %v2613_v51, %v2344_v11  ;;  %v2625_v53 = vsel %vm69_vm1, %v2623_v50, 0.0 }
0x1cd7   :  { %2626 = vadd.xlane.f32.xlu1 %v2625_v53  ;;  %v3356_v54 = vpop.f32.mrf.mxu0  ;;  %3368 = vmatpush3.bf16.msra.mxu0 %v3404_v24 }
0x1cd8   :  { %v2624_v7 = vadd.f32 %v2618_v52, %v3880_v47  ;;  %v3401_v47 = vld [vmem:[%s4158_s4 + $0x18] sm:$0xff]   ;;  %3369 = vmatprep.subr.bf16.mxu0 %v3487_v0 }
0x1cd9   :  { %3358 = vmatpush3.bf16.msra.mxu1 %v3401_v47 }
0x1cda   :  { %v2628_v55 = vsel %vm69_vm1, %v2624_v7, 0.0  ;;  %3359 = vmatprep.subr.bf16.mxu1 %v3487_v0 }
0x1cdb   :  { %2629 = vadd.xlane.f32.xlu0 %v2628_v55  ;;  %3370 = vmatpush3.bf16.msra.mxu0 %v3405_v25 }
0x1cdc   :  { %3371 = vmatprep.subr.bf16.mxu0 %v3487_v0  ;;  %v2969_v0 = vld [vmem:[%s4163_s7 + $0x1] ss:$0 sm:$0xff] }
0x1cdd   :  { %3360 = vmatpush3.bf16.msra.mxu1 %v3402_v2 }
0x1cdf   :  { %3372 = vmatpush3.bf16.msra.mxu0 %v3406_v26 }
0x1d60   :  { %v2627_v56 = vpop.xlane.xlu1 %2626 }
0x1d61   :  { %v2631_v57 = vmul.f32 0.03125, %v2627_v56 }
0x1d63   :  { %v2633_v58 = vsub.f32 %v2623_v50, %v2631_v57 }
0x1d64   :  { %v2630_v22 = vpop.xlane.xlu0 %2629 }
0x1d65   :  { %v2632_v59 = vmul.f32 0.03125, %v2630_v22  ;;  %v2635_v60 = vmul.f32 %v2633_v58, %v2633_v58 }
0x1d67   :  { %v2634_v61 = vsub.f32 %v2624_v7, %v2632_v59  ;;  %v2637_v46 = vsel %vm69_vm1, %v2635_v60, 0.0 }
0x1d68   :  { %2638 = vadd.xlane.f32.xlu1 %v2637_v46  ;;  %v2977_v46 = vld [vmem:[%s4164_s10 + $0x1] ss:$0 sm:$0xff] }
0x1d69   :  { %v2636_v10 = vmul.f32 %v2634_v61, %v2634_v61 }
0x1d6b   :  { %v2640_v1 = vsel %vm69_vm1, %v2636_v10, 0.0 }
0x1d6c   :  { %2641 = vadd.xlane.f32.xlu0 %v2640_v1  ;;  %v2978_v1 = vld [vmem:[%s4165_s11 + $0x1] ss:$0 sm:$0xff] }
0x1df1   :  { %v2639_v6 = vpop.xlane.xlu1 %2638 }
0x1df2   :  { %v2643_v8 = vmul.f32 0.03125, %v2639_v6 }
0x1df4   :  { %v2645_v9 = vadd.f32 1e-05, %v2643_v8 }
0x1df5   :  { %v2642_v11 = vpop.xlane.xlu0 %2641 }
0x1df6   :  { %3479 = vrsqrt.f32 %v2645_v9  ;;  %v2644_v13 = vmul.f32 0.03125, %v2642_v11 }
0x1df8   :  { %v2646_v14 = vadd.f32 1e-05, %v2644_v13 }
0x1dfa   :  { %3481 = vrsqrt.f32 %v2646_v14 }
0x1e03   :  { %v3480_v16 = vpop.eup %3479 }
0x1e04   :  { %v2649_v17 = vmul.f32 %v3480_v16, %v2633_v58 }
0x1e06   :  { %v2657_v21 = vmul.f32 %v2949_v18, %v2649_v17 }
0x1e07   :  { %v3482_v19 = vpop.eup %3481 }
0x1e08   :  { %v2650_v20 = vmul.f32 %v3482_v19, %v2634_v61  ;;  %v2665_v31 = vadd.f32 %v2950_v48, %v2657_v21 }
0x1e0a   :  { %v2658_v62 = vmul.f32 %v2949_v18, %v2650_v20 }
0x1e0c   :  { %v2666_v63 = vadd.f32 %v2950_v48, %v2658_v62 }
0x1e0e   :  { %v2685_v23 = vpack.c.bf16 %v2666_v63, %v2665_v31 }
0x1e10   :  { %3362 = vmatmul.mubr.msk.bf16.vlgmr.msra.gmra.mxu1 %vm69_vm1, %v2685_v23 }
0x1ed0   :  { %v2741_v12 = vpop.f32.mrf.mxu1 }
0x1ed1   :  { %v2742_v29 = vadd.f32 %v2965_v28, %v2741_v12 }
0x1ed2   :  { %v3363_v27 = vpop.f32.mrf.mxu1 }
0x1ed3   :  { %v2748_v35 = vmax.f32 %v2742_v29, 0.0 }
0x1ed4   :  { %v2744_v30 = vpop.f32.mrf.mxu1 }
0x1ed5   :  { %v2745_v32 = vadd.f32 %v2965_v28, %v2744_v30 }
0x1ed6   :  { %v3364_v34 = vpop.f32.mrf.mxu1 }
0x1ed7   :  { %v2749_v3 = vmax.f32 %v2745_v32, 0.0 }
0x1ed9   :  { %v2750_v36 = vpack.c.bf16 %v2749_v3, %v2748_v35 }
0x1edb   :  { %3374 = vmatmul.mubr.msk.bf16.vlgmr.msra.gmra.mxu0 %vm1369_vm6, %v2750_v36 }
0x1f9b   :  { %v2818_v33 = vpop.f32.mrf.mxu0 }
0x1f9c   :  { %v2819_v37 = vadd.f32 %v2969_v0, %v2818_v33 }
0x1f9d   :  { %v3375_v4 = vpop.f32.mrf.mxu0 }
0x1f9e   :  { %v2829_v38 = vadd.f32 %v2819_v37, %v2665_v31 }
0x1f9f   :  { %v2821_v39 = vpop.f32.mrf.mxu0 }
0x1fa0   :  { %v2822_v40 = vadd.f32 %v2969_v0, %v2821_v39  ;;  %v2831_v41 = vsel %vm69_vm1, %v2829_v38, 0.0 }
0x1fa1   :  { %2832 = vadd.xlane.f32.xlu1 %v2831_v41  ;;  %v3376_v42 = vpop.f32.mrf.mxu0 }
0x1fa2   :  { %v2830_v43 = vadd.f32 %v2822_v40, %v2666_v63 }
0x1fa4   :  { %v2834_v44 = vsel %vm69_vm1, %v2830_v43, 0.0 }
0x1fa5   :  { %2835 = vadd.xlane.f32.xlu0 %v2834_v44 }
0x202a   :  { %v2833_v45 = vpop.xlane.xlu1 %2832 }
0x202b   :  { %v2837_v49 = vmul.f32 0.03125, %v2833_v45 }
0x202d   :  { %v2839_v15 = vsub.f32 %v2829_v38, %v2837_v49 }
0x202e   :  { %v2836_v50 = vpop.xlane.xlu0 %2835 }
0x202f   :  { %v2838_v51 = vmul.f32 0.03125, %v2836_v50  ;;  %v2841_v52 = vmul.f32 %v2839_v15, %v2839_v15 }
0x2031   :  { %v2840_v53 = vsub.f32 %v2830_v43, %v2838_v51  ;;  %v2843_v54 = vsel %vm69_vm1, %v2841_v52, 0.0 }
0x2032   :  { %2844 = vadd.xlane.f32.xlu1 %v2843_v54 }
0x2033   :  { %v2842_v7 = vmul.f32 %v2840_v53, %v2840_v53 }
0x2035   :  { %v2846_v55 = vsel %vm69_vm1, %v2842_v7, 0.0 }
0x2036   :  { %2847 = vadd.xlane.f32.xlu0 %v2846_v55 }
0x20bb   :  { %v2845_v56 = vpop.xlane.xlu1 %2844 }
0x20bc   :  { %v2849_v57 = vmul.f32 0.03125, %v2845_v56 }
0x20be   :  { %v2851_v58 = vadd.f32 1e-05, %v2849_v57 }
0x20bf   :  { %v2848_v22 = vpop.xlane.xlu0 %2847 }
0x20c0   :  { %3483 = vrsqrt.f32 %v2851_v58  ;;  %v2850_v59 = vmul.f32 0.03125, %v2848_v22 }
0x20c2   :  { %v2852_v60 = vadd.f32 1e-05, %v2850_v59 }
0x20c4   :  { %3485 = vrsqrt.f32 %v2852_v60 }
0x20cd   :  { %v3484_v61 = vpop.eup %3483 }
0x20ce   :  { %v2855_v10 = vmul.f32 %v3484_v61, %v2839_v15 }
0x20d0   :  { %v2863_v47 = vmul.f32 %v2977_v46, %v2855_v10 }
0x20d1   :  { %v3486_v2 = vpop.eup %3485 }
0x20d2   :  { %v2871_v5 = vadd.f32 %v2978_v1, %v2863_v47  ;;  %v2856_v6 = vmul.f32 %v3486_v2, %v2840_v53 }
0x20d4   :  { %2873 = vst.msk [vmem:[%s4166_s12] sm:$0xff] %vm69_vm1, %v2871_v5  ;;  %v2864_v8 = vmul.f32 %v2977_v46, %v2856_v6 }
0x20d6   :  { %v2872_v9 = vadd.f32 %v2978_v1, %v2864_v8 }
0x20d8   :  { %2874 = vst.msk [vmem:[%s4166_s12 + $0x8] sm:$0xff] %vm69_vm1, %v2872_v9 }

// kernel: encoder_decoder_forward.3
= control target key start
LH: loop header
LB: loop body
LE: loop exit
PB: predicated region body
PF: predicated region fallthrough
CT: control target
= control target key end

     0   :  { %s7942_s0 = inlined_call_operand.vmem [shape: f32[16,32], index: 0, kind: input, shape index: {}]   ;;  %s7943_s1 = inlined_call_operand.vmem [shape: f32[16,32], index: 1, kind: input, shape index: {}]   ;;  %s7944_s2 = inlined_call_operand.vmem [shape: s32[16,8], index: 2, kind: input, shape index: {}]   ;;  %s7945_s3 = inlined_call_operand.vmem [shape: s32[16,8], index: 3, kind: input, shape index: {}]   ;;  %s7946_s4 = inlined_call_operand.vmem [shape: bf16[2,32,96], index: 4, kind: input, shape index: {}]   ;;  %s7947_s5 = inlined_call_operand.vmem [shape: bf16[2,4,8,32], index: 5, kind: input, shape index: {}]   ;;  %s7948_s6 = inlined_call_operand.vmem [shape: bf16[2,32,32], index: 6, kind: input, shape index: {}]   ;;  %s7949_s7 = inlined_call_operand.vmem [shape: bf16[2,32,64], index: 7, kind: input, shape index: {}]   ;;  %s7950_s8 = inlined_call_operand.vmem [shape: bf16[2,4,8,32], index: 8, kind: input, shape index: {}]   ;;  %s7951_s9 = inlined_call_operand.vmem [shape: bf16[2,32,64], index: 9, kind: input, shape index: {}]   ;;  %s7952_s10 = inlined_call_operand.vmem [shape: f32[2,1,64], index: 10, kind: input, shape index: {}]   ;;  %s7953_s11 = inlined_call_operand.vmem [shape: bf16[2,64,32], index: 11, kind: input, shape index: {}]   ;;  %s7954_s12 = inlined_call_operand.vmem [shape: f32[2,1,32], index: 12, kind: input, shape index: {}]   ;;  %s7955_s13 = inlined_call_operand.vmem [shape: f32[2,1,32], index: 13, kind: input, shape index: {}]   ;;  %s7956_s14 = inlined_call_operand.vmem [shape: f32[2,1,32], index: 14, kind: input, shape index: {}]   ;;  %s7957_s15 = inlined_call_operand.vmem [shape: f32[2,1,32], index: 15, kind: input, shape index: {}]   ;;  %s7958_s16 = inlined_call_operand.vmem [shape: f32[2,1,32], index: 16, kind: input, shape index: {}]   ;;  %s7959_s17 = inlined_call_operand.vmem [shape: f32[2,1,32], index: 17, kind: input, shape index: {}]   ;;  %s7960_s18 = inlined_call_operand.vmem [shape: f32[2,1,32], index: 18, kind: input, shape index: {}]   ;;  %s7961_s19 = inlined_call_operand.vmem [shape: bf16[32,32], index: 19, kind: input, shape index: {}]   ;;  %s7962_s20 = inlined_call_operand.vmem [shape: f32[1,32], index: 20, kind: input, shape index: {}]   ;;  %s7963_s21 = inlined_call_operand.hbm [shape: f32[16,32], index: 21, kind: output, shape index: {}]  }
   0x1   :  { %7986 = sst [smem:[#allocation5_spill]] %s7942_s0 }
   0x2   :  { %7987 = sst [smem:[#allocation6_spill]] %s7943_s1 }
   0x3   :  { %7988 = sst [smem:[#allocation7_spill]] %s7944_s2 }
   0x4   :  { %7989 = sst [smem:[#allocation8_spill]] %s7945_s3 }
   0x5   :  { %7990 = sst [smem:[#allocation9_spill]] %s7946_s4 }
   0x6   :  { %7991 = sst [smem:[#allocation10_spill]] %s7947_s5 }
   0x7   :  { %s7992_s26 = sld [smem:[#allocation9_spill]]  ;;  %v6688_v1 = vmov 0.0   ;;  %vm6689_vm0 = vmmov 0   ;;  %vm106_vm1 = vcmask 261120  }
   0x8   :  { %5895 = vmatprep.subr.bf16.mxu0 %v6688_v1  ;;  %5903 = vmatprep.subr.bf16.mxu1 %v6688_v1  ;;  %s7993_s0 = sld [smem:[#allocation5_spill]] }
   0x9   :  { %5899 = vmatprep.mubr.msk.bf16.mxu0 %vm6689_vm0, %v6688_v1  ;;  %5905 = vmatprep.mubr.msk.bf16.mxu1 %vm6689_vm0, %v6688_v1 }
   0xd   :  { %v6488_v0 = vld [vmem:[%s7992_s26 + $0x8] sm:$0xff]   ;;  %v6489_v2 = vld [vmem:[%s7992_s26] sm:$0xff]  }
   0xe   :  { %5896 = vmatpush3.bf16.msra.mxu0 %v6488_v0  ;;  %v6828_v3 = vld [vmem:[%s7993_s0] sm:$0xff]  ;;  %v6833_v4 = vld [vmem:[%s7993_s0 + $0x8] sm:$0xff] }
   0xf   :  { %5897 = vmatprep.subr.bf16.mxu0 %v6688_v1  ;;  %v89_v5 = vpack.c.bf16 %v6833_v4, %v6828_v3 }
  0x12   :  { %5898 = vmatpush3.bf16.msra.mxu0 %v6489_v2 }
  0x13   :  { %5909 = vmatprep.subr.bf16.mxu0 %v6688_v1 }
  0x15   :  { %5900 = vmatmul.mubr.msk.bf16.vlgmr.msra.gmra.mxu0 %vm106_vm1, %v89_v5 }
  0x16   :  { %5911 = vmatprep.mubr.msk.bf16.mxu0 %vm6689_vm0, %v6688_v1 }
  0x17   :  { %26 = vsyncpa [#allocation3], 0  ;;  %s6690_s5 = smov 96   ;;  %vm160_vm2 = vcmask 64512   ;;  %v75_v16 = vlaneseq  ;;  %s7994_s1 = sld [smem:[#allocation7_spill]]  ;;  %vm289_vm5 = vcmask 1043456  }
  0x18   :  { %v6691_v21 = vmov -1000000.0   ;;  %s7976_s25 = smov 64   ;;  %s6693_s27 = smov 88   ;;  %vm2669_vm8 = vcmask 523264  }
  0x19   :  { %v6864_v17 = vand.u32 127, %v75_v16  ;;  %s6694_s3 = smov 120   ;;  %s7974_s28 = smov 56  }
  0x1a   :  { %s7984_s29 = smov 112   ;;  %s7982_s0 = smov 80  }
  0x1b   :  { %s7995_s22 = sld [smem:[#allocation10_spill]]  ;;  %s7972_s24 = smov 48  }
  0x1c   :  { %s7978_s2 = smov 72   ;;  %s7980_s4 = smov 104  }
  0x1d   :  { %v77_v18 = vld [vmem:[%s7994_s1] sm:$0xff]  ;;  %v78_v19 = vld [vmem:[%s7994_s1 + $0x8] sm:$0xff]  ;;  %s7970_s1 = smov 40   ;;  %s7998_s23 = smov 80  }
  0x1e   :  { %vm79_vm3 = vcmp.lt.s32.totalorder %v6864_v17, %v77_v18  ;;  %vm80_vm4 = vcmp.lt.s32.totalorder %v6864_v17, %v78_v19  ;;  %s8002_s30 = smov 56  }
  0x1f   :  { %v6874_v22 = vsel %vm79_vm3, 0.0, %v6691_v21  ;;  %v6879_v28 = vsel %vm80_vm4, 0.0, %v6691_v21 }
  0xd5   :  { %v144_v6 = vpop.f32.mrf.mxu0 }
  0xd6   :  { %v6844_v7 = vpack.c.bf16 %v144_v6, %v144_v6 }
  0xd7   :  { %v5901_v8 = vpop.f32.mrf.mxu0 }
  0xd8   :  { %158 = vrot.lane.b32.xlu0 %v6844_v7, %s6690_s5 }
  0xd9   :  { %v147_v9 = vpop.f32.mrf.mxu0 }
  0xda   :  { %v6848_v10 = vpack.c.bf16 %v147_v9, %v147_v9 }
  0xdb   :  { %v5902_v11 = vpop.f32.mrf.mxu0 }
  0xdc   :  { %208 = vrot.lane.b32.xlu0 %v6848_v10, %s6690_s5 }
 0x14a   :  { %v159_v12 = vpop.permute.xlu0 %158 }
 0x14b   :  { %v165_v13 = vsel %vm160_vm2, %v159_v12, 0 }
 0x14c   :  { %5904 = vmatpush3.bf16.xpose.msra.mxu1 %v165_v13 }
 0x14d   :  { %5915 = vmatprep.subr.bf16.mxu1 %v6688_v1 }
 0x14e   :  { %v209_v14 = vpop.permute.xlu0 %208 }
 0x14f   :  { %v214_v15 = vsel %vm160_vm2, %v209_v14, 0 }
 0x150   :  { %5910 = vmatpush3.bf16.xpose.msra.mxu0 %v214_v15 }
 0x151   :  { %5921 = vmatprep.subr.bf16.mxu0 %v6688_v1 }
 0x153   :  { %5906 = vmatmul.mubr.msk.bf16.vlgmr.msra.gmra.mxu1 %vm160_vm2, %v6844_v7 }
 0x154   :  { %5917 = vmatprep.mubr.msk.bf16.mxu1 %vm6689_vm0, %v6688_v1 }
 0x157   :  { %5912 = vmatmul.mubr.msk.bf16.vlgmr.msra.gmra.mxu0 %vm160_vm2, %v6848_v10 }
 0x158   :  { %5923 = vmatprep.mubr.msk.bf16.mxu0 %vm6689_vm0, %v6688_v1 }
 0x213   :  { %v201_v20 = vpop.f32.mrf.mxu1 }
 0x214   :  { %v256_v23 = vmul.f32 0.35355338, %v201_v20 }
 0x215   :  { %v5907_v24 = vpop.f32.mrf.mxu1 }
 0x216   :  { %v258_v25 = vadd.f32 %v256_v23, %v6874_v22 }
 0x217   :  { %v204_v26 = vpop.f32.mrf.mxu1  ;;  %v250_v27 = vpop.f32.mrf.mxu0 }
 0x218   :  { %v257_v29 = vmul.f32 0.35355338, %v250_v27  ;;  %v260_v30 = vsel %vm160_vm2, %v258_v25, -inf }
 0x219   :  { %261 = vmax.xlane.f32.xlu1 %v260_v30  ;;  %v5908_v31 = vpop.f32.mrf.mxu1  ;;  %v5913_v32 = vpop.f32.mrf.mxu0 }
 0x21a   :  { %v259_v33 = vadd.f32 %v257_v29, %v6879_v28 }
 0x21b   :  { %v253_v34 = vpop.f32.mrf.mxu0 }
 0x21c   :  { %v263_v35 = vsel %vm160_vm2, %v259_v33, -inf }
 0x21d   :  { %264 = vmax.xlane.f32.xlu1 %v263_v35  ;;  %v5914_v36 = vpop.f32.mrf.mxu0 }
 0x22e   :  { %284 = vrot.lane.b32.xlu1 %v6844_v7, %s7976_s25 }
 0x232   :  { %333 = vrot.lane.b32.xlu1 %v6848_v10, %s7976_s25  ;;  %s8005_s25 = smov 40  }
 0x236   :  { %384 = vrot.lane.b32.xlu1 %v6844_v7, %s6693_s27 }
 0x2a2   :  { %v262_v37 = vpop.xlane.xlu1 %261 }
 0x2a3   :  { %v266_v38 = vsub.f32 %v258_v25, %v262_v37 }
 0x2a5   :  { %v268_v39 = vmul.f32 1.442695, %v266_v38 }
 0x2a6   :  { %v265_v40 = vpop.xlane.xlu1 %264 }
 0x2a7   :  { %6514 = vpow2.f32 %v268_v39  ;;  %v267_v41 = vsub.f32 %v259_v33, %v265_v40 }
 0x2a9   :  { %v270_v42 = vmul.f32 1.442695, %v267_v41 }
 0x2aa   :  { %v285_v43 = vpop.permute.xlu1 %284 }
 0x2ab   :  { %6516 = vpow2.f32 %v270_v42  ;;  %v291_v44 = vsel %vm289_vm5, %v285_v43, 0 }
 0x2ac   :  { %5916 = vmatpush3.bf16.msra.mxu1 %v291_v44 }
 0x2ad   :  { %5927 = vmatprep.subr.bf16.mxu1 %v6688_v1 }
 0x2ae   :  { %v334_v45 = vpop.permute.xlu1 %333 }
 0x2af   :  { %v339_v46 = vsel %vm289_vm5, %v334_v45, 0 }
 0x2b0   :  { %5922 = vmatpush3.bf16.msra.mxu0 %v339_v46 }
 0x2b1   :  { %5933 = vmatprep.subr.bf16.mxu0 %v6688_v1 }
 0x2b2   :  { %v385_v51 = vpop.permute.xlu1 %384 }
 0x2b3   :  { %v390_v58 = vsel %vm160_vm2, %v385_v51, 0 }
 0x2b4   :  { %v6515_v47 = vpop.eup %6514 }
 0x2b5   :  { %v272_v48 = vsel %vm160_vm2, %v6515_v47, 0.0 }
 0x2b6   :  { %273 = vadd.xlane.f32.xlu0 %v272_v48 }
 0x2b8   :  { %v6517_v49 = vpop.eup %6516 }
 0x2b9   :  { %v275_v50 = vsel %vm160_vm2, %v6517_v49, 0.0 }
 0x2ba   :  { %276 = vadd.xlane.f32.xlu1 %v275_v50 }
 0x2cb   :  { %434 = vrot.lane.b32.xlu1 %v6848_v10, %s6693_s27 }
 0x2cc   :  { %382 = vrot.lane.b32.xlu0 %v6844_v7, %s6694_s3 }
 0x2cf   :  { %432 = vrot.lane.b32.xlu1 %v6848_v10, %s6694_s3 }
 0x33f   :  { %v274_v52 = vpop.xlane.xlu0 %273 }
 0x340   :  { %6518 = vrcp.f32 %v274_v52 }
 0x343   :  { %v277_v53 = vpop.xlane.xlu1 %276  ;;  %v383_v63 = vpop.permute.xlu0 %382 }
 0x344   :  { %6520 = vrcp.f32 %v277_v53  ;;  %v151_v53 = vld [vmem:[%s7995_s22] sm:$0xf] }
 0x347   :  { %v435_v60 = vpop.permute.xlu1 %434 }
 0x348   :  { %v440_v62 = vsel %vm160_vm2, %v435_v60, 0 }
 0x34b   :  { %v433_v0 = vpop.permute.xlu1 %432 }
 0x34d   :  { %v6519_v54 = vpop.eup %6518 }
 0x34e   :  { %v280_v55 = vmul.f32 %v6519_v54, %v6515_v47 }
 0x350   :  { %v282_v56 = vpack.c.bf16 %v280_v55, %v280_v55 }
 0x351   :  { %v6521_v57 = vpop.eup %6520 }
 0x352   :  { %5918 = vmatmul.mubr.msk.bf16.vlgmr.msra.gmra.mxu1 %vm160_vm2, %v282_v56  ;;  %v281_v59 = vmul.f32 %v6521_v57, %v6517_v49  ;;  %v658_v56 = vsel %vm289_vm5, %v151_v53, 0 }
 0x353   :  { %5928 = vmatpush3.bf16.xpose.msra.mxu1 %v390_v58  ;;  %5929 = vmatprep.mubr.msk.bf16.mxu1 %vm6689_vm0, %v6688_v1 }
 0x354   :  { %v283_v61 = vpack.c.bf16 %v281_v59, %v281_v59  ;;  %5939 = vmatprep.subr.bf16.mxu1 %v6688_v1 }
 0x356   :  { %5924 = vmatmul.mubr.msk.bf16.vlgmr.msra.gmra.mxu0 %vm160_vm2, %v283_v61  ;;  %v152_v61 = vld [vmem:[%s7995_s22 + $0x4] sm:$0xf] }
 0x357   :  { %5934 = vmatpush3.bf16.xpose.msra.mxu0 %v440_v62  ;;  %5935 = vmatprep.mubr.msk.bf16.mxu0 %vm6689_vm0, %v6688_v1  ;;  %v611_v62 = vsel %vm289_vm5, %v152_v61, 0 }
 0x358   :  { %5945 = vmatprep.subr.bf16.mxu0 %v6688_v1 }
 0x35a   :  { %5930 = vmatmul.mubr.msk.bf16.vlgmr.msra.gmra.mxu1 %vm160_vm2, %v383_v63 }
 0x35b   :  { %5941 = vmatprep.mubr.msk.bf16.mxu1 %vm6689_vm0, %v6688_v1 }
 0x35e   :  { %5936 = vmatmul.mubr.msk.bf16.vlgmr.msra.gmra.mxu0 %vm160_vm2, %v433_v0 }
 0x35f   :  { %5947 = vmatprep.mubr.msk.bf16.mxu0 %vm6689_vm0, %v6688_v1 }
 0x412   :  { %v6918_v2 = vpop.f32.mrf.mxu1 }
 0x414   :  { %v5919_v5 = vpop.f32.mrf.mxu1 }
 0x416   :  { %v330_v6 = vpop.f32.mrf.mxu1  ;;  %v6920_v8 = vpop.f32.mrf.mxu0 }
 0x417   :  { %v381_v9 = vpack.c.bf16 %v6920_v8, %v6918_v2 }
 0x418   :  { %v5920_v11 = vpop.f32.mrf.mxu1  ;;  %v5925_v12 = vpop.f32.mrf.mxu0 }
 0x41a   :  { %v378_v13 = vpop.f32.mrf.mxu0  ;;  %v426_v14 = vpop.f32.mrf.mxu1 }
 0x41b   :  { %v482_v15 = vmul.f32 0.35355338, %v426_v14 }
 0x41c   :  { %v5926_v16 = vpop.f32.mrf.mxu0  ;;  %v5931_v18 = vpop.f32.mrf.mxu1 }
 0x41d   :  { %v484_v19 = vadd.f32 %v482_v15, %v6874_v22 }
 0x41e   :  { %v429_v20 = vpop.f32.mrf.mxu1  ;;  %v476_v23 = vpop.f32.mrf.mxu0 }
 0x41f   :  { %v483_v24 = vmul.f32 0.35355338, %v476_v23  ;;  %v486_v25 = vsel %vm160_vm2, %v484_v19, -inf }
 0x420   :  { %487 = vmax.xlane.f32.xlu1 %v486_v25  ;;  %v5932_v26 = vpop.f32.mrf.mxu1  ;;  %v5937_v27 = vpop.f32.mrf.mxu0 }
 0x421   :  { %v485_v29 = vadd.f32 %v483_v24, %v6879_v28 }
 0x422   :  { %v479_v30 = vpop.f32.mrf.mxu0 }
 0x423   :  { %v489_v31 = vsel %vm160_vm2, %v485_v29, -inf }
 0x424   :  { %490 = vmax.xlane.f32.xlu0 %v489_v31  ;;  %v5938_v32 = vpop.f32.mrf.mxu0 }
 0x43a   :  { %558 = vrot.lane.b32.xlu0 %v6848_v10, %s7974_s28 }
 0x43e   :  { %701 = vrot.lane.b32.xlu0 %v6844_v7, %s7984_s29 }
 0x4a9   :  { %v488_v33 = vpop.xlane.xlu1 %487 }
 0x4aa   :  { %v492_v34 = vsub.f32 %v484_v19, %v488_v33 }
 0x4ac   :  { %v494_v35 = vmul.f32 1.442695, %v492_v34 }
 0x4ad   :  { %v491_v36 = vpop.xlane.xlu0 %490 }
 0x4ae   :  { %6522 = vpow2.f32 %v494_v35  ;;  %v493_v37 = vsub.f32 %v485_v29, %v491_v36 }
 0x4b0   :  { %v496_v38 = vmul.f32 1.442695, %v493_v37 }
 0x4b1   :  { %v559_v39 = vpop.permute.xlu0 %558 }
 0x4b2   :  { %6524 = vpow2.f32 %v496_v38  ;;  %v564_v40 = vsel %vm289_vm5, %v559_v39, 0 }
 0x4b3   :  { %5946 = vmatpush3.bf16.msra.mxu0 %v564_v40 }
 0x4b4   :  { %5957 = vmatprep.subr.bf16.mxu0 %v6688_v1 }
 0x4b5   :  { %v702_v15 = vpop.permute.xlu0 %701 }
 0x4bb   :  { %v6523_v41 = vpop.eup %6522 }
 0x4bc   :  { %v498_v42 = vsel %vm160_vm2, %v6523_v41, 0.0 }
 0x4bd   :  { %499 = vadd.xlane.f32.xlu1 %v498_v42 }
 0x4bf   :  { %v6525_v43 = vpop.eup %6524 }
 0x4c0   :  { %v501_v44 = vsel %vm160_vm2, %v6525_v43, 0.0 }
 0x4c1   :  { %502 = vadd.xlane.f32.xlu1 %v501_v44 }
 0x4d2   :  { %510 = vrot.lane.b32.xlu1 %v6844_v7, %s7974_s28  ;;  %s8000_s28 = smov 72  }
 0x4d6   :  { %703 = vrot.lane.b32.xlu1 %v6844_v7, %s7982_s0 }
 0x4da   :  { %753 = vrot.lane.b32.xlu1 %v6848_v10, %s7982_s0 }
 0x4de   :  { %751 = vrot.lane.b32.xlu1 %v6848_v10, %s7984_s29 }
 0x546   :  { %v500_v45 = vpop.xlane.xlu1 %499 }
 0x547   :  { %6526 = vrcp.f32 %v500_v45 }
 0x54a   :  { %v503_v46 = vpop.xlane.xlu1 %502 }
 0x54b   :  { %6528 = vrcp.f32 %v503_v46 }
 0x54e   :  { %v511_v47 = vpop.permute.xlu1 %510 }
 0x54f   :  { %v516_v48 = vsel %vm289_vm5, %v511_v47, 0 }
 0x550   :  { %5940 = vmatpush3.bf16.msra.mxu1 %v516_v48 }
 0x551   :  { %5951 = vmatprep.subr.bf16.mxu1 %v6688_v1 }
 0x552   :  { %v704_v57 = vpop.permute.xlu1 %703 }
 0x553   :  { %v709_v11 = vsel %vm160_vm2, %v704_v57, 0 }
 0x554   :  { %v6527_v49 = vpop.eup %6526 }
 0x555   :  { %v506_v50 = vmul.f32 %v6527_v49, %v6523_v41 }
 0x556   :  { %v754_v58 = vpop.permute.xlu1 %753 }
 0x557   :  { %v508_v51 = vpack.c.bf16 %v506_v50, %v506_v50  ;;  %v759_v59 = vsel %vm160_vm2, %v754_v58, 0 }
 0x558   :  { %v6529_v52 = vpop.eup %6528 }
 0x559   :  { %5942 = vmatmul.mubr.msk.bf16.vlgmr.msra.gmra.mxu1 %vm160_vm2, %v508_v51  ;;  %v507_v54 = vmul.f32 %v6529_v52, %v6525_v43 }
 0x55a   :  { %5953 = vmatprep.mubr.msk.bf16.mxu1 %vm6689_vm0, %v6688_v1  ;;  %v752_v60 = vpop.permute.xlu1 %751  ;;  %5952 = vmatpush3.bf16.msra.mxu1 %v611_v62 }
 0x55b   :  { %v509_v55 = vpack.c.bf16 %v507_v54, %v507_v54  ;;  %5963 = vmatprep.subr.bf16.mxu1 %v6688_v1 }
 0x55d   :  { %5948 = vmatmul.mubr.msk.bf16.vlgmr.msra.gmra.mxu0 %vm160_vm2, %v509_v55 }
 0x55e   :  { %5958 = vmatpush3.bf16.msra.mxu0 %v658_v56  ;;  %5959 = vmatprep.mubr.msk.bf16.mxu0 %vm6689_vm0, %v6688_v1 }
 0x55f   :  { %5969 = vmatprep.subr.bf16.mxu0 %v6688_v1 }
 0x565   :  { %5960 = vmatmul.mubr.msk.bf16.vlgmr.msra.gmra.mxu0 %vm160_vm2, %v381_v9 }
 0x566   :  { %5970 = vmatpush3.bf16.xpose.msra.mxu0 %v759_v59  ;;  %5971 = vmatprep.mubr.msk.bf16.mxu0 %vm6689_vm0, %v6688_v1 }
 0x567   :  { %5981 = vmatprep.subr.bf16.mxu0 %v6688_v1 }
 0x56d   :  { %5972 = vmatmul.mubr.msk.bf16.vlgmr.msra.gmra.mxu0 %vm160_vm2, %v752_v60 }
 0x56e   :  { %5983 = vmatprep.mubr.msk.bf16.mxu0 %vm6689_vm0, %v6688_v1 }
 0x619   :  { %v552_v63 = vpop.f32.mrf.mxu1 }
 0x61b   :  { %v5943_v0 = vpop.f32.mrf.mxu1 }
 0x61d   :  { %v555_v2 = vpop.f32.mrf.mxu1  ;;  %v600_v5 = vpop.f32.mrf.mxu0 }
 0x61e   :  { %v606_v6 = vpack.c.bf16 %v600_v5, %v552_v63  ;;  %v153_v5 = vld [vmem:[%s7995_s22 + $0x8] sm:$0xf] }
 0x61f   :  { %v5944_v8 = vpop.f32.mrf.mxu1  ;;  %v5949_v9 = vpop.f32.mrf.mxu0 }
 0x620   :  { %5954 = vmatmul.mubr.msk.bf16.vlgmr.msra.gmra.mxu1 %vm160_vm2, %v606_v6  ;;  %v930_v6 = vsel %vm289_vm5, %v153_v5, 0 }
 0x621   :  { %5964 = vmatpush3.bf16.xpose.msra.mxu1 %v709_v11  ;;  %v603_v12 = vpop.f32.mrf.mxu0  ;;  %5965 = vmatprep.mubr.msk.bf16.mxu1 %vm6689_vm0, %v6688_v1 }
 0x622   :  { %5975 = vmatprep.subr.bf16.mxu1 %v6688_v1 }
 0x623   :  { %v5950_v13 = vpop.f32.mrf.mxu0 }
 0x625   :  { %v6978_v14 = vpop.f32.mrf.mxu0 }
 0x627   :  { %v5961_v16 = vpop.f32.mrf.mxu0 }
 0x628   :  { %5966 = vmatmul.mubr.msk.bf16.vlgmr.msra.gmra.mxu1 %vm160_vm2, %v702_v15 }
 0x629   :  { %v6981_v18 = vpop.f32.mrf.mxu0  ;;  %5977 = vmatprep.mubr.msk.bf16.mxu1 %vm6689_vm0, %v6688_v1 }
 0x62b   :  { %v5962_v19 = vpop.f32.mrf.mxu0 }
 0x62d   :  { %v795_v20 = vpop.f32.mrf.mxu0 }
 0x62e   :  { %v802_v23 = vmul.f32 0.35355338, %v795_v20 }
 0x62f   :  { %v5973_v24 = vpop.f32.mrf.mxu0 }
 0x630   :  { %v804_v25 = vadd.f32 %v802_v23, %v6879_v28 }
 0x631   :  { %v798_v26 = vpop.f32.mrf.mxu0 }
 0x632   :  { %v808_v27 = vsel %vm160_vm2, %v804_v25, -inf }
 0x633   :  { %809 = vmax.xlane.f32.xlu1 %v808_v27  ;;  %v5974_v29 = vpop.f32.mrf.mxu0 }
 0x644   :  { %829 = vrot.lane.b32.xlu1 %v6844_v7, %s7972_s24 }
 0x648   :  { %977 = vrot.lane.b32.xlu1 %v6844_v7, %s7978_s2 }
 0x64c   :  { %1027 = vrot.lane.b32.xlu1 %v6848_v10, %s7978_s2  ;;  %s7996_s2 = sld [smem:[#allocation6_spill]] }
 0x650   :  { %1025 = vrot.lane.b32.xlu1 %v6848_v10, %s7980_s4 }
 0x6bc   :  { %v810_v30 = vpop.xlane.xlu1 %809 }
 0x6bd   :  { %v812_v33 = vsub.f32 %v804_v25, %v810_v30 }
 0x6bf   :  { %v815_v34 = vmul.f32 1.442695, %v812_v33 }
 0x6c0   :  { %v830_v31 = vpop.permute.xlu1 %829 }
 0x6c1   :  { %v835_v32 = vsel %vm289_vm5, %v830_v31, 0  ;;  %6530 = vpow2.f32 %v815_v34 }
 0x6c2   :  { %5976 = vmatpush3.bf16.msra.mxu1 %v835_v32 }
 0x6c3   :  { %5987 = vmatprep.subr.bf16.mxu1 %v6688_v1 }
 0x6c4   :  { %v978_v59 = vpop.permute.xlu1 %977 }
 0x6c5   :  { %v983_v61 = vsel %vm160_vm2, %v978_v59, 0 }
 0x6c8   :  { %v1028_v15 = vpop.permute.xlu1 %1027 }
 0x6c9   :  { %v1033_v27 = vsel %vm160_vm2, %v1028_v15, 0 }
 0x6cc   :  { %v1026_v33 = vpop.permute.xlu1 %1025 }
 0x6ce   :  { %v6531_v45 = vpop.eup %6530 }
 0x6cf   :  { %v820_v47 = vsel %vm160_vm2, %v6531_v45, 0.0 }
 0x6e0   :  { %v6997_v35 = vpop.f32.mrf.mxu1 }
 0x6e2   :  { %v5955_v36 = vpop.f32.mrf.mxu1 }
 0x6e4   :  { %v6999_v37 = vpop.f32.mrf.mxu1 }
 0x6e6   :  { %v5956_v38 = vpop.f32.mrf.mxu1 }
 0x6e8   :  { %v745_v39 = vpop.f32.mrf.mxu1 }
 0x6e9   :  { %v801_v40 = vmul.f32 0.35355338, %v745_v39 }
 0x6ea   :  { %v5967_v41 = vpop.f32.mrf.mxu1 }
 0x6eb   :  { %v803_v42 = vadd.f32 %v801_v40, %v6874_v22  ;;  %v695_v41 = vadd.f32 %v6978_v14, %v6997_v35 }
 0x6ec   :  { %v748_v43 = vpop.f32.mrf.mxu1 }
 0x6ed   :  { %v805_v44 = vsel %vm160_vm2, %v803_v42, -inf }
 0x6ee   :  { %806 = vmax.xlane.f32.xlu0 %v805_v44  ;;  %v5968_v46 = vpop.f32.mrf.mxu1 }
 0x6f2   :  { %821 = vadd.xlane.f32.xlu0 %v820_v47 }
 0x777   :  { %v807_v48 = vpop.xlane.xlu0 %806 }
 0x778   :  { %v811_v49 = vsub.f32 %v803_v42, %v807_v48 }
 0x77a   :  { %v813_v50 = vmul.f32 1.442695, %v811_v49 }
 0x77b   :  { %v822_v53 = vpop.xlane.xlu0 %821 }
 0x77c   :  { %6532 = vpow2.f32 %v813_v50 }
 0x77d   :  { %6534 = vrcp.f32 %v822_v53 }
 0x789   :  { %v6533_v51 = vpop.eup %6532 }
 0x78a   :  { %v817_v52 = vsel %vm160_vm2, %v6533_v51, 0.0  ;;  %v6535_v54 = vpop.eup %6534 }
 0x78b   :  { %818 = vadd.xlane.f32.xlu0 %v817_v52  ;;  %v826_v56 = vmul.f32 %v6535_v54, %v6531_v45  ;;  %v698_v45 = vadd.f32 %v6981_v18, %v6999_v37 }
 0x78d   :  { %v828_v60 = vpack.c.bf16 %v826_v56, %v826_v56 }
 0x7a1   :  { %877 = vrot.lane.b32.xlu0 %v6848_v10, %s7972_s24  ;;  %s7999_s24 = smov 104  }
 0x7a5   :  { %975 = vrot.lane.b32.xlu0 %v6844_v7, %s7980_s4  ;;  %s8004_s4 = smov 48  }
 0x814   :  { %v819_v55 = vpop.xlane.xlu0 %818 }
 0x815   :  { %6536 = vrcp.f32 %v819_v55 }
 0x818   :  { %v878_v57 = vpop.permute.xlu0 %877 }
 0x819   :  { %v883_v58 = vsel %vm289_vm5, %v878_v57, 0 }
 0x81a   :  { %5982 = vmatpush3.bf16.msra.mxu0 %v883_v58 }
 0x81b   :  { %5993 = vmatprep.subr.bf16.mxu0 %v6688_v1 }
 0x81c   :  { %v976_v0 = vpop.permute.xlu0 %975 }
 0x81d   :  { %5984 = vmatmul.mubr.msk.bf16.vlgmr.msra.gmra.mxu0 %vm160_vm2, %v828_v60 }
 0x81e   :  { %5994 = vmatpush3.bf16.xpose.msra.mxu0 %v983_v61  ;;  %5995 = vmatprep.mubr.msk.bf16.mxu0 %vm6689_vm0, %v6688_v1 }
 0x81f   :  { %6005 = vmatprep.subr.bf16.mxu0 %v6688_v1 }
 0x822   :  { %v6537_v62 = vpop.eup %6536 }
 0x823   :  { %v825_v63 = vmul.f32 %v6537_v62, %v6533_v51  ;;  %v154_v62 = vld [vmem:[%s7995_s22 + $0xc] sm:$0xf] }
 0x825   :  { %5996 = vmatmul.mubr.msk.bf16.vlgmr.msra.gmra.mxu0 %vm160_vm2, %v976_v0  ;;  %v827_v2 = vpack.c.bf16 %v825_v63, %v825_v63  ;;  %v1204_v63 = vsel %vm289_vm5, %v154_v62, 0 }
 0x826   :  { %6007 = vmatprep.mubr.msk.bf16.mxu0 %vm6689_vm0, %v6688_v1 }
 0x827   :  { %5978 = vmatmul.mubr.msk.bf16.vlgmr.msra.gmra.mxu1 %vm160_vm2, %v827_v2 }
 0x828   :  { %5989 = vmatprep.mubr.msk.bf16.mxu1 %vm6689_vm0, %v6688_v1  ;;  %5988 = vmatpush3.bf16.msra.mxu1 %v930_v6 }
 0x829   :  { %5999 = vmatprep.subr.bf16.mxu1 %v6688_v1 }
 0x8dd   :  { %v919_v8 = vpop.f32.mrf.mxu0 }
 0x8df   :  { %v5985_v9 = vpop.f32.mrf.mxu0 }
 0x8e1   :  { %v922_v11 = vpop.f32.mrf.mxu0 }
 0x8e3   :  { %v5986_v12 = vpop.f32.mrf.mxu0 }
 0x8e5   :  { %v1019_v13 = vpop.f32.mrf.mxu0 }
 0x8e6   :  { %v1075_v16 = vmul.f32 0.35355338, %v1019_v13 }
 0x8e7   :  { %v871_v19 = vpop.f32.mrf.mxu1  ;;  %v5997_v20 = vpop.f32.mrf.mxu0 }
 0x8e8   :  { %v925_v23 = vpack.c.bf16 %v919_v8, %v871_v19  ;;  %v1077_v24 = vadd.f32 %v1075_v16, %v6874_v22 }
 0x8e9   :  { %v5979_v25 = vpop.f32.mrf.mxu1  ;;  %v1022_v26 = vpop.f32.mrf.mxu0 }
 0x8ea   :  { %5990 = vmatmul.mubr.msk.bf16.vlgmr.msra.gmra.mxu1 %vm160_vm2, %v925_v23  ;;  %v1079_v29 = vsel %vm160_vm2, %v1077_v24, -inf }
 0x8eb   :  { %6000 = vmatpush3.bf16.xpose.msra.mxu1 %v1033_v27  ;;  %v874_v30 = vpop.f32.mrf.mxu1  ;;  %1080 = vmax.xlane.f32.xlu0 %v1079_v29  ;;  %v5998_v31 = vpop.f32.mrf.mxu0 }
 0x8ec   :  { %6001 = vmatprep.mubr.msk.bf16.mxu1 %vm6689_vm0, %v6688_v1  ;;  %6011 = vmatprep.subr.bf16.mxu1 %v6688_v1 }
 0x8ed   :  { %v5980_v32 = vpop.f32.mrf.mxu1 }
 0x8f2   :  { %6002 = vmatmul.mubr.msk.bf16.vlgmr.msra.gmra.mxu1 %vm160_vm2, %v1026_v33 }
 0x8f3   :  { %6013 = vmatprep.mubr.msk.bf16.mxu1 %vm6689_vm0, %v6688_v1 }
 0x974   :  { %v1081_v34 = vpop.xlane.xlu0 %1080 }
 0x975   :  { %v1085_v36 = vsub.f32 %v1077_v24, %v1081_v34 }
 0x977   :  { %v1087_v38 = vmul.f32 1.442695, %v1085_v36 }
 0x979   :  { %6538 = vpow2.f32 %v1087_v38 }
 0x986   :  { %v6539_v39 = vpop.eup %6538 }
 0x987   :  { %v1091_v40 = vsel %vm160_vm2, %v6539_v39, 0.0 }
 0x988   :  { %1092 = vadd.xlane.f32.xlu0 %v1091_v40 }
 0x9aa   :  { %v966_v42 = vpop.f32.mrf.mxu1 }
 0x9ab   :  { %v973_v43 = vadd.f32 %v966_v42, %v695_v41 }
 0x9ac   :  { %v5991_v44 = vpop.f32.mrf.mxu1 }
 0x9ae   :  { %v969_v46 = vpop.f32.mrf.mxu1 }
 0x9af   :  { %v974_v47 = vadd.f32 %v969_v46, %v698_v45  ;;  %v6491_v46 = vld [vmem:[%s7949_s7] sm:$0xff]  }
 0x9b0   :  { %v5992_v48 = vpop.f32.mrf.mxu1 }
 0x9b1   :  { %v73_v48 = vld [vmem:[%s7996_s2 + $0x8] sm:$0xff] }
 0x9b2   :  { %v1069_v49 = vpop.f32.mrf.mxu1 }
 0x9b3   :  { %v1076_v50 = vmul.f32 0.35355338, %v1069_v49 }
 0x9b4   :  { %v6003_v51 = vpop.f32.mrf.mxu1 }
 0x9b5   :  { %v1078_v52 = vadd.f32 %v1076_v50, %v6879_v28  ;;  %v6492_v50 = vld [vmem:[%s7948_s6 + $0x8] sm:$0xff]   ;;  %v6493_v51 = vld [vmem:[%s7948_s6] sm:$0xff]  }
 0x9b6   :  { %v1072_v53 = vpop.f32.mrf.mxu1 }
 0x9b7   :  { %v1082_v54 = vsel %vm160_vm2, %v1078_v52, -inf }
 0x9b8   :  { %1083 = vmax.xlane.f32.xlu1 %v1082_v54  ;;  %v6004_v55 = vpop.f32.mrf.mxu1 }
 0x9c9   :  { %1103 = vrot.lane.b32.xlu1 %v6844_v7, %s7970_s1 }
 0xa11   :  { %v1093_v14 = vpop.xlane.xlu0 %1092 }
 0xa12   :  { %6540 = vrcp.f32 %v1093_v14 }
 0xa1f   :  { %v6541_v18 = vpop.eup %6540 }
 0xa20   :  { %v1099_v57 = vmul.f32 %v6541_v18, %v6539_v39 }
 0xa22   :  { %v1101_v60 = vpack.c.bf16 %v1099_v57, %v1099_v57 }
 0xa41   :  { %v1084_v35 = vpop.xlane.xlu1 %1083 }
 0xa42   :  { %v1086_v37 = vsub.f32 %v1078_v52, %v1084_v35 }
 0xa44   :  { %v1089_v56 = vmul.f32 1.442695, %v1086_v37 }
 0xa45   :  { %v1104_v58 = vpop.permute.xlu1 %1103 }
 0xa46   :  { %6542 = vpow2.f32 %v1089_v56  ;;  %v1109_v59 = vsel %vm289_vm5, %v1104_v58, 0  ;;  %v5547_v56 = vld [vmem:[%s7955_s13] ss:$0 sm:$0xff] }
 0xa47   :  { %6006 = vmatpush3.bf16.msra.mxu0 %v1109_v59 }
 0xa48   :  { %6017 = vmatprep.subr.bf16.mxu0 %v6688_v1 }
 0xa4a   :  { %6008 = vmatmul.mubr.msk.bf16.vlgmr.msra.gmra.mxu0 %vm160_vm2, %v1101_v60  ;;  %v5548_v60 = vld [vmem:[%s7956_s14] ss:$0 sm:$0xff] }
 0xa4b   :  { %6019 = vmatprep.mubr.msk.bf16.mxu0 %vm6689_vm0, %v6688_v1  ;;  %6018 = vmatpush3.bf16.msra.mxu0 %v1204_v63 }
 0xa4c   :  { %6031 = vmatprep.subr.bf16.mxu0 %v6688_v1 }
 0xa53   :  { %v6543_v7 = vpop.eup %6542 }
 0xa54   :  { %v1094_v61 = vsel %vm160_vm2, %v6543_v7, 0.0 }
 0xa55   :  { %1095 = vadd.xlane.f32.xlu0 %v1094_v61 }
 0xa6b   :  { %1151 = vrot.lane.b32.xlu0 %v6848_v10, %s7970_s1  ;;  %s7997_s1 = sld [smem:[#allocation8_spill]] }
 0xade   :  { %v1096_v0 = vpop.xlane.xlu0 %1095 }
 0xadf   :  { %6544 = vrcp.f32 %v1096_v0 }
 0xae2   :  { %v1152_v2 = vpop.permute.xlu0 %1151 }
 0xae3   :  { %v1157_v5 = vsel %vm289_vm5, %v1152_v2, 0 }
 0xae4   :  { %6012 = vmatpush3.bf16.msra.mxu1 %v1157_v5 }
 0xae5   :  { %6023 = vmatprep.subr.bf16.mxu1 %v6688_v1 }
 0xaec   :  { %v6545_v6 = vpop.eup %6544 }
 0xaed   :  { %v1100_v8 = vmul.f32 %v6545_v6, %v6543_v7 }
 0xaef   :  { %v1102_v10 = vpack.c.bf16 %v1100_v8, %v1100_v8 }
 0xaf1   :  { %6014 = vmatmul.mubr.msk.bf16.vlgmr.msra.gmra.mxu1 %vm160_vm2, %v1102_v10 }
 0xaf2   :  { %6027 = vmatprep.mubr.msk.bf16.mxu1 %vm6689_vm0, %v6688_v1  ;;  %6024 = vmatpush3.bf16.msra.mxu1 %v6492_v50 }
 0xaf3   :  { %6025 = vmatprep.subr.bf16.mxu1 %v6688_v1 }
 0xaf6   :  { %6026 = vmatpush3.bf16.msra.mxu1 %v6493_v51 }
 0xaf7   :  { %6039 = vmatprep.subr.bf16.mxu1 %v6688_v1 }
 0xb0a   :  { %v1145_v9 = vpop.f32.mrf.mxu0 }
 0xb0c   :  { %v6009_v11 = vpop.f32.mrf.mxu0 }
 0xb0e   :  { %v1148_v12 = vpop.f32.mrf.mxu0 }
 0xb10   :  { %v6010_v13 = vpop.f32.mrf.mxu0 }
 0xbb1   :  { %v1193_v15 = vpop.f32.mrf.mxu1 }
 0xbb2   :  { %v1199_v16 = vpack.c.bf16 %v1193_v15, %v1145_v9 }
 0xbb3   :  { %v6015_v19 = vpop.f32.mrf.mxu1 }
 0xbb4   :  { %6020 = vmatmul.mubr.msk.bf16.vlgmr.msra.gmra.mxu0 %vm160_vm2, %v1199_v16 }
 0xbb5   :  { %v1196_v20 = vpop.f32.mrf.mxu1  ;;  %6035 = vmatprep.mubr.msk.bf16.mxu0 %vm6689_vm0, %v6688_v1 }
 0xbb7   :  { %v6016_v23 = vpop.f32.mrf.mxu1 }
 0xbb8   :  { %v83_v23 = vld [vmem:[%s7997_s1] sm:$0xff] }
 0xbb9   :  { %vm85_vm6 = vcmp.lt.s32.totalorder %v6864_v17, %v83_v23 }
 0xc74   :  { %v1240_v24 = vpop.f32.mrf.mxu0 }
 0xc75   :  { %v1247_v25 = vadd.f32 %v1240_v24, %v973_v43  ;;  %v84_v24 = vld [vmem:[%s7997_s1 + $0x8] sm:$0xff]  ;;  %s8003_s1 = smov 112  }
 0xc76   :  { %v6021_v26 = vpop.f32.mrf.mxu0  ;;  %vm86_vm7 = vcmp.lt.s32.totalorder %v6864_v17, %v84_v24 }
 0xc77   :  { %v1251_v27 = vadd.f32 %v1247_v25, %v6828_v3  ;;  %v7146_v26 = vsel %vm85_vm6, 0.0, %v6691_v21 }
 0xc78   :  { %v1243_v29 = vpop.f32.mrf.mxu0 }
 0xc79   :  { %v1248_v30 = vadd.f32 %v1243_v29, %v974_v47  ;;  %v1253_v31 = vsel %vm106_vm1, %v1251_v27, 0.0  ;;  %v72_v47 = vld [vmem:[%s7996_s2] sm:$0xff] }
 0xc7a   :  { %1254 = vadd.xlane.f32.xlu1 %v1253_v31  ;;  %v6022_v32 = vpop.f32.mrf.mxu0  ;;  %v7086_v49 = vpack.c.bf16 %v73_v48, %v72_v47 }
 0xc7b   :  { %v1252_v33 = vadd.f32 %v1248_v30, %v6833_v4  ;;  %v6490_v4 = vld [vmem:[%s7949_s7 + $0x8] sm:$0xff]  }
 0xc7c   :  { %6032 = vmatpush3.bf16.msra.mxu0 %v6490_v4 }
 0xc7d   :  { %v1256_v34 = vsel %vm106_vm1, %v1252_v33, 0.0  ;;  %6033 = vmatprep.subr.bf16.mxu0 %v6688_v1 }
 0xc7e   :  { %1257 = vadd.xlane.f32.xlu0 %v1256_v34 }
 0xc80   :  { %6034 = vmatpush3.bf16.msra.mxu0 %v6491_v46 }
 0xc81   :  { %6045 = vmatprep.subr.bf16.mxu0 %v6688_v1 }
 0xc83   :  { %6036 = vmatmul.mubr.msk.bf16.vlgmr.msra.gmra.mxu0 %vm106_vm1, %v7086_v49 }
 0xc84   :  { %6047 = vmatprep.mubr.msk.bf16.mxu0 %vm6689_vm0, %v6688_v1 }
 0xd03   :  { %v1255_v36 = vpop.xlane.xlu1 %1254 }
 0xd04   :  { %v1260_v38 = vmul.f32 0.03125, %v1255_v36 }
 0xd06   :  { %v1262_v39 = vsub.f32 %v1251_v27, %v1260_v38 }
 0xd07   :  { %v1258_v40 = vpop.xlane.xlu0 %1257 }
 0xd08   :  { %v1261_v41 = vmul.f32 0.03125, %v1258_v40  ;;  %v1264_v42 = vmul.f32 %v1262_v39, %v1262_v39 }
 0xd0a   :  { %v1263_v43 = vsub.f32 %v1252_v33, %v1261_v41  ;;  %v1266_v3 = vsel %vm106_vm1, %v1264_v42, 0.0  ;;  %v7151_v33 = vsel %vm86_vm7, 0.0, %v6691_v21 }
 0xd0b   :  { %1267 = vadd.xlane.f32.xlu1 %v1266_v3 }
 0xd0c   :  { %v1265_v44 = vmul.f32 %v1263_v43, %v1263_v43 }
 0xd0e   :  { %v1269_v45 = vsel %vm106_vm1, %v1265_v44, 0.0 }
 0xd0f   :  { %1270 = vadd.xlane.f32.xlu0 %v1269_v45 }
 0xd43   :  { %v1410_v0 = vpop.f32.mrf.mxu0 }
 0xd44   :  { %v7116_v2 = vpack.c.bf16 %v1410_v0, %v1410_v0 }
 0xd45   :  { %v6037_v5 = vpop.f32.mrf.mxu0 }
 0xd46   :  { %v1429_v6 = vsel %vm160_vm2, %v7116_v2, 0 }
 0xd47   :  { %v1413_v8 = vpop.f32.mrf.mxu0 }
 0xd48   :  { %v7120_v10 = vpack.c.bf16 %v1413_v8, %v1413_v8 }
 0xd49   :  { %v6038_v9 = vpop.f32.mrf.mxu0 }
 0xd4a   :  { %v1475_v11 = vsel %vm160_vm2, %v7120_v10, 0 }
 0xd4b   :  { %6046 = vmatpush3.bf16.xpose.msra.mxu0 %v1475_v11 }
 0xd4c   :  { %6057 = vmatprep.subr.bf16.mxu0 %v6688_v1 }
 0xd94   :  { %v1268_v52 = vpop.xlane.xlu1 %1267 }
 0xd95   :  { %v1272_v53 = vmul.f32 0.03125, %v1268_v52 }
 0xd97   :  { %v1274_v54 = vadd.f32 1e-05, %v1272_v53 }
 0xd98   :  { %v1271_v55 = vpop.xlane.xlu0 %1270 }
 0xd99   :  { %6546 = vrsqrt.f32 %v1274_v54  ;;  %v1273_v14 = vmul.f32 0.03125, %v1271_v55 }
 0xd9b   :  { %v1275_v18 = vadd.f32 1e-05, %v1273_v14 }
 0xd9d   :  { %6548 = vrsqrt.f32 %v1275_v18 }
 0xda6   :  { %v6547_v35 = vpop.eup %6546 }
 0xda7   :  { %v1278_v37 = vmul.f32 %v6547_v35, %v1262_v39 }
 0xda9   :  { %v1286_v59 = vmul.f32 %v5547_v56, %v1278_v37 }
 0xdaa   :  { %v6549_v57 = vpop.eup %6548 }
 0xdab   :  { %v1279_v58 = vmul.f32 %v6549_v57, %v1263_v43  ;;  %v7107_v61 = vadd.f32 %v5548_v60, %v1286_v59 }
 0xdad   :  { %v1287_v7 = vmul.f32 %v5547_v56, %v1279_v58 }
 0xdaf   :  { %v7109_v62 = vadd.f32 %v5548_v60, %v1287_v7 }
 0xdb1   :  { %v1296_v63 = vpack.c.bf16 %v7109_v62, %v7107_v61 }
 0xdb3   :  { %6028 = vmatmul.mubr.msk.bf16.vlgmr.msra.gmra.mxu1 %vm106_vm1, %v1296_v63 }
 0xdb4   :  { %6041 = vmatprep.mubr.msk.bf16.mxu1 %vm6689_vm0, %v6688_v1  ;;  %6040 = vmatpush3.bf16.xpose.msra.mxu1 %v1429_v6 }
 0xdb5   :  { %6051 = vmatprep.subr.bf16.mxu1 %v6688_v1 }
 0xe73   :  { %v1350_v12 = vpop.f32.mrf.mxu1 }
 0xe74   :  { %v7126_v13 = vpack.c.bf16 %v1350_v12, %v1350_v12 }
 0xe75   :  { %v6029_v15 = vpop.f32.mrf.mxu1 }
 0xe76   :  { %6042 = vmatmul.mubr.msk.bf16.vlgmr.msra.gmra.mxu1 %vm160_vm2, %v7126_v13 }
 0xe77   :  { %v1353_v16 = vpop.f32.mrf.mxu1  ;;  %6053 = vmatprep.mubr.msk.bf16.mxu1 %vm6689_vm0, %v6688_v1 }
 0xe78   :  { %v7132_v19 = vpack.c.bf16 %v1353_v16, %v1353_v16 }
 0xe79   :  { %v6030_v20 = vpop.f32.mrf.mxu1 }
 0xe7a   :  { %6048 = vmatmul.mubr.msk.bf16.vlgmr.msra.gmra.mxu0 %vm160_vm2, %v7132_v19 }
 0xe7b   :  { %6059 = vmatprep.mubr.msk.bf16.mxu0 %vm6689_vm0, %v6688_v1 }
 0xf36   :  { %v1465_v25 = vpop.f32.mrf.mxu1 }
 0xf37   :  { %v1517_v27 = vmul.f32 0.35355338, %v1465_v25 }
 0xf38   :  { %v6043_v29 = vpop.f32.mrf.mxu1 }
 0xf39   :  { %v1519_v30 = vadd.f32 %v1517_v27, %v7146_v26 }
 0xf3a   :  { %v1468_v31 = vpop.f32.mrf.mxu1  ;;  %v1511_v32 = vpop.f32.mrf.mxu0 }
 0xf3b   :  { %v1518_v34 = vmul.f32 0.35355338, %v1511_v32  ;;  %v1521_v36 = vsel %vm160_vm2, %v1519_v30, -inf }
 0xf3c   :  { %1522 = vmax.xlane.f32.xlu1 %v1521_v36  ;;  %v6044_v38 = vpop.f32.mrf.mxu1  ;;  %v6049_v39 = vpop.f32.mrf.mxu0 }
 0xf3d   :  { %v1520_v40 = vadd.f32 %v1518_v34, %v7151_v33 }
 0xf3e   :  { %v1514_v41 = vpop.f32.mrf.mxu0 }
 0xf3f   :  { %v1524_v42 = vsel %vm160_vm2, %v1520_v40, -inf }
 0xf40   :  { %1525 = vmax.xlane.f32.xlu0 %v1524_v42  ;;  %v6050_v17 = vpop.f32.mrf.mxu0 }
 0xf4d   :  { %1546 = vrot.lane.b32.xlu1 %v7116_v2, %s6690_s5 }
 0xfc5   :  { %v1523_v43 = vpop.xlane.xlu1 %1522 }
 0xfc6   :  { %v1527_v3 = vsub.f32 %v1519_v30, %v1523_v43 }
 0xfc8   :  { %v1529_v21 = vmul.f32 1.442695, %v1527_v3 }
 0xfc9   :  { %v1547_v44 = vpop.permute.xlu1 %1546  ;;  %v1526_v45 = vpop.xlane.xlu0 %1525 }
 0xfca   :  { %6550 = vpow2.f32 %v1529_v21  ;;  %v1552_v4 = vsel %vm289_vm5, %v1547_v44, 0  ;;  %v1528_v46 = vsub.f32 %v1520_v40, %v1526_v45 }
 0xfcb   :  { %6052 = vmatpush3.bf16.msra.mxu1 %v1552_v4 }
 0xfcc   :  { %v1531_v47 = vmul.f32 1.442695, %v1528_v46  ;;  %6063 = vmatprep.subr.bf16.mxu1 %v6688_v1 }
 0xfce   :  { %6552 = vpow2.f32 %v1531_v47 }
 0xfd7   :  { %v6551_v48 = vpop.eup %6550 }
 0xfd8   :  { %v1533_v50 = vsel %vm160_vm2, %v6551_v48, 0.0 }
 0xfd9   :  { %1534 = vadd.xlane.f32.xlu1 %v1533_v50 }
 0xfdb   :  { %v6553_v51 = vpop.eup %6552 }
 0xfdc   :  { %v1536_v52 = vsel %vm160_vm2, %v6553_v51, 0.0 }
 0xfdd   :  { %1537 = vadd.xlane.f32.xlu0 %v1536_v52 }
 0xfea   :  { %1647 = vrot.lane.b32.xlu1 %v7116_v2, %s6694_s3 }
 0xfee   :  { %1698 = vrot.lane.b32.xlu1 %v7120_v10, %s6694_s3 }
 0xff2   :  { %1696 = vrot.lane.b32.xlu1 %v7132_v19, %s6694_s3 }
 0xff3   :  { %1595 = vrot.lane.b32.xlu0 %v7120_v10, %s6690_s5 }
 0xff7   :  { %1645 = vrot.lane.b32.xlu0 %v7126_v13, %s6694_s3 }
0x1062   :  { %v1535_v53 = vpop.xlane.xlu1 %1534 }
0x1063   :  { %6554 = vrcp.f32 %v1535_v53 }
0x1066   :  { %v1538_v54 = vpop.xlane.xlu0 %1537  ;;  %v1648_v35 = vpop.permute.xlu1 %1647 }
0x1067   :  { %6556 = vrcp.f32 %v1538_v54  ;;  %v1653_v58 = vsel %vm160_vm2, %v1648_v35, 0 }
0x106a   :  { %v1596_v55 = vpop.permute.xlu0 %1595  ;;  %v1699_v60 = vpop.permute.xlu1 %1698 }
0x106b   :  { %v1601_v14 = vsel %vm289_vm5, %v1596_v55, 0  ;;  %v1704_v63 = vsel %vm160_vm2, %v1699_v60, 0 }
0x106c   :  { %6058 = vmatpush3.bf16.msra.mxu0 %v1601_v14 }
0x106d   :  { %6069 = vmatprep.subr.bf16.mxu0 %v6688_v1 }
0x106e   :  { %v1646_v0 = vpop.permute.xlu0 %1645  ;;  %v1697_v5 = vpop.permute.xlu1 %1696 }
0x1070   :  { %v6555_v18 = vpop.eup %6554 }
0x1071   :  { %v1541_v37 = vmul.f32 %v6555_v18, %v6551_v48 }
0x1073   :  { %v1543_v56 = vpack.c.bf16 %v1541_v37, %v1541_v37 }
0x1074   :  { %v6557_v57 = vpop.eup %6556 }
0x1075   :  { %6054 = vmatmul.mubr.msk.bf16.vlgmr.msra.gmra.mxu1 %vm160_vm2, %v1543_v56  ;;  %v1542_v59 = vmul.f32 %v6557_v57, %v6553_v51  ;;  %v1417_v56 = vld [vmem:[%s7950_s8] sm:$0xf] }
0x1076   :  { %6064 = vmatpush3.bf16.xpose.msra.mxu1 %v1653_v58  ;;  %6065 = vmatprep.mubr.msk.bf16.mxu1 %vm6689_vm0, %v6688_v1 }
0x1077   :  { %v1544_v7 = vpack.c.bf16 %v1542_v59, %v1542_v59  ;;  %6075 = vmatprep.subr.bf16.mxu1 %v6688_v1  ;;  %v1922_v59 = vsel %vm289_vm5, %v1417_v56, 0 }
0x1079   :  { %6060 = vmatmul.mubr.msk.bf16.vlgmr.msra.gmra.mxu0 %vm160_vm2, %v1544_v7 }
0x107a   :  { %6070 = vmatpush3.bf16.xpose.msra.mxu0 %v1704_v63  ;;  %6071 = vmatprep.mubr.msk.bf16.mxu0 %vm6689_vm0, %v6688_v1 }
0x107b   :  { %6081 = vmatprep.subr.bf16.mxu0 %v6688_v1 }
0x107d   :  { %6066 = vmatmul.mubr.msk.bf16.vlgmr.msra.gmra.mxu1 %vm160_vm2, %v1646_v0 }
0x107e   :  { %6077 = vmatprep.mubr.msk.bf16.mxu1 %vm6689_vm0, %v6688_v1 }
0x1081   :  { %6072 = vmatmul.mubr.msk.bf16.vlgmr.msra.gmra.mxu0 %vm160_vm2, %v1697_v5  ;;  %v1418_v5 = vld [vmem:[%s7950_s8 + $0x4] sm:$0xf] }
0x1082   :  { %6083 = vmatprep.mubr.msk.bf16.mxu0 %vm6689_vm0, %v6688_v1 }
0x1135   :  { %v7190_v6 = vpop.f32.mrf.mxu1 }
0x1137   :  { %v6055_v8 = vpop.f32.mrf.mxu1 }
0x1139   :  { %v1591_v9 = vpop.f32.mrf.mxu1  ;;  %v7192_v11 = vpop.f32.mrf.mxu0 }
0x113a   :  { %v1643_v12 = vpack.c.bf16 %v7192_v11, %v7190_v6  ;;  %v1875_v6 = vsel %vm289_vm5, %v1418_v5, 0 }
0x113b   :  { %v6056_v15 = vpop.f32.mrf.mxu1  ;;  %v6061_v16 = vpop.f32.mrf.mxu0 }
0x113d   :  { %v1640_v20 = vpop.f32.mrf.mxu0  ;;  %v1689_v23 = vpop.f32.mrf.mxu1 }
0x113e   :  { %v1746_v24 = vmul.f32 0.35355338, %v1689_v23 }
0x113f   :  { %v6062_v25 = vpop.f32.mrf.mxu0  ;;  %v6067_v27 = vpop.f32.mrf.mxu1 }
0x1140   :  { %v1748_v29 = vadd.f32 %v1746_v24, %v7146_v26 }
0x1141   :  { %v1692_v30 = vpop.f32.mrf.mxu1  ;;  %v1740_v31 = vpop.f32.mrf.mxu0 }
0x1142   :  { %v1747_v32 = vmul.f32 0.35355338, %v1740_v31  ;;  %v1750_v34 = vsel %vm160_vm2, %v1748_v29, -inf }
0x1143   :  { %1751 = vmax.xlane.f32.xlu0 %v1750_v34  ;;  %v6068_v36 = vpop.f32.mrf.mxu1  ;;  %v6073_v38 = vpop.f32.mrf.mxu0 }
0x1144   :  { %v1749_v39 = vadd.f32 %v1747_v32, %v7151_v33 }
0x1145   :  { %v1743_v40 = vpop.f32.mrf.mxu0 }
0x1146   :  { %v1753_v41 = vsel %vm160_vm2, %v1749_v39, -inf }
0x1147   :  { %1754 = vmax.xlane.f32.xlu1 %v1753_v41  ;;  %v6074_v42 = vpop.f32.mrf.mxu0 }
0x1158   :  { %1774 = vrot.lane.b32.xlu1 %v7116_v2, %s6693_s27 }
0x115c   :  { %1967 = vrot.lane.b32.xlu1 %v7116_v2, %s7984_s29 }
0x1160   :  { %2017 = vrot.lane.b32.xlu1 %v7120_v10, %s7984_s29 }
0x1164   :  { %2015 = vrot.lane.b32.xlu1 %v7132_v19, %s7984_s29 }
0x11cc   :  { %v1752_v17 = vpop.xlane.xlu0 %1751 }
0x11cd   :  { %v1756_v43 = vsub.f32 %v1748_v29, %v1752_v17 }
0x11cf   :  { %v1758_v3 = vmul.f32 1.442695, %v1756_v43 }
0x11d0   :  { %v1755_v21 = vpop.xlane.xlu1 %1754 }
0x11d1   :  { %6558 = vpow2.f32 %v1758_v3  ;;  %v1757_v44 = vsub.f32 %v1749_v39, %v1755_v21 }
0x11d3   :  { %v1760_v45 = vmul.f32 1.442695, %v1757_v44 }
0x11d4   :  { %v1775_v4 = vpop.permute.xlu1 %1774 }
0x11d5   :  { %6560 = vpow2.f32 %v1760_v45  ;;  %v1780_v46 = vsel %vm289_vm5, %v1775_v4, 0 }
0x11d6   :  { %6076 = vmatpush3.bf16.msra.mxu1 %v1780_v46 }
0x11d7   :  { %6087 = vmatprep.subr.bf16.mxu1 %v6688_v1 }
0x11d8   :  { %v1968_v60 = vpop.permute.xlu1 %1967 }
0x11d9   :  { %v1973_v23 = vsel %vm160_vm2, %v1968_v60, 0 }
0x11dc   :  { %v2018_v7 = vpop.permute.xlu1 %2017 }
0x11dd   :  { %v2023_v63 = vsel %vm160_vm2, %v2018_v7, 0 }
0x11de   :  { %v6559_v47 = vpop.eup %6558 }
0x11df   :  { %v1762_v48 = vsel %vm160_vm2, %v6559_v47, 0.0 }
0x11e0   :  { %1763 = vadd.xlane.f32.xlu0 %v1762_v48  ;;  %v2016_v0 = vpop.permute.xlu1 %2015 }
0x11e2   :  { %v6561_v50 = vpop.eup %6560 }
0x11e3   :  { %v1765_v51 = vsel %vm160_vm2, %v6561_v50, 0.0 }
0x11e4   :  { %1766 = vadd.xlane.f32.xlu0 %v1765_v51 }
0x11fa   :  { %1822 = vrot.lane.b32.xlu0 %v7120_v10, %s6693_s27 }
0x11fe   :  { %1965 = vrot.lane.b32.xlu0 %v7126_v13, %s7984_s29  ;;  %s8001_s29 = smov 64  }
0x1269   :  { %v1764_v52 = vpop.xlane.xlu0 %1763 }
0x126a   :  { %6562 = vrcp.f32 %v1764_v52 }
0x126d   :  { %v1767_v53 = vpop.xlane.xlu0 %1766 }
0x126e   :  { %6564 = vrcp.f32 %v1767_v53 }
0x1271   :  { %v1823_v54 = vpop.permute.xlu0 %1822 }
0x1272   :  { %v1828_v55 = vsel %vm289_vm5, %v1823_v54, 0 }
0x1273   :  { %6082 = vmatpush3.bf16.msra.mxu0 %v1828_v55 }
0x1274   :  { %6093 = vmatprep.subr.bf16.mxu0 %v6688_v1 }
0x1275   :  { %v1966_v29 = vpop.permute.xlu0 %1965 }
0x1277   :  { %v6563_v14 = vpop.eup %6562 }
0x1278   :  { %v1770_v18 = vmul.f32 %v6563_v14, %v6559_v47 }
0x127a   :  { %v1772_v35 = vpack.c.bf16 %v1770_v18, %v1770_v18 }
0x127b   :  { %v6565_v37 = vpop.eup %6564 }
0x127c   :  { %6078 = vmatmul.mubr.msk.bf16.vlgmr.msra.gmra.mxu1 %vm160_vm2, %v1772_v35  ;;  %v1771_v57 = vmul.f32 %v6565_v37, %v6561_v50 }
0x127d   :  { %6089 = vmatprep.mubr.msk.bf16.mxu1 %vm6689_vm0, %v6688_v1  ;;  %6088 = vmatpush3.bf16.msra.mxu1 %v1875_v6 }
0x127e   :  { %v1773_v58 = vpack.c.bf16 %v1771_v57, %v1771_v57  ;;  %6099 = vmatprep.subr.bf16.mxu1 %v6688_v1 }
0x1280   :  { %6084 = vmatmul.mubr.msk.bf16.vlgmr.msra.gmra.mxu0 %vm160_vm2, %v1773_v58 }
0x1281   :  { %6094 = vmatpush3.bf16.msra.mxu0 %v1922_v59  ;;  %6095 = vmatprep.mubr.msk.bf16.mxu0 %vm6689_vm0, %v6688_v1 }
0x1282   :  { %6105 = vmatprep.subr.bf16.mxu0 %v6688_v1 }
0x1288   :  { %6096 = vmatmul.mubr.msk.bf16.vlgmr.msra.gmra.mxu0 %vm160_vm2, %v1643_v12 }
0x1289   :  { %6106 = vmatpush3.bf16.xpose.msra.mxu0 %v2023_v63  ;;  %6107 = vmatprep.mubr.msk.bf16.mxu0 %vm6689_vm0, %v6688_v1 }
0x128a   :  { %6117 = vmatprep.subr.bf16.mxu0 %v6688_v1 }
0x1290   :  { %6108 = vmatmul.mubr.msk.bf16.vlgmr.msra.gmra.mxu0 %vm160_vm2, %v2016_v0 }
0x1291   :  { %6119 = vmatprep.mubr.msk.bf16.mxu0 %vm6689_vm0, %v6688_v1 }
0x133c   :  { %v1816_v8 = vpop.f32.mrf.mxu1 }
0x133e   :  { %v6079_v9 = vpop.f32.mrf.mxu1 }
0x1340   :  { %v1819_v11 = vpop.f32.mrf.mxu1  ;;  %v1864_v12 = vpop.f32.mrf.mxu0 }
0x1341   :  { %v1870_v15 = vpack.c.bf16 %v1864_v12, %v1816_v8 }
0x1342   :  { %v6080_v16 = vpop.f32.mrf.mxu1  ;;  %v6085_v20 = vpop.f32.mrf.mxu0 }
0x1343   :  { %6090 = vmatmul.mubr.msk.bf16.vlgmr.msra.gmra.mxu1 %vm160_vm2, %v1870_v15  ;;  %v1419_v15 = vld [vmem:[%s7950_s8 + $0x8] sm:$0xf] }
0x1344   :  { %6100 = vmatpush3.bf16.xpose.msra.mxu1 %v1973_v23  ;;  %v1867_v24 = vpop.f32.mrf.mxu0  ;;  %6101 = vmatprep.mubr.msk.bf16.mxu1 %vm6689_vm0, %v6688_v1  ;;  %v2194_v16 = vsel %vm289_vm5, %v1419_v15, 0 }
0x1345   :  { %6111 = vmatprep.subr.bf16.mxu1 %v6688_v1 }
0x1346   :  { %v6086_v25 = vpop.f32.mrf.mxu0 }
0x1348   :  { %v7250_v27 = vpop.f32.mrf.mxu0 }
0x134a   :  { %v6097_v30 = vpop.f32.mrf.mxu0 }
0x134b   :  { %6102 = vmatmul.mubr.msk.bf16.vlgmr.msra.gmra.mxu1 %vm160_vm2, %v1966_v29 }
0x134c   :  { %v7253_v31 = vpop.f32.mrf.mxu0  ;;  %6113 = vmatprep.mubr.msk.bf16.mxu1 %vm6689_vm0, %v6688_v1 }
0x134e   :  { %v6098_v32 = vpop.f32.mrf.mxu0 }
0x1350   :  { %v2059_v34 = vpop.f32.mrf.mxu0 }
0x1351   :  { %v2066_v36 = vmul.f32 0.35355338, %v2059_v34 }
0x1352   :  { %v6109_v38 = vpop.f32.mrf.mxu0 }
0x1353   :  { %v2068_v39 = vadd.f32 %v2066_v36, %v7151_v33 }
0x1354   :  { %v2062_v40 = vpop.f32.mrf.mxu0 }
0x1355   :  { %v2072_v41 = vsel %vm160_vm2, %v2068_v39, -inf }
0x1356   :  { %2073 = vmax.xlane.f32.xlu1 %v2072_v41  ;;  %v6110_v42 = vpop.f32.mrf.mxu0 }
0x1367   :  { %2093 = vrot.lane.b32.xlu1 %v7116_v2, %s7998_s23 }
0x136b   :  { %2241 = vrot.lane.b32.xlu1 %v7116_v2, %s7999_s24 }
0x136f   :  { %2291 = vrot.lane.b32.xlu1 %v7120_v10, %s7999_s24 }
0x1373   :  { %2289 = vrot.lane.b32.xlu1 %v7132_v19, %s7999_s24 }
0x13df   :  { %v2074_v17 = vpop.xlane.xlu1 %2073 }
0x13e0   :  { %v2076_v21 = vsub.f32 %v2068_v39, %v2074_v17 }
0x13e2   :  { %v2079_v44 = vmul.f32 1.442695, %v2076_v21 }
0x13e3   :  { %v2094_v43 = vpop.permute.xlu1 %2093 }
0x13e4   :  { %v2099_v3 = vsel %vm289_vm5, %v2094_v43, 0  ;;  %6566 = vpow2.f32 %v2079_v44 }
0x13e5   :  { %6112 = vmatpush3.bf16.msra.mxu1 %v2099_v3 }
0x13e6   :  { %6123 = vmatprep.subr.bf16.mxu1 %v6688_v1 }
0x13e7   :  { %v2242_v5 = vpop.permute.xlu1 %2241 }
0x13e8   :  { %v2247_v8 = vsel %vm160_vm2, %v2242_v5, 0 }
0x13eb   :  { %v2292_v30 = vpop.permute.xlu1 %2291 }
0x13ec   :  { %v2297_v42 = vsel %vm160_vm2, %v2292_v30, 0 }
0x13ef   :  { %v2290_v44 = vpop.permute.xlu1 %2289 }
0x13f1   :  { %v6567_v54 = vpop.eup %6566 }
0x13f2   :  { %v2084_v14 = vsel %vm160_vm2, %v6567_v54, 0.0 }
0x1403   :  { %v7269_v45 = vpop.f32.mrf.mxu1 }
0x1405   :  { %v6091_v4 = vpop.f32.mrf.mxu1 }
0x1407   :  { %v7271_v46 = vpop.f32.mrf.mxu1 }
0x1409   :  { %v6092_v47 = vpop.f32.mrf.mxu1 }
0x140b   :  { %v2009_v48 = vpop.f32.mrf.mxu1 }
0x140c   :  { %v2065_v50 = vmul.f32 0.35355338, %v2009_v48 }
0x140d   :  { %v6103_v51 = vpop.f32.mrf.mxu1 }
0x140e   :  { %v2067_v19 = vadd.f32 %v2065_v50, %v7146_v26 }
0x140f   :  { %v2012_v52 = vpop.f32.mrf.mxu1 }
0x1410   :  { %v2069_v53 = vsel %vm160_vm2, %v2067_v19, -inf }
0x1411   :  { %2070 = vmax.xlane.f32.xlu0 %v2069_v53  ;;  %v6104_v55 = vpop.f32.mrf.mxu1 }
0x1412   :  { %v1962_v55 = vadd.f32 %v7253_v31, %v7271_v46 }
0x1415   :  { %2085 = vadd.xlane.f32.xlu0 %v2084_v14 }
0x149a   :  { %v2071_v18 = vpop.xlane.xlu0 %2070 }
0x149b   :  { %v2075_v35 = vsub.f32 %v2067_v19, %v2071_v18  ;;  %v1959_v19 = vadd.f32 %v7250_v27, %v7269_v45 }
0x149d   :  { %v2077_v37 = vmul.f32 1.442695, %v2075_v35 }
0x149e   :  { %v2086_v58 = vpop.xlane.xlu0 %2085 }
0x149f   :  { %6568 = vpow2.f32 %v2077_v37 }
0x14a0   :  { %6570 = vrcp.f32 %v2086_v58 }
0x14ac   :  { %v6569_v56 = vpop.eup %6568 }
0x14ad   :  { %v2081_v57 = vsel %vm160_vm2, %v6569_v56, 0.0  ;;  %v6571_v59 = vpop.eup %6570 }
0x14ae   :  { %2082 = vadd.xlane.f32.xlu0 %v2081_v57  ;;  %v2090_v7 = vmul.f32 %v6571_v59, %v6567_v54 }
0x14b0   :  { %v2092_v6 = vpack.c.bf16 %v2090_v7, %v2090_v7 }
0x14c4   :  { %2141 = vrot.lane.b32.xlu0 %v7120_v10, %s7998_s23 }
0x14c8   :  { %2239 = vrot.lane.b32.xlu0 %v7126_v13, %s7999_s24 }
0x1537   :  { %v2083_v60 = vpop.xlane.xlu0 %2082 }
0x1538   :  { %6572 = vrcp.f32 %v2083_v60 }
0x153b   :  { %v2142_v63 = vpop.permute.xlu0 %2141 }
0x153c   :  { %v2147_v0 = vsel %vm289_vm5, %v2142_v63, 0 }
0x153d   :  { %6118 = vmatpush3.bf16.msra.mxu0 %v2147_v0 }
0x153e   :  { %6129 = vmatprep.subr.bf16.mxu0 %v6688_v1 }
0x153f   :  { %v2240_v11 = vpop.permute.xlu0 %2239 }
0x1540   :  { %6120 = vmatmul.mubr.msk.bf16.vlgmr.msra.gmra.mxu0 %vm160_vm2, %v2092_v6 }
0x1541   :  { %6130 = vmatpush3.bf16.xpose.msra.mxu0 %v2247_v8  ;;  %6131 = vmatprep.mubr.msk.bf16.mxu0 %vm6689_vm0, %v6688_v1 }
0x1542   :  { %6141 = vmatprep.subr.bf16.mxu0 %v6688_v1 }
0x1545   :  { %v6573_v13 = vpop.eup %6572 }
0x1546   :  { %v2089_v9 = vmul.f32 %v6573_v13, %v6569_v56 }
0x1548   :  { %6132 = vmatmul.mubr.msk.bf16.vlgmr.msra.gmra.mxu0 %vm160_vm2, %v2240_v11  ;;  %v2091_v12 = vpack.c.bf16 %v2089_v9, %v2089_v9  ;;  %v1420_v9 = vld [vmem:[%s7950_s8 + $0xc] sm:$0xf] }
0x1549   :  { %6143 = vmatprep.mubr.msk.bf16.mxu0 %vm6689_vm0, %v6688_v1  ;;  %v2468_v11 = vsel %vm289_vm5, %v1420_v9, 0  ;;  %v6498_v9 = vld [vmem:[%s7953_s11 + $0x8] sm:$0xff]  }
0x154a   :  { %6114 = vmatmul.mubr.msk.bf16.vlgmr.msra.gmra.mxu1 %vm160_vm2, %v2091_v12 }
0x154b   :  { %6125 = vmatprep.mubr.msk.bf16.mxu1 %vm6689_vm0, %v6688_v1  ;;  %6124 = vmatpush3.bf16.msra.mxu1 %v2194_v16 }
0x154c   :  { %6135 = vmatprep.subr.bf16.mxu1 %v6688_v1 }
0x1600   :  { %v2183_v20 = vpop.f32.mrf.mxu0 }
0x1602   :  { %v6121_v23 = vpop.f32.mrf.mxu0 }
0x1604   :  { %v2186_v24 = vpop.f32.mrf.mxu0 }
0x1606   :  { %v6122_v25 = vpop.f32.mrf.mxu0 }
0x1608   :  { %v2283_v29 = vpop.f32.mrf.mxu0 }
0x1609   :  { %v2339_v32 = vmul.f32 0.35355338, %v2283_v29 }
0x160a   :  { %v2135_v34 = vpop.f32.mrf.mxu1  ;;  %v6133_v36 = vpop.f32.mrf.mxu0 }
0x160b   :  { %v2189_v38 = vpack.c.bf16 %v2183_v20, %v2135_v34  ;;  %v2341_v39 = vadd.f32 %v2339_v32, %v7146_v26 }
0x160c   :  { %v6115_v40 = vpop.f32.mrf.mxu1  ;;  %v2286_v41 = vpop.f32.mrf.mxu0 }
0x160d   :  { %6126 = vmatmul.mubr.msk.bf16.vlgmr.msra.gmra.mxu1 %vm160_vm2, %v2189_v38  ;;  %v2343_v17 = vsel %vm160_vm2, %v2341_v39, -inf }
0x160e   :  { %6136 = vmatpush3.bf16.xpose.msra.mxu1 %v2297_v42  ;;  %v2138_v43 = vpop.f32.mrf.mxu1  ;;  %2344 = vmax.xlane.f32.xlu0 %v2343_v17  ;;  %v6134_v3 = vpop.f32.mrf.mxu0 }
0x160f   :  { %6137 = vmatprep.mubr.msk.bf16.mxu1 %vm6689_vm0, %v6688_v1  ;;  %6147 = vmatprep.subr.bf16.mxu1 %v6688_v1 }
0x1610   :  { %v6116_v21 = vpop.f32.mrf.mxu1 }
0x1615   :  { %6138 = vmatmul.mubr.msk.bf16.vlgmr.msra.gmra.mxu1 %vm160_vm2, %v2290_v44 }
0x1616   :  { %6149 = vmatprep.mubr.msk.bf16.mxu1 %vm6689_vm0, %v6688_v1 }
0x1697   :  { %v2345_v4 = vpop.xlane.xlu0 %2344 }
0x1698   :  { %v2349_v47 = vsub.f32 %v2341_v39, %v2345_v4 }
0x169a   :  { %v2351_v48 = vmul.f32 1.442695, %v2349_v47 }
0x169c   :  { %6574 = vpow2.f32 %v2351_v48 }
0x16a9   :  { %v6575_v50 = vpop.eup %6574 }
0x16aa   :  { %v2355_v51 = vsel %vm160_vm2, %v6575_v50, 0.0 }
0x16ab   :  { %2356 = vadd.xlane.f32.xlu0 %v2355_v51 }
0x16cd   :  { %v2230_v52 = vpop.f32.mrf.mxu1 }
0x16ce   :  { %v2237_v53 = vadd.f32 %v2230_v52, %v1959_v19 }
0x16cf   :  { %v6127_v54 = vpop.f32.mrf.mxu1 }
0x16d1   :  { %v2233_v14 = vpop.f32.mrf.mxu1 }
0x16d2   :  { %v2238_v18 = vadd.f32 %v2233_v14, %v1962_v55 }
0x16d3   :  { %v6128_v35 = vpop.f32.mrf.mxu1 }
0x16d4   :  { %v6496_v35 = vld [vmem:[%s7953_s11 + $0x18] sm:$0xff]  }
0x16d5   :  { %v2333_v37 = vpop.f32.mrf.mxu1 }
0x16d6   :  { %v2340_v56 = vmul.f32 0.35355338, %v2333_v37 }
0x16d7   :  { %v6139_v57 = vpop.f32.mrf.mxu1 }
0x16d8   :  { %v2342_v58 = vadd.f32 %v2340_v56, %v7151_v33 }
0x16d9   :  { %v2336_v59 = vpop.f32.mrf.mxu1 }
0x16da   :  { %v2346_v60 = vsel %vm160_vm2, %v2342_v58, -inf }
0x16db   :  { %2347 = vmax.xlane.f32.xlu1 %v2346_v60  ;;  %v6140_v7 = vpop.f32.mrf.mxu1 }
0x16ec   :  { %2367 = vrot.lane.b32.xlu1 %v7116_v2, %s8000_s28 }
0x1734   :  { %v2357_v27 = vpop.xlane.xlu0 %2356 }
0x1735   :  { %6576 = vrcp.f32 %v2357_v27 }
0x1742   :  { %v6577_v45 = vpop.eup %6576 }
0x1743   :  { %v2363_v0 = vmul.f32 %v6577_v45, %v6575_v50  ;;  %v5575_v45 = vld [vmem:[%s7957_s15] ss:$0 sm:$0xff] }
0x1745   :  { %v2365_v8 = vpack.c.bf16 %v2363_v0, %v2363_v0  ;;  %v5576_v0 = vld [vmem:[%s7958_s16] ss:$0 sm:$0xff] }
0x1764   :  { %v2348_v31 = vpop.xlane.xlu1 %2347 }
0x1765   :  { %v2350_v46 = vsub.f32 %v2342_v58, %v2348_v31 }
0x1767   :  { %v2353_v63 = vmul.f32 1.442695, %v2350_v46 }
0x1768   :  { %v2368_v5 = vpop.permute.xlu1 %2367 }
0x1769   :  { %6578 = vpow2.f32 %v2353_v63  ;;  %v2373_v6 = vsel %vm289_vm5, %v2368_v5, 0 }
0x176a   :  { %6142 = vmatpush3.bf16.msra.mxu0 %v2373_v6 }
0x176b   :  { %6153 = vmatprep.subr.bf16.mxu0 %v6688_v1 }
0x176d   :  { %6144 = vmatmul.mubr.msk.bf16.vlgmr.msra.gmra.mxu0 %vm160_vm2, %v2365_v8 }
0x176e   :  { %6155 = vmatprep.mubr.msk.bf16.mxu0 %vm6689_vm0, %v6688_v1  ;;  %6154 = vmatpush3.bf16.msra.mxu0 %v2468_v11  ;;  %v6499_v11 = vld [vmem:[%s7953_s11] sm:$0xff]  }
0x176f   :  { %6167 = vmatprep.subr.bf16.mxu0 %v6688_v1 }
0x1776   :  { %v6579_v2 = vpop.eup %6578 }
0x1777   :  { %v2358_v13 = vsel %vm160_vm2, %v6579_v2, 0.0 }
0x1778   :  { %2359 = vadd.xlane.f32.xlu0 %v2358_v13  ;;  %v6497_v13 = vld [vmem:[%s7953_s11 + $0x10] sm:$0xff]  }
0x178e   :  { %2415 = vrot.lane.b32.xlu0 %v7120_v10, %s8000_s28 }
0x1801   :  { %v2360_v12 = vpop.xlane.xlu0 %2359 }
0x1802   :  { %6580 = vrcp.f32 %v2360_v12  ;;  %v5577_v12 = vld [vmem:[%s7952_s10] ss:$0 sm:$0xff] }
0x1805   :  { %v2416_v15 = vpop.permute.xlu0 %2415 }
0x1806   :  { %v2421_v16 = vsel %vm289_vm5, %v2416_v15, 0 }
0x1807   :  { %6148 = vmatpush3.bf16.msra.mxu1 %v2421_v16 }
0x1808   :  { %6159 = vmatprep.subr.bf16.mxu1 %v6688_v1 }
0x180f   :  { %v6581_v20 = vpop.eup %6580 }
0x1810   :  { %v2364_v23 = vmul.f32 %v6581_v20, %v6579_v2 }
0x1812   :  { %v2366_v10 = vpack.c.bf16 %v2364_v23, %v2364_v23 }
0x1814   :  { %6150 = vmatmul.mubr.msk.bf16.vlgmr.msra.gmra.mxu1 %vm160_vm2, %v2366_v10 }
0x1815   :  { %6163 = vmatprep.mubr.msk.bf16.mxu1 %vm6689_vm0, %v6688_v1 }
0x182d   :  { %v2409_v24 = vpop.f32.mrf.mxu0 }
0x182f   :  { %v6145_v25 = vpop.f32.mrf.mxu0 }
0x1831   :  { %v2412_v29 = vpop.f32.mrf.mxu0 }
0x1833   :  { %v6146_v30 = vpop.f32.mrf.mxu0 }
0x18d4   :  { %v2457_v32 = vpop.f32.mrf.mxu1 }
0x18d5   :  { %v2463_v34 = vpack.c.bf16 %v2457_v32, %v2409_v24  ;;  %v5581_v32 = vld [vmem:[%s7954_s12] ss:$0 sm:$0xff] }
0x18d6   :  { %v6151_v36 = vpop.f32.mrf.mxu1 }
0x18d7   :  { %6156 = vmatmul.mubr.msk.bf16.vlgmr.msra.gmra.mxu0 %vm160_vm2, %v2463_v34 }
0x18d8   :  { %v2460_v38 = vpop.f32.mrf.mxu1  ;;  %6175 = vmatprep.mubr.msk.bf16.mxu0 %vm6689_vm0, %v6688_v1  ;;  %6168 = vmatpush3.bf16.msra.mxu0 %v6496_v35 }
0x18d9   :  { %6169 = vmatprep.subr.bf16.mxu0 %v6688_v1 }
0x18da   :  { %v6152_v39 = vpop.f32.mrf.mxu1 }
0x18dc   :  { %6170 = vmatpush3.bf16.msra.mxu0 %v6497_v13 }
0x18dd   :  { %6171 = vmatprep.subr.bf16.mxu0 %v6688_v1 }
0x18e0   :  { %6172 = vmatpush3.bf16.msra.mxu0 %v6498_v9 }
0x18e1   :  { %6173 = vmatprep.subr.bf16.mxu0 %v6688_v1 }
0x18e4   :  { %6174 = vmatpush3.bf16.msra.mxu0 %v6499_v11 }
0x18e5   :  { %6193 = vmatprep.subr.bf16.mxu0 %v6688_v1 }
0x1997   :  { %v2504_v40 = vpop.f32.mrf.mxu0 }
0x1998   :  { %v2511_v41 = vadd.f32 %v2504_v40, %v2237_v53 }
0x1999   :  { %v6157_v42 = vpop.f32.mrf.mxu0 }
0x199a   :  { %v2515_v17 = vadd.f32 %v2511_v41, %v7107_v61 }
0x199b   :  { %v2507_v43 = vpop.f32.mrf.mxu0 }
0x199c   :  { %v2512_v3 = vadd.f32 %v2507_v43, %v2238_v18  ;;  %v2517_v21 = vsel %vm106_vm1, %v2515_v17, 0.0  ;;  %v6495_v18 = vld [vmem:[%s7951_s9] sm:$0xff]  }
0x199d   :  { %2518 = vadd.xlane.f32.xlu1 %v2517_v21  ;;  %v6158_v44 = vpop.f32.mrf.mxu0 }
0x199e   :  { %v2516_v4 = vadd.f32 %v2512_v3, %v7109_v62  ;;  %v6494_v62 = vld [vmem:[%s7951_s9 + $0x8] sm:$0xff]  }
0x199f   :  { %6160 = vmatpush3.bf16.msra.mxu1 %v6494_v62 }
0x19a0   :  { %v2520_v47 = vsel %vm106_vm1, %v2516_v4, 0.0  ;;  %6161 = vmatprep.subr.bf16.mxu1 %v6688_v1 }
0x19a1   :  { %2521 = vadd.xlane.f32.xlu0 %v2520_v47 }
0x19a3   :  { %6162 = vmatpush3.bf16.msra.mxu1 %v6495_v18 }
0x19a4   :  { %6179 = vmatprep.subr.bf16.mxu1 %v6688_v1 }
0x1a26   :  { %v2519_v48 = vpop.xlane.xlu1 %2518 }
0x1a27   :  { %v2523_v50 = vmul.f32 0.03125, %v2519_v48 }
0x1a29   :  { %v2525_v51 = vsub.f32 %v2515_v17, %v2523_v50 }
0x1a2a   :  { %v2522_v19 = vpop.xlane.xlu0 %2521 }
0x1a2b   :  { %v2524_v52 = vmul.f32 0.03125, %v2522_v19  ;;  %v2527_v53 = vmul.f32 %v2525_v51, %v2525_v51 }
0x1a2d   :  { %v2526_v54 = vsub.f32 %v2516_v4, %v2524_v52  ;;  %v2529_v61 = vsel %vm106_vm1, %v2527_v53, 0.0 }
0x1a2e   :  { %2530 = vadd.xlane.f32.xlu1 %v2529_v61  ;;  %v6501_v61 = vld [vmem:[%s7992_s26 + $0x10] sm:$0xff]  }
0x1a2f   :  { %v2528_v55 = vmul.f32 %v2526_v54, %v2526_v54 }
0x1a31   :  { %v2532_v14 = vsel %vm106_vm1, %v2528_v55, 0.0 }
0x1a32   :  { %2533 = vadd.xlane.f32.xlu0 %v2532_v14 }
0x1ab7   :  { %v2531_v37 = vpop.xlane.xlu1 %2530 }
0x1ab8   :  { %v2535_v56 = vmul.f32 0.03125, %v2531_v37 }
0x1aba   :  { %v2537_v57 = vadd.f32 1e-05, %v2535_v56 }
0x1abb   :  { %v2534_v58 = vpop.xlane.xlu0 %2533 }
0x1abc   :  { %6582 = vrsqrt.f32 %v2537_v57  ;;  %v2536_v59 = vmul.f32 0.03125, %v2534_v58  ;;  %v5587_v58 = vld [vmem:[%s7959_s17] ss:$0 sm:$0xff] }
0x1abe   :  { %v2538_v60 = vadd.f32 1e-05, %v2536_v59 }
0x1ac0   :  { %6584 = vrsqrt.f32 %v2538_v60 }
0x1ac9   :  { %v6583_v7 = vpop.eup %6582 }
0x1aca   :  { %v2541_v27 = vmul.f32 %v6583_v7, %v2525_v51 }
0x1acc   :  { %v2549_v63 = vmul.f32 %v5575_v45, %v2541_v27  ;;  %v5588_v27 = vld [vmem:[%s7960_s18] ss:$0 sm:$0xff] }
0x1acd   :  { %v6585_v31 = vpop.eup %6584 }
0x1ace   :  { %v2542_v46 = vmul.f32 %v6585_v31, %v2526_v54  ;;  %v2557_v6 = vadd.f32 %v5576_v0, %v2549_v63  ;;  %v6500_v54 = vld [vmem:[%s7992_s26 + $0x18] sm:$0xff]  }
0x1ad0   :  { %v2550_v5 = vmul.f32 %v5575_v45, %v2542_v46 }
0x1ad2   :  { %v2558_v8 = vadd.f32 %v5576_v0, %v2550_v5 }
0x1ad4   :  { %v2573_v2 = vpack.c.bf16 %v2558_v8, %v2557_v6 }
0x1ad6   :  { %6164 = vmatmul.mubr.msk.bf16.vlgmr.msra.gmra.mxu1 %vm106_vm1, %v2573_v2 }
0x1ad7   :  { %6183 = vmatprep.mubr.msk.bf16.mxu1 %vm6689_vm0, %v6688_v1  ;;  %6180 = vmatpush3.bf16.msra.mxu1 %v6500_v54 }
0x1ad8   :  { %6181 = vmatprep.subr.bf16.mxu1 %v6688_v1 }
0x1adb   :  { %6182 = vmatpush3.bf16.msra.mxu1 %v6501_v61 }
0x1adc   :  { %6187 = vmatprep.subr.bf16.mxu1 %v6688_v1 }
0x1b96   :  { %v2629_v15 = vpop.f32.mrf.mxu1 }
0x1b97   :  { %v2630_v20 = vadd.f32 %v5577_v12, %v2629_v15 }
0x1b98   :  { %v6165_v16 = vpop.f32.mrf.mxu1 }
0x1b99   :  { %v2636_v25 = vmax.f32 %v2630_v20, 0.0 }
0x1b9a   :  { %v2632_v23 = vpop.f32.mrf.mxu1 }
0x1b9b   :  { %v2633_v10 = vadd.f32 %v5577_v12, %v2632_v23 }
0x1b9c   :  { %v6166_v24 = vpop.f32.mrf.mxu1 }
0x1b9d   :  { %v2637_v29 = vmax.f32 %v2633_v10, 0.0 }
0x1b9f   :  { %v2638_v30 = vpack.c.bf16 %v2637_v29, %v2636_v25 }
0x1ba1   :  { %6176 = vmatmul.mubr.msk.bf16.vlgmr.msra.gmra.mxu0 %vm2669_vm8, %v2638_v30 }
0x1ba2   :  { %6195 = vmatprep.mubr.msk.bf16.mxu0 %vm6689_vm0, %v6688_v1 }
0x1c61   :  { %v2707_v34 = vpop.f32.mrf.mxu0 }
0x1c62   :  { %v2708_v36 = vadd.f32 %v5581_v32, %v2707_v34 }
0x1c63   :  { %v6177_v38 = vpop.f32.mrf.mxu0 }
0x1c64   :  { %v2716_v39 = vadd.f32 %v2708_v36, %v2557_v6 }
0x1c65   :  { %v2710_v40 = vpop.f32.mrf.mxu0 }
0x1c66   :  { %v2711_v41 = vadd.f32 %v5581_v32, %v2710_v40  ;;  %v2718_v42 = vsel %vm106_vm1, %v2716_v39, 0.0 }
0x1c67   :  { %2719 = vadd.xlane.f32.xlu1 %v2718_v42  ;;  %v6178_v17 = vpop.f32.mrf.mxu0 }
0x1c68   :  { %v2717_v43 = vadd.f32 %v2711_v41, %v2558_v8 }
0x1c6a   :  { %v2721_v3 = vsel %vm106_vm1, %v2717_v43, 0.0 }
0x1c6b   :  { %2722 = vadd.xlane.f32.xlu0 %v2721_v3 }
0x1cf0   :  { %v2720_v21 = vpop.xlane.xlu1 %2719 }
0x1cf1   :  { %v2724_v44 = vmul.f32 0.03125, %v2720_v21 }
0x1cf3   :  { %v2726_v4 = vsub.f32 %v2716_v39, %v2724_v44 }
0x1cf4   :  { %v2723_v47 = vpop.xlane.xlu0 %2722 }
0x1cf5   :  { %v2725_v48 = vmul.f32 0.03125, %v2723_v47  ;;  %v2728_v50 = vmul.f32 %v2726_v4, %v2726_v4 }
0x1cf7   :  { %v2727_v51 = vsub.f32 %v2717_v43, %v2725_v48  ;;  %v2730_v19 = vsel %vm106_vm1, %v2728_v50, 0.0 }
0x1cf8   :  { %2731 = vadd.xlane.f32.xlu1 %v2730_v19 }
0x1cf9   :  { %v2729_v52 = vmul.f32 %v2727_v51, %v2727_v51 }
0x1cfb   :  { %v2733_v53 = vsel %vm106_vm1, %v2729_v52, 0.0 }
0x1cfc   :  { %2734 = vadd.xlane.f32.xlu0 %v2733_v53 }
0x1d81   :  { %v2732_v55 = vpop.xlane.xlu1 %2731 }
0x1d82   :  { %v2736_v14 = vmul.f32 0.03125, %v2732_v55 }
0x1d84   :  { %v2738_v62 = vadd.f32 1e-05, %v2736_v14 }
0x1d85   :  { %v2735_v18 = vpop.xlane.xlu0 %2734 }
0x1d86   :  { %6586 = vrsqrt.f32 %v2738_v62  ;;  %v2737_v35 = vmul.f32 0.03125, %v2735_v18 }
0x1d88   :  { %v2739_v37 = vadd.f32 1e-05, %v2737_v35 }
0x1d8a   :  { %6588 = vrsqrt.f32 %v2739_v37 }
0x1d93   :  { %v6587_v56 = vpop.eup %6586 }
0x1d94   :  { %v2742_v57 = vmul.f32 %v6587_v56, %v2726_v4 }
0x1d96   :  { %v2750_v7 = vmul.f32 %v5587_v58, %v2742_v57 }
0x1d97   :  { %v6589_v59 = vpop.eup %6588 }
0x1d98   :  { %v2743_v60 = vmul.f32 %v6589_v59, %v2727_v51  ;;  %v7405_v31 = vadd.f32 %v5588_v27, %v2750_v7 }
0x1d9a   :  { %v2751_v45 = vmul.f32 %v5587_v58, %v2743_v60 }
0x1d9c   :  { %v7407_v46 = vadd.f32 %v5588_v27, %v2751_v45 }
0x1d9e   :  { %v2760_v63 = vpack.c.bf16 %v7407_v46, %v7405_v31 }
0x1da0   :  { %6184 = vmatmul.mubr.msk.bf16.vlgmr.msra.gmra.mxu1 %vm106_vm1, %v2760_v63 }
0x1da1   :  { %6189 = vmatprep.mubr.msk.bf16.mxu1 %vm6689_vm0, %v6688_v1 }
0x1e60   :  { %v2815_v0 = vpop.f32.mrf.mxu1 }
0x1e61   :  { %v7414_v5 = vpack.c.bf16 %v2815_v0, %v2815_v0 }
0x1e62   :  { %v6185_v6 = vpop.f32.mrf.mxu1 }
0x1e63   :  { %2830 = vrot.lane.b32.xlu1 %v7414_v5, %s6690_s5 }
0x1e64   :  { %v2818_v8 = vpop.f32.mrf.mxu1 }
0x1e65   :  { %v7418_v2 = vpack.c.bf16 %v2818_v8, %v2818_v8 }
0x1e66   :  { %v6186_v13 = vpop.f32.mrf.mxu1 }
0x1e67   :  { %2879 = vrot.lane.b32.xlu0 %v7418_v2, %s6690_s5 }
0x1ed5   :  { %v2831_v9 = vpop.permute.xlu1 %2830 }
0x1ed6   :  { %v2836_v11 = vsel %vm160_vm2, %v2831_v9, 0 }
0x1ed7   :  { %6188 = vmatpush3.bf16.xpose.msra.mxu1 %v2836_v11 }
0x1ed8   :  { %6199 = vmatprep.subr.bf16.mxu1 %v6688_v1 }
0x1ed9   :  { %v2880_v12 = vpop.permute.xlu0 %2879 }
0x1eda   :  { %v2885_v15 = vsel %vm160_vm2, %v2880_v12, 0 }
0x1edb   :  { %6194 = vmatpush3.bf16.xpose.msra.mxu0 %v2885_v15 }
0x1edc   :  { %6205 = vmatprep.subr.bf16.mxu0 %v6688_v1 }
0x1ede   :  { %6190 = vmatmul.mubr.msk.bf16.vlgmr.msra.gmra.mxu1 %vm160_vm2, %v7414_v5 }
0x1edf   :  { %6201 = vmatprep.mubr.msk.bf16.mxu1 %vm6689_vm0, %v6688_v1 }
0x1ee2   :  { %6196 = vmatmul.mubr.msk.bf16.vlgmr.msra.gmra.mxu0 %vm160_vm2, %v7418_v2 }
0x1ee3   :  { %6207 = vmatprep.mubr.msk.bf16.mxu0 %vm6689_vm0, %v6688_v1 }
0x1f9e   :  { %v2872_v16 = vpop.f32.mrf.mxu1 }
0x1f9f   :  { %v2927_v20 = vmul.f32 0.35355338, %v2872_v16 }
0x1fa0   :  { %v6191_v23 = vpop.f32.mrf.mxu1 }
0x1fa1   :  { %v2929_v10 = vadd.f32 %v2927_v20, %v6874_v22 }
0x1fa2   :  { %v2875_v24 = vpop.f32.mrf.mxu1  ;;  %v2921_v25 = vpop.f32.mrf.mxu0 }
0x1fa3   :  { %v2928_v29 = vmul.f32 0.35355338, %v2921_v25  ;;  %v2931_v30 = vsel %vm160_vm2, %v2929_v10, -inf }
0x1fa4   :  { %2932 = vmax.xlane.f32.xlu1 %v2931_v30  ;;  %v6192_v32 = vpop.f32.mrf.mxu1  ;;  %v6197_v34 = vpop.f32.mrf.mxu0 }
0x1fa5   :  { %v2930_v36 = vadd.f32 %v2928_v29, %v6879_v28 }
0x1fa6   :  { %v2924_v38 = vpop.f32.mrf.mxu0 }
0x1fa7   :  { %v2934_v39 = vsel %vm160_vm2, %v2930_v36, -inf }
0x1fa8   :  { %2935 = vmax.xlane.f32.xlu0 %v2934_v39  ;;  %v6198_v40 = vpop.f32.mrf.mxu0 }
0x1fb5   :  { %2955 = vrot.lane.b32.xlu1 %v7414_v5, %s8001_s29 }
0x202d   :  { %v2933_v41 = vpop.xlane.xlu1 %2932 }
0x202e   :  { %v2937_v42 = vsub.f32 %v2929_v10, %v2933_v41 }
0x2030   :  { %v2939_v17 = vmul.f32 1.442695, %v2937_v42 }
0x2031   :  { %v2956_v43 = vpop.permute.xlu1 %2955  ;;  %v2936_v3 = vpop.xlane.xlu0 %2935 }
0x2032   :  { %6590 = vpow2.f32 %v2939_v17  ;;  %v2961_v21 = vsel %vm289_vm5, %v2956_v43, 0  ;;  %v2938_v44 = vsub.f32 %v2930_v36, %v2936_v3 }
0x2033   :  { %6200 = vmatpush3.bf16.msra.mxu1 %v2961_v21 }
0x2034   :  { %v2941_v4 = vmul.f32 1.442695, %v2938_v44  ;;  %6211 = vmatprep.subr.bf16.mxu1 %v6688_v1 }
0x2036   :  { %6592 = vpow2.f32 %v2941_v4 }
0x203f   :  { %v6591_v47 = vpop.eup %6590 }
0x2040   :  { %v2943_v48 = vsel %vm160_vm2, %v6591_v47, 0.0 }
0x2041   :  { %2944 = vadd.xlane.f32.xlu1 %v2943_v48 }
0x2043   :  { %v6593_v50 = vpop.eup %6592 }
0x2044   :  { %v2946_v51 = vsel %vm160_vm2, %v6593_v50, 0.0 }
0x2045   :  { %2947 = vadd.xlane.f32.xlu0 %v2946_v51 }
0x2052   :  { %3054 = vrot.lane.b32.xlu1 %v7414_v5, %s6693_s27 }
0x2056   :  { %3104 = vrot.lane.b32.xlu1 %v7418_v2, %s6693_s27 }
0x205a   :  { %3102 = vrot.lane.b32.xlu1 %v7418_v2, %s6694_s3 }
0x205b   :  { %3003 = vrot.lane.b32.xlu0 %v7418_v2, %s8001_s29 }
0x205f   :  { %3052 = vrot.lane.b32.xlu0 %v7414_v5, %s6694_s3 }
0x20ca   :  { %v2945_v19 = vpop.xlane.xlu1 %2944 }
0x20cb   :  { %6594 = vrcp.f32 %v2945_v19 }
0x20ce   :  { %v2948_v52 = vpop.xlane.xlu0 %2947  ;;  %v3055_v55 = vpop.permute.xlu1 %3054 }
0x20cf   :  { %6596 = vrcp.f32 %v2948_v52  ;;  %v3060_v35 = vsel %vm160_vm2, %v3055_v55, 0  ;;  %v5596_v55 = vld [vmem:[%s7995_s22 + $0x10] sm:$0xf] }
0x20d2   :  { %v3004_v53 = vpop.permute.xlu0 %3003  ;;  %v3105_v56 = vpop.permute.xlu1 %3104 }
0x20d3   :  { %v3009_v54 = vsel %vm289_vm5, %v3004_v53, 0  ;;  %v3110_v58 = vsel %vm160_vm2, %v3105_v56, 0 }
0x20d4   :  { %6206 = vmatpush3.bf16.msra.mxu0 %v3009_v54 }
0x20d5   :  { %6217 = vmatprep.subr.bf16.mxu0 %v6688_v1 }
0x20d6   :  { %v3053_v59 = vpop.permute.xlu0 %3052  ;;  %v3103_v60 = vpop.permute.xlu1 %3102 }
0x20d8   :  { %v6595_v61 = vpop.eup %6594 }
0x20d9   :  { %v2951_v14 = vmul.f32 %v6595_v61, %v6591_v47 }
0x20db   :  { %v2953_v62 = vpack.c.bf16 %v2951_v14, %v2951_v14 }
0x20dc   :  { %v6597_v18 = vpop.eup %6596 }
0x20dd   :  { %6202 = vmatmul.mubr.msk.bf16.vlgmr.msra.gmra.mxu1 %vm160_vm2, %v2953_v62  ;;  %v2952_v37 = vmul.f32 %v6597_v18, %v6593_v50  ;;  %v3328_v18 = vsel %vm289_vm5, %v5596_v55, 0 }
0x20de   :  { %6212 = vmatpush3.bf16.xpose.msra.mxu1 %v3060_v35  ;;  %6213 = vmatprep.mubr.msk.bf16.mxu1 %vm6689_vm0, %v6688_v1 }
0x20df   :  { %v2954_v57 = vpack.c.bf16 %v2952_v37, %v2952_v37  ;;  %6223 = vmatprep.subr.bf16.mxu1 %v6688_v1 }
0x20e1   :  { %6208 = vmatmul.mubr.msk.bf16.vlgmr.msra.gmra.mxu0 %vm160_vm2, %v2954_v57 }
0x20e2   :  { %6218 = vmatpush3.bf16.xpose.msra.mxu0 %v3110_v58  ;;  %6219 = vmatprep.mubr.msk.bf16.mxu0 %vm6689_vm0, %v6688_v1  ;;  %v5597_v58 = vld [vmem:[%s7995_s22 + $0x14] sm:$0xf] }
0x20e3   :  { %6229 = vmatprep.subr.bf16.mxu0 %v6688_v1 }
0x20e5   :  { %6214 = vmatmul.mubr.msk.bf16.vlgmr.msra.gmra.mxu1 %vm160_vm2, %v3053_v59  ;;  %v3281_v59 = vsel %vm289_vm5, %v5597_v58, 0 }
0x20e6   :  { %6225 = vmatprep.mubr.msk.bf16.mxu1 %vm6689_vm0, %v6688_v1 }
0x20e9   :  { %6220 = vmatmul.mubr.msk.bf16.vlgmr.msra.gmra.mxu0 %vm160_vm2, %v3103_v60 }
0x20ea   :  { %6231 = vmatprep.mubr.msk.bf16.mxu0 %vm6689_vm0, %v6688_v1 }
0x219d   :  { %v7472_v7 = vpop.f32.mrf.mxu1 }
0x219f   :  { %v6203_v27 = vpop.f32.mrf.mxu1 }
0x21a1   :  { %v3000_v45 = vpop.f32.mrf.mxu1  ;;  %v7474_v63 = vpop.f32.mrf.mxu0 }
0x21a2   :  { %v3051_v0 = vpack.c.bf16 %v7474_v63, %v7472_v7 }
0x21a3   :  { %v6204_v6 = vpop.f32.mrf.mxu1  ;;  %v6209_v8 = vpop.f32.mrf.mxu0 }
0x21a5   :  { %v3048_v13 = vpop.f32.mrf.mxu0  ;;  %v3096_v9 = vpop.f32.mrf.mxu1 }
0x21a6   :  { %v3152_v11 = vmul.f32 0.35355338, %v3096_v9 }
0x21a7   :  { %v6210_v12 = vpop.f32.mrf.mxu0  ;;  %v6215_v15 = vpop.f32.mrf.mxu1 }
0x21a8   :  { %v3154_v16 = vadd.f32 %v3152_v11, %v6874_v22 }
0x21a9   :  { %v3099_v20 = vpop.f32.mrf.mxu1  ;;  %v3146_v23 = vpop.f32.mrf.mxu0 }
0x21aa   :  { %v3153_v10 = vmul.f32 0.35355338, %v3146_v23  ;;  %v3156_v24 = vsel %vm160_vm2, %v3154_v16, -inf }
0x21ab   :  { %3157 = vmax.xlane.f32.xlu0 %v3156_v24  ;;  %v6216_v25 = vpop.f32.mrf.mxu1  ;;  %v6221_v29 = vpop.f32.mrf.mxu0 }
0x21ac   :  { %v3155_v30 = vadd.f32 %v3153_v10, %v6879_v28 }
0x21ad   :  { %v3149_v32 = vpop.f32.mrf.mxu0 }
0x21ae   :  { %v3159_v34 = vsel %vm160_vm2, %v3155_v30, -inf }
0x21af   :  { %3160 = vmax.xlane.f32.xlu1 %v3159_v34  ;;  %v6222_v36 = vpop.f32.mrf.mxu0 }
0x21c0   :  { %3180 = vrot.lane.b32.xlu1 %v7414_v5, %s8002_s30 }
0x21c4   :  { %3373 = vrot.lane.b32.xlu1 %v7414_v5, %s7998_s23 }
0x21c8   :  { %3423 = vrot.lane.b32.xlu1 %v7418_v2, %s7998_s23 }
0x21cc   :  { %3421 = vrot.lane.b32.xlu1 %v7418_v2, %s8003_s1 }
0x2234   :  { %v3158_v38 = vpop.xlane.xlu0 %3157 }
0x2235   :  { %v3162_v39 = vsub.f32 %v3154_v16, %v3158_v38 }
0x2237   :  { %v3164_v40 = vmul.f32 1.442695, %v3162_v39 }
0x2238   :  { %v3161_v41 = vpop.xlane.xlu1 %3160 }
0x2239   :  { %6598 = vpow2.f32 %v3164_v40  ;;  %v3163_v42 = vsub.f32 %v3155_v30, %v3161_v41 }
0x223b   :  { %v3166_v17 = vmul.f32 1.442695, %v3163_v42 }
0x223c   :  { %v3181_v43 = vpop.permute.xlu1 %3180 }
0x223d   :  { %6600 = vpow2.f32 %v3166_v17  ;;  %v3186_v3 = vsel %vm289_vm5, %v3181_v43, 0 }
0x223e   :  { %6224 = vmatpush3.bf16.msra.mxu1 %v3186_v3 }
0x223f   :  { %6235 = vmatprep.subr.bf16.mxu1 %v6688_v1 }
0x2240   :  { %v3374_v35 = vpop.permute.xlu1 %3373 }
0x2241   :  { %v3379_v8 = vsel %vm160_vm2, %v3374_v35, 0 }
0x2244   :  { %v3424_v37 = vpop.permute.xlu1 %3423 }
0x2245   :  { %v3429_v56 = vsel %vm160_vm2, %v3424_v37, 0 }
0x2246   :  { %v6599_v21 = vpop.eup %6598 }
0x2247   :  { %v3168_v44 = vsel %vm160_vm2, %v6599_v21, 0.0 }
0x2248   :  { %3169 = vadd.xlane.f32.xlu0 %v3168_v44  ;;  %v3422_v57 = vpop.permute.xlu1 %3421 }
0x224a   :  { %v6601_v4 = vpop.eup %6600 }
0x224b   :  { %v3171_v47 = vsel %vm160_vm2, %v6601_v4, 0.0 }
0x224c   :  { %3172 = vadd.xlane.f32.xlu0 %v3171_v47 }
0x2262   :  { %3228 = vrot.lane.b32.xlu0 %v7418_v2, %s8002_s30 }
0x2266   :  { %3371 = vrot.lane.b32.xlu0 %v7414_v5, %s8003_s1 }
0x22d1   :  { %v3170_v48 = vpop.xlane.xlu0 %3169 }
0x22d2   :  { %6602 = vrcp.f32 %v3170_v48 }
0x22d5   :  { %v3173_v50 = vpop.xlane.xlu0 %3172 }
0x22d6   :  { %6604 = vrcp.f32 %v3173_v50 }
0x22d9   :  { %v3229_v51 = vpop.permute.xlu0 %3228 }
0x22da   :  { %v3234_v19 = vsel %vm289_vm5, %v3229_v51, 0 }
0x22db   :  { %6230 = vmatpush3.bf16.msra.mxu0 %v3234_v19 }
0x22dc   :  { %6241 = vmatprep.subr.bf16.mxu0 %v6688_v1 }
0x22dd   :  { %v3372_v12 = vpop.permute.xlu0 %3371 }
0x22df   :  { %v6603_v52 = vpop.eup %6602 }
0x22e0   :  { %v3176_v53 = vmul.f32 %v6603_v52, %v6599_v21 }
0x22e2   :  { %v3178_v54 = vpack.c.bf16 %v3176_v53, %v3176_v53 }
0x22e3   :  { %v6605_v61 = vpop.eup %6604 }
0x22e4   :  { %6226 = vmatmul.mubr.msk.bf16.vlgmr.msra.gmra.mxu1 %vm160_vm2, %v3178_v54  ;;  %v3177_v14 = vmul.f32 %v6605_v61, %v6601_v4 }
0x22e5   :  { %6237 = vmatprep.mubr.msk.bf16.mxu1 %vm6689_vm0, %v6688_v1  ;;  %6236 = vmatpush3.bf16.msra.mxu1 %v3281_v59 }
0x22e6   :  { %v3179_v62 = vpack.c.bf16 %v3177_v14, %v3177_v14  ;;  %6247 = vmatprep.subr.bf16.mxu1 %v6688_v1 }
0x22e8   :  { %6232 = vmatmul.mubr.msk.bf16.vlgmr.msra.gmra.mxu0 %vm160_vm2, %v3179_v62 }
0x22e9   :  { %6242 = vmatpush3.bf16.msra.mxu0 %v3328_v18  ;;  %6243 = vmatprep.mubr.msk.bf16.mxu0 %vm6689_vm0, %v6688_v1 }
0x22ea   :  { %6253 = vmatprep.subr.bf16.mxu0 %v6688_v1 }
0x22f0   :  { %6244 = vmatmul.mubr.msk.bf16.vlgmr.msra.gmra.mxu0 %vm160_vm2, %v3051_v0 }
0x22f1   :  { %6254 = vmatpush3.bf16.xpose.msra.mxu0 %v3429_v56  ;;  %6255 = vmatprep.mubr.msk.bf16.mxu0 %vm6689_vm0, %v6688_v1 }
0x22f2   :  { %6265 = vmatprep.subr.bf16.mxu0 %v6688_v1 }
0x22f8   :  { %6256 = vmatmul.mubr.msk.bf16.vlgmr.msra.gmra.mxu0 %vm160_vm2, %v3422_v57 }
0x22f9   :  { %6267 = vmatprep.mubr.msk.bf16.mxu0 %vm6689_vm0, %v6688_v1 }
0x23a4   :  { %v3222_v60 = vpop.f32.mrf.mxu1 }
0x23a6   :  { %v6227_v7 = vpop.f32.mrf.mxu1 }
0x23a8   :  { %v3225_v27 = vpop.f32.mrf.mxu1  ;;  %v3270_v45 = vpop.f32.mrf.mxu0 }
0x23a9   :  { %v3276_v63 = vpack.c.bf16 %v3270_v45, %v3222_v60 }
0x23aa   :  { %v6228_v0 = vpop.f32.mrf.mxu1  ;;  %v6233_v6 = vpop.f32.mrf.mxu0 }
0x23ab   :  { %6238 = vmatmul.mubr.msk.bf16.vlgmr.msra.gmra.mxu1 %vm160_vm2, %v3276_v63  ;;  %v5598_v63 = vld [vmem:[%s7995_s22 + $0x18] sm:$0xf] }
0x23ac   :  { %6248 = vmatpush3.bf16.xpose.msra.mxu1 %v3379_v8  ;;  %v3273_v13 = vpop.f32.mrf.mxu0  ;;  %6249 = vmatprep.mubr.msk.bf16.mxu1 %vm6689_vm0, %v6688_v1  ;;  %v3600_v0 = vsel %vm289_vm5, %v5598_v63, 0 }
0x23ad   :  { %6259 = vmatprep.subr.bf16.mxu1 %v6688_v1 }
0x23ae   :  { %v6234_v9 = vpop.f32.mrf.mxu0 }
0x23b0   :  { %v7532_v11 = vpop.f32.mrf.mxu0 }
0x23b2   :  { %v6245_v15 = vpop.f32.mrf.mxu0 }
0x23b3   :  { %6250 = vmatmul.mubr.msk.bf16.vlgmr.msra.gmra.mxu1 %vm160_vm2, %v3372_v12 }
0x23b4   :  { %v7535_v16 = vpop.f32.mrf.mxu0  ;;  %6261 = vmatprep.mubr.msk.bf16.mxu1 %vm6689_vm0, %v6688_v1 }
0x23b6   :  { %v6246_v20 = vpop.f32.mrf.mxu0 }
0x23b8   :  { %v3465_v23 = vpop.f32.mrf.mxu0 }
0x23b9   :  { %v3472_v10 = vmul.f32 0.35355338, %v3465_v23 }
0x23ba   :  { %v6257_v24 = vpop.f32.mrf.mxu0 }
0x23bb   :  { %v3474_v25 = vadd.f32 %v3472_v10, %v6879_v28 }
0x23bc   :  { %v3468_v29 = vpop.f32.mrf.mxu0 }
0x23bd   :  { %v3478_v30 = vsel %vm160_vm2, %v3474_v25, -inf }
0x23be   :  { %3479 = vmax.xlane.f32.xlu1 %v3478_v30  ;;  %v6258_v32 = vpop.f32.mrf.mxu0 }
0x23cf   :  { %3499 = vrot.lane.b32.xlu1 %v7414_v5, %s8004_s4 }
0x23d3   :  { %3647 = vrot.lane.b32.xlu1 %v7414_v5, %s8000_s28 }
0x23d7   :  { %3697 = vrot.lane.b32.xlu1 %v7418_v2, %s8000_s28 }
0x23db   :  { %3695 = vrot.lane.b32.xlu1 %v7418_v2, %s7999_s24 }
0x2447   :  { %v3480_v34 = vpop.xlane.xlu1 %3479 }
0x2448   :  { %v3482_v39 = vsub.f32 %v3474_v25, %v3480_v34 }
0x244a   :  { %v3485_v40 = vmul.f32 1.442695, %v3482_v39 }
0x244b   :  { %v3500_v36 = vpop.permute.xlu1 %3499 }
0x244c   :  { %v3505_v38 = vsel %vm289_vm5, %v3500_v36, 0  ;;  %6606 = vpow2.f32 %v3485_v40 }
0x244d   :  { %6260 = vmatpush3.bf16.msra.mxu1 %v3505_v38 }
0x244e   :  { %6271 = vmatprep.subr.bf16.mxu1 %v6688_v1 }
0x244f   :  { %v3648_v57 = vpop.permute.xlu1 %3647 }
0x2450   :  { %v3653_v59 = vsel %vm160_vm2, %v3648_v57, 0 }
0x2453   :  { %v3698_v15 = vpop.permute.xlu1 %3697 }
0x2454   :  { %v3703_v32 = vsel %vm160_vm2, %v3698_v15, 0 }
0x2459   :  { %v6607_v50 = vpop.eup %6606 }
0x245a   :  { %v3490_v19 = vsel %vm160_vm2, %v6607_v50, 0.0 }
0x246b   :  { %v7551_v41 = vpop.f32.mrf.mxu1 }
0x246d   :  { %v6239_v42 = vpop.f32.mrf.mxu1 }
0x246f   :  { %v7553_v17 = vpop.f32.mrf.mxu1 }
0x2471   :  { %v6240_v43 = vpop.f32.mrf.mxu1 }
0x2473   :  { %v3415_v3 = vpop.f32.mrf.mxu1 }
0x2474   :  { %v3471_v21 = vmul.f32 0.35355338, %v3415_v3 }
0x2475   :  { %v6251_v44 = vpop.f32.mrf.mxu1 }
0x2476   :  { %v3473_v4 = vadd.f32 %v3471_v21, %v6874_v22  ;;  %v3365_v44 = vadd.f32 %v7532_v11, %v7551_v41 }
0x2477   :  { %v3418_v47 = vpop.f32.mrf.mxu1 }
0x2478   :  { %v3475_v48 = vsel %vm160_vm2, %v3473_v4, -inf }
0x2479   :  { %3476 = vmax.xlane.f32.xlu0 %v3475_v48  ;;  %v6252_v51 = vpop.f32.mrf.mxu1 }
0x247d   :  { %3491 = vadd.xlane.f32.xlu0 %v3490_v19 }
0x2502   :  { %v3477_v52 = vpop.xlane.xlu0 %3476 }
0x2503   :  { %v3481_v53 = vsub.f32 %v3473_v4, %v3477_v52 }
0x2505   :  { %v3483_v54 = vmul.f32 1.442695, %v3481_v53 }
0x2506   :  { %v3492_v14 = vpop.xlane.xlu0 %3491 }
0x2507   :  { %6608 = vpow2.f32 %v3483_v54 }
0x2508   :  { %6610 = vrcp.f32 %v3492_v14 }
0x2514   :  { %v6609_v61 = vpop.eup %6608 }
0x2515   :  { %v3487_v55 = vsel %vm160_vm2, %v6609_v61, 0.0  ;;  %v6611_v62 = vpop.eup %6610 }
0x2516   :  { %3488 = vadd.xlane.f32.xlu0 %v3487_v55  ;;  %v3496_v35 = vmul.f32 %v6611_v62, %v6607_v50  ;;  %v3368_v50 = vadd.f32 %v7535_v16, %v7553_v17 }
0x2518   :  { %v3498_v58 = vpack.c.bf16 %v3496_v35, %v3496_v35 }
0x252c   :  { %3547 = vrot.lane.b32.xlu0 %v7418_v2, %s8004_s4 }
0x2530   :  { %3645 = vrot.lane.b32.xlu0 %v7414_v5, %s7999_s24 }
0x259f   :  { %v3489_v18 = vpop.xlane.xlu0 %3488 }
0x25a0   :  { %6612 = vrcp.f32 %v3489_v18 }
0x25a3   :  { %v3548_v37 = vpop.permute.xlu0 %3547 }
0x25a4   :  { %v3553_v56 = vsel %vm289_vm5, %v3548_v37, 0 }
0x25a5   :  { %6266 = vmatpush3.bf16.msra.mxu0 %v3553_v56 }
0x25a6   :  { %6277 = vmatprep.subr.bf16.mxu0 %v6688_v1 }
0x25a7   :  { %v3646_v27 = vpop.permute.xlu0 %3645 }
0x25a8   :  { %6268 = vmatmul.mubr.msk.bf16.vlgmr.msra.gmra.mxu0 %vm160_vm2, %v3498_v58 }
0x25a9   :  { %6278 = vmatpush3.bf16.xpose.msra.mxu0 %v3653_v59  ;;  %6279 = vmatprep.mubr.msk.bf16.mxu0 %vm6689_vm0, %v6688_v1  ;;  %v5599_v59 = vld [vmem:[%s7995_s22 + $0x1c] sm:$0xf] }
0x25aa   :  { %6289 = vmatprep.subr.bf16.mxu0 %v6688_v1 }
0x25ad   :  { %v6613_v60 = vpop.eup %6612 }
0x25ae   :  { %v3495_v7 = vmul.f32 %v6613_v60, %v6609_v61  ;;  %v3874_v60 = vsel %vm289_vm5, %v5599_v59, 0 }
0x25b0   :  { %v3497_v45 = vpack.c.bf16 %v3495_v7, %v3495_v7  ;;  %6280 = vmatmul.mubr.msk.bf16.vlgmr.msra.gmra.mxu0 %vm160_vm2, %v3646_v27 }
0x25b1   :  { %6291 = vmatprep.mubr.msk.bf16.mxu0 %vm6689_vm0, %v6688_v1 }
0x25b2   :  { %6262 = vmatmul.mubr.msk.bf16.vlgmr.msra.gmra.mxu1 %vm160_vm2, %v3497_v45 }
0x25b3   :  { %6273 = vmatprep.mubr.msk.bf16.mxu1 %vm6689_vm0, %v6688_v1  ;;  %6272 = vmatpush3.bf16.msra.mxu1 %v3600_v0 }
0x25b4   :  { %6283 = vmatprep.subr.bf16.mxu1 %v6688_v1 }
0x2668   :  { %v3589_v6 = vpop.f32.mrf.mxu0 }
0x266a   :  { %v6269_v8 = vpop.f32.mrf.mxu0 }
0x266c   :  { %v3592_v13 = vpop.f32.mrf.mxu0 }
0x266e   :  { %v6270_v9 = vpop.f32.mrf.mxu0 }
0x2670   :  { %v3689_v12 = vpop.f32.mrf.mxu0 }
0x2671   :  { %v3745_v20 = vmul.f32 0.35355338, %v3689_v12 }
0x2672   :  { %v3541_v23 = vpop.f32.mrf.mxu1  ;;  %v6281_v10 = vpop.f32.mrf.mxu0 }
0x2673   :  { %v3747_v24 = vadd.f32 %v3745_v20, %v6874_v22  ;;  %v3595_v25 = vpack.c.bf16 %v3589_v6, %v3541_v23  ;;  %v3696_v22 = vpop.permute.xlu1 %3695 }
0x2674   :  { %v6263_v29 = vpop.f32.mrf.mxu1  ;;  %v3692_v30 = vpop.f32.mrf.mxu0 }
0x2675   :  { %6274 = vmatmul.mubr.msk.bf16.vlgmr.msra.gmra.mxu1 %vm160_vm2, %v3595_v25  ;;  %v3749_v34 = vsel %vm160_vm2, %v3747_v24, -inf }
0x2676   :  { %6284 = vmatpush3.bf16.xpose.msra.mxu1 %v3703_v32  ;;  %v3544_v36 = vpop.f32.mrf.mxu1  ;;  %3750 = vmax.xlane.f32.xlu0 %v3749_v34  ;;  %v6282_v38 = vpop.f32.mrf.mxu0 }
0x2677   :  { %6285 = vmatprep.mubr.msk.bf16.mxu1 %vm6689_vm0, %v6688_v1  ;;  %6295 = vmatprep.subr.bf16.mxu1 %v6688_v1 }
0x2678   :  { %v6264_v39 = vpop.f32.mrf.mxu1 }
0x267d   :  { %6286 = vmatmul.mubr.msk.bf16.vlgmr.msra.gmra.mxu1 %vm160_vm2, %v3696_v22 }
0x267e   :  { %6297 = vmatprep.mubr.msk.bf16.mxu1 %vm6689_vm0, %v6688_v1 }
0x26ff   :  { %v3751_v40 = vpop.xlane.xlu0 %3750 }
0x2700   :  { %v3755_v42 = vsub.f32 %v3747_v24, %v3751_v40 }
0x2702   :  { %v3757_v43 = vmul.f32 1.442695, %v3755_v42 }
0x2704   :  { %6614 = vpow2.f32 %v3757_v43 }
0x2711   :  { %v6615_v3 = vpop.eup %6614 }
0x2712   :  { %v3761_v21 = vsel %vm160_vm2, %v6615_v3, 0.0 }
0x2713   :  { %3762 = vadd.xlane.f32.xlu0 %v3761_v21 }
0x2735   :  { %v3636_v4 = vpop.f32.mrf.mxu1 }
0x2736   :  { %v3643_v47 = vadd.f32 %v3636_v4, %v3365_v44 }
0x2737   :  { %v6275_v48 = vpop.f32.mrf.mxu1 }
0x2739   :  { %v3639_v51 = vpop.f32.mrf.mxu1 }
0x273a   :  { %v3644_v19 = vadd.f32 %v3639_v51, %v3368_v50  ;;  %v6503_v50 = vld [vmem:[%s7949_s7 + $0x10] sm:$0xff]   ;;  %v6504_v51 = vld [vmem:[%s7948_s6 + $0x18] sm:$0xff]  }
0x273b   :  { %v6276_v52 = vpop.f32.mrf.mxu1 }
0x273d   :  { %v3739_v53 = vpop.f32.mrf.mxu1 }
0x273e   :  { %v3746_v54 = vmul.f32 0.35355338, %v3739_v53 }
0x273f   :  { %v6287_v61 = vpop.f32.mrf.mxu1 }
0x2740   :  { %v3748_v55 = vadd.f32 %v3746_v54, %v6879_v28 }
0x2741   :  { %v3742_v14 = vpop.f32.mrf.mxu1 }
0x2742   :  { %v3752_v62 = vsel %vm160_vm2, %v3748_v55, -inf }
0x2743   :  { %3753 = vmax.xlane.f32.xlu1 %v3752_v62  ;;  %v6288_v18 = vpop.f32.mrf.mxu1 }
0x2744   :  { %v5622_v18 = vld [vmem:[%s7955_s13 + $0x1] ss:$0 sm:$0xff] }
0x2754   :  { %3773 = vrot.lane.b32.xlu1 %v7414_v5, %s8005_s25 }
0x279c   :  { %v3763_v11 = vpop.xlane.xlu0 %3762 }
0x279d   :  { %6616 = vrcp.f32 %v3763_v11 }
0x27aa   :  { %v6617_v41 = vpop.eup %6616 }
0x27ab   :  { %v3769_v35 = vmul.f32 %v6617_v41, %v6615_v3 }
0x27ad   :  { %v3771_v28 = vpack.c.bf16 %v3769_v35, %v3769_v35 }
0x27cc   :  { %v3754_v16 = vpop.xlane.xlu1 %3753 }
0x27cd   :  { %v3756_v17 = vsub.f32 %v3748_v55, %v3754_v16 }
0x27cf   :  { %v3759_v37 = vmul.f32 1.442695, %v3756_v17  ;;  %v5623_v17 = vld [vmem:[%s7956_s14 + $0x1] ss:$0 sm:$0xff] }
0x27d0   :  { %v3774_v56 = vpop.permute.xlu1 %3773 }
0x27d1   :  { %6618 = vpow2.f32 %v3759_v37  ;;  %v3779_v57 = vsel %vm289_vm5, %v3774_v56, 0 }
0x27d2   :  { %6290 = vmatpush3.bf16.msra.mxu0 %v3779_v57 }
0x27d3   :  { %6301 = vmatprep.subr.bf16.mxu0 %v6688_v1 }
0x27d5   :  { %6292 = vmatmul.mubr.msk.bf16.vlgmr.msra.gmra.mxu0 %vm160_vm2, %v3771_v28 }
0x27d6   :  { %6303 = vmatprep.mubr.msk.bf16.mxu0 %vm6689_vm0, %v6688_v1  ;;  %6302 = vmatpush3.bf16.msra.mxu0 %v3874_v60 }
0x27d7   :  { %6315 = vmatprep.subr.bf16.mxu0 %v6688_v1 }
0x27de   :  { %v6619_v5 = vpop.eup %6618 }
0x27df   :  { %v3764_v58 = vsel %vm160_vm2, %v6619_v5, 0.0 }
0x27e0   :  { %3765 = vadd.xlane.f32.xlu0 %v3764_v58 }
0x27f6   :  { %3821 = vrot.lane.b32.xlu0 %v7418_v2, %s8005_s25 }
0x2869   :  { %v3766_v7 = vpop.xlane.xlu0 %3765 }
0x286a   :  { %6620 = vrcp.f32 %v3766_v7 }
0x286d   :  { %v3822_v27 = vpop.permute.xlu0 %3821 }
0x286e   :  { %v3827_v45 = vsel %vm289_vm5, %v3822_v27, 0 }
0x286f   :  { %6296 = vmatpush3.bf16.msra.mxu1 %v3827_v45 }
0x2870   :  { %6307 = vmatprep.subr.bf16.mxu1 %v6688_v1 }
0x2877   :  { %v6621_v63 = vpop.eup %6620 }
0x2878   :  { %v3770_v0 = vmul.f32 %v6621_v63, %v6619_v5 }
0x287a   :  { %v3772_v2 = vpack.c.bf16 %v3770_v0, %v3770_v0 }
0x287c   :  { %6298 = vmatmul.mubr.msk.bf16.vlgmr.msra.gmra.mxu1 %vm160_vm2, %v3772_v2 }
0x287d   :  { %6311 = vmatprep.mubr.msk.bf16.mxu1 %vm6689_vm0, %v6688_v1  ;;  %6308 = vmatpush3.bf16.msra.mxu1 %v6504_v51 }
0x287e   :  { %6309 = vmatprep.subr.bf16.mxu1 %v6688_v1 }
0x2895   :  { %v3815_v6 = vpop.f32.mrf.mxu0 }
0x2897   :  { %v6293_v8 = vpop.f32.mrf.mxu0 }
0x2899   :  { %v3818_v13 = vpop.f32.mrf.mxu0 }
0x289b   :  { %v6294_v9 = vpop.f32.mrf.mxu0 }
0x293c   :  { %v3863_v12 = vpop.f32.mrf.mxu1 }
0x293d   :  { %v3869_v15 = vpack.c.bf16 %v3863_v12, %v3815_v6 }
0x293e   :  { %v6299_v20 = vpop.f32.mrf.mxu1 }
0x293f   :  { %6304 = vmatmul.mubr.msk.bf16.vlgmr.msra.gmra.mxu0 %vm160_vm2, %v3869_v15 }
0x2940   :  { %v3866_v23 = vpop.f32.mrf.mxu1  ;;  %6319 = vmatprep.mubr.msk.bf16.mxu0 %vm6689_vm0, %v6688_v1 }
0x2942   :  { %v6300_v10 = vpop.f32.mrf.mxu1 }
0x29ff   :  { %v3910_v24 = vpop.f32.mrf.mxu0 }
0x2a00   :  { %v3917_v25 = vadd.f32 %v3910_v24, %v3643_v47 }
0x2a01   :  { %v6305_v29 = vpop.f32.mrf.mxu0 }
0x2a02   :  { %v3923_v30 = vadd.f32 %v3917_v25, %v7405_v31 }
0x2a03   :  { %v3913_v32 = vpop.f32.mrf.mxu0 }
0x2a04   :  { %v3918_v34 = vadd.f32 %v3913_v32, %v3644_v19  ;;  %v3925_v36 = vsel %vm106_vm1, %v3923_v30, 0.0  ;;  %v6505_v19 = vld [vmem:[%s7948_s6 + $0x10] sm:$0xff]  }
0x2a05   :  { %3926 = vadd.xlane.f32.xlu1 %v3925_v36  ;;  %v6306_v38 = vpop.f32.mrf.mxu0  ;;  %6310 = vmatpush3.bf16.msra.mxu1 %v6505_v19 }
0x2a06   :  { %v3924_v39 = vadd.f32 %v3918_v34, %v7407_v46  ;;  %v6502_v46 = vld [vmem:[%s7949_s7 + $0x18] sm:$0xff]   ;;  %6323 = vmatprep.subr.bf16.mxu1 %v6688_v1 }
0x2a07   :  { %6316 = vmatpush3.bf16.msra.mxu0 %v6502_v46 }
0x2a08   :  { %v3928_v22 = vsel %vm106_vm1, %v3924_v39, 0.0  ;;  %6317 = vmatprep.subr.bf16.mxu0 %v6688_v1 }
0x2a09   :  { %3929 = vadd.xlane.f32.xlu0 %v3928_v22 }
0x2a0b   :  { %6318 = vmatpush3.bf16.msra.mxu0 %v6503_v50 }
0x2a0c   :  { %6329 = vmatprep.subr.bf16.mxu0 %v6688_v1 }
0x2a0e   :  { %6320 = vmatmul.mubr.msk.bf16.vlgmr.msra.gmra.mxu0 %vm106_vm1, %v7086_v49 }
0x2a0f   :  { %6331 = vmatprep.mubr.msk.bf16.mxu0 %vm6689_vm0, %v6688_v1 }
0x2a8e   :  { %v3927_v40 = vpop.xlane.xlu1 %3926 }
0x2a8f   :  { %v3931_v42 = vmul.f32 0.03125, %v3927_v40 }
0x2a91   :  { %v3933_v43 = vsub.f32 %v3923_v30, %v3931_v42 }
0x2a92   :  { %v3930_v3 = vpop.xlane.xlu0 %3929 }
0x2a93   :  { %v3932_v21 = vmul.f32 0.03125, %v3930_v3  ;;  %v3935_v44 = vmul.f32 %v3933_v43, %v3933_v43 }
0x2a95   :  { %v3934_v4 = vsub.f32 %v3924_v39, %v3932_v21  ;;  %v3937_v31 = vsel %vm106_vm1, %v3935_v44, 0.0 }
0x2a96   :  { %3938 = vadd.xlane.f32.xlu1 %v3937_v31 }
0x2a97   :  { %v3936_v47 = vmul.f32 %v3934_v4, %v3934_v4 }
0x2a99   :  { %v3940_v48 = vsel %vm106_vm1, %v3936_v47, 0.0 }
0x2a9a   :  { %3941 = vadd.xlane.f32.xlu0 %v3940_v48 }
0x2ace   :  { %v4080_v28 = vpop.f32.mrf.mxu0 }
0x2acf   :  { %v7662_v5 = vpack.c.bf16 %v4080_v28, %v4080_v28 }
0x2ad0   :  { %v6321_v58 = vpop.f32.mrf.mxu0 }
0x2ad1   :  { %v4100_v59 = vsel %vm160_vm2, %v7662_v5, 0 }
0x2ad2   :  { %v4083_v60 = vpop.f32.mrf.mxu0 }
0x2ad3   :  { %v7666_v7 = vpack.c.bf16 %v4083_v60, %v4083_v60 }
0x2ad4   :  { %v6322_v27 = vpop.f32.mrf.mxu0 }
0x2ad5   :  { %v4146_v45 = vsel %vm160_vm2, %v7666_v7, 0 }
0x2ad6   :  { %6330 = vmatpush3.bf16.xpose.msra.mxu0 %v4146_v45 }
0x2ad7   :  { %6341 = vmatprep.subr.bf16.mxu0 %v6688_v1 }
0x2b1f   :  { %v3939_v52 = vpop.xlane.xlu1 %3938 }
0x2b20   :  { %v3943_v53 = vmul.f32 0.03125, %v3939_v52 }
0x2b22   :  { %v3945_v49 = vadd.f32 1e-05, %v3943_v53 }
0x2b23   :  { %v3942_v54 = vpop.xlane.xlu0 %3941 }
0x2b24   :  { %6622 = vrsqrt.f32 %v3945_v49  ;;  %v3944_v61 = vmul.f32 0.03125, %v3942_v54 }
0x2b26   :  { %v3946_v55 = vadd.f32 1e-05, %v3944_v61 }
0x2b28   :  { %6624 = vrsqrt.f32 %v3946_v55 }
0x2b31   :  { %v6623_v14 = vpop.eup %6622 }
0x2b32   :  { %v3949_v62 = vmul.f32 %v6623_v14, %v3933_v43 }
0x2b34   :  { %v3957_v41 = vmul.f32 %v5622_v18, %v3949_v62 }
0x2b35   :  { %v6625_v11 = vpop.eup %6624 }
0x2b36   :  { %v3950_v16 = vmul.f32 %v6625_v11, %v3934_v4  ;;  %v7653_v37 = vadd.f32 %v5623_v17, %v3957_v41 }
0x2b38   :  { %v3958_v35 = vmul.f32 %v5622_v18, %v3950_v16 }
0x2b3a   :  { %v7655_v56 = vadd.f32 %v5623_v17, %v3958_v35 }
0x2b3c   :  { %v3967_v57 = vpack.c.bf16 %v7655_v56, %v7653_v37 }
0x2b3e   :  { %6312 = vmatmul.mubr.msk.bf16.vlgmr.msra.gmra.mxu1 %vm106_vm1, %v3967_v57 }
0x2b3f   :  { %6325 = vmatprep.mubr.msk.bf16.mxu1 %vm6689_vm0, %v6688_v1  ;;  %6324 = vmatpush3.bf16.xpose.msra.mxu1 %v4100_v59 }
0x2b40   :  { %6335 = vmatprep.subr.bf16.mxu1 %v6688_v1 }
0x2bfe   :  { %v4022_v63 = vpop.f32.mrf.mxu1 }
0x2bff   :  { %v7672_v0 = vpack.c.bf16 %v4022_v63, %v4022_v63 }
0x2c00   :  { %v6313_v2 = vpop.f32.mrf.mxu1 }
0x2c01   :  { %6326 = vmatmul.mubr.msk.bf16.vlgmr.msra.gmra.mxu1 %vm160_vm2, %v7672_v0 }
0x2c02   :  { %v4025_v6 = vpop.f32.mrf.mxu1  ;;  %6337 = vmatprep.mubr.msk.bf16.mxu1 %vm6689_vm0, %v6688_v1 }
0x2c03   :  { %v7678_v8 = vpack.c.bf16 %v4025_v6, %v4025_v6 }
0x2c04   :  { %v6314_v13 = vpop.f32.mrf.mxu1 }
0x2c05   :  { %6332 = vmatmul.mubr.msk.bf16.vlgmr.msra.gmra.mxu0 %vm160_vm2, %v7678_v8 }
0x2c06   :  { %6343 = vmatprep.mubr.msk.bf16.mxu0 %vm6689_vm0, %v6688_v1 }
0x2cc1   :  { %v4136_v9 = vpop.f32.mrf.mxu1 }
0x2cc2   :  { %v4188_v12 = vmul.f32 0.35355338, %v4136_v9 }
0x2cc3   :  { %v6327_v15 = vpop.f32.mrf.mxu1 }
0x2cc4   :  { %v4190_v20 = vadd.f32 %v4188_v12, %v7146_v26 }
0x2cc5   :  { %v4139_v23 = vpop.f32.mrf.mxu1  ;;  %v4182_v10 = vpop.f32.mrf.mxu0 }
0x2cc6   :  { %v4189_v24 = vmul.f32 0.35355338, %v4182_v10  ;;  %v4192_v25 = vsel %vm160_vm2, %v4190_v20, -inf }
0x2cc7   :  { %4193 = vmax.xlane.f32.xlu1 %v4192_v25  ;;  %v6328_v29 = vpop.f32.mrf.mxu1  ;;  %v6333_v30 = vpop.f32.mrf.mxu0 }
0x2cc8   :  { %v4191_v32 = vadd.f32 %v4189_v24, %v7151_v33 }
0x2cc9   :  { %v4185_v34 = vpop.f32.mrf.mxu0 }
0x2cca   :  { %v4195_v36 = vsel %vm160_vm2, %v4191_v32, -inf }
0x2ccb   :  { %4196 = vmax.xlane.f32.xlu0 %v4195_v36  ;;  %v6334_v38 = vpop.f32.mrf.mxu0 }
0x2cd8   :  { %4217 = vrot.lane.b32.xlu1 %v7662_v5, %s6690_s5 }
0x2d50   :  { %v4194_v39 = vpop.xlane.xlu1 %4193 }
0x2d51   :  { %v4198_v22 = vsub.f32 %v4190_v20, %v4194_v39 }
0x2d53   :  { %v4200_v40 = vmul.f32 1.442695, %v4198_v22 }
0x2d54   :  { %v4218_v42 = vpop.permute.xlu1 %4217  ;;  %v4197_v43 = vpop.xlane.xlu0 %4196 }
0x2d55   :  { %6626 = vpow2.f32 %v4200_v40  ;;  %v4223_v3 = vsel %vm289_vm5, %v4218_v42, 0  ;;  %v4199_v21 = vsub.f32 %v4191_v32, %v4197_v43 }
0x2d56   :  { %6336 = vmatpush3.bf16.msra.mxu1 %v4223_v3 }
0x2d57   :  { %v4202_v44 = vmul.f32 1.442695, %v4199_v21  ;;  %6347 = vmatprep.subr.bf16.mxu1 %v6688_v1 }
0x2d59   :  { %6628 = vpow2.f32 %v4202_v44 }
0x2d62   :  { %v6627_v4 = vpop.eup %6626 }
0x2d63   :  { %v4204_v31 = vsel %vm160_vm2, %v6627_v4, 0.0 }
0x2d64   :  { %4205 = vadd.xlane.f32.xlu1 %v4204_v31 }
0x2d66   :  { %v6629_v47 = vpop.eup %6628 }
0x2d67   :  { %v4207_v48 = vsel %vm160_vm2, %v6629_v47, 0.0 }
0x2d68   :  { %4208 = vadd.xlane.f32.xlu0 %v4207_v48 }
0x2d75   :  { %4318 = vrot.lane.b32.xlu1 %v7662_v5, %s6694_s3 }
0x2d79   :  { %4369 = vrot.lane.b32.xlu1 %v7666_v7, %s6694_s3 }
0x2d7d   :  { %4367 = vrot.lane.b32.xlu1 %v7678_v8, %s6694_s3 }
0x2d7e   :  { %4266 = vrot.lane.b32.xlu0 %v7666_v7, %s6690_s5 }
0x2d82   :  { %4316 = vrot.lane.b32.xlu0 %v7672_v0, %s6694_s3 }
0x2ded   :  { %v4206_v46 = vpop.xlane.xlu1 %4205 }
0x2dee   :  { %6630 = vrcp.f32 %v4206_v46 }
0x2df1   :  { %v4209_v50 = vpop.xlane.xlu0 %4208  ;;  %v4319_v53 = vpop.permute.xlu1 %4318 }
0x2df2   :  { %6632 = vrcp.f32 %v4209_v50  ;;  %v4324_v55 = vsel %vm160_vm2, %v4319_v53, 0 }
0x2df5   :  { %v4267_v51 = vpop.permute.xlu0 %4266  ;;  %v4370_v62 = vpop.permute.xlu1 %4369 }
0x2df6   :  { %v4272_v19 = vsel %vm289_vm5, %v4267_v51, 0  ;;  %v4375_v11 = vsel %vm160_vm2, %v4370_v62, 0 }
0x2df7   :  { %6342 = vmatpush3.bf16.msra.mxu0 %v4272_v19 }
0x2df8   :  { %6353 = vmatprep.subr.bf16.mxu0 %v6688_v1 }
0x2df9   :  { %v4317_v41 = vpop.permute.xlu0 %4316  ;;  %v4368_v16 = vpop.permute.xlu1 %4367 }
0x2dfb   :  { %v6631_v52 = vpop.eup %6630 }
0x2dfc   :  { %v4212_v49 = vmul.f32 %v6631_v52, %v6627_v4  ;;  %v5638_v52 = vld [vmem:[%s7950_s8 + $0x10] sm:$0xf] }
0x2dfe   :  { %v4214_v54 = vpack.c.bf16 %v4212_v49, %v4212_v49 }
0x2dff   :  { %v6633_v61 = vpop.eup %6632 }
0x2e00   :  { %v4213_v14 = vmul.f32 %v6633_v61, %v6629_v47  ;;  %6338 = vmatmul.mubr.msk.bf16.vlgmr.msra.gmra.mxu1 %vm160_vm2, %v4214_v54  ;;  %v4593_v54 = vsel %vm289_vm5, %v5638_v52, 0 }
0x2e01   :  { %6348 = vmatpush3.bf16.xpose.msra.mxu1 %v4324_v55  ;;  %6349 = vmatprep.mubr.msk.bf16.mxu1 %vm6689_vm0, %v6688_v1 }
0x2e02   :  { %v4215_v18 = vpack.c.bf16 %v4213_v14, %v4213_v14  ;;  %6359 = vmatprep.subr.bf16.mxu1 %v6688_v1 }
0x2e04   :  { %6344 = vmatmul.mubr.msk.bf16.vlgmr.msra.gmra.mxu0 %vm160_vm2, %v4215_v18  ;;  %v5639_v18 = vld [vmem:[%s7950_s8 + $0x14] sm:$0xf] }
0x2e05   :  { %6354 = vmatpush3.bf16.xpose.msra.mxu0 %v4375_v11  ;;  %6355 = vmatprep.mubr.msk.bf16.mxu0 %vm6689_vm0, %v6688_v1  ;;  %v4546_v11 = vsel %vm289_vm5, %v5639_v18, 0 }
0x2e06   :  { %6365 = vmatprep.subr.bf16.mxu0 %v6688_v1 }
0x2e08   :  { %6350 = vmatmul.mubr.msk.bf16.vlgmr.msra.gmra.mxu1 %vm160_vm2, %v4317_v41 }
0x2e09   :  { %6361 = vmatprep.mubr.msk.bf16.mxu1 %vm6689_vm0, %v6688_v1 }
0x2e0c   :  { %6356 = vmatmul.mubr.msk.bf16.vlgmr.msra.gmra.mxu0 %vm160_vm2, %v4368_v16 }
0x2e0d   :  { %6367 = vmatprep.mubr.msk.bf16.mxu0 %vm6689_vm0, %v6688_v1 }
0x2ec0   :  { %v7722_v17 = vpop.f32.mrf.mxu1 }
0x2ec2   :  { %v6339_v35 = vpop.f32.mrf.mxu1 }
0x2ec4   :  { %v4262_v57 = vpop.f32.mrf.mxu1  ;;  %v7724_v28 = vpop.f32.mrf.mxu0 }
0x2ec5   :  { %v4314_v58 = vpack.c.bf16 %v7724_v28, %v7722_v17 }
0x2ec6   :  { %v6340_v59 = vpop.f32.mrf.mxu1  ;;  %v6345_v60 = vpop.f32.mrf.mxu0 }
0x2ec8   :  { %v4311_v27 = vpop.f32.mrf.mxu0  ;;  %v4360_v45 = vpop.f32.mrf.mxu1 }
0x2ec9   :  { %v4417_v63 = vmul.f32 0.35355338, %v4360_v45 }
0x2eca   :  { %v6346_v2 = vpop.f32.mrf.mxu0  ;;  %v6351_v6 = vpop.f32.mrf.mxu1 }
0x2ecb   :  { %v4419_v13 = vadd.f32 %v4417_v63, %v7146_v26 }
0x2ecc   :  { %v4363_v9 = vpop.f32.mrf.mxu1  ;;  %v4411_v12 = vpop.f32.mrf.mxu0 }
0x2ecd   :  { %v4418_v15 = vmul.f32 0.35355338, %v4411_v12  ;;  %v4421_v20 = vsel %vm160_vm2, %v4419_v13, -inf }
0x2ece   :  { %4422 = vmax.xlane.f32.xlu0 %v4421_v20  ;;  %v6352_v23 = vpop.f32.mrf.mxu1  ;;  %v6357_v10 = vpop.f32.mrf.mxu0 }
0x2ecf   :  { %v4420_v24 = vadd.f32 %v4418_v15, %v7151_v33 }
0x2ed0   :  { %v4414_v25 = vpop.f32.mrf.mxu0 }
0x2ed1   :  { %v4424_v29 = vsel %vm160_vm2, %v4420_v24, -inf }
0x2ed2   :  { %4425 = vmax.xlane.f32.xlu1 %v4424_v29  ;;  %v6358_v30 = vpop.f32.mrf.mxu0 }
0x2ee3   :  { %4445 = vrot.lane.b32.xlu1 %v7662_v5, %s6693_s27 }
0x2ee7   :  { %4638 = vrot.lane.b32.xlu1 %v7662_v5, %s8003_s1 }
0x2eeb   :  { %4688 = vrot.lane.b32.xlu1 %v7666_v7, %s8003_s1 }
0x2eef   :  { %4686 = vrot.lane.b32.xlu1 %v7678_v8, %s8003_s1 }
0x2f57   :  { %v4423_v32 = vpop.xlane.xlu0 %4422 }
0x2f58   :  { %v4427_v34 = vsub.f32 %v4419_v13, %v4423_v32 }
0x2f5a   :  { %v4429_v36 = vmul.f32 1.442695, %v4427_v34 }
0x2f5b   :  { %v4426_v38 = vpop.xlane.xlu1 %4425 }
0x2f5c   :  { %6634 = vpow2.f32 %v4429_v36  ;;  %v4428_v39 = vsub.f32 %v4420_v24, %v4426_v38 }
0x2f5e   :  { %v4431_v22 = vmul.f32 1.442695, %v4428_v39 }
0x2f5f   :  { %v4446_v40 = vpop.permute.xlu1 %4445 }
0x2f60   :  { %6636 = vpow2.f32 %v4431_v22  ;;  %v4451_v42 = vsel %vm289_vm5, %v4446_v40, 0 }
0x2f61   :  { %6360 = vmatpush3.bf16.msra.mxu1 %v4451_v42 }
0x2f62   :  { %6371 = vmatprep.subr.bf16.mxu1 %v6688_v1 }
0x2f63   :  { %v4639_v61 = vpop.permute.xlu1 %4638 }
0x2f64   :  { %v4644_v59 = vsel %vm160_vm2, %v4639_v61, 0 }
0x2f67   :  { %v4689_v55 = vpop.permute.xlu1 %4688 }
0x2f68   :  { %v4694_v14 = vsel %vm160_vm2, %v4689_v55, 0 }
0x2f69   :  { %v6635_v43 = vpop.eup %6634 }
0x2f6a   :  { %v4433_v3 = vsel %vm160_vm2, %v6635_v43, 0.0 }
0x2f6b   :  { %4434 = vadd.xlane.f32.xlu0 %v4433_v3  ;;  %v4687_v62 = vpop.permute.xlu1 %4686 }
0x2f6d   :  { %v6637_v21 = vpop.eup %6636 }
0x2f6e   :  { %v4436_v44 = vsel %vm160_vm2, %v6637_v21, 0.0 }
0x2f6f   :  { %4437 = vadd.xlane.f32.xlu0 %v4436_v44 }
0x2f85   :  { %4493 = vrot.lane.b32.xlu0 %v7666_v7, %s6693_s27 }
0x2f89   :  { %4636 = vrot.lane.b32.xlu0 %v7672_v0, %s8003_s1 }
0x2ff4   :  { %v4435_v4 = vpop.xlane.xlu0 %4434 }
0x2ff5   :  { %6638 = vrcp.f32 %v4435_v4 }
0x2ff8   :  { %v4438_v31 = vpop.xlane.xlu0 %4437 }
0x2ff9   :  { %6640 = vrcp.f32 %v4438_v31 }
0x2ffc   :  { %v4494_v47 = vpop.permute.xlu0 %4493 }
0x2ffd   :  { %v4499_v48 = vsel %vm289_vm5, %v4494_v47, 0 }
0x2ffe   :  { %6366 = vmatpush3.bf16.msra.mxu0 %v4499_v48 }
0x2fff   :  { %6377 = vmatprep.subr.bf16.mxu0 %v6688_v1 }
0x3000   :  { %v4637_v63 = vpop.permute.xlu0 %4636 }
0x3002   :  { %v6639_v46 = vpop.eup %6638 }
0x3003   :  { %v4441_v50 = vmul.f32 %v6639_v46, %v6635_v43 }
0x3005   :  { %v4443_v51 = vpack.c.bf16 %v4441_v50, %v4441_v50 }
0x3006   :  { %v6641_v19 = vpop.eup %6640 }
0x3007   :  { %v4442_v53 = vmul.f32 %v6641_v19, %v6637_v21  ;;  %6362 = vmatmul.mubr.msk.bf16.vlgmr.msra.gmra.mxu1 %vm160_vm2, %v4443_v51 }
0x3008   :  { %6373 = vmatprep.mubr.msk.bf16.mxu1 %vm6689_vm0, %v6688_v1  ;;  %6372 = vmatpush3.bf16.msra.mxu1 %v4546_v11 }
0x3009   :  { %v4444_v49 = vpack.c.bf16 %v4442_v53, %v4442_v53  ;;  %6383 = vmatprep.subr.bf16.mxu1 %v6688_v1 }
0x300b   :  { %6368 = vmatmul.mubr.msk.bf16.vlgmr.msra.gmra.mxu0 %vm160_vm2, %v4444_v49 }
0x300c   :  { %6378 = vmatpush3.bf16.msra.mxu0 %v4593_v54  ;;  %6379 = vmatprep.mubr.msk.bf16.mxu0 %vm6689_vm0, %v6688_v1 }
0x300d   :  { %6389 = vmatprep.subr.bf16.mxu0 %v6688_v1 }
0x3013   :  { %6380 = vmatmul.mubr.msk.bf16.vlgmr.msra.gmra.mxu0 %vm160_vm2, %v4314_v58 }
0x3014   :  { %6390 = vmatpush3.bf16.xpose.msra.mxu0 %v4694_v14  ;;  %6391 = vmatprep.mubr.msk.bf16.mxu0 %vm6689_vm0, %v6688_v1 }
0x3015   :  { %6401 = vmatprep.subr.bf16.mxu0 %v6688_v1 }
0x301b   :  { %6392 = vmatmul.mubr.msk.bf16.vlgmr.msra.gmra.mxu0 %vm160_vm2, %v4687_v62 }
0x301c   :  { %6403 = vmatprep.mubr.msk.bf16.mxu0 %vm6689_vm0, %v6688_v1 }
0x30c7   :  { %v4487_v41 = vpop.f32.mrf.mxu1 }
0x30c9   :  { %v6363_v16 = vpop.f32.mrf.mxu1 }
0x30ca   :  { %v5640_v16 = vld [vmem:[%s7950_s8 + $0x18] sm:$0xf] }
0x30cb   :  { %v4490_v17 = vpop.f32.mrf.mxu1  ;;  %v4535_v35 = vpop.f32.mrf.mxu0 }
0x30cc   :  { %v4541_v57 = vpack.c.bf16 %v4535_v35, %v4487_v41  ;;  %v4865_v17 = vsel %vm289_vm5, %v5640_v16, 0 }
0x30cd   :  { %v6364_v28 = vpop.f32.mrf.mxu1  ;;  %v6369_v58 = vpop.f32.mrf.mxu0 }
0x30ce   :  { %6374 = vmatmul.mubr.msk.bf16.vlgmr.msra.gmra.mxu1 %vm160_vm2, %v4541_v57 }
0x30cf   :  { %6384 = vmatpush3.bf16.xpose.msra.mxu1 %v4644_v59  ;;  %v4538_v60 = vpop.f32.mrf.mxu0  ;;  %6385 = vmatprep.mubr.msk.bf16.mxu1 %vm6689_vm0, %v6688_v1 }
0x30d0   :  { %6395 = vmatprep.subr.bf16.mxu1 %v6688_v1 }
0x30d1   :  { %v6370_v27 = vpop.f32.mrf.mxu0 }
0x30d3   :  { %v7782_v45 = vpop.f32.mrf.mxu0 }
0x30d5   :  { %v6381_v2 = vpop.f32.mrf.mxu0 }
0x30d6   :  { %6386 = vmatmul.mubr.msk.bf16.vlgmr.msra.gmra.mxu1 %vm160_vm2, %v4637_v63 }
0x30d7   :  { %v7785_v6 = vpop.f32.mrf.mxu0  ;;  %6397 = vmatprep.mubr.msk.bf16.mxu1 %vm6689_vm0, %v6688_v1 }
0x30d9   :  { %v6382_v13 = vpop.f32.mrf.mxu0 }
0x30db   :  { %v4730_v9 = vpop.f32.mrf.mxu0 }
0x30dc   :  { %v4737_v12 = vmul.f32 0.35355338, %v4730_v9 }
0x30dd   :  { %v6393_v15 = vpop.f32.mrf.mxu0 }
0x30de   :  { %v4739_v20 = vadd.f32 %v4737_v12, %v7151_v33 }
0x30df   :  { %v4733_v23 = vpop.f32.mrf.mxu0 }
0x30e0   :  { %v4743_v10 = vsel %vm160_vm2, %v4739_v20, -inf }
0x30e1   :  { %4744 = vmax.xlane.f32.xlu1 %v4743_v10  ;;  %v6394_v24 = vpop.f32.mrf.mxu0 }
0x30f2   :  { %4764 = vrot.lane.b32.xlu1 %v7662_v5, %s7998_s23 }
0x30f6   :  { %4912 = vrot.lane.b32.xlu1 %v7662_v5, %s7999_s24 }
0x30fa   :  { %4962 = vrot.lane.b32.xlu1 %v7666_v7, %s7999_s24 }
0x30fe   :  { %4960 = vrot.lane.b32.xlu1 %v7678_v8, %s7999_s24 }
0x316a   :  { %v4745_v25 = vpop.xlane.xlu1 %4744 }
0x316b   :  { %v4747_v32 = vsub.f32 %v4739_v20, %v4745_v25 }
0x316d   :  { %v4750_v34 = vmul.f32 1.442695, %v4747_v32 }
0x316e   :  { %v4765_v29 = vpop.permute.xlu1 %4764 }
0x316f   :  { %v4770_v30 = vsel %vm289_vm5, %v4765_v29, 0  ;;  %6642 = vpow2.f32 %v4750_v34 }
0x3170   :  { %6396 = vmatpush3.bf16.msra.mxu1 %v4770_v30 }
0x3171   :  { %6407 = vmatprep.subr.bf16.mxu1 %v6688_v1 }
0x3172   :  { %v4913_v55 = vpop.permute.xlu1 %4912 }
0x3173   :  { %v4918_v62 = vsel %vm160_vm2, %v4913_v55, 0 }
0x3176   :  { %v4963_v60 = vpop.permute.xlu1 %4962 }
0x3177   :  { %v4968_v20 = vsel %vm160_vm2, %v4963_v60, 0 }
0x317c   :  { %v6643_v44 = vpop.eup %6642 }
0x317d   :  { %v4755_v31 = vsel %vm160_vm2, %v6643_v44, 0.0 }
0x318e   :  { %v7801_v36 = vpop.f32.mrf.mxu1 }
0x3190   :  { %v6375_v38 = vpop.f32.mrf.mxu1 }
0x3192   :  { %v7803_v39 = vpop.f32.mrf.mxu1 }
0x3194   :  { %v6376_v22 = vpop.f32.mrf.mxu1 }
0x3195   :  { %v4630_v22 = vadd.f32 %v7782_v45, %v7801_v36 }
0x3196   :  { %v4680_v40 = vpop.f32.mrf.mxu1 }
0x3197   :  { %v4736_v42 = vmul.f32 0.35355338, %v4680_v40 }
0x3198   :  { %v6387_v43 = vpop.f32.mrf.mxu1 }
0x3199   :  { %v4738_v8 = vadd.f32 %v4736_v42, %v7146_v26 }
0x319a   :  { %v4683_v3 = vpop.f32.mrf.mxu1 }
0x319b   :  { %v4740_v21 = vsel %vm160_vm2, %v4738_v8, -inf }
0x319c   :  { %4741 = vmax.xlane.f32.xlu0 %v4740_v21  ;;  %v6388_v4 = vpop.f32.mrf.mxu1 }
0x31a0   :  { %4756 = vadd.xlane.f32.xlu0 %v4755_v31 }
0x3225   :  { %v4742_v47 = vpop.xlane.xlu0 %4741 }
0x3226   :  { %v4746_v48 = vsub.f32 %v4738_v8, %v4742_v47  ;;  %v4633_v8 = vadd.f32 %v7785_v6, %v7803_v39 }
0x3228   :  { %v4748_v46 = vmul.f32 1.442695, %v4746_v48 }
0x3229   :  { %v4757_v19 = vpop.xlane.xlu0 %4756 }
0x322a   :  { %6644 = vpow2.f32 %v4748_v46 }
0x322b   :  { %6646 = vrcp.f32 %v4757_v19 }
0x3237   :  { %v6645_v50 = vpop.eup %6644 }
0x3238   :  { %v4752_v51 = vsel %vm160_vm2, %v6645_v50, 0.0  ;;  %v6647_v52 = vpop.eup %6646 }
0x3239   :  { %4753 = vadd.xlane.f32.xlu0 %v4752_v51  ;;  %v4761_v49 = vmul.f32 %v6647_v52, %v6643_v44 }
0x323b   :  { %v4763_v14 = vpack.c.bf16 %v4761_v49, %v4761_v49 }
0x324f   :  { %4812 = vrot.lane.b32.xlu0 %v7666_v7, %s7998_s23 }
0x3253   :  { %4910 = vrot.lane.b32.xlu0 %v7672_v0, %s7999_s24 }
0x32c2   :  { %v4754_v53 = vpop.xlane.xlu0 %4753 }
0x32c3   :  { %6648 = vrcp.f32 %v4754_v53 }
0x32c6   :  { %v4813_v54 = vpop.permute.xlu0 %4812 }
0x32c7   :  { %v4818_v61 = vsel %vm289_vm5, %v4813_v54, 0 }
0x32c8   :  { %6402 = vmatpush3.bf16.msra.mxu0 %v4818_v61  ;;  %v5641_v61 = vld [vmem:[%s7950_s8 + $0x1c] sm:$0xf] }
0x32c9   :  { %6413 = vmatprep.subr.bf16.mxu0 %v6688_v1  ;;  %v5139_v55 = vsel %vm289_vm5, %v5641_v61, 0 }
0x32ca   :  { %v4911_v11 = vpop.permute.xlu0 %4910 }
0x32cb   :  { %6404 = vmatmul.mubr.msk.bf16.vlgmr.msra.gmra.mxu0 %vm160_vm2, %v4763_v14 }
0x32cc   :  { %6414 = vmatpush3.bf16.xpose.msra.mxu0 %v4918_v62  ;;  %6415 = vmatprep.mubr.msk.bf16.mxu0 %vm6689_vm0, %v6688_v1 }
0x32cd   :  { %6425 = vmatprep.subr.bf16.mxu0 %v6688_v1 }
0x32d0   :  { %v6649_v0 = vpop.eup %6648 }
0x32d1   :  { %v4760_v18 = vmul.f32 %v6649_v0, %v6645_v50 }
0x32d3   :  { %v4762_v41 = vpack.c.bf16 %v4760_v18, %v4760_v18  ;;  %6416 = vmatmul.mubr.msk.bf16.vlgmr.msra.gmra.mxu0 %vm160_vm2, %v4911_v11 }
0x32d4   :  { %6427 = vmatprep.mubr.msk.bf16.mxu0 %vm6689_vm0, %v6688_v1 }
0x32d5   :  { %6398 = vmatmul.mubr.msk.bf16.vlgmr.msra.gmra.mxu1 %vm160_vm2, %v4762_v41 }
0x32d6   :  { %6409 = vmatprep.mubr.msk.bf16.mxu1 %vm6689_vm0, %v6688_v1  ;;  %6408 = vmatpush3.bf16.msra.mxu1 %v4865_v17 }
0x32d7   :  { %6419 = vmatprep.subr.bf16.mxu1 %v6688_v1 }
0x338b   :  { %v4854_v35 = vpop.f32.mrf.mxu0 }
0x338d   :  { %v6405_v57 = vpop.f32.mrf.mxu0 }
0x338f   :  { %v4857_v28 = vpop.f32.mrf.mxu0 }
0x3391   :  { %v6406_v58 = vpop.f32.mrf.mxu0 }
0x3393   :  { %v4954_v59 = vpop.f32.mrf.mxu0 }
0x3394   :  { %v5010_v27 = vmul.f32 0.35355338, %v4954_v59 }
0x3395   :  { %v4806_v63 = vpop.f32.mrf.mxu1  ;;  %v6417_v2 = vpop.f32.mrf.mxu0 }
0x3396   :  { %v5012_v13 = vadd.f32 %v5010_v27, %v7146_v26  ;;  %v4860_v9 = vpack.c.bf16 %v4854_v35, %v4806_v63  ;;  %v4961_v26 = vpop.permute.xlu1 %4960 }
0x3397   :  { %v6399_v12 = vpop.f32.mrf.mxu1  ;;  %v4957_v15 = vpop.f32.mrf.mxu0 }
0x3398   :  { %6410 = vmatmul.mubr.msk.bf16.vlgmr.msra.gmra.mxu1 %vm160_vm2, %v4860_v9  ;;  %v5014_v23 = vsel %vm160_vm2, %v5012_v13, -inf }
0x3399   :  { %6420 = vmatpush3.bf16.xpose.msra.mxu1 %v4968_v20  ;;  %v4809_v10 = vpop.f32.mrf.mxu1  ;;  %5015 = vmax.xlane.f32.xlu0 %v5014_v23  ;;  %v6418_v24 = vpop.f32.mrf.mxu0 }
0x339a   :  { %6421 = vmatprep.mubr.msk.bf16.mxu1 %vm6689_vm0, %v6688_v1  ;;  %6431 = vmatprep.subr.bf16.mxu1 %v6688_v1 }
0x339b   :  { %v6400_v25 = vpop.f32.mrf.mxu1 }
0x33a0   :  { %6422 = vmatmul.mubr.msk.bf16.vlgmr.msra.gmra.mxu1 %vm160_vm2, %v4961_v26 }
0x33a1   :  { %6433 = vmatprep.mubr.msk.bf16.mxu1 %vm6689_vm0, %v6688_v1 }
0x3422   :  { %v5016_v29 = vpop.xlane.xlu0 %5015 }
0x3423   :  { %v5020_v30 = vsub.f32 %v5012_v13, %v5016_v29 }
0x3425   :  { %v5022_v32 = vmul.f32 1.442695, %v5020_v30 }
0x3427   :  { %6650 = vpow2.f32 %v5022_v32 }
0x3434   :  { %v6651_v34 = vpop.eup %6650 }
0x3435   :  { %v5026_v38 = vsel %vm160_vm2, %v6651_v34, 0.0 }
0x3436   :  { %5027 = vadd.xlane.f32.xlu0 %v5026_v38 }
0x3458   :  { %v4901_v40 = vpop.f32.mrf.mxu1 }
0x3459   :  { %v4908_v42 = vadd.f32 %v4901_v40, %v4630_v22  ;;  %v6507_v40 = vld [vmem:[%s7951_s9 + $0x10] sm:$0xff]  }
0x345a   :  { %v6411_v43 = vpop.f32.mrf.mxu1 }
0x345c   :  { %v4904_v3 = vpop.f32.mrf.mxu1 }
0x345d   :  { %v4909_v21 = vadd.f32 %v4904_v3, %v4633_v8 }
0x345e   :  { %v6412_v44 = vpop.f32.mrf.mxu1 }
0x3460   :  { %v5004_v4 = vpop.f32.mrf.mxu1 }
0x3461   :  { %v5011_v31 = vmul.f32 0.35355338, %v5004_v4 }
0x3462   :  { %v6423_v47 = vpop.f32.mrf.mxu1 }
0x3463   :  { %v5013_v48 = vadd.f32 %v5011_v31, %v7151_v33 }
0x3464   :  { %v5007_v46 = vpop.f32.mrf.mxu1 }
0x3465   :  { %v5017_v50 = vsel %vm160_vm2, %v5013_v48, -inf }
0x3466   :  { %5018 = vmax.xlane.f32.xlu1 %v5017_v50  ;;  %v6424_v51 = vpop.f32.mrf.mxu1 }
0x3477   :  { %5038 = vrot.lane.b32.xlu1 %v7662_v5, %s8000_s28 }
0x34bf   :  { %v5028_v45 = vpop.xlane.xlu0 %5027 }
0x34c0   :  { %6652 = vrcp.f32 %v5028_v45  ;;  %v5665_v45 = vld [vmem:[%s7958_s16 + $0x1] ss:$0 sm:$0xff] }
0x34cd   :  { %v6653_v36 = vpop.eup %6652 }
0x34ce   :  { %v5034_v19 = vmul.f32 %v6653_v36, %v6651_v34 }
0x34d0   :  { %v5036_v33 = vpack.c.bf16 %v5034_v19, %v5034_v19 }
0x34ef   :  { %v5019_v6 = vpop.xlane.xlu1 %5018 }
0x34f0   :  { %v5021_v39 = vsub.f32 %v5013_v48, %v5019_v6  ;;  %v5664_v48 = vld [vmem:[%s7957_s15 + $0x1] ss:$0 sm:$0xff] }
0x34f2   :  { %v5024_v52 = vmul.f32 1.442695, %v5021_v39 }
0x34f3   :  { %v5039_v53 = vpop.permute.xlu1 %5038 }
0x34f4   :  { %6654 = vpow2.f32 %v5024_v52  ;;  %v5044_v49 = vsel %vm289_vm5, %v5039_v53, 0  ;;  %v6509_v52 = vld [vmem:[%s7953_s11 + $0x30] sm:$0xff]   ;;  %v6510_v53 = vld [vmem:[%s7953_s11 + $0x28] sm:$0xff]  }
0x34f5   :  { %6426 = vmatpush3.bf16.msra.mxu0 %v5044_v49  ;;  %v6511_v49 = vld [vmem:[%s7953_s11 + $0x20] sm:$0xff]  }
0x34f6   :  { %6437 = vmatprep.subr.bf16.mxu0 %v6688_v1 }
0x34f8   :  { %6428 = vmatmul.mubr.msk.bf16.vlgmr.msra.gmra.mxu0 %vm160_vm2, %v5036_v33  ;;  %v5680_v33 = vld [vmem:[%s7952_s10 + $0x1] ss:$0 sm:$0xff] }
0x34f9   :  { %6439 = vmatprep.mubr.msk.bf16.mxu0 %vm6689_vm0, %v6688_v1  ;;  %6438 = vmatpush3.bf16.msra.mxu0 %v5139_v55 }
0x34fa   :  { %6451 = vmatprep.subr.bf16.mxu0 %v6688_v1 }
0x3501   :  { %v6655_v5 = vpop.eup %6654 }
0x3502   :  { %v5029_v54 = vsel %vm160_vm2, %v6655_v5, 0.0 }
0x3503   :  { %5030 = vadd.xlane.f32.xlu0 %v5029_v54 }
0x3519   :  { %5086 = vrot.lane.b32.xlu0 %v7666_v7, %s8000_s28 }
0x358c   :  { %v5031_v14 = vpop.xlane.xlu0 %5030 }
0x358d   :  { %6656 = vrcp.f32 %v5031_v14 }
0x3590   :  { %v5087_v62 = vpop.permute.xlu0 %5086 }
0x3591   :  { %v5092_v0 = vsel %vm289_vm5, %v5087_v62, 0 }
0x3592   :  { %6432 = vmatpush3.bf16.msra.mxu1 %v5092_v0 }
0x3593   :  { %6443 = vmatprep.subr.bf16.mxu1 %v6688_v1 }
0x359a   :  { %v6657_v18 = vpop.eup %6656 }
0x359b   :  { %v5035_v11 = vmul.f32 %v6657_v18, %v6655_v5 }
0x359d   :  { %v5037_v7 = vpack.c.bf16 %v5035_v11, %v5035_v11 }
0x359f   :  { %6434 = vmatmul.mubr.msk.bf16.vlgmr.msra.gmra.mxu1 %vm160_vm2, %v5037_v7  ;;  %v5684_v7 = vld [vmem:[%s7954_s12 + $0x1] ss:$0 sm:$0xff] }
0x35a0   :  { %6447 = vmatprep.mubr.msk.bf16.mxu1 %vm6689_vm0, %v6688_v1 }
0x35b8   :  { %v5080_v41 = vpop.f32.mrf.mxu0 }
0x35ba   :  { %v6429_v16 = vpop.f32.mrf.mxu0 }
0x35bc   :  { %v5083_v17 = vpop.f32.mrf.mxu0 }
0x35be   :  { %v6430_v35 = vpop.f32.mrf.mxu0 }
0x365f   :  { %v5128_v57 = vpop.f32.mrf.mxu1 }
0x3660   :  { %v5134_v28 = vpack.c.bf16 %v5128_v57, %v5080_v41 }
0x3661   :  { %v6435_v58 = vpop.f32.mrf.mxu1 }
0x3662   :  { %6440 = vmatmul.mubr.msk.bf16.vlgmr.msra.gmra.mxu0 %vm160_vm2, %v5134_v28 }
0x3663   :  { %v5131_v59 = vpop.f32.mrf.mxu1  ;;  %6459 = vmatprep.mubr.msk.bf16.mxu0 %vm6689_vm0, %v6688_v1 }
0x3665   :  { %v6436_v60 = vpop.f32.mrf.mxu1 }
0x3722   :  { %v5175_v27 = vpop.f32.mrf.mxu0 }
0x3723   :  { %v5182_v63 = vadd.f32 %v5175_v27, %v4908_v42  ;;  %v6508_v42 = vld [vmem:[%s7953_s11 + $0x38] sm:$0xff]  }
0x3724   :  { %v6441_v2 = vpop.f32.mrf.mxu0  ;;  %6452 = vmatpush3.bf16.msra.mxu0 %v6508_v42 }
0x3725   :  { %v5188_v13 = vadd.f32 %v5182_v63, %v7653_v37  ;;  %6453 = vmatprep.subr.bf16.mxu0 %v6688_v1 }
0x3726   :  { %v5178_v9 = vpop.f32.mrf.mxu0 }
0x3727   :  { %v5183_v12 = vadd.f32 %v5178_v9, %v4909_v21  ;;  %v5190_v15 = vsel %vm106_vm1, %v5188_v13, 0.0 }
0x3728   :  { %5191 = vadd.xlane.f32.xlu1 %v5190_v15  ;;  %v6442_v20 = vpop.f32.mrf.mxu0  ;;  %6454 = vmatpush3.bf16.msra.mxu0 %v6509_v52 }
0x3729   :  { %v5189_v23 = vadd.f32 %v5183_v12, %v7655_v56  ;;  %v6506_v56 = vld [vmem:[%s7951_s9 + $0x18] sm:$0xff]   ;;  %6455 = vmatprep.subr.bf16.mxu0 %v6688_v1 }
0x372a   :  { %6444 = vmatpush3.bf16.msra.mxu1 %v6506_v56 }
0x372b   :  { %v5193_v10 = vsel %vm106_vm1, %v5189_v23, 0.0  ;;  %6445 = vmatprep.subr.bf16.mxu1 %v6688_v1 }
0x372c   :  { %5194 = vadd.xlane.f32.xlu0 %v5193_v10  ;;  %6456 = vmatpush3.bf16.msra.mxu0 %v6510_v53 }
0x372d   :  { %6457 = vmatprep.subr.bf16.mxu0 %v6688_v1 }
0x372e   :  { %6446 = vmatpush3.bf16.msra.mxu1 %v6507_v40  ;;  %v5692_v40 = vld [vmem:[%s7959_s17 + $0x1] ss:$0 sm:$0xff]  ;;  %s6702_s17 = smov [#allocation2]  }
0x372f   :  { %6463 = vmatprep.subr.bf16.mxu1 %v6688_v1  ;;  %s5513_s29 = sshll.u32 %s6702_s17, 4  ;;  %s5514_s29 = int_to_ptr.vmem [resolvable:$true] %s5513_s29 }
0x3730   :  { %6458 = vmatpush3.bf16.msra.mxu0 %v6511_v49  ;;  %p6671_p1 = scmp.lt.s32.totalorder %s5514_s29, %s5514_s29 }
0x37b1   :  { %v5192_v24 = vpop.xlane.xlu1 %5191 }
0x37b2   :  { %v5196_v25 = vmul.f32 0.03125, %v5192_v24 }
0x37b4   :  { %v5198_v26 = vsub.f32 %v5188_v13, %v5196_v25  ;;  %v6512_v25 = vld [vmem:[%s7961_s19 + $0x8] sm:$0xff]  }
0x37b5   :  { %v5195_v29 = vpop.xlane.xlu0 %5194 }
0x37b6   :  { %v5197_v30 = vmul.f32 0.03125, %v5195_v29  ;;  %v5200_v32 = vmul.f32 %v5198_v26, %v5198_v26 }
0x37b8   :  { %v5199_v34 = vsub.f32 %v5189_v23, %v5197_v30  ;;  %v5202_v37 = vsel %vm106_vm1, %v5200_v32, 0.0 }
0x37b9   :  { %5203 = vadd.xlane.f32.xlu1 %v5202_v37 }
0x37ba   :  { %v5201_v38 = vmul.f32 %v5199_v34, %v5199_v34 }
0x37bc   :  { %v5205_v22 = vsel %vm106_vm1, %v5201_v38, 0.0 }
0x37bd   :  { %5206 = vadd.xlane.f32.xlu0 %v5205_v22 }
0x3842   :  { %v5204_v43 = vpop.xlane.xlu1 %5203 }
0x3843   :  { %v5208_v8 = vmul.f32 0.03125, %v5204_v43 }
0x3845   :  { %v5210_v3 = vadd.f32 1e-05, %v5208_v8  ;;  %v5693_v8 = vld [vmem:[%s7960_s18 + $0x1] ss:$0 sm:$0xff]  ;;  %s6666_s18 = scalar_lea.vmem %s5514_s29, 256 }
0x3846   :  { %v5207_v21 = vpop.xlane.xlu0 %5206  ;;  %p6667_p0 = scmp.ne.s32.totalorder %s5514_s29, %s6666_s18  ;;  %p6672_p2 = scmp.lt.s32.totalorder %s6666_s18, %s6666_s18 }
0x3847   :  { %6658 = vrsqrt.f32 %v5210_v3  ;;  %v5209_v44 = vmul.f32 0.03125, %v5207_v21 }
0x3848   :  { %p6673_p3 = por %p6672_p2, %p6671_p1 }
0x3849   :  { %v5211_v4 = vadd.f32 1e-05, %v5209_v44 }
0x384a   :  { %p6674_p4 = pnand %p6673_p3, %p6667_p0 }
0x384b   :  { %6660 = vrsqrt.f32 %v5211_v4 }
0x3854   :  { %v6659_v31 = vpop.eup %6658 }
0x3855   :  { %v5214_v47 = vmul.f32 %v6659_v31, %v5198_v26  ;;  %v6513_v26 = vld [vmem:[%s7961_s19] sm:$0xff]  }
0x3856   :  { %v5694_v31 = vld [vmem:[%s7962_s20] ss:$0 sm:$0xff] }
0x3857   :  { %v5222_v50 = vmul.f32 %v5664_v48, %v5214_v47 }
0x3858   :  { %v6661_v46 = vpop.eup %6660 }
0x3859   :  { %v5215_v51 = vmul.f32 %v6661_v46, %v5199_v34  ;;  %v5230_v6 = vadd.f32 %v5665_v45, %v5222_v50 }
0x385b   :  { %v5223_v36 = vmul.f32 %v5664_v48, %v5215_v51 }
0x385d   :  { %v5231_v39 = vadd.f32 %v5665_v45, %v5223_v36 }
0x385f   :  { %v5250_v19 = vpack.c.bf16 %v5231_v39, %v5230_v6 }
0x3861   :  { %6448 = vmatmul.mubr.msk.bf16.vlgmr.msra.gmra.mxu1 %vm106_vm1, %v5250_v19 }
0x3862   :  { %6467 = vmatprep.mubr.msk.bf16.mxu1 %vm6689_vm0, %v6688_v1  ;;  %6464 = vmatpush3.bf16.msra.mxu1 %v6512_v25 }
0x3863   :  { %6465 = vmatprep.subr.bf16.mxu1 %v6688_v1 }
0x3866   :  { %6466 = vmatpush3.bf16.msra.mxu1 %v6513_v26 }
0x3921   :  { %v5306_v5 = vpop.f32.mrf.mxu1 }
0x3922   :  { %v5307_v61 = vadd.f32 %v5680_v33, %v5306_v5 }
0x3923   :  { %v6449_v54 = vpop.f32.mrf.mxu1 }
0x3924   :  { %v5313_v0 = vmax.f32 %v5307_v61, 0.0 }
0x3925   :  { %v5309_v55 = vpop.f32.mrf.mxu1 }
0x3926   :  { %v5310_v14 = vadd.f32 %v5680_v33, %v5309_v55 }
0x3927   :  { %v6450_v62 = vpop.f32.mrf.mxu1 }
0x3928   :  { %v5314_v18 = vmax.f32 %v5310_v14, 0.0 }
0x392a   :  { %v5315_v11 = vpack.c.bf16 %v5314_v18, %v5313_v0 }
0x392c   :  { %6460 = vmatmul.mubr.msk.bf16.vlgmr.msra.gmra.mxu0 %vm2669_vm8, %v5315_v11 }
0x39ec   :  { %v5383_v41 = vpop.f32.mrf.mxu0 }
0x39ed   :  { %v5384_v16 = vadd.f32 %v5684_v7, %v5383_v41 }
0x39ee   :  { %v6461_v17 = vpop.f32.mrf.mxu0 }
0x39ef   :  { %v5394_v35 = vadd.f32 %v5384_v16, %v5230_v6 }
0x39f0   :  { %v5386_v57 = vpop.f32.mrf.mxu0 }
0x39f1   :  { %v5387_v28 = vadd.f32 %v5684_v7, %v5386_v57  ;;  %v5396_v58 = vsel %vm106_vm1, %v5394_v35, 0.0 }
0x39f2   :  { %5397 = vadd.xlane.f32.xlu1 %v5396_v58  ;;  %v6462_v59 = vpop.f32.mrf.mxu0 }
0x39f3   :  { %v5395_v60 = vadd.f32 %v5387_v28, %v5231_v39 }
0x39f5   :  { %v5399_v27 = vsel %vm106_vm1, %v5395_v60, 0.0 }
0x39f6   :  { %5400 = vadd.xlane.f32.xlu0 %v5399_v27 }
0x3a7b   :  { %v5398_v63 = vpop.xlane.xlu1 %5397 }
0x3a7c   :  { %v5402_v2 = vmul.f32 0.03125, %v5398_v63 }
0x3a7e   :  { %v5404_v13 = vsub.f32 %v5394_v35, %v5402_v2 }
0x3a7f   :  { %v5401_v9 = vpop.xlane.xlu0 %5400 }
0x3a80   :  { %v5403_v12 = vmul.f32 0.03125, %v5401_v9  ;;  %v5406_v15 = vmul.f32 %v5404_v13, %v5404_v13 }
0x3a82   :  { %v5405_v20 = vsub.f32 %v5395_v60, %v5403_v12  ;;  %v5408_v23 = vsel %vm106_vm1, %v5406_v15, 0.0 }
0x3a83   :  { %5409 = vadd.xlane.f32.xlu1 %v5408_v23 }
0x3a84   :  { %v5407_v10 = vmul.f32 %v5405_v20, %v5405_v20 }
0x3a86   :  { %v5411_v24 = vsel %vm106_vm1, %v5407_v10, 0.0 }
0x3a87   :  { %5412 = vadd.xlane.f32.xlu0 %v5411_v24 }
0x3b0c   :  { %v5410_v29 = vpop.xlane.xlu1 %5409 }
0x3b0d   :  { %v5414_v30 = vmul.f32 0.03125, %v5410_v29 }
0x3b0f   :  { %v5416_v32 = vadd.f32 1e-05, %v5414_v30 }
0x3b10   :  { %v5413_v34 = vpop.xlane.xlu0 %5412 }
0x3b11   :  { %6662 = vrsqrt.f32 %v5416_v32  ;;  %v5415_v37 = vmul.f32 0.03125, %v5413_v34 }
0x3b13   :  { %v5417_v38 = vadd.f32 1e-05, %v5415_v37 }
0x3b15   :  { %6664 = vrsqrt.f32 %v5417_v38 }
0x3b1e   :  { %v6663_v22 = vpop.eup %6662 }
0x3b1f   :  { %v5420_v56 = vmul.f32 %v6663_v22, %v5404_v13 }
0x3b21   :  { %v5428_v42 = vmul.f32 %v5692_v40, %v5420_v56 }
0x3b22   :  { %v6665_v1 = vpop.eup %6664 }
0x3b23   :  { %v5421_v43 = vmul.f32 %v6665_v1, %v5405_v20  ;;  %v5436_v21 = vadd.f32 %v5693_v8, %v5428_v42 }
0x3b25   :  { %v5429_v3 = vmul.f32 %v5692_v40, %v5421_v43 }
0x3b27   :  { %v5437_v44 = vadd.f32 %v5693_v8, %v5429_v3 }
0x3b29   :  { %v5438_v4 = vpack.c.bf16 %v5437_v44, %v5436_v21 }
0x3b2b   :  { %6468 = vmatmul.mubr.msk.bf16.vlgmr.msra.gmra.mxu1 %vm106_vm1, %v5438_v4 }
0x3beb   :  { %v5499_v47 = vpop.f32.mrf.mxu1 }
0x3bec   :  { %v5500_v48 = vadd.f32 %v5694_v31, %v5499_v47 }
0x3bed   :  { %v6469_v46 = vpop.f32.mrf.mxu1 }
0x3bee   :  { %5506 = vst.msk [vmem:[#allocation2] sm:$0xff] %vm106_vm1, %v5500_v48 }
0x3bef   :  { %v5502_v50 = vpop.f32.mrf.mxu1 }
0x3bf0   :  { %v5503_v51 = vadd.f32 %v5694_v31, %v5502_v50 }
0x3bf1   :  { %v6470_v45 = vpop.f32.mrf.mxu1 }
0x3bf2   :  { %5507 = vst.msk [vmem:[#allocation2 + $0x8] sm:$0xff] %vm106_vm1, %v5503_v51 }
0x3bf3   :  { %6677 = shalt.err (!%p6674_p4)
}
0x3bf4   :  { %s6703_s20 = smov 128   ;;  %s6704_s30 = smov 8  }
0x3bf5   :  { %5519 = dma.vmem_to_hbm [thread:$0]  %s5514_s29, 256, %s7963_s21, [#allocation3], %s6703_s20, %s6703_s20, %s6704_s30  }
0x3bf6   :  { %6686 = dma.done.wait [#allocation3], 256  }
0x3bf7   :  { %6687 = vsyncadd [#allocation3], 4294967040 }
0x3bf8   :  { %5523 = vsyncpa [#allocation3], 1 }

</bundles_post_ra>
